<compile_context>
chip_gen: v7x
topology: tpu7x:2x2x1
jax: 0.10.0
libtpu: 0.0.40
codegen_flags: <defaults>
</compile_context>

<pallas_src>
import functools

import jax
import jax.numpy as jnp
from jax import lax
from jax.experimental import pallas as pl
from jax.experimental.pallas import tpu as pltpu

K = 3            # conv kernel size
PAD = 1          # spatial padding
EPS = 1e-5       # BatchNorm eps
VMEM_LIMIT = 32 * 1024 * 1024   # explicit scoped-VMEM cap (safe on v5e/v6e/v7x)


def _conv1_kernel(x_ref, w_ref, y_ref, st_ref, xp_ref, patch_ref, *, H, W, C_in):
    """conv1 tile: halo-padded staging + im2col + one MXU matmul + BN stats.

    x_ref    : (1, H, W, C_in)     bf16   one image (unpadded)
    w_ref    : (K*K*C_in, C_out)   bf16   flattened conv1 weights
    y_ref    : (1, H*W, C_out)     bf16   conv1 output for this image
    st_ref   : (1, 2, C_out)       f32    per-image [sum ; sum-of-squares]
    xp_ref   : (H+2, W+2, C_in)    bf16   scratch: padded input
    patch_ref: (H*W, K*K*C_in)     bf16   scratch: im2col patch matrix
    """
    # Stage padded input: zero ONLY the 1-px halo, then write the interior.
    zrow = jnp.zeros((1, W + 2 * PAD, C_in), jnp.bfloat16)
    zcol = jnp.zeros((H, 1, C_in), jnp.bfloat16)
    xp_ref[0:1, :, :] = zrow
    xp_ref[H + 1:H + 2, :, :] = zrow
    xp_ref[1:H + 1, 0:1, :] = zcol
    xp_ref[1:H + 1, W + 1:W + 2, :] = zcol
    xp_ref[1:H + 1, 1:W + 1, :] = x_ref[0]

    # im2col: pack the 9 shifted taps into one (H*W, K*K*C_in) patch so the
    # whole conv is a single MXU push (contraction depth K*K*C_in instead of
    # nine depth-C_in matmuls).
    for kh in range(K):
        for kw in range(K):
            t = kh * K + kw
            patch_ref[:, t * C_in:(t + 1) * C_in] = (
                xp_ref[kh:kh + H, kw:kw + W, :].reshape(H * W, C_in))

    acc = jnp.dot(patch_ref[...], w_ref[...],
                  preferred_element_type=jnp.float32)          # (H*W, C_out) f32

    # BN1 statistics from the exact f32 accumulator (reduced across the batch
    # grid in the wrapper); only the stored activation copy is bf16-rounded.
    st_ref[0, 0:1, :] = jnp.sum(acc, axis=0, keepdims=True)
    st_ref[0, 1:2, :] = jnp.sum(acc * acc, axis=0, keepdims=True)
    y_ref[0] = acc.astype(jnp.bfloat16)


def _conv2_kernel(y1_ref, s1_ref, t1_ref, w_ref, y_ref, st_ref,
                  y1p_ref, patch_ref, *, H, W, C):
    """bn1 + relu (f32) -> conv2 (bf16 im2col matmul) + BN2 partial stats."""
    y1 = y1_ref[0].astype(jnp.float32)                             # (H*W, C)
    a = jnp.maximum(y1 * s1_ref[...] + t1_ref[...], 0.0)
    ab = a.astype(jnp.bfloat16).reshape(H, W, C)   # leading-dim split: no relayout

    zrow = jnp.zeros((1, W + 2 * PAD, C), jnp.bfloat16)
    zcol = jnp.zeros((H, 1, C), jnp.bfloat16)
    y1p_ref[0:1, :, :] = zrow
    y1p_ref[H + 1:H + 2, :, :] = zrow
    y1p_ref[1:H + 1, 0:1, :] = zcol
    y1p_ref[1:H + 1, W + 1:W + 2, :] = zcol
    y1p_ref[1:H + 1, 1:W + 1, :] = ab

    for kh in range(K):
        for kw in range(K):
            t = kh * K + kw
            patch_ref[:, t * C:(t + 1) * C] = (
                y1p_ref[kh:kh + H, kw:kw + W, :].reshape(H * W, C))

    acc = jnp.dot(patch_ref[...], w_ref[...],
                  preferred_element_type=jnp.float32)              # (H*W, C) f32
    y_ref[0] = acc
    st_ref[0, 0:1, :] = jnp.sum(acc, axis=0, keepdims=True)
    st_ref[0, 1:2, :] = jnp.sum(acc * acc, axis=0, keepdims=True)


def _bn_relu_kernel(y_ref, s_ref, t_ref, o_ref):
    """bn2 + relu, elementwise on a lane-dense (1, H, W*C) view.

    y_ref/o_ref: (1, H, W*C) f32 ; s_ref/t_ref: (1, W*C) f32 (channel-tiled).
    Everything is 128-lane dense -> unmasked vld/vst, contiguous fat DMA rows.
    """
    o_ref[...] = jnp.maximum(y_ref[...] * s_ref[...] + t_ref[...], 0.0)


def _bn_scale_shift(stats, gamma, beta, count):
    """Fold per-tile [sum; sumsq] into per-channel scale/shift (f32).

    Biased variance via E[x^2]-E[x]^2 (kept in f32; TODO(synk): use a shifted /
    Welford form for very large N*H*W to avoid cancellation)."""
    tot = jnp.sum(stats, axis=0)                        # (2, C)
    mean = tot[0] / count
    var = jnp.maximum(tot[1] / count - mean * mean, 0.0)
    s = gamma * lax.rsqrt(var + EPS)
    t = beta - mean * s
    return s.reshape(1, -1), t.reshape(1, -1)


@jax.jit
def conv_block_forward(x_nchw, w1, w2, g1, b1, g2, b2):
    """x_nchw: (N, Cin, H, W) f32 -> (N, Cmid, H, W) f32 (ConvBlock.forward)."""
    N, C_in, H, W = x_nchw.shape
    C_mid = w1.shape[2]
    HW = H * W
    count = N * HW
    cparams = pltpu.CompilerParams(dimension_semantics=("parallel",),
                                   vmem_limit_bytes=VMEM_LIMIT)

    # Layout glue (one fused XLA pass): NCHW -> NHWC + bf16 cast.  Padding is
    # done inside the kernels, so no padded copy of x ever hits HBM.
    x_nhwc = jnp.transpose(x_nchw, (0, 2, 3, 1)).astype(jnp.bfloat16)
    w1f = w1.reshape(K * K * C_in, C_mid).astype(jnp.bfloat16)
    w2f = w2.reshape(K * K * C_mid, C_mid).astype(jnp.bfloat16)

    # ---------------- pass 1: conv1 + partial BN1 stats ---------------------
    y1_raw, st1 = pl.pallas_call(
        functools.partial(_conv1_kernel, H=H, W=W, C_in=C_in),
        grid=(N,),
        in_specs=[
            pl.BlockSpec((1, H, W, C_in), lambda n: (n, 0, 0, 0)),
            pl.BlockSpec((K * K * C_in, C_mid), lambda n: (0, 0)),
        ],
        out_specs=(
            pl.BlockSpec((1, HW, C_mid), lambda n: (n, 0, 0)),
            pl.BlockSpec((1, 2, C_mid), lambda n: (n, 0, 0)),
        ),
        out_shape=(
            jax.ShapeDtypeStruct((N, HW, C_mid), jnp.bfloat16),
            jax.ShapeDtypeStruct((N, 2, C_mid), jnp.float32),
        ),
        scratch_shapes=[
            pltpu.VMEM((H + 2 * PAD, W + 2 * PAD, C_in), jnp.bfloat16),
            pltpu.VMEM((HW, K * K * C_in), jnp.bfloat16),
        ],
        compiler_params=cparams,
        cost_estimate=pl.CostEstimate(
            flops=2 * count * (K * K * C_in) * C_mid,
            transcendentals=0,
            bytes_accessed=(N * HW * C_in * 2 + K * K * C_in * C_mid * 2
                            + N * HW * C_mid * 2 + N * 2 * C_mid * 4)),
    )(x_nhwc, w1f)

    s1, t1 = _bn_scale_shift(st1, g1, b1, count)

    # ---------------- pass 2: bn1+relu -> conv2 + partial BN2 stats ---------
    y2_raw, st2 = pl.pallas_call(
        functools.partial(_conv2_kernel, H=H, W=W, C=C_mid),
        grid=(N,),
        in_specs=[
            pl.BlockSpec((1, HW, C_mid), lambda n: (n, 0, 0)),
            pl.BlockSpec((1, C_mid), lambda n: (0, 0)),
            pl.BlockSpec((1, C_mid), lambda n: (0, 0)),
            pl.BlockSpec((K * K * C_mid, C_mid), lambda n: (0, 0)),
        ],
        out_specs=(
            pl.BlockSpec((1, HW, C_mid), lambda n: (n, 0, 0)),
            pl.BlockSpec((1, 2, C_mid), lambda n: (n, 0, 0)),
        ),
        out_shape=(
            jax.ShapeDtypeStruct((N, HW, C_mid), jnp.float32),
            jax.ShapeDtypeStruct((N, 2, C_mid), jnp.float32),
        ),
        scratch_shapes=[
            pltpu.VMEM((H + 2 * PAD, W + 2 * PAD, C_mid), jnp.bfloat16),
            pltpu.VMEM((HW, K * K * C_mid), jnp.bfloat16),
        ],
        compiler_params=cparams,
        cost_estimate=pl.CostEstimate(
            flops=2 * count * (K * K * C_mid) * C_mid + 3 * count * C_mid,
            transcendentals=0,
            bytes_accessed=(N * HW * C_mid * 2 + N * HW * C_mid * 4
                            + K * K * C_mid * C_mid * 2 + N * 2 * C_mid * 4)),
    )(y1_raw, s1, t1, w2f)

    s2, t2 = _bn_scale_shift(st2, g2, b2, count)

    # ---------------- pass 3: bn2 + relu (lane-dense view) -------------------
    # (N, HW, C) and (N, H, W*C) are the same contiguous HBM bytes; the flat
    # view gives the kernel 128-lane-dense rows.  Scale/shift are tiled W times
    # so index (w*C + c) still picks channel c.
    y2_flat = y2_raw.reshape(N, H, W * C_mid)
    s2t = jnp.tile(s2, (1, W))                      # (1, W*C)
    t2t = jnp.tile(t2, (1, W))
    WC = W * C_mid

    out_flat = pl.pallas_call(
        _bn_relu_kernel,
        grid=(N,),
        in_specs=[
            pl.BlockSpec((1, H, WC), lambda n: (n, 0, 0)),
            pl.BlockSpec((1, WC), lambda n: (0, 0)),
            pl.BlockSpec((1, WC), lambda n: (0, 0)),
        ],
        out_specs=pl.BlockSpec((1, H, WC), lambda n: (n, 0, 0)),
        out_shape=jax.ShapeDtypeStruct((N, H, WC), jnp.float32),
        compiler_params=cparams,
        cost_estimate=pl.CostEstimate(
            flops=3 * count * C_mid, transcendentals=0,
            bytes_accessed=2 * N * HW * C_mid * 4 + 2 * WC * 4),
    )(y2_flat, s2t, t2t)

    # NHWC -> NCHW to match the PyTorch module's output convention.
    return jnp.transpose(out_flat.reshape(N, H, W, C_mid), (0, 3, 1, 2))


def _reference_forward(x_nchw, w1, w2, g1, b1, g2, b2):
    """Pure-JAX reference mirroring the kernel's precision choices
    (bf16 conv operands, f32 accumulation, BN1 stats from f32 conv1 output but
    normalization applied to its bf16-stored copy, f32 BN/ReLU)."""
    x = jnp.transpose(x_nchw, (0, 2, 3, 1)).astype(jnp.bfloat16)

    def conv(x_bf16, w, cin, cout):
        w_hwio = w.reshape(K, K, cin, cout).astype(jnp.bfloat16)
        return lax.conv_general_dilated(
            x_bf16, w_hwio, window_strides=(1, 1),
            padding=((PAD, PAD), (PAD, PAD)),
            dimension_numbers=("NHWC", "HWIO", "NHWC"),
            preferred_element_type=jnp.float32)

    def bn_relu(x_stats, x_apply, g, b):
        mean = jnp.mean(x_stats, axis=(0, 1, 2), keepdims=True)
        var = jnp.mean((x_stats - mean) ** 2, axis=(0, 1, 2), keepdims=True)
        y = (x_apply.astype(jnp.float32) - mean) * (g * lax.rsqrt(var + EPS)) + b
        return jnp.maximum(y, 0.0)

    cin, cmid = w1.shape[1], w1.shape[2]
    y1 = conv(x, w1, cin, cmid)                                   # f32
    a1 = bn_relu(y1, y1.astype(jnp.bfloat16), g1, b1)             # f32
    y2 = conv(a1.astype(jnp.bfloat16), w2, cmid, cmid)            # f32
    out = bn_relu(y2, y2, g2, b2)
    return jnp.transpose(out, (0, 3, 1, 2))


if __name__ == "__main__":
    # ConvBlock(in_planes=4, planes=8) at small shapes.
    N, Cin, Cmid, H, W = 2, 4, 8, 16, 16

    key = jax.random.PRNGKey(0)
    kx, k1, k2, kg1, kb1, kg2, kb2 = jax.random.split(key, 7)

    x = jax.random.normal(kx, (N, Cin, H, W), jnp.float32)
    # conv weights stored as (K*K, Cin, Cout); equivalent to PyTorch
    # (Cout, Cin, K, K) with W_ours[kh*K+kw, ci, co] = W_torch[co, ci, kh, kw].
    w1 = jax.random.normal(k1, (K * K, Cin, Cmid), jnp.float32) * 0.1
    w2 = jax.random.normal(k2, (K * K, Cmid, Cmid), jnp.float32) * 0.1
    g1 = 1.0 + 0.1 * jax.random.normal(kg1, (Cmid,), jnp.float32)
    b1 = 0.1 * jax.random.normal(kb1, (Cmid,), jnp.float32)
    g2 = 1.0 + 0.1 * jax.random.normal(kg2, (Cmid,), jnp.float32)
    b2 = 0.1 * jax.random.normal(kb2, (Cmid,), jnp.float32)

    out = conv_block_forward(x, w1, w2, g1, b1, g2, b2)
    out = jax.block_until_ready(out)

    ref = _reference_forward(x, w1, w2, g1, b1, g2, b2)
    # bf16 MXU operands / bf16 intermediate on both sides; tolerance covers
    # f32 accumulation-order and E[x^2]-E[x]^2 vs two-pass variance deltas.
    if not bool(jnp.allclose(out, ref, atol=2e-3, rtol=2e-3)):
        raise AssertionError("Pallas kernel output mismatch vs JAX reference")

    print("KERNEL_OK")
</pallas_src>

<mosaic_0001>
module attributes {stable_mosaic.version = 11 : i64} {
  func.func @_conv1_kernel(%arg0: i32, %arg1: memref<1x16x16x4xbf16, #tpu.memory_space<vmem>>, %arg2: memref<36x8xbf16, #tpu.memory_space<vmem>>, %arg3: memref<1x256x8xbf16, #tpu.memory_space<vmem>>, %arg4: memref<1x2x8xf32, #tpu.memory_space<vmem>>, %arg5: memref<18x18x4xbf16, #tpu.memory_space<vmem>>, %arg6: memref<256x36xbf16, #tpu.memory_space<vmem>>) attributes {dimension_semantics = [#tpu.dimension_semantics<parallel>], iteration_bounds = array<i64: 2>, scalar_prefetch = 0 : i64, scratch_operands = 2 : i64, tpu.core_type = #tpu.core_type<tc>, window_params = [{transform_indices = @transform_0, window_bounds = array<i64: 1, 16, 16, 4>}, {pipeline_mode = #tpu.pipeline_mode<synchronous>, transform_indices = @transform_1, window_bounds = array<i64: 36, 8>}, {transform_indices = @transform_2, window_bounds = array<i64: 1, 256, 8>}, {transform_indices = @transform_3, window_bounds = array<i64: 1, 2, 8>}]} {
    %cst = arith.constant 0.000000e+00 : bf16
    %0 = vector.broadcast %cst : bf16 to vector<1x18x4xbf16>
    %cst_0 = arith.constant 0.000000e+00 : bf16
    %1 = vector.broadcast %cst_0 : bf16 to vector<16x1x4xbf16>
    %c0 = arith.constant 0 : index
    %c0_1 = arith.constant 0 : index
    %c0_2 = arith.constant 0 : index
    %2 = vector.load %arg5[%c0, %c0_1, %c0_2] : memref<18x18x4xbf16, #tpu.memory_space<vmem>>, vector<1x18x4xbf16>
    tpu.vector_store %arg5[%c0, %c0_1, %c0_2], %0 {strides = array<i32>} : memref<18x18x4xbf16, #tpu.memory_space<vmem>>, vector<1x18x4xbf16>,
    %c17 = arith.constant 17 : index
    %c0_3 = arith.constant 0 : index
    %c0_4 = arith.constant 0 : index
    %3 = vector.load %arg5[%c17, %c0_3, %c0_4] : memref<18x18x4xbf16, #tpu.memory_space<vmem>>, vector<1x18x4xbf16>
    tpu.vector_store %arg5[%c17, %c0_3, %c0_4], %0 {strides = array<i32>} : memref<18x18x4xbf16, #tpu.memory_space<vmem>>, vector<1x18x4xbf16>,
    %c1 = arith.constant 1 : index
    %c0_5 = arith.constant 0 : index
    %c0_6 = arith.constant 0 : index
    %4 = vector.load %arg5[%c1, %c0_5, %c0_6] : memref<18x18x4xbf16, #tpu.memory_space<vmem>>, vector<16x1x4xbf16>
    tpu.vector_store %arg5[%c1, %c0_5, %c0_6], %1 {strides = array<i32>} : memref<18x18x4xbf16, #tpu.memory_space<vmem>>, vector<16x1x4xbf16>,
    %c1_7 = arith.constant 1 : index
    %c17_8 = arith.constant 17 : index
    %c0_9 = arith.constant 0 : index
    %5 = vector.load %arg5[%c1_7, %c17_8, %c0_9] : memref<18x18x4xbf16, #tpu.memory_space<vmem>>, vector<16x1x4xbf16>
    tpu.vector_store %arg5[%c1_7, %c17_8, %c0_9], %1 {strides = array<i32>} : memref<18x18x4xbf16, #tpu.memory_space<vmem>>, vector<16x1x4xbf16>,
    %c0_10 = arith.constant 0 : index
    %c0_11 = arith.constant 0 : index
    %c0_12 = arith.constant 0 : index
    %c0_13 = arith.constant 0 : index
    %6 = vector.load %arg1[%c0_10, %c0_11, %c0_12, %c0_13] : memref<1x16x16x4xbf16, #tpu.memory_space<vmem>>, vector<1x16x16x4xbf16>
    %7 = vector.shape_cast %6 : vector<1x16x16x4xbf16> to vector<16x16x4xbf16>
    %c1_14 = arith.constant 1 : index
    %c1_15 = arith.constant 1 : index
    %c0_16 = arith.constant 0 : index
    %8 = vector.load %arg5[%c1_14, %c1_15, %c0_16] : memref<18x18x4xbf16, #tpu.memory_space<vmem>>, vector<16x16x4xbf16>
    tpu.vector_store %arg5[%c1_14, %c1_15, %c0_16], %7 {strides = array<i32>} : memref<18x18x4xbf16, #tpu.memory_space<vmem>>, vector<16x16x4xbf16>,
    %c0_17 = arith.constant 0 : index
    %c0_18 = arith.constant 0 : index
    %c0_19 = arith.constant 0 : index
    %9 = vector.load %arg5[%c0_17, %c0_18, %c0_19] : memref<18x18x4xbf16, #tpu.memory_space<vmem>>, vector<16x16x4xbf16>
    %10 = vector.shape_cast %9 : vector<16x16x4xbf16> to vector<256x4xbf16>
    %c0_20 = arith.constant 0 : index
    %c0_21 = arith.constant 0 : index
    %11 = vector.load %arg6[%c0_20, %c0_21] : memref<256x36xbf16, #tpu.memory_space<vmem>>, vector<256x4xbf16>
    tpu.vector_store %arg6[%c0_20, %c0_21], %10 {strides = array<i32>} : memref<256x36xbf16, #tpu.memory_space<vmem>>, vector<256x4xbf16>,
    %c0_22 = arith.constant 0 : index
    %c1_23 = arith.constant 1 : index
    %c0_24 = arith.constant 0 : index
    %12 = vector.load %arg5[%c0_22, %c1_23, %c0_24] : memref<18x18x4xbf16, #tpu.memory_space<vmem>>, vector<16x16x4xbf16>
    %13 = vector.shape_cast %12 : vector<16x16x4xbf16> to vector<256x4xbf16>
    %c0_25 = arith.constant 0 : index
    %c4 = arith.constant 4 : index
    %14 = vector.load %arg6[%c0_25, %c4] : memref<256x36xbf16, #tpu.memory_space<vmem>>, vector<256x4xbf16>
    tpu.vector_store %arg6[%c0_25, %c4], %13 {strides = array<i32>} : memref<256x36xbf16, #tpu.memory_space<vmem>>, vector<256x4xbf16>,
    %c0_26 = arith.constant 0 : index
    %c2 = arith.constant 2 : index
    %c0_27 = arith.constant 0 : index
    %15 = vector.load %arg5[%c0_26, %c2, %c0_27] : memref<18x18x4xbf16, #tpu.memory_space<vmem>>, vector<16x16x4xbf16>
    %16 = vector.shape_cast %15 : vector<16x16x4xbf16> to vector<256x4xbf16>
    %c0_28 = arith.constant 0 : index
    %c8 = arith.constant 8 : index
    %17 = vector.load %arg6[%c0_28, %c8] : memref<256x36xbf16, #tpu.memory_space<vmem>>, vector<256x4xbf16>
    tpu.vector_store %arg6[%c0_28, %c8], %16 {strides = array<i32>} : memref<256x36xbf16, #tpu.memory_space<vmem>>, vector<256x4xbf16>,
    %c1_29 = arith.constant 1 : index
    %c0_30 = arith.constant 0 : index
    %c0_31 = arith.constant 0 : index
    %18 = vector.load %arg5[%c1_29, %c0_30, %c0_31] : memref<18x18x4xbf16, #tpu.memory_space<vmem>>, vector<16x16x4xbf16>
    %19 = vector.shape_cast %18 : vector<16x16x4xbf16> to vector<256x4xbf16>
    %c0_32 = arith.constant 0 : index
    %c12 = arith.constant 12 : index
    %20 = vector.load %arg6[%c0_32, %c12] : memref<256x36xbf16, #tpu.memory_space<vmem>>, vector<256x4xbf16>
    tpu.vector_store %arg6[%c0_32, %c12], %19 {strides = array<i32>} : memref<256x36xbf16, #tpu.memory_space<vmem>>, vector<256x4xbf16>,
    %c1_33 = arith.constant 1 : index
    %c1_34 = arith.constant 1 : index
    %c0_35 = arith.constant 0 : index
    %21 = vector.load %arg5[%c1_33, %c1_34, %c0_35] : memref<18x18x4xbf16, #tpu.memory_space<vmem>>, vector<16x16x4xbf16>
    %22 = vector.shape_cast %21 : vector<16x16x4xbf16> to vector<256x4xbf16>
    %c0_36 = arith.constant 0 : index
    %c16 = arith.constant 16 : index
    %23 = vector.load %arg6[%c0_36, %c16] : memref<256x36xbf16, #tpu.memory_space<vmem>>, vector<256x4xbf16>
    tpu.vector_store %arg6[%c0_36, %c16], %22 {strides = array<i32>} : memref<256x36xbf16, #tpu.memory_space<vmem>>, vector<256x4xbf16>,
    %c1_37 = arith.constant 1 : index
    %c2_38 = arith.constant 2 : index
    %c0_39 = arith.constant 0 : index
    %24 = vector.load %arg5[%c1_37, %c2_38, %c0_39] : memref<18x18x4xbf16, #tpu.memory_space<vmem>>, vector<16x16x4xbf16>
    %25 = vector.shape_cast %24 : vector<16x16x4xbf16> to vector<256x4xbf16>
    %c0_40 = arith.constant 0 : index
    %c20 = arith.constant 20 : index
    %26 = vector.load %arg6[%c0_40, %c20] : memref<256x36xbf16, #tpu.memory_space<vmem>>, vector<256x4xbf16>
    tpu.vector_store %arg6[%c0_40, %c20], %25 {strides = array<i32>} : memref<256x36xbf16, #tpu.memory_space<vmem>>, vector<256x4xbf16>,
    %c2_41 = arith.constant 2 : index
    %c0_42 = arith.constant 0 : index
    %c0_43 = arith.constant 0 : index
    %27 = vector.load %arg5[%c2_41, %c0_42, %c0_43] : memref<18x18x4xbf16, #tpu.memory_space<vmem>>, vector<16x16x4xbf16>
    %28 = vector.shape_cast %27 : vector<16x16x4xbf16> to vector<256x4xbf16>
    %c0_44 = arith.constant 0 : index
    %c24 = arith.constant 24 : index
    %29 = vector.load %arg6[%c0_44, %c24] : memref<256x36xbf16, #tpu.memory_space<vmem>>, vector<256x4xbf16>
    tpu.vector_store %arg6[%c0_44, %c24], %28 {strides = array<i32>} : memref<256x36xbf16, #tpu.memory_space<vmem>>, vector<256x4xbf16>,
    %c2_45 = arith.constant 2 : index
    %c1_46 = arith.constant 1 : index
    %c0_47 = arith.constant 0 : index
    %30 = vector.load %arg5[%c2_45, %c1_46, %c0_47] : memref<18x18x4xbf16, #tpu.memory_space<vmem>>, vector<16x16x4xbf16>
    %31 = vector.shape_cast %30 : vector<16x16x4xbf16> to vector<256x4xbf16>
    %c0_48 = arith.constant 0 : index
    %c28 = arith.constant 28 : index
    %32 = vector.load %arg6[%c0_48, %c28] : memref<256x36xbf16, #tpu.memory_space<vmem>>, vector<256x4xbf16>
    tpu.vector_store %arg6[%c0_48, %c28], %31 {strides = array<i32>} : memref<256x36xbf16, #tpu.memory_space<vmem>>, vector<256x4xbf16>,
    %c2_49 = arith.constant 2 : index
    %c2_50 = arith.constant 2 : index
    %c0_51 = arith.constant 0 : index
    %33 = vector.load %arg5[%c2_49, %c2_50, %c0_51] : memref<18x18x4xbf16, #tpu.memory_space<vmem>>, vector<16x16x4xbf16>
    %34 = vector.shape_cast %33 : vector<16x16x4xbf16> to vector<256x4xbf16>
    %c0_52 = arith.constant 0 : index
    %c32 = arith.constant 32 : index
    %35 = vector.load %arg6[%c0_52, %c32] : memref<256x36xbf16, #tpu.memory_space<vmem>>, vector<256x4xbf16>
    tpu.vector_store %arg6[%c0_52, %c32], %34 {strides = array<i32>} : memref<256x36xbf16, #tpu.memory_space<vmem>>, vector<256x4xbf16>,
    %c0_53 = arith.constant 0 : index
    %c0_54 = arith.constant 0 : index
    %36 = vector.load %arg6[%c0_53, %c0_54] : memref<256x36xbf16, #tpu.memory_space<vmem>>, vector<256x36xbf16>
    %c0_55 = arith.constant 0 : index
    %c0_56 = arith.constant 0 : index
    %37 = vector.load %arg2[%c0_55, %c0_56] : memref<36x8xbf16, #tpu.memory_space<vmem>>, vector<36x8xbf16>
    %cst_57 = arith.constant dense<0.000000e+00> : vector<256x8xf32>
    %38 = tpu.matmul %36, %37, %cst_57 {dimension_numbers = #tpu.dot_dimension_numbers<[1], [0], [0], [1], [0, 0, 1, 1], [], []>} : vector<256x36xbf16>, vector<36x8xbf16>, vector<256x8xf32> -> vector<256x8xf32>
    %cst_58 = arith.constant dense<0.000000e+00> : vector<8xf32>
    %39 = vector.multi_reduction <add>, %38, %cst_58 [0] : vector<256x8xf32> to vector<8xf32>
    %40 = vector.shape_cast %39 : vector<8xf32> to vector<1x8xf32>
    %c0_59 = arith.constant 0 : index
    %c0_60 = arith.constant 0 : index
    %c0_61 = arith.constant 0 : index
    %41 = vector.load %arg4[%c0_59, %c0_60, %c0_61] : memref<1x2x8xf32, #tpu.memory_space<vmem>>, vector<1x1x8xf32>
    %42 = vector.shape_cast %41 : vector<1x1x8xf32> to vector<1x8xf32>
    %43 = vector.shape_cast %40 : vector<1x8xf32> to vector<1x1x8xf32>
    tpu.vector_store %arg4[%c0_59, %c0_60, %c0_61], %43 {strides = array<i32>} : memref<1x2x8xf32, #tpu.memory_space<vmem>>, vector<1x1x8xf32>,
    %44 = arith.mulf %38, %38 : vector<256x8xf32>
    %cst_62 = arith.constant dense<0.000000e+00> : vector<8xf32>
    %45 = vector.multi_reduction <add>, %44, %cst_62 [0] : vector<256x8xf32> to vector<8xf32>
    %46 = vector.shape_cast %45 : vector<8xf32> to vector<1x8xf32>
    %c0_63 = arith.constant 0 : index
    %c1_64 = arith.constant 1 : index
    %c0_65 = arith.constant 0 : index
    %47 = vector.load %arg4[%c0_63, %c1_64, %c0_65] : memref<1x2x8xf32, #tpu.memory_space<vmem>>, vector<1x1x8xf32>
    %48 = vector.shape_cast %47 : vector<1x1x8xf32> to vector<1x8xf32>
    %49 = vector.shape_cast %46 : vector<1x8xf32> to vector<1x1x8xf32>
    tpu.vector_store %arg4[%c0_63, %c1_64, %c0_65], %49 {strides = array<i32>} : memref<1x2x8xf32, #tpu.memory_space<vmem>>, vector<1x1x8xf32>,
    %50 = arith.truncf %38 : vector<256x8xf32> to vector<256x8xbf16>
    %c0_66 = arith.constant 0 : index
    %c0_67 = arith.constant 0 : index
    %c0_68 = arith.constant 0 : index
    %51 = vector.load %arg3[%c0_66, %c0_67, %c0_68] : memref<1x256x8xbf16, #tpu.memory_space<vmem>>, vector<1x256x8xbf16>
    %52 = vector.shape_cast %51 : vector<1x256x8xbf16> to vector<256x8xbf16>
    %53 = vector.shape_cast %50 : vector<256x8xbf16> to vector<1x256x8xbf16>
    tpu.vector_store %arg3[%c0_66, %c0_67, %c0_68], %53 {strides = array<i32>} : memref<1x256x8xbf16, #tpu.memory_space<vmem>>, vector<1x256x8xbf16>,
    return
  }
  func.func @transform_0(%arg0: i32) -> (i32, i32, i32, i32) {
    %c0_i32 = arith.constant 0 : i32
    %c0_i32_0 = arith.constant 0 : i32
    %c0_i32_1 = arith.constant 0 : i32
    %c0_i32_2 = arith.constant 0 : i32
    return %arg0, %c0_i32, %c0_i32_0, %c0_i32_1 : i32, i32, i32, i32
  }
  func.func @transform_1(%arg0: i32) -> (i32, i32) {
    %c0_i32 = arith.constant 0 : i32
    %c0_i32_0 = arith.constant 0 : i32
    %c0_i32_1 = arith.constant 0 : i32
    return %c0_i32, %c0_i32_0 : i32, i32
  }
  func.func @transform_2(%arg0: i32) -> (i32, i32, i32) {
    %c0_i32 = arith.constant 0 : i32
    %c0_i32_0 = arith.constant 0 : i32
    %c0_i32_1 = arith.constant 0 : i32
    return %arg0, %c0_i32, %c0_i32_0 : i32, i32, i32
  }
  func.func @transform_3(%arg0: i32) -> (i32, i32, i32) {
    %c0_i32 = arith.constant 0 : i32
    %c0_i32_0 = arith.constant 0 : i32
    %c0_i32_1 = arith.constant 0 : i32
    return %arg0, %c0_i32, %c0_i32_0 : i32, i32, i32
  }
}

module attributes {stable_mosaic.version = 11 : i64} {
  func.func @_conv2_kernel(%arg0: i32, %arg1: memref<1x256x8xbf16, #tpu.memory_space<vmem>>, %arg2: memref<1x8xf32, #tpu.memory_space<vmem>>, %arg3: memref<1x8xf32, #tpu.memory_space<vmem>>, %arg4: memref<72x8xbf16, #tpu.memory_space<vmem>>, %arg5: memref<1x256x8xf32, #tpu.memory_space<vmem>>, %arg6: memref<1x2x8xf32, #tpu.memory_space<vmem>>, %arg7: memref<18x18x8xbf16, #tpu.memory_space<vmem>>, %arg8: memref<256x72xbf16, #tpu.memory_space<vmem>>) attributes {dimension_semantics = [#tpu.dimension_semantics<parallel>], iteration_bounds = array<i64: 2>, scalar_prefetch = 0 : i64, scratch_operands = 2 : i64, tpu.core_type = #tpu.core_type<tc>, window_params = [{transform_indices = @transform_0, window_bounds = array<i64: 1, 256, 8>}, {pipeline_mode = #tpu.pipeline_mode<synchronous>, transform_indices = @transform_1, window_bounds = array<i64: 1, 8>}, {pipeline_mode = #tpu.pipeline_mode<synchronous>, transform_indices = @transform_2, window_bounds = array<i64: 1, 8>}, {pipeline_mode = #tpu.pipeline_mode<synchronous>, transform_indices = @transform_3, window_bounds = array<i64: 72, 8>}, {transform_indices = @transform_4, window_bounds = array<i64: 1, 256, 8>}, {transform_indices = @transform_5, window_bounds = array<i64: 1, 2, 8>}]} {
    %c0 = arith.constant 0 : index
    %c0_0 = arith.constant 0 : index
    %c0_1 = arith.constant 0 : index
    %0 = vector.load %arg1[%c0, %c0_0, %c0_1] : memref<1x256x8xbf16, #tpu.memory_space<vmem>>, vector<1x256x8xbf16>
    %1 = vector.shape_cast %0 : vector<1x256x8xbf16> to vector<256x8xbf16>
    %2 = arith.extf %1 : vector<256x8xbf16> to vector<256x8xf32>
    %c0_2 = arith.constant 0 : index
    %c0_3 = arith.constant 0 : index
    %3 = vector.load %arg2[%c0_2, %c0_3] : memref<1x8xf32, #tpu.memory_space<vmem>>, vector<1x8xf32>
    %4 = vector.broadcast %3 : vector<1x8xf32> to vector<256x8xf32>
    %5 = arith.mulf %2, %4 : vector<256x8xf32>
    %c0_4 = arith.constant 0 : index
    %c0_5 = arith.constant 0 : index
    %6 = vector.load %arg3[%c0_4, %c0_5] : memref<1x8xf32, #tpu.memory_space<vmem>>, vector<1x8xf32>
    %7 = vector.broadcast %6 : vector<1x8xf32> to vector<256x8xf32>
    %8 = arith.addf %5, %7 : vector<256x8xf32>
    %cst = arith.constant 0.000000e+00 : f32
    %9 = vector.broadcast %cst : f32 to vector<256x8xf32>
    %10 = arith.maximumf %8, %9 : vector<256x8xf32>
    %11 = arith.truncf %10 : vector<256x8xf32> to vector<256x8xbf16>
    %12 = vector.shape_cast %11 : vector<256x8xbf16> to vector<16x16x8xbf16>
    %cst_6 = arith.constant 0.000000e+00 : bf16
    %13 = vector.broadcast %cst_6 : bf16 to vector<1x18x8xbf16>
    %cst_7 = arith.constant 0.000000e+00 : bf16
    %14 = vector.broadcast %cst_7 : bf16 to vector<16x1x8xbf16>
    %c0_8 = arith.constant 0 : index
    %c0_9 = arith.constant 0 : index
    %c0_10 = arith.constant 0 : index
    %15 = vector.load %arg7[%c0_8, %c0_9, %c0_10] : memref<18x18x8xbf16, #tpu.memory_space<vmem>>, vector<1x18x8xbf16>
    tpu.vector_store %arg7[%c0_8, %c0_9, %c0_10], %13 {strides = array<i32>} : memref<18x18x8xbf16, #tpu.memory_space<vmem>>, vector<1x18x8xbf16>,
    %c17 = arith.constant 17 : index
    %c0_11 = arith.constant 0 : index
    %c0_12 = arith.constant 0 : index
    %16 = vector.load %arg7[%c17, %c0_11, %c0_12] : memref<18x18x8xbf16, #tpu.memory_space<vmem>>, vector<1x18x8xbf16>
    tpu.vector_store %arg7[%c17, %c0_11, %c0_12], %13 {strides = array<i32>} : memref<18x18x8xbf16, #tpu.memory_space<vmem>>, vector<1x18x8xbf16>,
    %c1 = arith.constant 1 : index
    %c0_13 = arith.constant 0 : index
    %c0_14 = arith.constant 0 : index
    %17 = vector.load %arg7[%c1, %c0_13, %c0_14] : memref<18x18x8xbf16, #tpu.memory_space<vmem>>, vector<16x1x8xbf16>
    tpu.vector_store %arg7[%c1, %c0_13, %c0_14], %14 {strides = array<i32>} : memref<18x18x8xbf16, #tpu.memory_space<vmem>>, vector<16x1x8xbf16>,
    %c1_15 = arith.constant 1 : index
    %c17_16 = arith.constant 17 : index
    %c0_17 = arith.constant 0 : index
    %18 = vector.load %arg7[%c1_15, %c17_16, %c0_17] : memref<18x18x8xbf16, #tpu.memory_space<vmem>>, vector<16x1x8xbf16>
    tpu.vector_store %arg7[%c1_15, %c17_16, %c0_17], %14 {strides = array<i32>} : memref<18x18x8xbf16, #tpu.memory_space<vmem>>, vector<16x1x8xbf16>,
    %c1_18 = arith.constant 1 : index
    %c1_19 = arith.constant 1 : index
    %c0_20 = arith.constant 0 : index
    %19 = vector.load %arg7[%c1_18, %c1_19, %c0_20] : memref<18x18x8xbf16, #tpu.memory_space<vmem>>, vector<16x16x8xbf16>
    tpu.vector_store %arg7[%c1_18, %c1_19, %c0_20], %12 {strides = array<i32>} : memref<18x18x8xbf16, #tpu.memory_space<vmem>>, vector<16x16x8xbf16>,
    %c0_21 = arith.constant 0 : index
    %c0_22 = arith.constant 0 : index
    %c0_23 = arith.constant 0 : index
    %20 = vector.load %arg7[%c0_21, %c0_22, %c0_23] : memref<18x18x8xbf16, #tpu.memory_space<vmem>>, vector<16x16x8xbf16>
    %21 = vector.shape_cast %20 : vector<16x16x8xbf16> to vector<256x8xbf16>
    %c0_24 = arith.constant 0 : index
    %c0_25 = arith.constant 0 : index
    %22 = vector.load %arg8[%c0_24, %c0_25] : memref<256x72xbf16, #tpu.memory_space<vmem>>, vector<256x8xbf16>
    tpu.vector_store %arg8[%c0_24, %c0_25], %21 {strides = array<i32>} : memref<256x72xbf16, #tpu.memory_space<vmem>>, vector<256x8xbf16>,
    %c0_26 = arith.constant 0 : index
    %c1_27 = arith.constant 1 : index
    %c0_28 = arith.constant 0 : index
    %23 = vector.load %arg7[%c0_26, %c1_27, %c0_28] : memref<18x18x8xbf16, #tpu.memory_space<vmem>>, vector<16x16x8xbf16>
    %24 = vector.shape_cast %23 : vector<16x16x8xbf16> to vector<256x8xbf16>
    %c0_29 = arith.constant 0 : index
    %c8 = arith.constant 8 : index
    %25 = vector.load %arg8[%c0_29, %c8] : memref<256x72xbf16, #tpu.memory_space<vmem>>, vector<256x8xbf16>
    tpu.vector_store %arg8[%c0_29, %c8], %24 {strides = array<i32>} : memref<256x72xbf16, #tpu.memory_space<vmem>>, vector<256x8xbf16>,
    %c0_30 = arith.constant 0 : index
    %c2 = arith.constant 2 : index
    %c0_31 = arith.constant 0 : index
    %26 = vector.load %arg7[%c0_30, %c2, %c0_31] : memref<18x18x8xbf16, #tpu.memory_space<vmem>>, vector<16x16x8xbf16>
    %27 = vector.shape_cast %26 : vector<16x16x8xbf16> to vector<256x8xbf16>
    %c0_32 = arith.constant 0 : index
    %c16 = arith.constant 16 : index
    %28 = vector.load %arg8[%c0_32, %c16] : memref<256x72xbf16, #tpu.memory_space<vmem>>, vector<256x8xbf16>
    tpu.vector_store %arg8[%c0_32, %c16], %27 {strides = array<i32>} : memref<256x72xbf16, #tpu.memory_space<vmem>>, vector<256x8xbf16>,
    %c1_33 = arith.constant 1 : index
    %c0_34 = arith.constant 0 : index
    %c0_35 = arith.constant 0 : index
    %29 = vector.load %arg7[%c1_33, %c0_34, %c0_35] : memref<18x18x8xbf16, #tpu.memory_space<vmem>>, vector<16x16x8xbf16>
    %30 = vector.shape_cast %29 : vector<16x16x8xbf16> to vector<256x8xbf16>
    %c0_36 = arith.constant 0 : index
    %c24 = arith.constant 24 : index
    %31 = vector.load %arg8[%c0_36, %c24] : memref<256x72xbf16, #tpu.memory_space<vmem>>, vector<256x8xbf16>
    tpu.vector_store %arg8[%c0_36, %c24], %30 {strides = array<i32>} : memref<256x72xbf16, #tpu.memory_space<vmem>>, vector<256x8xbf16>,
    %c1_37 = arith.constant 1 : index
    %c1_38 = arith.constant 1 : index
    %c0_39 = arith.constant 0 : index
    %32 = vector.load %arg7[%c1_37, %c1_38, %c0_39] : memref<18x18x8xbf16, #tpu.memory_space<vmem>>, vector<16x16x8xbf16>
    %33 = vector.shape_cast %32 : vector<16x16x8xbf16> to vector<256x8xbf16>
    %c0_40 = arith.constant 0 : index
    %c32 = arith.constant 32 : index
    %34 = vector.load %arg8[%c0_40, %c32] : memref<256x72xbf16, #tpu.memory_space<vmem>>, vector<256x8xbf16>
    tpu.vector_store %arg8[%c0_40, %c32], %33 {strides = array<i32>} : memref<256x72xbf16, #tpu.memory_space<vmem>>, vector<256x8xbf16>,
    %c1_41 = arith.constant 1 : index
    %c2_42 = arith.constant 2 : index
    %c0_43 = arith.constant 0 : index
    %35 = vector.load %arg7[%c1_41, %c2_42, %c0_43] : memref<18x18x8xbf16, #tpu.memory_space<vmem>>, vector<16x16x8xbf16>
    %36 = vector.shape_cast %35 : vector<16x16x8xbf16> to vector<256x8xbf16>
    %c0_44 = arith.constant 0 : index
    %c40 = arith.constant 40 : index
    %37 = vector.load %arg8[%c0_44, %c40] : memref<256x72xbf16, #tpu.memory_space<vmem>>, vector<256x8xbf16>
    tpu.vector_store %arg8[%c0_44, %c40], %36 {strides = array<i32>} : memref<256x72xbf16, #tpu.memory_space<vmem>>, vector<256x8xbf16>,
    %c2_45 = arith.constant 2 : index
    %c0_46 = arith.constant 0 : index
    %c0_47 = arith.constant 0 : index
    %38 = vector.load %arg7[%c2_45, %c0_46, %c0_47] : memref<18x18x8xbf16, #tpu.memory_space<vmem>>, vector<16x16x8xbf16>
    %39 = vector.shape_cast %38 : vector<16x16x8xbf16> to vector<256x8xbf16>
    %c0_48 = arith.constant 0 : index
    %c48 = arith.constant 48 : index
    %40 = vector.load %arg8[%c0_48, %c48] : memref<256x72xbf16, #tpu.memory_space<vmem>>, vector<256x8xbf16>
    tpu.vector_store %arg8[%c0_48, %c48], %39 {strides = array<i32>} : memref<256x72xbf16, #tpu.memory_space<vmem>>, vector<256x8xbf16>,
    %c2_49 = arith.constant 2 : index
    %c1_50 = arith.constant 1 : index
    %c0_51 = arith.constant 0 : index
    %41 = vector.load %arg7[%c2_49, %c1_50, %c0_51] : memref<18x18x8xbf16, #tpu.memory_space<vmem>>, vector<16x16x8xbf16>
    %42 = vector.shape_cast %41 : vector<16x16x8xbf16> to vector<256x8xbf16>
    %c0_52 = arith.constant 0 : index
    %c56 = arith.constant 56 : index
    %43 = vector.load %arg8[%c0_52, %c56] : memref<256x72xbf16, #tpu.memory_space<vmem>>, vector<256x8xbf16>
    tpu.vector_store %arg8[%c0_52, %c56], %42 {strides = array<i32>} : memref<256x72xbf16, #tpu.memory_space<vmem>>, vector<256x8xbf16>,
    %c2_53 = arith.constant 2 : index
    %c2_54 = arith.constant 2 : index
    %c0_55 = arith.constant 0 : index
    %44 = vector.load %arg7[%c2_53, %c2_54, %c0_55] : memref<18x18x8xbf16, #tpu.memory_space<vmem>>, vector<16x16x8xbf16>
    %45 = vector.shape_cast %44 : vector<16x16x8xbf16> to vector<256x8xbf16>
    %c0_56 = arith.constant 0 : index
    %c64 = arith.constant 64 : index
    %46 = vector.load %arg8[%c0_56, %c64] : memref<256x72xbf16, #tpu.memory_space<vmem>>, vector<256x8xbf16>
    tpu.vector_store %arg8[%c0_56, %c64], %45 {strides = array<i32>} : memref<256x72xbf16, #tpu.memory_space<vmem>>, vector<256x8xbf16>,
    %c0_57 = arith.constant 0 : index
    %c0_58 = arith.constant 0 : index
    %47 = vector.load %arg8[%c0_57, %c0_58] : memref<256x72xbf16, #tpu.memory_space<vmem>>, vector<256x72xbf16>
    %c0_59 = arith.constant 0 : index
    %c0_60 = arith.constant 0 : index
    %48 = vector.load %arg4[%c0_59, %c0_60] : memref<72x8xbf16, #tpu.memory_space<vmem>>, vector<72x8xbf16>
    %cst_61 = arith.constant dense<0.000000e+00> : vector<256x8xf32>
    %49 = tpu.matmul %47, %48, %cst_61 {dimension_numbers = #tpu.dot_dimension_numbers<[1], [0], [0], [1], [0, 0, 1, 1], [], []>} : vector<256x72xbf16>, vector<72x8xbf16>, vector<256x8xf32> -> vector<256x8xf32>
    %c0_62 = arith.constant 0 : index
    %c0_63 = arith.constant 0 : index
    %c0_64 = arith.constant 0 : index
    %50 = vector.load %arg5[%c0_62, %c0_63, %c0_64] : memref<1x256x8xf32, #tpu.memory_space<vmem>>, vector<1x256x8xf32>
    %51 = vector.shape_cast %50 : vector<1x256x8xf32> to vector<256x8xf32>
    %52 = vector.shape_cast %49 : vector<256x8xf32> to vector<1x256x8xf32>
    tpu.vector_store %arg5[%c0_62, %c0_63, %c0_64], %52 {strides = array<i32>} : memref<1x256x8xf32, #tpu.memory_space<vmem>>, vector<1x256x8xf32>,
    %cst_65 = arith.constant dense<0.000000e+00> : vector<8xf32>
    %53 = vector.multi_reduction <add>, %49, %cst_65 [0] : vector<256x8xf32> to vector<8xf32>
    %54 = vector.shape_cast %53 : vector<8xf32> to vector<1x8xf32>
    %c0_66 = arith.constant 0 : index
    %c0_67 = arith.constant 0 : index
    %c0_68 = arith.constant 0 : index
    %55 = vector.load %arg6[%c0_66, %c0_67, %c0_68] : memref<1x2x8xf32, #tpu.memory_space<vmem>>, vector<1x1x8xf32>
    %56 = vector.shape_cast %55 : vector<1x1x8xf32> to vector<1x8xf32>
    %57 = vector.shape_cast %54 : vector<1x8xf32> to vector<1x1x8xf32>
    tpu.vector_store %arg6[%c0_66, %c0_67, %c0_68], %57 {strides = array<i32>} : memref<1x2x8xf32, #tpu.memory_space<vmem>>, vector<1x1x8xf32>,
    %58 = arith.mulf %49, %49 : vector<256x8xf32>
    %cst_69 = arith.constant dense<0.000000e+00> : vector<8xf32>
    %59 = vector.multi_reduction <add>, %58, %cst_69 [0] : vector<256x8xf32> to vector<8xf32>
    %60 = vector.shape_cast %59 : vector<8xf32> to vector<1x8xf32>
    %c0_70 = arith.constant 0 : index
    %c1_71 = arith.constant 1 : index
    %c0_72 = arith.constant 0 : index
    %61 = vector.load %arg6[%c0_70, %c1_71, %c0_72] : memref<1x2x8xf32, #tpu.memory_space<vmem>>, vector<1x1x8xf32>
    %62 = vector.shape_cast %61 : vector<1x1x8xf32> to vector<1x8xf32>
    %63 = vector.shape_cast %60 : vector<1x8xf32> to vector<1x1x8xf32>
    tpu.vector_store %arg6[%c0_70, %c1_71, %c0_72], %63 {strides = array<i32>} : memref<1x2x8xf32, #tpu.memory_space<vmem>>, vector<1x1x8xf32>,
    return
  }
  func.func @transform_0(%arg0: i32) -> (i32, i32, i32) {
    %c0_i32 = arith.constant 0 : i32
    %c0_i32_0 = arith.constant 0 : i32
    %c0_i32_1 = arith.constant 0 : i32
    return %arg0, %c0_i32, %c0_i32_0 : i32, i32, i32
  }
  func.func @transform_1(%arg0: i32) -> (i32, i32) {
    %c0_i32 = arith.constant 0 : i32
    %c0_i32_0 = arith.constant 0 : i32
    %c0_i32_1 = arith.constant 0 : i32
    return %c0_i32, %c0_i32_0 : i32, i32
  }
  func.func @transform_2(%arg0: i32) -> (i32, i32) {
    %c0_i32 = arith.constant 0 : i32
    %c0_i32_0 = arith.constant 0 : i32
    %c0_i32_1 = arith.constant 0 : i32
    return %c0_i32, %c0_i32_0 : i32, i32
  }
  func.func @transform_3(%arg0: i32) -> (i32, i32) {
    %c0_i32 = arith.constant 0 : i32
    %c0_i32_0 = arith.constant 0 : i32
    %c0_i32_1 = arith.constant 0 : i32
    return %c0_i32, %c0_i32_0 : i32, i32
  }
  func.func @transform_4(%arg0: i32) -> (i32, i32, i32) {
    %c0_i32 = arith.constant 0 : i32
    %c0_i32_0 = arith.constant 0 : i32
    %c0_i32_1 = arith.constant 0 : i32
    return %arg0, %c0_i32, %c0_i32_0 : i32, i32, i32
  }
  func.func @transform_5(%arg0: i32) -> (i32, i32, i32) {
    %c0_i32 = arith.constant 0 : i32
    %c0_i32_0 = arith.constant 0 : i32
    %c0_i32_1 = arith.constant 0 : i32
    return %arg0, %c0_i32, %c0_i32_0 : i32, i32, i32
  }
}

module attributes {stable_mosaic.version = 11 : i64} {
  func.func @_bn_relu_kernel(%arg0: i32, %arg1: memref<1x16x128xf32, #tpu.memory_space<vmem>>, %arg2: memref<1x128xf32, #tpu.memory_space<vmem>>, %arg3: memref<1x128xf32, #tpu.memory_space<vmem>>, %arg4: memref<1x16x128xf32, #tpu.memory_space<vmem>>) attributes {dimension_semantics = [#tpu.dimension_semantics<parallel>], iteration_bounds = array<i64: 2>, scalar_prefetch = 0 : i64, scratch_operands = 0 : i64, tpu.core_type = #tpu.core_type<tc>, window_params = [{transform_indices = @transform_0, window_bounds = array<i64: 1, 16, 128>}, {pipeline_mode = #tpu.pipeline_mode<synchronous>, transform_indices = @transform_1, window_bounds = array<i64: 1, 128>}, {pipeline_mode = #tpu.pipeline_mode<synchronous>, transform_indices = @transform_2, window_bounds = array<i64: 1, 128>}, {transform_indices = @transform_3, window_bounds = array<i64: 1, 16, 128>}]} {
    %c0 = arith.constant 0 : index
    %c0_0 = arith.constant 0 : index
    %c0_1 = arith.constant 0 : index
    %0 = vector.load %arg1[%c0, %c0_0, %c0_1] : memref<1x16x128xf32, #tpu.memory_space<vmem>>, vector<1x16x128xf32>
    %c0_2 = arith.constant 0 : index
    %c0_3 = arith.constant 0 : index
    %1 = vector.load %arg2[%c0_2, %c0_3] : memref<1x128xf32, #tpu.memory_space<vmem>>, vector<1x128xf32>
    %2 = vector.shape_cast %1 : vector<1x128xf32> to vector<1x1x128xf32>
    %3 = vector.broadcast %2 : vector<1x1x128xf32> to vector<1x16x128xf32>
    %4 = arith.mulf %0, %3 : vector<1x16x128xf32>
    %c0_4 = arith.constant 0 : index
    %c0_5 = arith.constant 0 : index
    %5 = vector.load %arg3[%c0_4, %c0_5] : memref<1x128xf32, #tpu.memory_space<vmem>>, vector<1x128xf32>
    %6 = vector.shape_cast %5 : vector<1x128xf32> to vector<1x1x128xf32>
    %7 = vector.broadcast %6 : vector<1x1x128xf32> to vector<1x16x128xf32>
    %8 = arith.addf %4, %7 : vector<1x16x128xf32>
    %cst = arith.constant 0.000000e+00 : f32
    %9 = vector.broadcast %cst : f32 to vector<1x16x128xf32>
    %10 = arith.maximumf %8, %9 : vector<1x16x128xf32>
    %c0_6 = arith.constant 0 : index
    %c0_7 = arith.constant 0 : index
    %c0_8 = arith.constant 0 : index
    %11 = vector.load %arg4[%c0_6, %c0_7, %c0_8] : memref<1x16x128xf32, #tpu.memory_space<vmem>>, vector<1x16x128xf32>
    tpu.vector_store %arg4[%c0_6, %c0_7, %c0_8], %10 {strides = array<i32>} : memref<1x16x128xf32, #tpu.memory_space<vmem>>, vector<1x16x128xf32>,
    return
  }
  func.func @transform_0(%arg0: i32) -> (i32, i32, i32) {
    %c0_i32 = arith.constant 0 : i32
    %c0_i32_0 = arith.constant 0 : i32
    %c0_i32_1 = arith.constant 0 : i32
    return %arg0, %c0_i32, %c0_i32_0 : i32, i32, i32
  }
  func.func @transform_1(%arg0: i32) -> (i32, i32) {
    %c0_i32 = arith.constant 0 : i32
    %c0_i32_0 = arith.constant 0 : i32
    %c0_i32_1 = arith.constant 0 : i32
    return %c0_i32, %c0_i32_0 : i32, i32
  }
  func.func @transform_2(%arg0: i32) -> (i32, i32) {
    %c0_i32 = arith.constant 0 : i32
    %c0_i32_0 = arith.constant 0 : i32
    %c0_i32_1 = arith.constant 0 : i32
    return %c0_i32, %c0_i32_0 : i32, i32
  }
  func.func @transform_3(%arg0: i32) -> (i32, i32, i32) {
    %c0_i32 = arith.constant 0 : i32
    %c0_i32_0 = arith.constant 0 : i32
    %c0_i32_1 = arith.constant 0 : i32
    return %arg0, %c0_i32, %c0_i32_0 : i32, i32, i32
  }
}

</mosaic_0001>

<bundles_post_ra>
// kernel: conv_block_forward.5
= control target key start
LH: loop header
LB: loop body
LE: loop exit
PB: predicated region body
PF: predicated region fallthrough
CT: control target
= control target key end

     0   :  { %s301_s12 = smov 0   ;;  %s318_s0 = inlined_call_operand.vmem [shape: f32[2,16,128], index: 0, kind: input, shape index: {}]   ;;  %s319_s1 = inlined_call_operand.vmem [shape: f32[1,128], index: 1, kind: input, shape index: {}]   ;;  %s320_s2 = inlined_call_operand.vmem [shape: f32[1,128], index: 2, kind: input, shape index: {}]   ;;  %s321_s3 = inlined_call_operand.vmem [shape: f32[2,16,128], index: 3, kind: output, shape index: {}]  }
   0x1 LB: > { %s250_s13 = sadd.s32 4294967295, %s279_s12   ;;  %p254_p0 = scmp.ge.s32.totalorder %s279_s12, 1  ;;  %s279_s12 = sphi %s301_s12, %s13_s12  }
   0x2   : > { %p137_p1 = scmp.lt.s32.totalorder %s279_s12, 3 }
   0x4   : > { %p138_p2 = pnand %p254_p0, %p137_p1 }
   0x5   : > { %p161_p3 = scmp.lt.s32.totalorder (!%p138_p2), %s250_s13, 1  ;;  %v259_v0 = vld [vmem:[%s319_s1] ss:$0 sm:$0xff] (!%p138_p2) }
   0x6   : > { %141 = sbr.rel (%p138_p2) target bundleno = 24 (0x18), region = 32  ;;  %v260_v3 = vld [vmem:[%s320_s2] ss:$0 sm:$0xff] (!%p138_p2) }
   0xd   : > { %s323_s13 = smov (!%p161_p3, %s250_s13), 1 }
   0xe   : > { %s263_s14 = sshll.u32 %s323_s13, 4 }
   0xf   : > { %s165_s19 = scalar_lea.vmem %s318_s0, %s263_s14  ;;  %s170_s24 = scalar_lea.vmem %s321_s3, %s263_s14 }
  0x10   : > { %v171_v1 = vld [vmem:[%s165_s19] sm:$0xff]  ;;  %v172_v2 = vld [vmem:[%s165_s19 + $0x8] sm:$0xff] }
  0x11   : > { %v180_v4 = vmul.f32 %v259_v0, %v171_v1  ;;  %v181_v5 = vmul.f32 %v259_v0, %v172_v2 }
  0x13   : > { %v189_v6 = vadd.f32 %v260_v3, %v180_v4  ;;  %v190_v7 = vadd.f32 %v260_v3, %v181_v5 }
  0x15   : > { %v191_v8 = vmax.f32 %v189_v6, 0.0  ;;  %v192_v9 = vmax.f32 %v190_v7, 0.0 }
  0x17   : > { %193 = vst [vmem:[%s170_s24] sm:$0xff] %v191_v8  ;;  %194 = vst [vmem:[%s170_s24 + $0x8] sm:$0xff] %v192_v9 }
  0x18 PF: > { %s13_s12 = sadd.s32 1, %s279_s12  }
  0x19   : > { %p10_p4 = scmp.ge.s32.totalorder %s13_s12, 4  }
  0x1b   :  { %12 = sbr.rel (!%p10_p4) target bundleno = 1 (0x1), region = 62 }

// kernel: conv_block_forward.4
= control target key start
LH: loop header
LB: loop body
LE: loop exit
PB: predicated region body
PF: predicated region fallthrough
CT: control target
= control target key end

     0   :  { %s5284_s18 = smov 0   ;;  %s6927_s0 = inlined_call_operand.vmem [shape: bf16[2,256,8], index: 0, kind: input, shape index: {}]   ;;  %s6928_s1 = inlined_call_operand.vmem [shape: f32[1,8], index: 1, kind: input, shape index: {}]   ;;  %s6929_s2 = inlined_call_operand.vmem [shape: f32[1,8], index: 2, kind: input, shape index: {}]   ;;  %s6930_s3 = inlined_call_operand.vmem [shape: bf16[72,8], index: 3, kind: input, shape index: {}]   ;;  %s6931_s4 = inlined_call_operand.vmem [shape: f32[2,256,8], index: 4, kind: output, shape index: {0}]   ;;  %s6932_s5 = inlined_call_operand.vmem [shape: f32[2,2,8], index: 5, kind: output, shape index: {1}]  }
   0x1 LB: > { %s4714_s19 = sadd.s32 4294967295, %s5243_s18   ;;  %p4718_p0 = scmp.ge.s32.totalorder %s5243_s18, 1  ;;  %s5243_s18 = sphi %s5284_s18, %s16_s18  }
   0x2   : > { %p190_p1 = scmp.lt.s32.totalorder %s5243_s18, 3 }
   0x4   : > { %p191_p2 = pnand %p4718_p0, %p190_p1 }
   0x5   : > { %vm427_vm0 = vcmask (!%p191_p2), 60416   ;;  %vm6933_vm1 = vcmask (!%p191_p2), 57344   ;;  %vm438_vm2 = vsmask.f32 (!%p191_p2), 256  ;;  %v5245_v0 = vmov (!%p191_p2), 0   ;;  %p222_p3 = scmp.lt.s32.totalorder (!%p191_p2), %s4714_s19, 1 }
   0x6   : > { %194 = sbr.rel (%p191_p2) target bundleno = 795 (0x31b), region = 36  ;;  %428 = vst.msk [vmem:[#allocation2] sm:$0xf] (!%p191_p2), %vm427_vm0, %v5245_v0  ;;  %429 = vst.msk [vmem:[#allocation2 + $0x4] sm:$0xf] (!%p191_p2), %vm427_vm0, %v5245_v0  ;;  %vm1843_vm5 = vcmask (!%p191_p2), 1042432  }
   0x7   : > { %431 = vst.msk [vmem:[#allocation2 + $0x8] sm:$0x1] (!%p191_p2), %vm6933_vm1, %v5245_v0  ;;  %vm5297_vm3 = vmand (!%p191_p2), %vm6933_vm1, %vm438_vm2  ;;  %vm488_vm4 = vsmask.f32 (!%p191_p2), 7938  ;;  %vm1844_vm6 = vcmask (!%p191_p2), 1046532   ;;  %s5246_s28 = smov (!%p191_p2), 16  }
   0x8   : > { %433 = vst.msk [vmem:[#allocation2 + $0xcc] sm:$0xf] (!%p191_p2), %vm427_vm0, %v5245_v0  ;;  %434 = vst.msk [vmem:[#allocation2 + $0xd0] sm:$0xf] (!%p191_p2), %vm427_vm0, %v5245_v0  ;;  %v443_v2 = vld [vmem:[#allocation2 + $0x18] sm:$0x1] (!%p191_p2) }
   0x9   : > { %435 = vst.msk [vmem:[#allocation2 + $0xd4] sm:$0x1] (!%p191_p2), %vm6933_vm1, %v5245_v0  ;;  %vm5306_vm7 = vmand (!%p191_p2), %vm6933_vm1, %vm488_vm4  ;;  %v444_v4 = vsel (!%p191_p2), %vm5297_vm3, 0, %v443_v2  ;;  %v440_v5 = vld [vmem:[#allocation2 + $0xc] sm:$0x1] (!%p191_p2)  ;;  %s5247_s29 = smov (!%p191_p2), 8  }
   0xa   : > { %v446_v6 = vld [vmem:[#allocation2 + $0x24] sm:$0x1] (!%p191_p2)  ;;  %445 = vst [vmem:[#allocation2 + $0x18] sm:$0x1] (!%p191_p2), %v444_v4  ;;  %v441_v7 = vsel (!%p191_p2), %vm5297_vm3, 0, %v440_v5  ;;  %vm5323_vm9 = vmor (!%p191_p2), %vm1843_vm5, %vm1844_vm6  ;;  %s5248_s30 = smov (!%p191_p2), 24  }
   0xb   : > { %v447_v8 = vsel (!%p191_p2), %vm5297_vm3, 0, %v446_v6  ;;  %v449_v9 = vld [vmem:[#allocation2 + $0x30] sm:$0x1] (!%p191_p2)  ;;  %vm1247_vm8 = vsmask.f32 (!%p191_p2), 3328  ;;  %vm5378_vm13 = vmand (!%p191_p2), %vm427_vm0, %vm488_vm4  ;;  %s5249_s6 = smov (!%p191_p2), 48  }
   0xc   : > { %442 = vst [vmem:[#allocation2 + $0xc] sm:$0x1] (!%p191_p2), %v441_v7  ;;  %448 = vst [vmem:[#allocation2 + $0x24] sm:$0x1] (!%p191_p2), %v447_v8  ;;  %v450_v10 = vsel (!%p191_p2), %vm5297_vm3, 0, %v449_v9  ;;  %s5250_s7 = smov (!%p191_p2), 40  }
   0xd   : > { %s7077_s19 = smov (!%p222_p3, %s4714_s19), 1  ;;  %v490_v11 = vld [vmem:[#allocation2 + $0x14] sm:$0x1]  ;;  %vm1248_vm10 = vsmask.f32 7440  ;;  %s5251_s8 = smov 64  }
   0xe   : > { %s4973_s20 = sshll.u32 %s7077_s19, 7  ;;  %v5335_v13 = vld [vmem:[%s6928_s1] ss:$0 sm:$0xff]  ;;  %451 = vst [vmem:[#allocation2 + $0x30] sm:$0x1] %v450_v10  ;;  %v491_v14 = vsel %vm5306_vm7, 0, %v490_v11  ;;  %vm5356_vm12 = vmor %vm1247_vm8, %vm1248_vm10 }
   0xf   : > { %s5330_s23 = scalar_lea.vmem %s6927_s0, %s4973_s20  ;;  %v1747_v15 = vld [vmem:[#allocation2] sm:$0xe]  ;;  %v1748_v16 = vld [vmem:[#allocation2 + $0x4] sm:$0xf]  ;;  %v1749_v17 = vld [vmem:[#allocation2 + $0x8] sm:$0x1] }
  0x10   : > { %492 = vst [vmem:[#allocation2 + $0x14] sm:$0x1] %v491_v14  ;;  %v4790_v18 = vrot.slane %v1747_v15, 9  ;;  %v1848_v19 = vrot.slane %v1748_v16, 5  ;;  %v1851_v20 = vrot.slane %v1749_v17, 5  ;;  %v5071_v22 = vld [vmem:[%s5330_s23 + $0x8] sm:$0xff]  }
  0x11   : > { %v1199_v21 = vld [vmem:[#allocation2] sm:$0xf]  ;;  %v1200_v23 = vld [vmem:[#allocation2 + $0x4] sm:$0xf]  ;;  %v1201_v24 = vld [vmem:[#allocation2 + $0x8] sm:$0x1]  ;;  %v5013_v27 = vunpack.c.l.bf16 %v5071_v22  ;;  %v5014_v28 = vunpack.c.h.bf16 %v5071_v22 }
  0x12   : > { %v1251_v25 = vshrl.u32 %v1199_v21, 16  ;;  %v1254_v26 = vshll.u32 %v1199_v21, 16  ;;  %v1849_v29 = vsel %vm5323_vm9, %v4790_v18, %v1848_v19  ;;  %v1850_v30 = vrot.slane %v1848_v19, 4  ;;  %v5345_v33 = vld [vmem:[%s6929_s2] ss:$0 sm:$0xff]  ;;  %v5072_v43 = vld [vmem:[%s5330_s23 + $0x10] sm:$0xff]  }
  0x13   : > { %v1260_v31 = vshll.u32 %v1200_v23, 16  ;;  %v1264_v32 = vshrl.u32 %v1200_v23, 16  ;;  %v1270_v36 = vshll.u32 %v1201_v24, 16  ;;  %v310_v37 = vmul.f32 %v5013_v27, %v5335_v13  ;;  %v5008_v38 = vld [vmem:[%s5330_s23] sm:$0xff]   ;;  %v5073_v2 = vld [vmem:[%s5330_s23 + $0x18] sm:$0xff]   ;;  %s5252_s9 = smov 32  }
  0x14   : > { %v1253_v34 = vrot.slane %v1251_v25, 4  ;;  %v1256_v35 = vrot.slane %v1254_v26, 5  ;;  %v1852_v39 = vsel %vm5323_vm9, %v1850_v30, %v1851_v20  ;;  %v311_v42 = vmul.f32 %v5014_v28, %v5335_v13  ;;  %v949_v16 = vld [vmem:[#allocation2 + $0x18] sm:$0xf]  ;;  %s5253_s10 = smov 56  }
  0x15   : > { %v1262_v40 = vrot.slane %v1260_v31, 5  ;;  %v1266_v41 = vrot.slane %v1264_v32, 4  ;;  %vm618_vm11 = vsmask.f32 4368  ;;  %v4806_v44 = vcombine.low %v1849_v29, %v1852_v39 }
  0x16   : > { %v1257_v45 = vor.u32 %v1256_v35, %v1253_v34  ;;  %v1272_v46 = vrot.slane %v1270_v36, 5  ;;  %v349_v47 = vadd.f32 %v5345_v33, %v310_v37  ;;  %v350_v50 = vadd.f32 %v5345_v33, %v311_v42  ;;  %vm5386_vm14 = vmor %vm438_vm2, %vm618_vm11 }
  0x17   : > { %v1267_v49 = vor.u32 %v1266_v41, %v1262_v40  ;;  %v5009_v51 = vunpack.c.l.bf16 %v5008_v38  ;;  %v5010_v52 = vunpack.c.h.bf16 %v5008_v38  ;;  %2006 = vrot.lane.b32.xlu1 %v4806_v44, %s5246_s28  ;;  %v5017_v55 = vunpack.c.l.bf16 %v5072_v43 }
  0x18   : > { %v1258_v53 = vrot.slane %v1257_v45, 4  ;;  %v381_v54 = vmax.f32 %v349_v47, 0.0  ;;  %v5018_v56 = vunpack.c.h.bf16 %v5072_v43  ;;  %v382_v58 = vmax.f32 %v350_v50, 0.0  ;;  %v942_v47 = vld [vmem:[#allocation2 + $0xc] sm:$0xf] }
  0x19   : > { %v1268_v57 = vrot.slane %v1267_v49, 4  ;;  %v308_v59 = vmul.f32 %v5009_v51, %v5335_v13  ;;  %v309_v60 = vmul.f32 %v5010_v52, %v5335_v13  ;;  %v312_v63 = vmul.f32 %v5017_v55, %v5335_v13 }
  0x1a   : > { %v1263_v61 = vsel %vm5356_vm12, %v1258_v53, %v1262_v40  ;;  %v4977_v62 = vpack.c.bf16 %v381_v54, %v381_v54  ;;  %v313_v0 = vmul.f32 %v5018_v56, %v5335_v13  ;;  %v4978_v5 = vpack.c.bf16 %v382_v58, %v382_v58  ;;  %v493_v56 = vld [vmem:[#allocation2 + $0x20] sm:$0x1] }
  0x1b   : > { %v1273_v4 = vsel %vm5356_vm12, %v1268_v57, %v1272_v46  ;;  %v347_v6 = vadd.f32 %v5345_v33, %v308_v59  ;;  %v348_v7 = vadd.f32 %v5345_v33, %v309_v60  ;;  %v351_v11 = vadd.f32 %v5345_v33, %v312_v63  ;;  %v956_v60 = vld [vmem:[#allocation2 + $0x24] sm:$0xf] }
  0x1c   : > { %v4774_v8 = vcombine.low %v1263_v61, %v1273_v4  ;;  %v638_v9 = vshrl.u32 %v4977_v62, 16  ;;  %v641_v10 = vshll.u32 %v4977_v62, 16  ;;  %v646_v14 = vshrl.u32 %v4978_v5, 16  ;;  %v946_v62 = vld [vmem:[#allocation2 + $0x14] sm:$0x1] }
  0x1d   : > { %v649_v15 = vshll.u32 %v4978_v5, 16  ;;  %v379_v17 = vmax.f32 %v347_v6, 0.0  ;;  %v380_v18 = vmax.f32 %v348_v7, 0.0  ;;  %v352_v20 = vadd.f32 %v5345_v33, %v313_v0  ;;  %v5074_v5 = vld [vmem:[%s5330_s23 + $0x20] sm:$0xff]  }
  0x1e   : > { %1682 = vrot.lane.b32.xlu0 %v4774_v8, %s5247_s29  ;;  %v640_v19 = vrot.slane %v638_v9, 7  ;;  %v383_v21 = vmax.f32 %v351_v11, 0.0  ;;  %v5021_v22 = vunpack.c.l.bf16 %v5073_v2  ;;  %v5382_v24 = vrot.slane %v646_v14, 7 }
  0x1f   : > { %v4975_v25 = vpack.c.bf16 %v379_v17, %v379_v17  ;;  %v4976_v26 = vpack.c.bf16 %v380_v18, %v380_v18  ;;  %v5022_v27 = vunpack.c.h.bf16 %v5073_v2  ;;  %v384_v31 = vmax.f32 %v352_v20, 0.0  ;;  %v496_v17 = vld [vmem:[#allocation2 + $0x2c] sm:$0x1]  ;;  %v499_v18 = vld [vmem:[#allocation2 + $0x38] sm:$0x1] }
  0x20   : > { %v643_v29 = vor.u32 %v641_v10, %v640_v19  ;;  %v644_v30 = vrot.slane %v640_v19, 4  ;;  %v4979_v32 = vpack.c.bf16 %v383_v21, %v383_v21  ;;  %v651_v34 = vor.u32 %v649_v15, %v5382_v24  ;;  %v5075_v10 = vld [vmem:[%s5330_s23 + $0x28] sm:$0xff]  }
  0x21   : > { %v653_v35 = vrot.slane %v5382_v24, 4  ;;  %v621_v36 = vshrl.u32 %v4975_v25, 16  ;;  %v624_v37 = vshll.u32 %v4975_v25, 16  ;;  %v629_v39 = vshrl.u32 %v4976_v26, 16 }
  0x22   : > { %v950_v38 = vsel %vm5378_vm13, %v643_v29, %v949_v16  ;;  %v632_v40 = vshll.u32 %v4976_v26, 16  ;;  %v4980_v41 = vpack.c.bf16 %v384_v31, %v384_v31  ;;  %v652_v42 = vsel %vm5386_vm14, %v644_v30, %v651_v34 }
  0x23   : > { %951 = vst [vmem:[#allocation2 + $0x18] sm:$0xf] %v950_v38  ;;  %v623_v43 = vrot.slane %v621_v36, 7  ;;  %v655_v44 = vshrl.u32 %v4979_v32, 16  ;;  %v658_v45 = vshll.u32 %v4979_v32, 16  ;;  %v631_v46 = vrot.slane %v629_v39, 7 }
  0x24   : > { %952 = vst.msk [vmem:[#allocation2 + $0x1c] sm:$0xf] %vm427_vm0, %v652_v42  ;;  %v663_v49 = vshrl.u32 %v4980_v41, 16  ;;  %v666_v50 = vshll.u32 %v4980_v41, 16  ;;  %v314_v51 = vmul.f32 %v5021_v22, %v5335_v13  ;;  %v315_v55 = vmul.f32 %v5022_v27, %v5335_v13  ;;  %v963_v41 = vld [vmem:[#allocation2 + $0x30] sm:$0xf] }
  0x25   : > { %v626_v52 = vor.u32 %v624_v37, %v623_v43  ;;  %v627_v53 = vrot.slane %v623_v43, 4  ;;  %v657_v54 = vrot.slane %v655_v44, 7  ;;  %v634_v57 = vor.u32 %v632_v40, %v631_v46 }
  0x26   : > { %v636_v58 = vrot.slane %v631_v46, 4  ;;  %v5399_v59 = vrot.slane %v663_v49, 7  ;;  %v353_v61 = vadd.f32 %v5345_v33, %v314_v51  ;;  %v354_v4 = vadd.f32 %v5345_v33, %v315_v55  ;;  %v5432_v51 = vld [vmem:[%s5330_s23 + $0x30] sm:$0xff]  }
  0x27   : > { %v943_v63 = vsel %vm5378_vm13, %v626_v52, %v942_v47  ;;  %v660_v0 = vor.u32 %v658_v45, %v657_v54  ;;  %v661_v2 = vrot.slane %v657_v54, 4  ;;  %v635_v6 = vsel %vm5386_vm14, %v627_v53, %v634_v57  ;;  %v5435_v52 = vld [vmem:[%s5330_s23 + $0x38] sm:$0xff]  }
  0x28   : > { %944 = vst [vmem:[#allocation2 + $0xc] sm:$0xf] %v943_v63  ;;  %v668_v7 = vor.u32 %v666_v50, %v5399_v59  ;;  %v670_v8 = vrot.slane %v5399_v59, 4  ;;  %v385_v9 = vmax.f32 %v353_v61, 0.0  ;;  %945 = vst.msk [vmem:[#allocation2 + $0x10] sm:$0xf] %vm427_vm0, %v635_v6  ;;  %v947_v15 = vsel %vm5297_vm3, %v636_v58, %v946_v62 }
  0x29   : > { %v957_v11 = vsel %vm5378_vm13, %v660_v0, %v956_v60  ;;  %v386_v14 = vmax.f32 %v354_v4, 0.0  ;;  %v494_v16 = vsel %vm5306_vm7, 0, %v493_v56  ;;  %948 = vst [vmem:[#allocation2 + $0x14] sm:$0x1] %v947_v15  ;;  %v5025_v22 = vunpack.c.l.bf16 %v5074_v5 }
  0x2a   : > { %v669_v19 = vsel %vm5386_vm14, %v661_v2, %v668_v7  ;;  %958 = vst [vmem:[#allocation2 + $0x24] sm:$0xf] %v957_v11  ;;  %v4981_v20 = vpack.c.bf16 %v385_v9, %v385_v9  ;;  %495 = vst [vmem:[#allocation2 + $0x20] sm:$0x1] %v494_v16  ;;  %v3837_v21 = vld [vmem:[#allocation2 + $0x18] sm:$0xe]  ;;  %v5026_v25 = vunpack.c.h.bf16 %v5074_v5  ;;  %v5029_v30 = vunpack.c.l.bf16 %v5075_v10 }
  0x2b   : > { %v5178_v26 = vld [vmem:[#allocation2 + $0x18] sm:$0xff]   ;;  %959 = vst.msk [vmem:[#allocation2 + $0x28] sm:$0xf] %vm427_vm0, %v669_v19  ;;  %v4982_v27 = vpack.c.bf16 %v386_v14, %v386_v14  ;;  %v4918_v29 = vrot.slane %v3837_v21, 9  ;;  %v5030_v31 = vunpack.c.h.bf16 %v5075_v10  ;;  %v497_v37 = vsel %vm5306_vm7, 0, %v496_v17 }
  0x2c   : > { %v672_v32 = vshrl.u32 %v4981_v20, 16  ;;  %v675_v34 = vshll.u32 %v4981_v20, 16  ;;  %v3838_v36 = vld [vmem:[#allocation2 + $0x1c] sm:$0xf]  ;;  %v316_v38 = vmul.f32 %v5025_v22, %v5335_v13  ;;  %2185 = vrot.lane.b32.xlu1 %v5178_v26, %s5248_s30  ;;  %v2796_v43 = vld [vmem:[#allocation2 + $0x18] sm:$0xe]  ;;  %v317_v49 = vmul.f32 %v5026_v25, %v5335_v13 }
  0x2d   : > { %v680_v39 = vshrl.u32 %v4982_v27, 16  ;;  %v683_v40 = vshll.u32 %v4982_v27, 16  ;;  %v3935_v42 = vrot.slane %v3838_v36, 5  ;;  %498 = vst [vmem:[#allocation2 + $0x2c] sm:$0x1] %v497_v37  ;;  %v500_v44 = vsel %vm5306_vm7, 0, %v499_v18 }
  0x2e   : > { %v674_v45 = vrot.slane %v672_v32, 7  ;;  %v2797_v46 = vld [vmem:[#allocation2 + $0x1c] sm:$0xf]  ;;  %v4855_v47 = vrot.slane %v2796_v43, 9  ;;  %501 = vst [vmem:[#allocation2 + $0x38] sm:$0x1] %v500_v44  ;;  %v5429_v50 = vadd.f32 %v5345_v33, %v316_v38  ;;  %v318_v57 = vmul.f32 %v5029_v30, %v5335_v13 }
  0x2f   : > { %v5437_v53 = vrot.slane %v680_v39, 7  ;;  %v2793_v54 = vld [vmem:[#allocation2 + $0xc] sm:$0xe]  ;;  %v5441_v55 = vsel %vm5323_vm9, %v4918_v29, %v3935_v42  ;;  %v5443_v56 = vrot.slane %v3935_v42, 4  ;;  %v5181_v60 = vld [vmem:[#allocation2 + $0x18] sm:$0xff]   ;;  %v5447_v0 = vadd.f32 %v5345_v33, %v317_v49 }
  0x30   : > { %v5179_v58 = vld [vmem:[#allocation2 + $0xc] sm:$0xff]   ;;  %v677_v61 = vor.u32 %v675_v34, %v674_v45  ;;  %v678_v62 = vrot.slane %v674_v45, 4  ;;  %v319_v2 = vmul.f32 %v5030_v31, %v5335_v13  ;;  %v4854_v6 = vrot.slane %v2793_v54, 9  ;;  %v5452_v7 = vld [vmem:[#allocation2 + $0x18] sm:$0xe] }
  0x31   : > { %v2794_v63 = vld [vmem:[#allocation2 + $0x10] sm:$0xf]  ;;  %v685_v4 = vor.u32 %v683_v40, %v5437_v53  ;;  %v687_v5 = vrot.slane %v5437_v53, 4  ;;  %v5455_v9 = vadd.f32 %v5345_v33, %v318_v57  ;;  %2183 = vrot.lane.b32.xlu0 %v5179_v58, %s5248_s30  ;;  %v5033_v16 = vunpack.c.l.bf16 %v5432_v51  ;;  %v2795_v18 = vld [vmem:[#allocation2 + $0x14] sm:$0x1] }
  0x32   : > { %v5180_v10 = vld [vmem:[#allocation2 + $0x24] sm:$0xff]   ;;  %v964_v11 = vsel %vm5378_vm13, %v677_v61, %v963_v41  ;;  %v2891_v14 = vrot.slane %v2794_v63, 5  ;;  %v5461_v15 = vadd.f32 %v5345_v33, %v319_v2  ;;  %v1750_v19 = vld [vmem:[#allocation2 + $0xc] sm:$0xe]  ;;  %v2898_v20 = vrot.slane %v2797_v46, 5 }
  0x33   : > { %v686_v17 = vsel %vm5386_vm14, %v678_v62, %v685_v4  ;;  %965 = vst [vmem:[#allocation2 + $0x30] sm:$0xf] %v964_v11  ;;  %v5034_v21 = vunpack.c.h.bf16 %v5432_v51  ;;  %v5037_v22 = vunpack.c.l.bf16 %v5435_v52  ;;  %3229 = vrot.lane.b32.xlu1 %v5180_v10, %s5249_s6  ;;  %v2894_v27 = vrot.slane %v2795_v18, 5  ;;  %v1751_v29 = vld [vmem:[#allocation2 + $0x10] sm:$0xf]  ;;  %v5183_v32 = vld [vmem:[#allocation2 + $0x24] sm:$0xff]  }
  0x34   : > { %966 = vst.msk [vmem:[#allocation2 + $0x34] sm:$0xf] %vm427_vm0, %v686_v17  ;;  %v2892_v25 = vsel %vm5323_vm9, %v4854_v6, %v2891_v14  ;;  %v2893_v26 = vrot.slane %v2891_v14, 4  ;;  %v1752_v30 = vld [vmem:[#allocation2 + $0x14] sm:$0x1]  ;;  %v320_v31 = vmul.f32 %v5033_v16, %v5335_v13  ;;  %v4791_v34 = vrot.slane %v1750_v19, 9 }
  0x35   : > { %v1855_v36 = vrot.slane %v1751_v29, 5  ;;  %v1858_v37 = vrot.slane %v1752_v30, 5  ;;  %v953_v38 = vld [vmem:[#allocation2 + $0x20] sm:$0x1]  ;;  %v5475_v39 = vsel %vm5323_vm9, %v4855_v47, %v2898_v20  ;;  %3227 = vrot.lane.b32.xlu0 %v5181_v60, %s5249_s6  ;;  %v5484_v42 = vrot.slane %v2898_v20, 4 }
  0x36   : > { %v2895_v40 = vsel %vm5323_vm9, %v2893_v26, %v2894_v27  ;;  %v954_v41 = vsel %vm5297_vm3, %v653_v35, %v953_v38  ;;  %v960_v43 = vld [vmem:[#allocation2 + $0x2c] sm:$0x1]  ;;  %v3840_v44 = vld [vmem:[#allocation2 + $0x24] sm:$0xe]  ;;  %v4792_v45 = vrot.slane %v5452_v7, 9  ;;  %v387_v61 = vmax.f32 %v5429_v50, 0.0 }
  0x37   : > { %v4870_v46 = vcombine.low %v2892_v25, %v2895_v40  ;;  %v1856_v47 = vsel %vm5323_vm9, %v4791_v34, %v1855_v36  ;;  %v1857_v49 = vrot.slane %v1855_v36, 4  ;;  %955 = vst [vmem:[#allocation2 + $0x20] sm:$0x1] %v954_v41  ;;  %v961_v24 = vsel %vm5297_vm3, %v670_v8, %v960_v43  ;;  %v3841_v51 = vld [vmem:[#allocation2 + $0x28] sm:$0xf] }
  0x38   : > { %v1756_v54 = vld [vmem:[#allocation2 + $0x24] sm:$0xe]  ;;  %962 = vst [vmem:[#allocation2 + $0x2c] sm:$0x1] %v961_v24  ;;  %v4919_v35 = vrot.slane %v3840_v44, 9  ;;  %v3942_v57 = vrot.slane %v3841_v51, 5  ;;  %v321_v6 = vmul.f32 %v5034_v21, %v5335_v13  ;;  %v5518_v40 = vadd.f32 %v5345_v33, %v320_v31 }
  0x39   : > { %v1757_v58 = vld [vmem:[#allocation2 + $0x28] sm:$0xf]  ;;  %v4793_v60 = vrot.slane %v1756_v54, 9  ;;  %v1859_v62 = vsel %vm5323_vm9, %v1857_v49, %v1858_v37  ;;  %v1754_v2 = vld [vmem:[#allocation2 + $0x1c] sm:$0xf]  ;;  %v388_v59 = vmax.f32 %v5447_v0, 0.0  ;;  %2187 = vrot.lane.b32.xlu0 %v5183_v32, %s5248_s30  ;;  %v5513_v37 = vpack.c.bf16 %v387_v61, %v387_v61 }
  0x3a   : > { %v1869_v63 = vrot.slane %v1757_v58, 5  ;;  %v2251_v4 = vld [vmem:[#allocation2 + $0x18] sm:$0xf]  ;;  %v4807_v8 = vcombine.low %v1856_v47, %v1859_v62  ;;  %v5501_v7 = vsel %vm5323_vm9, %v4919_v35, %v3942_v57  ;;  %v3944_v10 = vrot.slane %v3942_v57, 4  ;;  %v2252_v50 = vld [vmem:[#allocation2 + $0x1c] sm:$0xf] }
  0x3b   : > { %v1862_v11 = vrot.slane %v1754_v2, 5  ;;  %v5182_v14 = vld [vmem:[#allocation2 + $0x30] sm:$0xff]   ;;  %v2321_v18 = vshrl.u32 %v2251_v4, 16  ;;  %v2324_v0 = vshll.u32 %v2251_v4, 16  ;;  %v2330_v20 = vshll.u32 %v2252_v50, 16 }
  0x3c   : > { %v5505_v16 = vsel %vm5323_vm9, %v4793_v60, %v1869_v63  ;;  %v1871_v17 = vrot.slane %v1869_v63, 4  ;;  %v2334_v21 = vshrl.u32 %v2252_v50, 16  ;;  %v3295_v25 = vld [vmem:[#allocation2 + $0x24] sm:$0xf]  ;;  %2189 = vrot.lane.b32.xlu1 %v5182_v14, %s5248_s30  ;;  %v5515_v38 = vpack.c.bf16 %v388_v59, %v388_v59  ;;  %v3296_v4 = vld [vmem:[#allocation2 + $0x28] sm:$0xf] }
  0x3d   : > { %v5509_v13 = vsel %vm5323_vm9, %v4792_v45, %v1862_v11  ;;  %v1864_v19 = vrot.slane %v1862_v11, 4  ;;  %v2323_v26 = vrot.slane %v2321_v18, 4  ;;  %v2326_v27 = vrot.slane %v2324_v0, 5  ;;  %3049 = vrot.lane.b32.xlu0 %v4870_v46, %s5250_s7  ;;  %v1203_v18 = vld [vmem:[#allocation2 + $0x10] sm:$0xf] }
  0x3e   : > { %v3365_v29 = vshrl.u32 %v3295_v25, 16  ;;  %v3368_v30 = vshll.u32 %v3295_v25, 16  ;;  %v3839_v32 = vld [vmem:[#allocation2 + $0x20] sm:$0x1]  ;;  %v5521_v41 = vadd.f32 %v5345_v33, %v321_v6  ;;  %v5038_v46 = vunpack.c.h.bf16 %v5435_v52 }
  0x3f   : > { %v2798_v34 = vld [vmem:[#allocation2 + $0x20] sm:$0x1]  ;;  %v3938_v43 = vrot.slane %v3839_v32, 5  ;;  %v3842_v45 = vld [vmem:[#allocation2 + $0x2c] sm:$0x1]  ;;  %v2327_v49 = vor.u32 %v2326_v27, %v2323_v26  ;;  %v2332_v35 = vrot.slane %v2330_v20, 5 }
  0x40   : > { %v1755_v36 = vld [vmem:[#allocation2 + $0x20] sm:$0x1]  ;;  %v2901_v44 = vrot.slane %v2798_v34, 5  ;;  %v1758_v47 = vld [vmem:[#allocation2 + $0x2c] sm:$0x1]  ;;  %v3945_v24 = vrot.slane %v3842_v45, 5  ;;  %2008 = vrot.lane.b32.xlu1 %v4807_v8, %s5246_s28 }
  0x41   : > { %v1872_v51 = vrot.slane %v1758_v47, 5  ;;  %v1865_v54 = vrot.slane %v1755_v36, 5  ;;  %v3939_v31 = vsel %vm5323_vm9, %v5443_v56, %v3938_v43  ;;  %v2253_v57 = vld [vmem:[#allocation2 + $0x20] sm:$0x1]  ;;  %v2328_v58 = vrot.slane %v2327_v49, 4 }
  0x42   : > { %v2902_v33 = vsel %vm5323_vm9, %v5484_v42, %v2901_v44  ;;  %v2336_v60 = vrot.slane %v2334_v21, 4  ;;  %v4934_v61 = vcombine.low %v5441_v55, %v3939_v31  ;;  %v3946_v63 = vsel %vm5323_vm9, %v3944_v10, %v3945_v24  ;;  %v3297_v59 = vld [vmem:[#allocation2 + $0x2c] sm:$0x1]  ;;  %v1204_v20 = vld [vmem:[#allocation2 + $0x14] sm:$0x1] }
  0x43   : > { %v4871_v62 = vcombine.low %v5475_v39, %v2902_v33  ;;  %v1873_v2 = vsel %vm5323_vm9, %v1871_v17, %v1872_v51  ;;  %v4935_v56 = vcombine.low %v5501_v7, %v3946_v63  ;;  %v1866_v42 = vsel %vm5323_vm9, %v1864_v19, %v1865_v54  ;;  %v1202_v8 = vld [vmem:[#allocation2 + $0xc] sm:$0xf]  ;;  %v1206_v24 = vld [vmem:[#allocation2 + $0x1c] sm:$0xf] }
  0x44   : > { %v4809_v6 = vcombine.low %v5505_v16, %v1873_v2  ;;  %v2333_v55 = vsel %vm5356_vm12, %v2328_v58, %v2332_v35  ;;  %4093 = vrot.lane.b32.xlu0 %v4934_v61, %s5251_s8  ;;  %v4808_v39 = vcombine.low %v5509_v13, %v1866_v42  ;;  %v2337_v10 = vor.u32 %v2336_v60, %v2332_v35  ;;  %v1205_v13 = vld [vmem:[#allocation2 + $0x18] sm:$0xf]  ;;  %v1207_v60 = vld [vmem:[#allocation2 + $0x20] sm:$0x1] }
  0x45   : > { %v2340_v11 = vshll.u32 %v2253_v57, 16  ;;  %v3367_v50 = vrot.slane %v3365_v29, 4  ;;  %3051 = vrot.lane.b32.xlu1 %v4871_v62, %s5250_s7  ;;  %v3370_v7 = vrot.slane %v3368_v30, 5  ;;  %v3374_v14 = vshll.u32 %v3296_v4, 16 }
  0x46   : > { %v3378_v16 = vshrl.u32 %v3296_v4, 16  ;;  %v3384_v17 = vshll.u32 %v3297_v59, 16  ;;  %v2338_v0 = vrot.slane %v2337_v10, 4  ;;  %v1275_v21 = vshrl.u32 %v1202_v8, 16  ;;  %v2248_v59 = vld [vmem:[#allocation2 + $0xc] sm:$0xf] }
  0x47   : > { %v2342_v19 = vrot.slane %v2340_v11, 5  ;;  %v1278_v25 = vshll.u32 %v1202_v8, 16  ;;  %v3371_v26 = vor.u32 %v3370_v7, %v3367_v50  ;;  %v3376_v27 = vrot.slane %v3374_v14, 5  ;;  %v2249_v8 = vld [vmem:[#allocation2 + $0x10] sm:$0xf] }
  0x48   : > { %v3380_v32 = vrot.slane %v3378_v16, 4  ;;  %v3386_v34 = vrot.slane %v3384_v17, 5  ;;  %4095 = vrot.lane.b32.xlu0 %v4935_v56, %s5251_s8  ;;  %v1277_v30 = vrot.slane %v1275_v21, 4  ;;  %v1284_v43 = vshll.u32 %v1203_v18, 16  ;;  %v2250_v17 = vld [vmem:[#allocation2 + $0x14] sm:$0x1] }
  0x49   : > { %v2343_v29 = vsel %vm5356_vm12, %v2338_v0, %v2342_v19  ;;  %v1280_v36 = vrot.slane %v1278_v25, 5  ;;  %2012 = vrot.lane.b32.xlu1 %v4809_v6, %s5246_s28  ;;  %v3372_v45 = vrot.slane %v3371_v26, 4  ;;  %v1288_v49 = vshrl.u32 %v1203_v18, 16  ;;  %v1208_v25 = vld [vmem:[#allocation2 + $0x24] sm:$0xf] }
  0x4a   : > { %v4839_v44 = vcombine.low %v2333_v55, %v2343_v29  ;;  %v3381_v47 = vor.u32 %v3380_v32, %v3376_v27  ;;  %v1286_v54 = vrot.slane %v1284_v43, 5  ;;  %v1294_v35 = vshll.u32 %v1204_v20, 16 }
  0x4b   : > { %v1281_v51 = vor.u32 %v1280_v36, %v1277_v30  ;;  %v1299_v31 = vshrl.u32 %v1205_v13, 16  ;;  %v3377_v33 = vsel %vm5356_vm12, %v3372_v45, %v3376_v27  ;;  %v1290_v58 = vrot.slane %v1288_v49, 4 }
  0x4c   : > { %v3382_v57 = vrot.slane %v3381_v47, 4  ;;  %v1302_v61 = vshll.u32 %v1205_v13, 16  ;;  %2010 = vrot.lane.b32.xlu0 %v4808_v39, %s5246_s28  ;;  %v1296_v63 = vrot.slane %v1294_v35, 5  ;;  %v1308_v4 = vshll.u32 %v1206_v24, 16  ;;  %v1209_v13 = vld [vmem:[#allocation2 + $0x28] sm:$0xf] }
  0x4d   : > { %v1282_v62 = vrot.slane %v1281_v51, 4  ;;  %v1301_v2 = vrot.slane %v1299_v31, 4  ;;  %2730 = vrot.lane.b32.xlu1 %v4839_v44, %s5252_s9  ;;  %v1291_v6 = vor.u32 %v1290_v58, %v1286_v54  ;;  %v1312_v55 = vshrl.u32 %v1206_v24, 16 }
  0x4e   : > { %v3387_v56 = vsel %vm5356_vm12, %v3382_v57, %v3386_v34  ;;  %v1304_v42 = vrot.slane %v1302_v61, 5  ;;  %v1310_v39 = vrot.slane %v1308_v4, 5  ;;  %v1318_v50 = vshll.u32 %v1207_v60, 16 }
  0x4f   : > { %v4903_v10 = vcombine.low %v3377_v33, %v3387_v56  ;;  %v1287_v11 = vsel %vm5356_vm12, %v1282_v62, %v1286_v54  ;;  %v1292_v7 = vrot.slane %v1291_v6, 4  ;;  %v1314_v16 = vrot.slane %v1312_v55, 4  ;;  %v1210_v54 = vld [vmem:[#allocation2 + $0x2c] sm:$0x1]  ;;  %v3292_v33 = vld [vmem:[#allocation2 + $0x18] sm:$0xf] }
  0x50   : > { %v1305_v14 = vor.u32 %v1304_v42, %v1301_v2  ;;  %v2297_v18 = vshrl.u32 %v2248_v59, 16  ;;  %v1320_v0 = vrot.slane %v1318_v50, 5  ;;  %v2300_v19 = vshll.u32 %v2248_v59, 16  ;;  %v3293_v42 = vld [vmem:[#allocation2 + $0x1c] sm:$0xf] }
  0x51   : > { %v2306_v20 = vshll.u32 %v2249_v8, 16  ;;  %v2310_v21 = vshrl.u32 %v2249_v8, 16  ;;  %3774 = vrot.lane.b32.xlu1 %v4903_v10, %s5253_s10  ;;  %v1297_v26 = vsel %vm5356_vm12, %v1292_v7, %v1296_v63  ;;  %v1315_v32 = vor.u32 %v1314_v16, %v1310_v39  ;;  %v2254_v7 = vld [vmem:[#allocation2 + $0x24] sm:$0xf] }
  0x52   : > { %v1306_v27 = vrot.slane %v1305_v14, 4  ;;  %v2299_v34 = vrot.slane %v2297_v18, 4  ;;  %v4775_v29 = vcombine.low %v1287_v11, %v1297_v26  ;;  %v2302_v30 = vrot.slane %v2300_v19, 5  ;;  %v2256_v26 = vld [vmem:[#allocation2 + $0x2c] sm:$0x1] }
  0x53   : > { %v2308_v36 = vrot.slane %v2306_v20, 5  ;;  %v2312_v43 = vrot.slane %v2310_v21, 4  ;;  %v1316_v45 = vrot.slane %v1315_v32, 4  ;;  %v2316_v47 = vshll.u32 %v2250_v17, 16 }
  0x54   : > { %v1311_v44 = vsel %vm5356_vm12, %v1306_v27, %v1310_v39  ;;  %v1323_v49 = vshrl.u32 %v1208_v25, 16  ;;  %1684 = vrot.lane.b32.xlu0 %v4775_v29, %s5247_s29  ;;  %v2303_v24 = vor.u32 %v2302_v30, %v2299_v34  ;;  %v1326_v35 = vshll.u32 %v1208_v25, 16  ;;  %v3294_v39 = vld [vmem:[#allocation2 + $0x20] sm:$0x1]  ;;  %v967_v29 = vld [vmem:[#allocation2 + $0x38] sm:$0x1] }
  0x55   : > { %v2313_v51 = vor.u32 %v2312_v43, %v2308_v36  ;;  %v1332_v31 = vshll.u32 %v1209_v13, 16  ;;  %v1321_v57 = vsel %vm5356_vm12, %v1316_v45, %v1320_v0  ;;  %v2318_v58 = vrot.slane %v2316_v47, 5  ;;  %v2255_v0 = vld [vmem:[#allocation2 + $0x28] sm:$0xf]  ;;  %v2257_v45 = vld [vmem:[#allocation2 + $0x30] sm:$0xf] }
  0x56   : > { %v1325_v60 = vrot.slane %v1323_v49, 4  ;;  %v1336_v61 = vshrl.u32 %v1209_v13, 16  ;;  %v4776_v62 = vcombine.low %v1311_v44, %v1321_v57  ;;  %v2304_v63 = vrot.slane %v2303_v24, 4 }
  0x57   : > { %v2314_v2 = vrot.slane %v2313_v51, 4  ;;  %v1328_v4 = vrot.slane %v1326_v35, 5  ;;  %v1334_v59 = vrot.slane %v1332_v31, 5  ;;  %v1342_v6 = vshll.u32 %v1210_v54, 16  ;;  %v2258_v54 = vld [vmem:[#allocation2 + $0x34] sm:$0xf] }
  0x58   : > { %v1338_v56 = vrot.slane %v1336_v61, 4  ;;  %v3341_v55 = vshrl.u32 %v3292_v33, 16  ;;  %1686 = vrot.lane.b32.xlu1 %v4776_v62, %s5247_s29  ;;  %v2309_v8 = vsel %vm5356_vm12, %v2304_v63, %v2308_v36  ;;  %v3344_v50 = vshll.u32 %v3292_v33, 16  ;;  %v2799_v63 = vld [vmem:[#allocation2 + $0x24] sm:$0xe] }
  0x59   : > { %v2319_v10 = vsel %vm5356_vm12, %v2314_v2, %v2318_v58  ;;  %v1329_v11 = vor.u32 %v1328_v4, %v1325_v60  ;;  %v1344_v17 = vrot.slane %v1342_v6, 5  ;;  %v3350_v21 = vshll.u32 %v3293_v42, 16  ;;  %v2800_v2 = vld [vmem:[#allocation2 + $0x28] sm:$0xf] }
  0x5a   : > { %v4838_v14 = vcombine.low %v2309_v8, %v2319_v10  ;;  %v1339_v16 = vor.u32 %v1338_v56, %v1334_v59  ;;  %v3343_v18 = vrot.slane %v3341_v55, 4  ;;  %v3346_v20 = vrot.slane %v3344_v50, 5 }
  0x5b   : > { %v1330_v19 = vrot.slane %v1329_v11, 4  ;;  %v3354_v25 = vshrl.u32 %v3293_v42, 16  ;;  %v3360_v32 = vshll.u32 %v3294_v39, 16  ;;  %v2345_v34 = vshrl.u32 %v2254_v7, 16  ;;  %v2801_v42 = vld [vmem:[#allocation2 + $0x2c] sm:$0x1] }
  0x5c   : > { %2728 = vrot.lane.b32.xlu0 %v4838_v14, %s5252_s9  ;;  %v1340_v27 = vrot.slane %v1339_v16, 4  ;;  %v2348_v13 = vshll.u32 %v2254_v7, 16  ;;  %v3347_v36 = vor.u32 %v3346_v20, %v3343_v18  ;;  %v3352_v43 = vrot.slane %v3350_v21, 5  ;;  %v2802_v7 = vld [vmem:[#allocation2 + $0x30] sm:$0xe] }
  0x5d   : > { %v1335_v30 = vsel %vm5356_vm12, %v1330_v19, %v1334_v59  ;;  %v3356_v44 = vrot.slane %v3354_v25, 4  ;;  %v3362_v49 = vrot.slane %v3360_v32, 5  ;;  %v2347_v24 = vrot.slane %v2345_v34, 4 }
  0x5e   : > { %v1345_v47 = vsel %vm5356_vm12, %v1340_v27, %v1344_v17  ;;  %v2350_v51 = vrot.slane %v2348_v13, 5  ;;  %v3348_v31 = vrot.slane %v3347_v36, 4  ;;  %v2354_v57 = vshll.u32 %v2255_v0, 16 }
  0x5f   : > { %v4777_v35 = vcombine.low %v1335_v30, %v1345_v47  ;;  %v3357_v33 = vor.u32 %v3356_v44, %v3352_v43  ;;  %v2358_v60 = vshrl.u32 %v2255_v0, 16  ;;  %v2364_v61 = vshll.u32 %v2256_v26, 16  ;;  %v2803_v0 = vld [vmem:[#allocation2 + $0x34] sm:$0xf]  ;;  %v452_v26 = vld [vmem:[#allocation2 + $0x3c] sm:$0x1] }
  0x60   : > { %v2351_v58 = vor.u32 %v2350_v51, %v2347_v24  ;;  %v968_v62 = vsel %vm5297_vm3, %v687_v5, %v967_v29  ;;  %v3353_v4 = vsel %vm5356_vm12, %v3348_v31, %v3352_v43  ;;  %v2356_v56 = vrot.slane %v2354_v57, 5  ;;  %v5597_v51 = vld [vmem:[%s6928_s1] ss:$0 sm:$0xff] }
  0x61   : > { %1688 = vrot.lane.b32.xlu1 %v4777_v35, %s5247_s29  ;;  %v3358_v59 = vrot.slane %v3357_v33, 4  ;;  %969 = vst [vmem:[#allocation2 + $0x38] sm:$0x1] %v968_v62  ;;  %v2369_v6 = vshrl.u32 %v2257_v45, 16  ;;  %v2360_v8 = vrot.slane %v2358_v60, 4  ;;  %v2366_v10 = vrot.slane %v2364_v61, 5 }
  0x62   : > { %v2352_v55 = vrot.slane %v2351_v58, 4  ;;  %v2372_v11 = vshll.u32 %v2257_v45, 16  ;;  %v2378_v39 = vshll.u32 %v2258_v54, 16  ;;  %v2382_v50 = vshrl.u32 %v2258_v54, 16  ;;  %v3298_v58 = vld [vmem:[#allocation2 + $0x30] sm:$0xf] }
  0x63   : > { %v3363_v53 = vsel %vm5356_vm12, %v3358_v59, %v3362_v49  ;;  %v2371_v5 = vrot.slane %v2369_v6, 4  ;;  %v2361_v17 = vor.u32 %v2360_v8, %v2356_v56  ;;  %v4856_v21 = vrot.slane %v2799_v63, 9 }
  0x64   : > { %v4902_v14 = vcombine.low %v3353_v4, %v3363_v53  ;;  %v2357_v16 = vsel %vm5356_vm12, %v2352_v55, %v2356_v56  ;;  %v2374_v18 = vrot.slane %v2372_v11, 5  ;;  %v2380_v19 = vrot.slane %v2378_v39, 5 }
  0x65   : > { %v2384_v20 = vrot.slane %v2382_v50, 4  ;;  %v2905_v25 = vrot.slane %v2800_v2, 5  ;;  %v2362_v27 = vrot.slane %v2361_v17, 4  ;;  %v2908_v34 = vrot.slane %v2801_v42, 5  ;;  %v3299_v2 = vld [vmem:[#allocation2 + $0x34] sm:$0xf] }
  0x66   : > { %3772 = vrot.lane.b32.xlu0 %v4902_v14, %s5253_s10  ;;  %v2375_v32 = vor.u32 %v2374_v18, %v2371_v5  ;;  %v4857_v13 = vrot.slane %v2802_v7, 9  ;;  %v2912_v43 = vrot.slane %v2803_v0, 5  ;;  %v453_v24 = vsel %vm5297_vm3, 0, %v452_v26  ;;  %v3843_v7 = vld [vmem:[#allocation2 + $0x30] sm:$0xe] }
  0x67   : > { %v2385_v29 = vor.u32 %v2384_v20, %v2380_v19  ;;  %v2906_v30 = vsel %vm5323_vm9, %v4856_v21, %v2905_v25  ;;  %v2907_v36 = vrot.slane %v2905_v25, 4  ;;  %v2367_v44 = vsel %vm5356_vm12, %v2362_v27, %v2366_v10  ;;  %454 = vst [vmem:[#allocation2 + $0x3c] sm:$0x1] %v453_v24  ;;  %v502_v10 = vld [vmem:[#allocation2 + $0x44] sm:$0x1]  ;;  %v5184_v0 = vld [vmem:[#allocation2 + $0x30] sm:$0xff]  }
  0x68   : > { %v2259_v45 = vld [vmem:[#allocation2 + $0x38] sm:$0x1]  ;;  %v2376_v47 = vrot.slane %v2375_v32, 4  ;;  %v5602_v54 = vmul.f32 %v5597_v51, %v5037_v22  ;;  %v4840_v35 = vcombine.low %v2357_v16, %v2367_v44  ;;  %v2913_v62 = vsel %vm5323_vm9, %v4857_v13, %v2912_v43  ;;  %v3844_v18 = vld [vmem:[#allocation2 + $0x34] sm:$0xf] }
  0x69   : > { %v2804_v49 = vld [vmem:[#allocation2 + $0x38] sm:$0x1]  ;;  %v2386_v31 = vrot.slane %v2385_v29, 4  ;;  %v2388_v33 = vshll.u32 %v2259_v45, 16  ;;  %v2909_v57 = vsel %vm5323_vm9, %v2907_v36, %v2908_v34  ;;  %v2914_v63 = vrot.slane %v2912_v43, 4 }
  0x6a   : > { %v2381_v60 = vsel %vm5356_vm12, %v2376_v47, %v2380_v19  ;;  %v4872_v61 = vcombine.low %v2906_v30, %v2909_v57  ;;  %2732 = vrot.lane.b32.xlu0 %v4840_v35, %s5252_s9  ;;  %v2915_v4 = vrot.slane %v2804_v49, 5  ;;  %v689_v59 = vshrl.u32 %v5513_v37, 16  ;;  %v3300_v39 = vld [vmem:[#allocation2 + $0x38] sm:$0x1]  ;;  %v1212_v45 = vld [vmem:[#allocation2 + $0x34] sm:$0xf] }
  0x6b   : > { %v2390_v22 = vrot.slane %v2388_v33, 5  ;;  %v692_v56 = vshll.u32 %v5513_v37, 16  ;;  %v697_v6 = vshrl.u32 %v5515_v38, 16  ;;  %v700_v42 = vshll.u32 %v5515_v38, 16  ;;  %v1211_v38 = vld [vmem:[#allocation2 + $0x30] sm:$0xf] }
  0x6c   : > { %v3389_v55 = vshrl.u32 %v3298_v58, 16  ;;  %v3392_v8 = vshll.u32 %v3298_v58, 16  ;;  %v2916_v53 = vsel %vm5323_vm9, %v2914_v63, %v2915_v4  ;;  %v691_v5 = vrot.slane %v689_v59, 7  ;;  %v3845_v26 = vld [vmem:[#allocation2 + $0x38] sm:$0x1] }
  0x6d   : > { %v2391_v11 = vsel %vm5356_vm12, %v2386_v31, %v2390_v22  ;;  %v3398_v50 = vshll.u32 %v3299_v2, 16  ;;  %v4873_v16 = vcombine.low %v2913_v62, %v2916_v53  ;;  %v5619_v37 = vrot.slane %v697_v6, 7  ;;  %v1213_v57 = vld [vmem:[#allocation2 + $0x38] sm:$0x1]  ;;  %v1759_v22 = vld [vmem:[#allocation2 + $0x30] sm:$0xe] }
  0x6e   : > { %v4841_v14 = vcombine.low %v2381_v60, %v2391_v11  ;;  %v3391_v17 = vrot.slane %v3389_v55, 4  ;;  %3053 = vrot.lane.b32.xlu0 %v4872_v61, %s5250_s7  ;;  %v694_v19 = vor.u32 %v692_v56, %v691_v5  ;;  %v695_v20 = vrot.slane %v691_v5, 4  ;;  %v970_v34 = vld [vmem:[#allocation2 + $0x3c] sm:$0xf]  ;;  %v1760_v4 = vld [vmem:[#allocation2 + $0x34] sm:$0xf] }
  0x6f   : > { %v3394_v21 = vrot.slane %v3392_v8, 5  ;;  %v3400_v25 = vrot.slane %v3398_v50, 5  ;;  %v702_v27 = vor.u32 %v700_v42, %v5619_v37  ;;  %v704_v32 = vrot.slane %v5619_v37, 4  ;;  %v5638_v55 = vld [vmem:[#allocation2 + $0x38] sm:$0x1] }
  0x70   : > { %2734 = vrot.lane.b32.xlu1 %v4841_v14, %s5252_s9  ;;  %v3402_v13 = vshrl.u32 %v3299_v2, 16  ;;  %v3408_v29 = vshll.u32 %v3300_v39, 16  ;;  %v971_v30 = vsel %vm5378_vm13, %v694_v19, %v970_v34  ;;  %v503_v43 = vsel %vm5306_vm7, 0, %v502_v10  ;;  %v5643_v14 = vld [vmem:[%s5330_s23 + $0x40] sm:$0xff]  }
  0x71   : > { %v3395_v36 = vor.u32 %v3394_v21, %v3391_v17  ;;  %v4920_v44 = vrot.slane %v3843_v7, 9  ;;  %v703_v47 = vsel %vm5386_vm14, %v695_v20, %v702_v27  ;;  %972 = vst [vmem:[#allocation2 + $0x3c] sm:$0xf] %v971_v30  ;;  %504 = vst [vmem:[#allocation2 + $0x44] sm:$0x1] %v503_v43  ;;  %v3949_v35 = vrot.slane %v3844_v18, 5 }
  0x72   : > { %v3404_v49 = vrot.slane %v3402_v13, 4  ;;  %v3410_v24 = vrot.slane %v3408_v29, 5  ;;  %3231 = vrot.lane.b32.xlu0 %v5184_v0, %s5249_s6  ;;  %973 = vst.msk [vmem:[#allocation2 + $0x40] sm:$0xf] %vm427_vm0, %v703_v47  ;;  %v3952_v33 = vrot.slane %v3845_v26, 5  ;;  %v1347_v58 = vshrl.u32 %v1211_v38, 16 }
  0x73   : > { %v3396_v31 = vrot.slane %v3395_v36, 4  ;;  %v1350_v60 = vshll.u32 %v1211_v38, 16  ;;  %v3950_v62 = vsel %vm5323_vm9, %v4920_v44, %v3949_v35  ;;  %v3951_v63 = vrot.slane %v3949_v35, 4 }
  0x74   : > { %3055 = vrot.lane.b32.xlu1 %v4873_v16, %s5250_s7  ;;  %v3405_v61 = vor.u32 %v3404_v49, %v3400_v25  ;;  %v1356_v2 = vshll.u32 %v1212_v45, 16  ;;  %v1349_v56 = vrot.slane %v1347_v58, 4  ;;  %v1360_v42 = vshrl.u32 %v1212_v45, 16 }
  0x75   : > { %v3401_v59 = vsel %vm5356_vm12, %v3396_v31, %v3400_v25  ;;  %v1352_v6 = vrot.slane %v1350_v60, 5  ;;  %v3953_v10 = vsel %vm5323_vm9, %v3951_v63, %v3952_v33  ;;  %v1366_v53 = vshll.u32 %v1213_v57, 16  ;;  %v5654_v25 = vld [vmem:[%s6929_s2] ss:$0 sm:$0xff] }
  0x76   : > { %v3406_v8 = vrot.slane %v3405_v61, 4  ;;  %v1358_v11 = vrot.slane %v1356_v2, 5  ;;  %v4936_v5 = vcombine.low %v3950_v62, %v3953_v10  ;;  %v1362_v50 = vrot.slane %v1360_v42, 4 }
  0x77   : > { %v1353_v39 = vor.u32 %v1352_v6, %v1349_v56  ;;  %v4794_v7 = vrot.slane %v1759_v22, 9  ;;  %v1368_v37 = vrot.slane %v1366_v53, 5  ;;  %v1876_v17 = vrot.slane %v1760_v4, 5 }
  0x78   : > { %v3411_v16 = vsel %vm5356_vm12, %v3406_v8, %v3410_v24  ;;  %v1879_v18 = vrot.slane %v5638_v55, 5  ;;  %v974_v0 = vld [vmem:[#allocation2 + $0x44] sm:$0x1]  ;;  %v3301_v19 = vld [vmem:[#allocation2 + $0x3c] sm:$0xf]  ;;  %v1363_v20 = vor.u32 %v1362_v50, %v1358_v11  ;;  %v323_v21 = vmul.f32 %v5597_v51, %v5038_v46 }
  0x79   : > { %v4904_v38 = vcombine.low %v3401_v59, %v3411_v16  ;;  %v5658_v26 = vadd.f32 %v5654_v25, %v5602_v54  ;;  %v5185_v27 = vld [vmem:[#allocation2 + $0x3c] sm:$0xff]   ;;  %v975_v34 = vsel %vm5297_vm3, %v704_v32, %v974_v0  ;;  %v3413_v29 = vshrl.u32 %v3301_v19, 16 }
  0x7a   : > { %v3302_v13 = vld [vmem:[#allocation2 + $0x40] sm:$0xf]  ;;  %v5664_v52 = vsel %vm5323_vm9, %v4794_v7, %v1876_v17  ;;  %v5041_v46 = vunpack.c.l.bf16 %v5643_v14  ;;  %976 = vst [vmem:[#allocation2 + $0x44] sm:$0x1] %v975_v34  ;;  %v3416_v30 = vshll.u32 %v3301_v19, 16  ;;  %v1354_v54 = vrot.slane %v1353_v39, 4  ;;  %3233 = vrot.lane.b32.xlu1 %v5185_v27, %s5249_s6 }
  0x7b   : > { %3776 = vrot.lane.b32.xlu0 %v4904_v38, %s5253_s10  ;;  %v3422_v36 = vshll.u32 %v3302_v13, 16  ;;  %v3426_v43 = vshrl.u32 %v3302_v13, 16  ;;  %v3846_v44 = vld [vmem:[#allocation2 + $0x3c] sm:$0xe]  ;;  %v3415_v45 = vrot.slane %v3413_v29, 4  ;;  %v1364_v32 = vrot.slane %v1363_v20, 4 }
  0x7c   : > { %v3847_v47 = vld [vmem:[#allocation2 + $0x40] sm:$0xf]  ;;  %v4921_v49 = vrot.slane %v3846_v44, 9  ;;  %v1878_v24 = vrot.slane %v1876_v17, 4  ;;  %v3418_v35 = vrot.slane %v3416_v30, 5  ;;  %v1359_v57 = vsel %vm5356_vm12, %v1354_v54, %v1358_v11 }
  0x7d   : > { %v3424_v31 = vrot.slane %v3422_v36, 5  ;;  %v3428_v33 = vrot.slane %v3426_v43, 4  ;;  %v1214_v58 = vld [vmem:[#allocation2 + $0x3c] sm:$0xf]  ;;  %v1369_v60 = vsel %vm5356_vm12, %v1364_v32, %v1368_v37  ;;  %v3956_v61 = vrot.slane %v3847_v47, 5 }
  0x7e   : > { %v1215_v62 = vld [vmem:[#allocation2 + $0x40] sm:$0xf]  ;;  %v1371_v63 = vshrl.u32 %v1214_v58, 16  ;;  %v1374_v2 = vshll.u32 %v1214_v58, 16  ;;  %v3419_v22 = vor.u32 %v3418_v35, %v3415_v45  ;;  %v5674_v59 = vcombine.low %v1359_v57, %v1369_v60  ;;  %v1762_v6 = vld [vmem:[#allocation2 + $0x3c] sm:$0xe] }
  0x7f   : > { %v3429_v4 = vor.u32 %v3428_v33, %v3424_v31  ;;  %4097 = vrot.lane.b32.xlu0 %v4936_v5, %s5251_s8  ;;  %v1380_v56 = vshll.u32 %v1215_v62, 16  ;;  %v3957_v42 = vsel %vm5323_vm9, %v4921_v49, %v3956_v61  ;;  %v3958_v55 = vrot.slane %v3956_v61, 4  ;;  %v1763_v11 = vld [vmem:[#allocation2 + $0x40] sm:$0xf]  ;;  %v455_v32 = vld [vmem:[#allocation2 + $0x48] sm:$0x1] }
  0x80   : > { %v1373_v8 = vrot.slane %v1371_v63, 4  ;;  %v1376_v10 = vrot.slane %v1374_v2, 5  ;;  %v3420_v53 = vrot.slane %v3419_v22, 4  ;;  %v1384_v7 = vshrl.u32 %v1215_v62, 16  ;;  %v5197_v60 = vld [vmem:[%s6930_s3] sm:$0xff]  }
  0x81   : > { %v3430_v39 = vrot.slane %v3429_v4, 4  ;;  %v1382_v50 = vrot.slane %v1380_v56, 5  ;;  %v3303_v16 = vld [vmem:[#allocation2 + $0x44] sm:$0x1]  ;;  %v1880_v5 = vsel %vm5323_vm9, %v1878_v24, %v1879_v18  ;;  %v5681_v0 = vadd.f32 %v5654_v25, %v323_v21  ;;  %v2261_v22 = vld [vmem:[#allocation2 + $0x40] sm:$0xf]  ;;  %5107 = vmatprep.subr.bf16.mxu0 %v5197_v60  ;;  %5149 = vmatprep.subr.bf16.mxu1 %v5197_v60 }
  0x82   : > { %v3848_v37 = vld [vmem:[#allocation2 + $0x44] sm:$0x1]  ;;  %v1377_v38 = vor.u32 %v1376_v10, %v1373_v8  ;;  %v5042_v19 = vunpack.c.h.bf16 %v5643_v14  ;;  %v3425_v20 = vsel %vm5356_vm12, %v3420_v53, %v3424_v31  ;;  %v3432_v27 = vshll.u32 %v3303_v16, 16  ;;  %v2260_v31 = vld [vmem:[#allocation2 + $0x3c] sm:$0xf]  ;;  %5108 = vmatpush3.bf16.msra.mxu0 %v5197_v60  ;;  %5154 = vmatpush3.bf16.msra.mxu1 %v5197_v60  ;;  %v5203_v60 = vld [vmem:[%s6930_s3 + $0x10] sm:$0xff]  }
  0x83   : > { %v1216_v17 = vld [vmem:[#allocation2 + $0x44] sm:$0x1]  ;;  %v3959_v34 = vrot.slane %v3848_v37, 5  ;;  %v1386_v13 = vrot.slane %v1384_v7, 4  ;;  %v4810_v43 = vcombine.low %v5664_v52, %v1880_v5  ;;  %v4795_v54 = vrot.slane %v1762_v6, 9  ;;  %v5186_v8 = vld [vmem:[#allocation2 + $0x3c] sm:$0xff]  }
  0x84   : > { %v1764_v29 = vld [vmem:[#allocation2 + $0x44] sm:$0x1]  ;;  %v1378_v30 = vrot.slane %v1377_v38, 4  ;;  %v1390_v36 = vshll.u32 %v1216_v17, 16  ;;  %v3434_v44 = vrot.slane %v3432_v27, 5  ;;  %v1883_v45 = vrot.slane %v1763_v11, 5 }
  0x85   : > { %v3960_v18 = vsel %vm5323_vm9, %v3958_v55, %v3959_v34  ;;  %v1387_v21 = vor.u32 %v1386_v13, %v1382_v50  ;;  %v1886_v35 = vrot.slane %v1764_v29, 5  ;;  %v389_v62 = vmax.f32 %v5455_v9, 0.0  ;;  %v505_v55 = vld [vmem:[#allocation2 + $0x50] sm:$0x1]  ;;  %v2262_v53 = vld [vmem:[#allocation2 + $0x44] sm:$0x1] }
  0x86   : > { %v4937_v47 = vcombine.low %v3957_v42, %v3960_v18  ;;  %v1383_v49 = vsel %vm5356_vm12, %v1378_v30, %v1382_v50  ;;  %v1392_v24 = vrot.slane %v1390_v36, 5  ;;  %v3435_v33 = vsel %vm5356_vm12, %v3430_v39, %v3434_v44  ;;  %v5200_v39 = vld [vmem:[%s6930_s3 + $0x8] sm:$0xff]   ;;  %v2805_v17 = vld [vmem:[#allocation2 + $0x3c] sm:$0xe]  ;;  %v2806_v34 = vld [vmem:[#allocation2 + $0x40] sm:$0xf] }
  0x87   : > { %v1388_v57 = vrot.slane %v1387_v21, 4  ;;  %v5695_v52 = vsel %vm5323_vm9, %v4795_v54, %v1883_v45  ;;  %v1885_v58 = vrot.slane %v1883_v45, 4  ;;  %v4905_v61 = vcombine.low %v3425_v20, %v3435_v33  ;;  %5109 = vmatprep.subr.bf16.mxu0 %v5200_v39  ;;  %5150 = vmatprep.subr.bf16.mxu1 %v5200_v39  ;;  %v458_v21 = vld [vmem:[#allocation2 + $0x54] sm:$0x1]  ;;  %v508_v45 = vld [vmem:[#allocation2 + $0x5c] sm:$0x1] }
  0x88   : > { %4099 = vrot.lane.b32.xlu0 %v4937_v47, %s5251_s8  ;;  %v390_v63 = vmax.f32 %v5461_v15, 0.0  ;;  %v456_v2 = vsel %vm5297_vm3, 0, %v455_v32  ;;  %v2393_v6 = vshrl.u32 %v2260_v31, 16  ;;  %v2396_v42 = vshll.u32 %v2260_v31, 16  ;;  %5110 = vmatpush3.bf16.msra.mxu0 %v5200_v39 }
  0x89   : > { %v1393_v4 = vsel %vm5356_vm12, %v1388_v57, %v1392_v24  ;;  %v5709_v56 = vsel %vm5323_vm9, %v1885_v58, %v1886_v35  ;;  %457 = vst [vmem:[#allocation2 + $0x48] sm:$0x1] %v456_v2  ;;  %3778 = vrot.lane.b32.xlu1 %v4905_v61, %s5253_s10  ;;  %v4985_v10 = vpack.c.bf16 %v389_v62, %v389_v62  ;;  %v2402_v16 = vshll.u32 %v2261_v22, 16  ;;  %v2807_v24 = vld [vmem:[#allocation2 + $0x44] sm:$0x1] }
  0x8a   : > { %v4779_v9 = vcombine.low %v1383_v49, %v1393_v4  ;;  %v4811_v15 = vcombine.low %v5695_v52, %v5709_v56  ;;  %v4986_v11 = vpack.c.bf16 %v390_v63, %v390_v63  ;;  %v2395_v50 = vrot.slane %v2393_v6, 4  ;;  %5155 = vmatpush3.bf16.msra.mxu1 %v5200_v39  ;;  %5111 = vmatprep.subr.bf16.mxu0 %v5203_v60 }
  0x8b   : > { %v2398_v7 = vrot.slane %v2396_v42, 5  ;;  %v2406_v37 = vshrl.u32 %v2261_v22, 16  ;;  %v706_v38 = vshrl.u32 %v4985_v10, 16  ;;  %v709_v5 = vshll.u32 %v4985_v10, 16  ;;  %5151 = vmatprep.subr.bf16.mxu1 %v5203_v60 }
  0x8c   : > { %2014 = vrot.lane.b32.xlu0 %v4810_v43, %s5246_s28  ;;  %v714_v20 = vshrl.u32 %v4986_v11, 16  ;;  %v717_v27 = vshll.u32 %v4986_v11, 16  ;;  %v2404_v29 = vrot.slane %v2402_v16, 5  ;;  %v2412_v36 = vshll.u32 %v2262_v53, 16  ;;  %v511_v53 = vld [vmem:[#allocation2 + $0x68] sm:$0x1]  ;;  %5112 = vmatpush3.bf16.msra.mxu0 %v5203_v60 }
  0x8d   : > { %v2399_v13 = vor.u32 %v2398_v7, %v2395_v50  ;;  %v2408_v30 = vrot.slane %v2406_v37, 4  ;;  %1690 = vrot.lane.b32.xlu1 %v5674_v59, %s5247_s29  ;;  %v708_v54 = vrot.slane %v706_v38, 7  ;;  %v506_v43 = vsel %vm5306_vm7, 0, %v505_v55  ;;  %v461_v55 = vld [vmem:[#allocation2 + $0x60] sm:$0x1] }
  0x8e   : > { %v5720_v44 = vrot.slane %v714_v20, 7  ;;  %v4858_v18 = vrot.slane %v2805_v17, 9  ;;  %v2414_v49 = vrot.slane %v2412_v36, 5  ;;  %507 = vst [vmem:[#allocation2 + $0x50] sm:$0x1] %v506_v43  ;;  %v2919_v35 = vrot.slane %v2806_v34, 5  ;;  %5156 = vmatpush3.bf16.msra.mxu1 %v5203_v60 }
  0x8f   : > { %v2400_v32 = vrot.slane %v2399_v13, 4  ;;  %v2409_v47 = vor.u32 %v2408_v30, %v2404_v29  ;;  %v711_v59 = vor.u32 %v709_v5, %v708_v54  ;;  %v712_v31 = vrot.slane %v708_v54, 4  ;;  %v5192_v38 = vld [vmem:[#allocation2] sm:$0xff]   ;;  %v5198_v5 = vld [vmem:[#allocation2 + $0xc] sm:$0xff]   ;;  %v5202_v20 = vld [vmem:[#allocation2 + $0x18] sm:$0xff]  }
  0x90   : > { %2191 = vrot.lane.b32.xlu0 %v5186_v8, %s5248_s30  ;;  %v719_v33 = vor.u32 %v717_v27, %v5720_v44  ;;  %v721_v57 = vrot.slane %v5720_v44, 4  ;;  %v977_v58 = vld [vmem:[#allocation2 + $0x48] sm:$0xf]  ;;  %v2920_v63 = vsel %vm5323_vm9, %v4858_v18, %v2919_v35  ;;  %v2921_v2 = vrot.slane %v2919_v35, 4  ;;  %v1683_v56 = vpop.permute.xlu0 %1682  ;;  %v5773_v18 = vld [vmem:[%s5330_s23 + $0x50] sm:$0xff]  }
  0x91   : > { %v2405_v61 = vsel %vm5356_vm12, %v2400_v32, %v2404_v29  ;;  %v2410_v62 = vrot.slane %v2409_v47, 4  ;;  %1692 = vrot.lane.b32.xlu1 %v4779_v9, %s5247_s29  ;;  %v978_v4 = vsel %vm5378_vm13, %v711_v59, %v977_v58  ;;  %v2922_v6 = vrot.slane %v2807_v24, 5  ;;  %v5770_v43 = vld [vmem:[%s5330_s23 + $0x48] sm:$0xff]  }
  0x92   : > { %v720_v22 = vsel %vm5386_vm14, %v712_v31, %v719_v33  ;;  %v391_v42 = vmax.f32 %v5518_v40, 0.0  ;;  %979 = vst [vmem:[#allocation2 + $0x48] sm:$0xf] %v978_v4  ;;  %v392_v10 = vmax.f32 %v5521_v41, 0.0  ;;  %v459_v9 = vsel %vm5297_vm3, 0, %v458_v21  ;;  %v5204_v47 = vld [vmem:[#allocation2 + $0x24] sm:$0xff]  }
  0x93   : > { %980 = vst.msk [vmem:[#allocation2 + $0x4c] sm:$0xf] %vm427_vm0, %v720_v22  ;;  %v2415_v8 = vsel %vm5356_vm12, %v2410_v62, %v2414_v49  ;;  %v509_v11 = vsel %vm5306_vm7, 0, %v508_v45  ;;  %v2923_v39 = vsel %vm5323_vm9, %v2921_v2, %v2922_v6  ;;  %460 = vst [vmem:[#allocation2 + $0x54] sm:$0x1] %v459_v9  ;;  %v393_v7 = vmax.f32 %v5658_v26, 0.0 }
  0x94   : > { %v4842_v40 = vcombine.low %v2405_v61, %v2415_v8  ;;  %v4987_v50 = vpack.c.bf16 %v391_v42, %v391_v42  ;;  %510 = vst [vmem:[#allocation2 + $0x5c] sm:$0x1] %v509_v11  ;;  %v4874_v41 = vcombine.low %v2920_v63, %v2923_v39  ;;  %v4988_v16 = vpack.c.bf16 %v392_v10, %v392_v10  ;;  %v5205_v39 = vld [vmem:[%s6930_s3 + $0x18] sm:$0xff]  }
  0x95   : > { %v394_v37 = vmax.f32 %v5681_v0, 0.0  ;;  %v462_v17 = vsel %vm5297_vm3, 0, %v461_v55  ;;  %2016 = vrot.lane.b32.xlu1 %v4811_v15, %s5246_s28  ;;  %v981_v27 = vld [vmem:[#allocation2 + $0x50] sm:$0x1]  ;;  %v5759_v0 = vpack.c.bf16 %v393_v7, %v393_v7  ;;  %v512_v13 = vsel %vm5306_vm7, 0, %v511_v53  ;;  %5113 = vmatprep.subr.bf16.mxu0 %v5205_v39 }
  0x96   : > { %2736 = vrot.lane.b32.xlu0 %v4842_v40, %s5252_s9  ;;  %v723_v26 = vshrl.u32 %v4987_v50, 16  ;;  %v726_v34 = vshll.u32 %v4987_v50, 16  ;;  %463 = vst [vmem:[#allocation2 + $0x60] sm:$0x1] %v462_v17  ;;  %v982_v29 = vsel %vm5297_vm3, %v721_v57, %v981_v27  ;;  %v731_v30 = vshrl.u32 %v4988_v16, 16  ;;  %v5802_v40 = vpop.permute.xlu1 %2006  ;;  %5114 = vmatpush3.bf16.msra.mxu0 %v5205_v39 }
  0x97   : > { %v734_v36 = vshll.u32 %v4988_v16, 16  ;;  %v5765_v52 = vpack.c.bf16 %v394_v37, %v394_v37  ;;  %513 = vst [vmem:[#allocation2 + $0x68] sm:$0x1] %v512_v13  ;;  %983 = vst [vmem:[#allocation2 + $0x50] sm:$0x1] %v982_v29  ;;  %v740_v54 = vshrl.u32 %v5759_v0, 16  ;;  %v324_v59 = vmul.f32 %v5597_v51, %v5041_v46  ;;  %5152 = vmatprep.subr.bf16.mxu1 %v5205_v39 }
  0x98   : > { %v725_v15 = vrot.slane %v723_v26, 7  ;;  %v743_v44 = vshll.u32 %v5759_v0, 16  ;;  %vm6934_vm15 = vcmask 64512   ;;  %v5775_v21 = vrot.slane %v731_v30, 7  ;;  %5157 = vmatpush3.bf16.msra.mxu1 %v5205_v39 }
  0x99   : > { %v748_v45 = vshrl.u32 %v5765_v52, 16  ;;  %v751_v32 = vshll.u32 %v5765_v52, 16  ;;  %vm1730_vm2 = vcmask 130112   ;;  %1183 = vst.msk [vmem:[#allocation3] sm:$0xff] %vm6934_vm15, %v5192_v38  ;;  %1184 = vst.msk [vmem:[#allocation3 + $0x8] sm:$0xff] %vm6934_vm15, %v5198_v5  ;;  %v325_v31 = vmul.f32 %v5597_v51, %v5042_v19 }
  0x9a   : > { %1185 = vst.msk [vmem:[#allocation3 + $0x10] sm:$0xff] %vm6934_vm15, %v5202_v20  ;;  %v5187_v49 = vld [vmem:[#allocation2 + $0x48] sm:$0xff]   ;;  %3057 = vrot.lane.b32.xlu0 %v4874_v41, %s5250_s7  ;;  %v728_v24 = vor.u32 %v726_v34, %v725_v15  ;;  %v729_v35 = vrot.slane %v725_v15, 4  ;;  %v736_v60 = vor.u32 %v734_v36, %v5775_v21  ;;  %v5045_v61 = vunpack.c.l.bf16 %v5770_v43  ;;  %1186 = vst.msk [vmem:[#allocation3 + $0x18] sm:$0xff] %vm6934_vm15, %v5204_v47  ;;  %v984_v26 = vld [vmem:[#allocation2 + $0x54] sm:$0xf] }
  0x9b   : > { %1731 = vst.msk [vmem:[#allocation3] sm:$0xff] %vm1730_vm2, %v1683_v56  ;;  %v2263_v33 = vld [vmem:[#allocation2 + $0x48] sm:$0xf]  ;;  %v2264_v57 = vld [vmem:[#allocation2 + $0x4c] sm:$0xf]  ;;  %v5046_v62 = vunpack.c.h.bf16 %v5770_v43  ;;  %v5049_v63 = vunpack.c.l.bf16 %v5773_v18  ;;  %2193 = vrot.lane.b32.xlu1 %v5187_v49, %s5248_s30  ;;  %v5799_v55 = vadd.f32 %v5654_v25, %v324_v59  ;;  %v738_v37 = vrot.slane %v5775_v21, 4 }
  0x9c   : > { %v2808_v58 = vld [vmem:[#allocation2 + $0x48] sm:$0xe]  ;;  %v2417_v46 = vshrl.u32 %v2263_v33, 16  ;;  %v2420_v2 = vshll.u32 %v2263_v33, 16  ;;  %v2426_v14 = vshll.u32 %v2264_v57, 16  ;;  %v2430_v22 = vshrl.u32 %v2264_v57, 16 }
  0x9d   : > { %v2809_v19 = vld [vmem:[#allocation2 + $0x4c] sm:$0xf]  ;;  %v4859_v4 = vrot.slane %v2808_v58, 9  ;;  %v737_v42 = vsel %vm5386_vm14, %v729_v35, %v736_v60  ;;  %v5813_v17 = vadd.f32 %v5654_v25, %v325_v31  ;;  %v3304_v34 = vld [vmem:[#allocation2 + $0x48] sm:$0xf]  ;;  %v985_v13 = vsel %vm5378_vm13, %v728_v24, %v984_v26 }
  0x9e   : > { %v2926_v6 = vrot.slane %v2809_v19, 5  ;;  %v2419_v8 = vrot.slane %v2417_v46, 4  ;;  %v2422_v10 = vrot.slane %v2420_v2, 5  ;;  %v2428_v9 = vrot.slane %v2426_v14, 5  ;;  %v5188_v53 = vld [vmem:[#allocation2 + $0x48] sm:$0xff]   ;;  %v5828_v19 = vpop.permute.xlu1 %2185 }
  0x9f   : > { %v2432_v11 = vrot.slane %v2430_v22, 4  ;;  %987 = vst.msk [vmem:[#allocation2 + $0x58] sm:$0xf] %vm427_vm0, %v737_v42  ;;  %v2265_v50 = vld [vmem:[#allocation2 + $0x50] sm:$0x1]  ;;  %3235 = vrot.lane.b32.xlu0 %v5188_v53, %s5249_s6  ;;  %v3437_v36 = vshrl.u32 %v3304_v34, 16  ;;  %v5819_v15 = vmul.f32 %v5597_v51, %v5045_v61 }
  0xa0   : > { %v2810_v7 = vld [vmem:[#allocation2 + $0x50] sm:$0x1]  ;;  %v5809_v41 = vsel %vm5323_vm9, %v4859_v4, %v2926_v6  ;;  %v2928_v16 = vrot.slane %v2926_v6, 4  ;;  %v2423_v38 = vor.u32 %v2422_v10, %v2419_v8  ;;  %v2436_v20 = vshll.u32 %v2265_v50, 16  ;;  %v3305_v29 = vld [vmem:[#allocation2 + $0x4c] sm:$0xf] }
  0xa1   : > { %v2433_v5 = vor.u32 %v2432_v11, %v2428_v9  ;;  %v2929_v27 = vrot.slane %v2810_v7, 5  ;;  %v3306_v30 = vld [vmem:[#allocation2 + $0x50] sm:$0x1]  ;;  %v3440_v56 = vshll.u32 %v3304_v34, 16  ;;  %986 = vst [vmem:[#allocation2 + $0x54] sm:$0xf] %v985_v13 }
  0xa2   : > { %v2424_v21 = vrot.slane %v2423_v38, 4  ;;  %v2438_v49 = vrot.slane %v2436_v20, 5  ;;  %v988_v59 = vld [vmem:[#allocation2 + $0x5c] sm:$0x1]  ;;  %v3439_v31 = vrot.slane %v3437_v36, 4  ;;  %v3446_v57 = vshll.u32 %v3305_v29, 16 }
  0xa3   : > { %v2434_v47 = vrot.slane %v2433_v5, 4  ;;  %v2930_v35 = vsel %vm5323_vm9, %v2928_v16, %v2929_v27  ;;  %v3442_v33 = vrot.slane %v3440_v56, 5  ;;  %v3849_v58 = vld [vmem:[#allocation2 + $0x48] sm:$0xe]  ;;  %v3450_v46 = vshrl.u32 %v3305_v29, 16  ;;  %v5832_v11 = vpop.permute.xlu0 %2183 }
  0xa4   : > { %v4875_v24 = vcombine.low %v5809_v41, %v2930_v35  ;;  %v2429_v60 = vsel %vm5356_vm12, %v2424_v21, %v2428_v9  ;;  %v3456_v2 = vshll.u32 %v3306_v30, 16  ;;  %v3850_v14 = vld [vmem:[#allocation2 + $0x4c] sm:$0xf]  ;;  %v3851_v22 = vld [vmem:[#allocation2 + $0x50] sm:$0x1]  ;;  %v3448_v42 = vrot.slane %v3446_v57, 5 }
  0xa5   : > { %v2439_v61 = vsel %vm5356_vm12, %v2434_v47, %v2438_v49  ;;  %v3443_v6 = vor.u32 %v3442_v33, %v3439_v31  ;;  %v989_v8 = vsel %vm5297_vm3, %v738_v37, %v988_v59  ;;  %v3452_v53 = vrot.slane %v3450_v46, 4  ;;  %v1217_v7 = vld [vmem:[#allocation2 + $0x48] sm:$0xf]  ;;  %v1218_v37 = vld [vmem:[#allocation2 + $0x4c] sm:$0xf]  ;;  %v5849_v33 = vpop.permute.xlu1 %3229 }
  0xa6   : > { %v4843_v4 = vcombine.low %v2429_v60, %v2439_v61  ;;  %v3308_v10 = vld [vmem:[#allocation2 + $0x58] sm:$0xf]  ;;  %v3458_v9 = vrot.slane %v3456_v2, 5  ;;  %990 = vst [vmem:[#allocation2 + $0x5c] sm:$0x1] %v989_v8  ;;  %v4922_v16 = vrot.slane %v3849_v58, 9  ;;  %v5846_v21 = vmul.f32 %v5597_v51, %v5046_v62 }
  0xa7   : > { %v3470_v39 = vshll.u32 %v3308_v10, 16  ;;  %v3474_v50 = vshrl.u32 %v3308_v10, 16  ;;  %v3444_v41 = vrot.slane %v3443_v6, 4  ;;  %v3963_v38 = vrot.slane %v3850_v14, 5  ;;  %v5841_v56 = vpop.permute.xlu0 %3227  ;;  %v1219_v31 = vld [vmem:[#allocation2 + $0x50] sm:$0x1] }
  0xa8   : > { %2738 = vrot.lane.b32.xlu1 %v4843_v4, %s5252_s9  ;;  %v3966_v5 = vrot.slane %v3851_v22, 5  ;;  %v3453_v20 = vor.u32 %v3452_v53, %v3448_v42  ;;  %v1395_v34 = vshrl.u32 %v1217_v7, 16  ;;  %v3307_v29 = vld [vmem:[#allocation2 + $0x54] sm:$0xf]  ;;  %v1398_v61 = vshll.u32 %v1217_v7, 16 }
  0xa9   : > { %v5835_v27 = vrot.slane %v3470_v39, 5  ;;  %v3476_v26 = vrot.slane %v3474_v50, 4  ;;  %v3449_v13 = vsel %vm5356_vm12, %v3444_v41, %v3448_v42  ;;  %v3964_v30 = vsel %vm5323_vm9, %v4922_v16, %v3963_v38  ;;  %v5189_v57 = vld [vmem:[#allocation2 + $0x54] sm:$0xff]   ;;  %v464_v52 = vld [vmem:[#allocation2 + $0x6c] sm:$0x1] }
  0xaa   : > { %v3965_v36 = vrot.slane %v3963_v38, 4  ;;  %v3454_v47 = vrot.slane %v3453_v20, 4  ;;  %v3461_v49 = vshrl.u32 %v3307_v29, 16  ;;  %v3464_v35 = vshll.u32 %v3307_v29, 16  ;;  %v3852_v46 = vld [vmem:[#allocation2 + $0x54] sm:$0xe] }
  0xab   : > { %v3477_v59 = vor.u32 %v3476_v26, %v5835_v27  ;;  %v1397_v60 = vrot.slane %v1395_v34, 4  ;;  %v1404_v43 = vshll.u32 %v1218_v37, 16  ;;  %v3853_v22 = vld [vmem:[#allocation2 + $0x58] sm:$0xf]  ;;  %v1400_v8 = vrot.slane %v1398_v61, 5  ;;  %v5856_v53 = vpop.permute.xlu0 %2187 }
  0xac   : > { %3059 = vrot.lane.b32.xlu1 %v4875_v24, %s5250_s7  ;;  %v3967_v58 = vsel %vm5323_vm9, %v3965_v36, %v3966_v5  ;;  %v3459_v51 = vsel %vm5356_vm12, %v3454_v47, %v3458_v9  ;;  %v3463_v62 = vrot.slane %v3461_v49, 4  ;;  %v3466_v2 = vrot.slane %v3464_v35, 5  ;;  %v1220_v16 = vld [vmem:[#allocation2 + $0x54] sm:$0xf]  ;;  %v1221_v26 = vld [vmem:[#allocation2 + $0x58] sm:$0xf] }
  0xad   : > { %v3478_v14 = vrot.slane %v3477_v59, 4  ;;  %v4906_v4 = vcombine.low %v3449_v13, %v3459_v51  ;;  %v3309_v6 = vld [vmem:[#allocation2 + $0x5c] sm:$0x1]  ;;  %v4938_v42 = vcombine.low %v3964_v30, %v3967_v58  ;;  %v1406_v24 = vrot.slane %v1404_v43, 5  ;;  %v1767_v51 = vld [vmem:[#allocation2 + $0x50] sm:$0x1] }
  0xae   : > { %v3854_v10 = vld [vmem:[#allocation2 + $0x5c] sm:$0x1]  ;;  %v3467_v39 = vor.u32 %v3466_v2, %v3463_v62  ;;  %v3480_v50 = vshll.u32 %v3309_v6, 16  ;;  %v1408_v7 = vshrl.u32 %v1218_v37, 16  ;;  %v1414_v41 = vshll.u32 %v1219_v31, 16  ;;  %v5860_v47 = vpop.permute.xlu1 %2189 }
  0xaf   : > { %3780 = vrot.lane.b32.xlu0 %v4906_v4, %s5253_s10  ;;  %v1401_v9 = vor.u32 %v1400_v8, %v1397_v60  ;;  %v4923_v38 = vrot.slane %v3852_v46, 9  ;;  %v3970_v5 = vrot.slane %v3853_v22, 5  ;;  %v3973_v20 = vrot.slane %v3854_v10, 5  ;;  %v1222_v36 = vld [vmem:[#allocation2 + $0x5c] sm:$0x1] }
  0xb0   : > { %3237 = vrot.lane.b32.xlu1 %v5189_v57, %s5249_s6  ;;  %v3468_v34 = vrot.slane %v3467_v39, 4  ;;  %v3482_v13 = vrot.slane %v3480_v50, 5  ;;  %v1410_v29 = vrot.slane %v1408_v7, 4  ;;  %v1416_v30 = vrot.slane %v1414_v41, 5  ;;  %v1765_v31 = vld [vmem:[#allocation2 + $0x48] sm:$0xe]  ;;  %v5864_v57 = vpop.permute.xlu0 %3049 }
  0xb1   : > { %v1402_v49 = vrot.slane %v1401_v9, 4  ;;  %v3971_v37 = vsel %vm5323_vm9, %v4923_v38, %v3970_v5  ;;  %v3972_v35 = vrot.slane %v3970_v5, 4  ;;  %v1419_v59 = vshrl.u32 %v1220_v16, 16  ;;  %v1766_v46 = vld [vmem:[#allocation2 + $0x4c] sm:$0xf] }
  0xb2   : > { %v3473_v58 = vsel %vm5356_vm12, %v3468_v34, %v5835_v27  ;;  %v3483_v60 = vsel %vm5356_vm12, %v3478_v14, %v3482_v13  ;;  %v1411_v61 = vor.u32 %v1410_v29, %v1406_v24  ;;  %v1422_v43 = vshll.u32 %v1220_v16, 16  ;;  %v1768_v6 = vld [vmem:[#allocation2 + $0x54] sm:$0xe]  ;;  %v1769_v8 = vld [vmem:[#allocation2 + $0x58] sm:$0xf]  ;;  %v5876_v50 = vpop.permute.xlu1 %2008 }
  0xb3   : > { %v4907_v62 = vcombine.low %v3473_v58, %v3483_v60  ;;  %4101 = vrot.lane.b32.xlu0 %v4938_v42, %s5251_s8  ;;  %v1407_v2 = vsel %vm5356_vm12, %v1402_v49, %v1406_v24  ;;  %v3974_v22 = vsel %vm5323_vm9, %v3972_v35, %v3973_v20  ;;  %v1421_v4 = vrot.slane %v1419_v59, 4  ;;  %v1770_v20 = vld [vmem:[#allocation2 + $0x5c] sm:$0x1] }
  0xb4   : > { %v1412_v27 = vrot.slane %v1411_v61, 4  ;;  %v4939_v10 = vcombine.low %v3971_v37, %v3974_v22  ;;  %v1424_v39 = vrot.slane %v1422_v43, 5  ;;  %v1428_v14 = vshll.u32 %v1221_v26, 16  ;;  %v2266_v43 = vld [vmem:[#allocation2 + $0x54] sm:$0xf] }
  0xb5   : > { %3782 = vrot.lane.b32.xlu1 %v4907_v62, %s5253_s10  ;;  %v1432_v7 = vshrl.u32 %v1221_v26, 16  ;;  %v1438_v41 = vshll.u32 %v1222_v36, 16  ;;  %v4796_v42 = vrot.slane %v1765_v31, 9  ;;  %v1890_v16 = vrot.slane %v1766_v46, 5  ;;  %v5209_v46 = vld [vmem:[#allocation2 + $0x30] sm:$0xff]  }
  0xb6   : > { %v1417_v24 = vsel %vm5356_vm12, %v1412_v27, %v1416_v30  ;;  %v1425_v9 = vor.u32 %v1424_v39, %v1421_v4  ;;  %v1430_v38 = vrot.slane %v1428_v14, 5  ;;  %v1893_v5 = vrot.slane %v1767_v51, 5  ;;  %v5884_v37 = vpop.permute.xlu0 %4093  ;;  %v991_v4 = vld [vmem:[#allocation2 + $0x60] sm:$0xf]  ;;  %v5190_v27 = vld [vmem:[#allocation2 + $0x54] sm:$0xff]   ;;  %1187 = vst.msk [vmem:[#allocation3 + $0x20] sm:$0xff] %vm6934_vm15, %v5209_v46 }
  0xb7   : > { %v4780_v34 = vcombine.low %v1407_v2, %v1417_v24  ;;  %4103 = vrot.lane.b32.xlu0 %v4939_v10, %s5251_s8  ;;  %v1434_v13 = vrot.slane %v1432_v7, 4  ;;  %v1440_v29 = vrot.slane %v1438_v41, 5  ;;  %v1891_v49 = vsel %vm5323_vm9, %v4796_v42, %v1890_v16  ;;  %v5886_v31 = vpop.permute.xlu1 %3051  ;;  %v2267_v10 = vld [vmem:[#allocation2 + $0x58] sm:$0xf]  ;;  %v2268_v39 = vld [vmem:[#allocation2 + $0x5c] sm:$0x1] }
  0xb8   : > { %v1426_v26 = vrot.slane %v1425_v9, 4  ;;  %v1892_v36 = vrot.slane %v1890_v16, 4  ;;  %v4797_v35 = vrot.slane %v1768_v6, 9  ;;  %v1897_v59 = vrot.slane %v1769_v8, 5  ;;  %v995_v24 = vld [vmem:[#allocation2 + $0x68] sm:$0x1] }
  0xb9   : > { %1694 = vrot.lane.b32.xlu1 %v4780_v34, %s5247_s29  ;;  %v1435_v30 = vor.u32 %v1434_v13, %v1430_v38  ;;  %v1900_v58 = vrot.slane %v1770_v20, 5  ;;  %v742_v60 = vrot.slane %v740_v54, 7  ;;  %v750_v61 = vrot.slane %v748_v45, 7  ;;  %v2811_v9 = vld [vmem:[#allocation2 + $0x54] sm:$0xe] }
  0xba   : > { %v1431_v51 = vsel %vm5356_vm12, %v1426_v26, %v1430_v38  ;;  %v1894_v62 = vsel %vm5323_vm9, %v1892_v36, %v1893_v5  ;;  %v1898_v2 = vsel %vm5323_vm9, %v4797_v35, %v1897_v59  ;;  %v1899_v22 = vrot.slane %v1897_v59, 4  ;;  %v5901_v14 = vpop.permute.xlu0 %4095  ;;  %v2812_v34 = vld [vmem:[#allocation2 + $0x58] sm:$0xf]  ;;  %v2813_v13 = vld [vmem:[#allocation2 + $0x5c] sm:$0x1] }
  0xbb   : > { %v1436_v6 = vrot.slane %v1435_v30, 4  ;;  %v4812_v8 = vcombine.low %v1891_v49, %v1894_v62  ;;  %v745_v54 = vor.u32 %v743_v44, %v742_v60  ;;  %v746_v45 = vrot.slane %v742_v60, 4  ;;  %v5908_v38 = vpop.permute.xlu1 %2012 }
  0xbc   : > { %v1901_v7 = vsel %vm5323_vm9, %v1899_v22, %v1900_v58  ;;  %v753_v41 = vor.u32 %v751_v32, %v750_v61  ;;  %v755_v42 = vrot.slane %v750_v61, 4  ;;  %v2441_v16 = vshrl.u32 %v2266_v43, 16  ;;  %v5210_v32 = vld [vmem:[#allocation2 + $0x3c] sm:$0xff]  }
  0xbd   : > { %v1441_v0 = vsel %vm5356_vm12, %v1436_v6, %v1440_v29  ;;  %2018 = vrot.lane.b32.xlu0 %v4812_v8, %s5246_s28  ;;  %v4813_v44 = vcombine.low %v1898_v2, %v1901_v7  ;;  %v992_v5 = vsel %vm5378_vm13, %v745_v54, %v991_v4  ;;  %v2444_v20 = vshll.u32 %v2266_v43, 16  ;;  %1188 = vst.msk [vmem:[#allocation3 + $0x28] sm:$0xff] %vm6934_vm15, %v5210_v32  ;;  %v514_v6 = vld [vmem:[#allocation2 + $0x74] sm:$0x1] }
  0xbe   : > { %v4781_v49 = vcombine.low %v1431_v51, %v1441_v0  ;;  %v754_v26 = vsel %vm5386_vm14, %v746_v45, %v753_v41  ;;  %993 = vst [vmem:[#allocation2 + $0x60] sm:$0xf] %v992_v5  ;;  %v2443_v36 = vrot.slane %v2441_v16, 4  ;;  %v2450_v35 = vshll.u32 %v2267_v10, 16  ;;  %v5926_v8 = vpop.permute.xlu0 %2010 }
  0xbf   : > { %994 = vst.msk [vmem:[#allocation2 + $0x64] sm:$0xf] %vm427_vm0, %v754_v26  ;;  %v2446_v29 = vrot.slane %v2444_v20, 5  ;;  %v2454_v59 = vshrl.u32 %v2267_v10, 16  ;;  %v2460_v30 = vshll.u32 %v2268_v39, 16  ;;  %v996_v58 = vsel %vm5297_vm3, %v755_v42, %v995_v24  ;;  %v5922_v51 = vpop.permute.xlu1 %2730 }
  0xc0   : > { %1696 = vrot.lane.b32.xlu1 %v4781_v49, %s5247_s29  ;;  %v2452_v60 = vrot.slane %v2450_v35, 5  ;;  %997 = vst [vmem:[#allocation2 + $0x68] sm:$0x1] %v996_v58  ;;  %v4860_v61 = vrot.slane %v2811_v9, 9  ;;  %v2933_v43 = vrot.slane %v2812_v34, 5  ;;  %v2936_v46 = vrot.slane %v2813_v13, 5 }
  0xc1   : > { %2195 = vrot.lane.b32.xlu0 %v5190_v27, %s5248_s30  ;;  %v2447_v62 = vor.u32 %v2446_v29, %v2443_v36  ;;  %v2456_v2 = vrot.slane %v2454_v59, 4  ;;  %v2462_v22 = vrot.slane %v2460_v30, 5  ;;  %v395_v4 = vmax.f32 %v5799_v55, 0.0 }
  0xc2   : > { %v5930_v54 = vsel %vm5323_vm9, %v4860_v61, %v2933_v43  ;;  %v2935_v45 = vrot.slane %v2933_v43, 4  ;;  %v396_v10 = vmax.f32 %v5813_v17, 0.0  ;;  %v465_v39 = vsel %vm5297_vm3, 0, %v464_v52 }
  0xc3   : > { %v2448_v7 = vrot.slane %v2447_v62, 4  ;;  %v2457_v27 = vor.u32 %v2456_v2, %v2452_v60  ;;  %466 = vst [vmem:[#allocation2 + $0x6c] sm:$0x1] %v465_v39  ;;  %v5935_v41 = vpack.c.bf16 %v395_v4, %v395_v4  ;;  %vm2054_vm4 = vcmask 195712   ;;  %v5955_v5 = vpop.permute.xlu1 %3774 }
  0xc4   : > { %2020 = vrot.lane.b32.xlu1 %v4813_v44, %s5246_s28  ;;  %v5940_v55 = vsel %vm5323_vm9, %v2935_v45, %v2936_v46  ;;  %v5942_v42 = vpack.c.bf16 %v396_v10, %v396_v10  ;;  %2055 = vst.msk [vmem:[#allocation3] sm:$0xff] %vm2054_vm4, %v5802_v40  ;;  %vm6937_vm5 = vcmask 261312   ;;  %v515_v17 = vsel %vm5306_vm7, 0, %v514_v6 }
  0xc5   : > { %v2453_v16 = vsel %vm5356_vm12, %v2448_v7, %v2452_v60  ;;  %v2458_v24 = vrot.slane %v2457_v27, 4  ;;  %v2269_v9 = vld [vmem:[#allocation2 + $0x60] sm:$0xf]  ;;  %v4876_v0 = vcombine.low %v5930_v54, %v5940_v55  ;;  %v757_v44 = vshrl.u32 %v5935_v41, 16  ;;  %2232 = vst.msk [vmem:[#allocation3] sm:$0xff] %vm6937_vm5, %v5832_v11 }
  0xc6   : > { %516 = vst [vmem:[#allocation2 + $0x74] sm:$0x1] %v515_v17  ;;  %v5191_v40 = vld [vmem:[#allocation2 + $0x60] sm:$0xff]   ;;  %v2465_v34 = vshrl.u32 %v2269_v9, 16  ;;  %v5959_v13 = vadd.f32 %v5654_v25, %v5819_v15  ;;  %v5963_v52 = vadd.f32 %v5654_v25, %v5846_v21  ;;  %v5050_v32 = vunpack.c.h.bf16 %v5773_v18  ;;  %v1685_v29 = vpop.permute.xlu0 %1684 }
  0xc7   : > { %v2270_v20 = vld [vmem:[#allocation2 + $0x64] sm:$0xf]  ;;  %v2463_v49 = vsel %vm5356_vm12, %v2458_v24, %v2462_v22  ;;  %v2271_v11 = vld [vmem:[#allocation2 + $0x68] sm:$0x1]  ;;  %v2468_v26 = vshll.u32 %v2269_v9, 16  ;;  %1732 = vst.msk [vmem:[#allocation3 + $0x8] sm:$0xff] %vm1730_vm2, %v1685_v29 }
  0xc8   : > { %v2474_v36 = vshll.u32 %v2270_v20, 16  ;;  %v2478_v35 = vshrl.u32 %v2270_v20, 16  ;;  %2197 = vrot.lane.b32.xlu1 %v5191_v40, %s5248_s30  ;;  %v4844_v59 = vcombine.low %v2453_v16, %v2463_v49  ;;  %v2467_v30 = vrot.slane %v2465_v34, 4  ;;  %v2814_v58 = vld [vmem:[#allocation2 + $0x60] sm:$0xe]  ;;  %2056 = vst.msk [vmem:[#allocation3 + $0x8] sm:$0xff] %vm2054_vm4, %v5876_v50 }
  0xc9   : > { %v2484_v15 = vshll.u32 %v2271_v11, 16  ;;  %v2815_v60 = vld [vmem:[#allocation2 + $0x64] sm:$0xf]  ;;  %v5973_v25 = vld [vmem:[%s6928_s1] ss:$0 sm:$0xff]  ;;  %v2470_v61 = vrot.slane %v2468_v26, 5 }
  0xca   : > { %v5978_v21 = vmul.f32 %v5973_v25, %v5049_v63  ;;  %v2476_v43 = vrot.slane %v2474_v36, 5  ;;  %v2480_v46 = vrot.slane %v2478_v35, 4  ;;  %v2816_v62 = vld [vmem:[#allocation2 + $0x68] sm:$0x1]  ;;  %v4861_v2 = vrot.slane %v2814_v58, 9  ;;  %2740 = vrot.lane.b32.xlu0 %v4844_v59, %s5252_s9  ;;  %2233 = vst.msk [vmem:[#allocation3 + $0x8] sm:$0xff] %vm6937_vm5, %v5828_v19  ;;  %v1687_v27 = vpop.permute.xlu1 %1686 }
  0xcb   : > { %v2486_v22 = vrot.slane %v2484_v15, 5  ;;  %v2940_v4 = vrot.slane %v2815_v60, 5  ;;  %v2943_v6 = vrot.slane %v2816_v62, 5  ;;  %v759_v54 = vrot.slane %v757_v44, 7  ;;  %v998_v7 = vld [vmem:[#allocation2 + $0x6c] sm:$0xf] }
  0xcc   : > { %v2471_v45 = vor.u32 %v2470_v61, %v2467_v30  ;;  %v2481_v63 = vor.u32 %v2480_v46, %v2476_v43  ;;  %v760_v10 = vshll.u32 %v5935_v41, 16  ;;  %v765_v39 = vshrl.u32 %v5942_v42, 16  ;;  %v3310_v24 = vld [vmem:[#allocation2 + $0x60] sm:$0xf]  ;;  %1733 = vst.msk [vmem:[#allocation3 + $0x10] sm:$0xff] %vm1730_vm2, %v1687_v27 }
  0xcd   : > { %v5989_v50 = vsel %vm5323_vm9, %v4861_v2, %v2940_v4  ;;  %v2942_v55 = vrot.slane %v2940_v4, 4  ;;  %v763_v17 = vrot.slane %v759_v54, 4  ;;  %v768_v16 = vshll.u32 %v5942_v42, 16  ;;  %v3311_v41 = vld [vmem:[#allocation2 + $0x64] sm:$0xf]  ;;  %2057 = vst.msk [vmem:[#allocation3 + $0x10] sm:$0xff] %vm2054_vm4, %v5926_v8 }
  0xce   : > { %v2472_v19 = vrot.slane %v2471_v45, 4  ;;  %v2482_v9 = vrot.slane %v2481_v63, 4  ;;  %v762_v44 = vor.u32 %v760_v10, %v759_v54  ;;  %v767_v40 = vrot.slane %v765_v39, 7  ;;  %3061 = vrot.lane.b32.xlu0 %v4876_v0, %s5250_s7  ;;  %v5193_v34 = vld [vmem:[#allocation2 + $0x60] sm:$0xff]   ;;  %v3312_v49 = vld [vmem:[#allocation2 + $0x68] sm:$0x1]  ;;  %v6014_v10 = vpop.permute.xlu0 %2728 }
  0xcf   : > { %v2944_v20 = vsel %vm5323_vm9, %v2942_v55, %v2943_v6  ;;  %v3485_v11 = vshrl.u32 %v3310_v24, 16  ;;  %v3488_v42 = vshll.u32 %v3310_v24, 16  ;;  %v3494_v26 = vshll.u32 %v3311_v41, 16  ;;  %2234 = vst.msk [vmem:[#allocation3 + $0x10] sm:$0xff] %vm6937_vm5, %v5856_v53  ;;  %v1002_v29 = vld [vmem:[#allocation2 + $0x74] sm:$0x1] }
  0xd0   : > { %v2477_v36 = vsel %vm5356_vm12, %v2472_v19, %v2476_v43  ;;  %v2487_v35 = vsel %vm5356_vm12, %v2482_v9, %v2486_v22  ;;  %v4877_v8 = vcombine.low %v5989_v50, %v2944_v20  ;;  %v770_v0 = vor.u32 %v768_v16, %v767_v40  ;;  %v3855_v59 = vld [vmem:[#allocation2 + $0x60] sm:$0xe]  ;;  %v3856_v30 = vld [vmem:[#allocation2 + $0x64] sm:$0xf]  ;;  %v3857_v46 = vld [vmem:[#allocation2 + $0x68] sm:$0x1] }
  0xd1   : > { %v4845_v15 = vcombine.low %v2477_v36, %v2487_v35  ;;  %v772_v58 = vrot.slane %v767_v40, 4  ;;  %v999_v60 = vsel %vm5378_vm13, %v762_v44, %v998_v7  ;;  %v3487_v61 = vrot.slane %v3485_v11, 4  ;;  %v1223_v53 = vld [vmem:[#allocation2 + $0x60] sm:$0xf]  ;;  %v1224_v63 = vld [vmem:[#allocation2 + $0x64] sm:$0xf] }
  0xd2   : > { %v771_v43 = vsel %vm5386_vm14, %v763_v17, %v770_v0  ;;  %1000 = vst [vmem:[#allocation2 + $0x6c] sm:$0xf] %v999_v60  ;;  %v3490_v62 = vrot.slane %v3488_v42, 5  ;;  %v3496_v2 = vrot.slane %v3494_v26, 5  ;;  %v3498_v22 = vshrl.u32 %v3311_v41, 16  ;;  %3239 = vrot.lane.b32.xlu0 %v5193_v34, %s5249_s6  ;;  %v6031_v26 = vld [vmem:[%s5330_s23 + $0x58] sm:$0xff]  }
  0xd3   : > { %2742 = vrot.lane.b32.xlu1 %v4845_v15, %s5252_s9  ;;  %1001 = vst.msk [vmem:[#allocation2 + $0x70] sm:$0xf] %vm427_vm0, %v771_v43  ;;  %v3504_v4 = vshll.u32 %v3312_v49, 16  ;;  %v1003_v6 = vsel %vm5297_vm3, %v772_v58, %v1002_v29  ;;  %v4924_v54 = vrot.slane %v3855_v59, 9  ;;  %v3977_v45 = vrot.slane %v3856_v30, 5  ;;  %v1689_v17 = vpop.permute.xlu1 %1688 }
  0xd4   : > { %v3491_v39 = vor.u32 %v3490_v62, %v3487_v61  ;;  %v3500_v7 = vrot.slane %v3498_v22, 4  ;;  %1004 = vst [vmem:[#allocation2 + $0x74] sm:$0x1] %v1003_v6  ;;  %v3980_v27 = vrot.slane %v3857_v46, 5  ;;  %v1225_v50 = vld [vmem:[#allocation2 + $0x68] sm:$0x1]  ;;  %v6040_v15 = vmul.f32 %v5973_v25, %v5050_v32 }
  0xd5   : > { %v1443_v55 = vshrl.u32 %v1223_v53, 16  ;;  %v3506_v16 = vrot.slane %v3504_v4, 5  ;;  %v6018_v24 = vsel %vm5323_vm9, %v4924_v54, %v3977_v45  ;;  %v3979_v19 = vrot.slane %v3977_v45, 4  ;;  %1734 = vst.msk [vmem:[#allocation3 + $0x18] sm:$0xff] %vm1730_vm2, %v1689_v17  ;;  %v6051_v43 = vld [vmem:[%s6929_s2] ss:$0 sm:$0xff] }
  0xd6   : > { %v1446_v9 = vshll.u32 %v1223_v53, 16  ;;  %v3492_v44 = vrot.slane %v3491_v39, 4  ;;  %v3501_v40 = vor.u32 %v3500_v7, %v3496_v2  ;;  %v1452_v20 = vshll.u32 %v1224_v63, 16  ;;  %2058 = vst.msk [vmem:[#allocation3 + $0x18] sm:$0xff] %vm2054_vm4, %v5908_v38  ;;  %v6046_v53 = vld [vmem:[#allocation2 + $0x60] sm:$0xe] }
  0xd7   : > { %v1445_v41 = vrot.slane %v1443_v55, 4  ;;  %3063 = vrot.lane.b32.xlu1 %v4877_v8, %s5250_s7  ;;  %v6026_v34 = vsel %vm5323_vm9, %v3979_v19, %v3980_v27  ;;  %v1456_v11 = vshrl.u32 %v1224_v63, 16  ;;  %v1462_v42 = vshll.u32 %v1225_v50, 16  ;;  %2235 = vst.msk [vmem:[#allocation3 + $0x18] sm:$0xff] %vm6937_vm5, %v5860_v47 }
  0xd8   : > { %v1448_v49 = vrot.slane %v1446_v9, 5  ;;  %v3497_v36 = vsel %vm5356_vm12, %v3492_v44, %v3496_v2  ;;  %v3502_v35 = vrot.slane %v3501_v40, 4  ;;  %v4940_v38 = vcombine.low %v6018_v24, %v6026_v34  ;;  %v6042_v47 = vpop.permute.xlu0 %3772 }
  0xd9   : > { %v1454_v8 = vrot.slane %v1452_v20, 5  ;;  %v3313_v0 = vld [vmem:[#allocation2 + $0x6c] sm:$0xf]  ;;  %v1458_v59 = vrot.slane %v1456_v11, 4  ;;  %v1464_v30 = vrot.slane %v1462_v42, 5  ;;  %v6055_v18 = vadd.f32 %v6051_v43, %v5978_v21 }
  0xda   : > { %v1449_v29 = vor.u32 %v1448_v49, %v1445_v41  ;;  %v5194_v58 = vld [vmem:[#allocation2 + $0x6c] sm:$0xff]   ;;  %v3507_v60 = vsel %vm5356_vm12, %v3502_v35, %v3506_v16  ;;  %v3509_v46 = vshrl.u32 %v3313_v0, 16  ;;  %v5053_v32 = vunpack.c.l.bf16 %v6031_v26 }
  0xdb   : > { %v3314_v61 = vld [vmem:[#allocation2 + $0x70] sm:$0xf]  ;;  %v4908_v62 = vcombine.low %v3497_v36, %v3507_v60  ;;  %v3315_v2 = vld [vmem:[#allocation2 + $0x74] sm:$0x1]  ;;  %v3512_v22 = vshll.u32 %v3313_v0, 16  ;;  %3241 = vrot.lane.b32.xlu1 %v5194_v58, %s5249_s6  ;;  %v1459_v39 = vor.u32 %v1458_v59, %v1454_v8  ;;  %v4798_v42 = vrot.slane %v6046_v53, 9 }
  0xdc   : > { %v3518_v4 = vshll.u32 %v3314_v61, 16  ;;  %v3522_v6 = vshrl.u32 %v3314_v61, 16  ;;  %v3511_v54 = vrot.slane %v3509_v46, 4  ;;  %v3528_v45 = vshll.u32 %v3315_v2, 16  ;;  %v3858_v7 = vld [vmem:[#allocation2 + $0x6c] sm:$0xe]  ;;  %v6062_v40 = vpop.permute.xlu0 %2732 }
  0xdd   : > { %v1450_v63 = vrot.slane %v1449_v29, 4  ;;  %3784 = vrot.lane.b32.xlu0 %v4908_v62, %s5253_s10  ;;  %v3514_v27 = vrot.slane %v3512_v22, 5  ;;  %v3859_v55 = vld [vmem:[#allocation2 + $0x70] sm:$0xf]  ;;  %v4925_v17 = vrot.slane %v3858_v7, 9  ;;  %v1460_v19 = vrot.slane %v1459_v39, 4 }
  0xde   : > { %v3520_v50 = vrot.slane %v3518_v4, 5  ;;  %v3524_v21 = vrot.slane %v3522_v6, 4  ;;  %v3530_v16 = vrot.slane %v3528_v45, 5  ;;  %v3860_v9 = vld [vmem:[#allocation2 + $0x74] sm:$0x1]  ;;  %v3984_v44 = vrot.slane %v3859_v55, 5 }
  0xdf   : > { %v1455_v24 = vsel %vm5356_vm12, %v1450_v63, %v1454_v8  ;;  %v3515_v41 = vor.u32 %v3514_v27, %v3511_v54  ;;  %v3987_v34 = vrot.slane %v3860_v9, 5  ;;  %v1226_v49 = vld [vmem:[#allocation2 + $0x6c] sm:$0xf]  ;;  %v1227_v11 = vld [vmem:[#allocation2 + $0x70] sm:$0xf]  ;;  %v1465_v36 = vsel %vm5356_vm12, %v1460_v19, %v1464_v30 }
  0xe0   : > { %v3525_v20 = vor.u32 %v3524_v21, %v3520_v50  ;;  %v3985_v35 = vsel %vm5323_vm9, %v4925_v17, %v3984_v44  ;;  %v3986_v0 = vrot.slane %v3984_v44, 4  ;;  %v1228_v8 = vld [vmem:[#allocation2 + $0x74] sm:$0x1]  ;;  %v1467_v29 = vshrl.u32 %v1226_v49, 16  ;;  %v1772_v59 = vld [vmem:[#allocation2 + $0x64] sm:$0xf]  ;;  %v6072_v45 = vpop.permute.xlu0 %3053 }
  0xe1   : > { %v1773_v58 = vld [vmem:[#allocation2 + $0x68] sm:$0x1]  ;;  %v1774_v60 = vld [vmem:[#allocation2 + $0x6c] sm:$0xe]  ;;  %v3516_v61 = vrot.slane %v3515_v41, 4  ;;  %4105 = vrot.lane.b32.xlu0 %v4940_v38, %s5251_s8  ;;  %v4782_v62 = vcombine.low %v1455_v24, %v1465_v36  ;;  %v1470_v2 = vshll.u32 %v1226_v49, 16 }
  0xe2   : > { %v3526_v46 = vrot.slane %v3525_v20, 4  ;;  %v1775_v22 = vld [vmem:[#allocation2 + $0x70] sm:$0xf]  ;;  %v3988_v53 = vsel %vm5323_vm9, %v3986_v0, %v3987_v34  ;;  %v1469_v30 = vrot.slane %v1467_v29, 4  ;;  %v1476_v4 = vshll.u32 %v1227_v11, 16 }
  0xe3   : > { %v1480_v6 = vshrl.u32 %v1227_v11, 16  ;;  %v1776_v54 = vld [vmem:[#allocation2 + $0x74] sm:$0x1]  ;;  %v3521_v63 = vsel %vm5356_vm12, %v3516_v61, %v3520_v50  ;;  %v4941_v7 = vcombine.low %v3985_v35, %v3988_v53  ;;  %v1472_v38 = vrot.slane %v1470_v2, 5  ;;  %v467_v49 = vld [vmem:[#allocation2 + $0x78] sm:$0x1] }
  0xe4   : > { %v3531_v39 = vsel %vm5356_vm12, %v3526_v46, %v3530_v16  ;;  %v1478_v21 = vrot.slane %v1476_v4, 5  ;;  %v1486_v17 = vshll.u32 %v1228_v8, 16  ;;  %v1904_v19 = vrot.slane %v1772_v59, 5  ;;  %v6080_v16 = vpop.permute.xlu1 %2734  ;;  %v6088_v61 = vpop.permute.xlu0 %3231  ;;  %v2274_v53 = vld [vmem:[#allocation2 + $0x74] sm:$0x1] }
  0xe5   : > { %v4909_v27 = vcombine.low %v3521_v63, %v3531_v39  ;;  %v1482_v55 = vrot.slane %v1480_v6, 4  ;;  %4107 = vrot.lane.b32.xlu0 %v4941_v7, %s5251_s8  ;;  %v1473_v24 = vor.u32 %v1472_v38, %v1469_v30  ;;  %v1907_v9 = vrot.slane %v1773_v58, 5  ;;  %v5215_v30 = vld [vmem:[#allocation2 + $0x48] sm:$0xff]  }
  0xe6   : > { %v4799_v44 = vrot.slane %v1774_v60, 9  ;;  %v1488_v20 = vrot.slane %v1486_v17, 5  ;;  %v1911_v50 = vrot.slane %v1775_v22, 5  ;;  %v1914_v34 = vrot.slane %v1776_v54, 5  ;;  %v2272_v60 = vld [vmem:[#allocation2 + $0x6c] sm:$0xf] }
  0xe7   : > { %3786 = vrot.lane.b32.xlu1 %v4909_v27, %s5253_s10  ;;  %v1483_v41 = vor.u32 %v1482_v55, %v1478_v21  ;;  %v1474_v11 = vrot.slane %v1473_v24, 4  ;;  %v1905_v36 = vsel %vm5323_vm9, %v4798_v42, %v1904_v19  ;;  %v1906_v35 = vrot.slane %v1904_v19, 4  ;;  %v2273_v22 = vld [vmem:[#allocation2 + $0x70] sm:$0xf]  ;;  %1189 = vst.msk [vmem:[#allocation3 + $0x30] sm:$0xff] %vm6934_vm15, %v5215_v30 }
  0xe8   : > { %v397_v0 = vmax.f32 %v5959_v13, 0.0  ;;  %v1912_v29 = vsel %vm5323_vm9, %v4799_v44, %v1911_v50  ;;  %v1913_v59 = vrot.slane %v1911_v50, 4  ;;  %v398_v58 = vmax.f32 %v5963_v52, 0.0  ;;  %v5195_v7 = vld [vmem:[#allocation2 + $0x6c] sm:$0xff]   ;;  %v3056_v44 = vpop.permute.xlu1 %3055 }
  0xe9   : > { %v1484_v8 = vrot.slane %v1483_v41, 4  ;;  %v1479_v46 = vsel %vm5356_vm12, %v1474_v11, %v1478_v21  ;;  %v1908_v2 = vsel %vm5323_vm9, %v1906_v35, %v1907_v9  ;;  %v468_v42 = vsel %vm5297_vm3, 0, %v467_v49  ;;  %v517_v21 = vld [vmem:[#allocation2 + $0x80] sm:$0x1]  ;;  %v2817_v19 = vld [vmem:[#allocation2 + $0x6c] sm:$0xe] }
  0xea   : > { %v4993_v13 = vpack.c.bf16 %v397_v0, %v397_v0  ;;  %v4814_v4 = vcombine.low %v1905_v36, %v1908_v2  ;;  %v1915_v6 = vsel %vm5323_vm9, %v1913_v59, %v1914_v34  ;;  %469 = vst [vmem:[#allocation2 + $0x78] sm:$0x1] %v468_v42  ;;  %v4994_v54 = vpack.c.bf16 %v398_v58, %v398_v58  ;;  %v2818_v9 = vld [vmem:[#allocation2 + $0x70] sm:$0xf]  ;;  %v5216_v49 = vld [vmem:[#allocation2 + $0x54] sm:$0xff]  }
  0xeb   : > { %1698 = vrot.lane.b32.xlu1 %v4782_v62, %s5247_s29  ;;  %v1489_v52 = vsel %vm5356_vm12, %v1484_v8, %v1488_v20  ;;  %v4815_v39 = vcombine.low %v1912_v29, %v1915_v6  ;;  %v2489_v17 = vshrl.u32 %v2272_v60, 16  ;;  %v2492_v24 = vshll.u32 %v2272_v60, 16  ;;  %v2819_v8 = vld [vmem:[#allocation2 + $0x74] sm:$0x1]  ;;  %1190 = vst.msk [vmem:[#allocation3 + $0x38] sm:$0xff] %vm6934_vm15, %v5216_v49 }
  0xec   : > { %v4783_v63 = vcombine.low %v1479_v46, %v1489_v52  ;;  %v774_v38 = vshrl.u32 %v4993_v13, 16  ;;  %v777_v27 = vshll.u32 %v4993_v13, 16  ;;  %2022 = vrot.lane.b32.xlu0 %v4814_v4, %s5246_s28  ;;  %v782_v62 = vshrl.u32 %v4994_v54, 16 }
  0xed   : > { %v785_v55 = vshll.u32 %v4994_v54, 16  ;;  %v2498_v20 = vshll.u32 %v2273_v22, 16  ;;  %v2502_v50 = vshrl.u32 %v2273_v22, 16  ;;  %v2508_v34 = vshll.u32 %v2274_v53, 16  ;;  %v3777_v29 = vpop.permute.xlu0 %3776 }
  0xee   : > { %v776_v41 = vrot.slane %v774_v38, 7  ;;  %v6104_v11 = vrot.slane %v782_v62, 7  ;;  %v2491_v36 = vrot.slane %v2489_v17, 4  ;;  %v2494_v35 = vrot.slane %v2492_v24, 5  ;;  %v470_v38 = vld [vmem:[#allocation2 + $0x84] sm:$0x1] }
  0xef   : > { %1700 = vrot.lane.b32.xlu1 %v4783_v63, %s5247_s29  ;;  %v518_v0 = vsel %vm5306_vm7, 0, %v517_v21  ;;  %v2500_v60 = vrot.slane %v2498_v20, 5  ;;  %v2504_v46 = vrot.slane %v2502_v50, 4  ;;  %v2510_v22 = vrot.slane %v2508_v34, 5 }
  0xf0   : > { %v779_v59 = vor.u32 %v777_v27, %v776_v41  ;;  %v780_v58 = vrot.slane %v776_v41, 4  ;;  %519 = vst [vmem:[#allocation2 + $0x80] sm:$0x1] %v518_v0  ;;  %2199 = vrot.lane.b32.xlu0 %v5195_v7, %s5248_s30  ;;  %v787_v2 = vor.u32 %v785_v55, %v6104_v11  ;;  %v789_v42 = vrot.slane %v6104_v11, 4  ;;  %v3234_v27 = vpop.permute.xlu1 %3233  ;;  %v6184_v41 = vld [vmem:[%s5330_s23 + $0x68] sm:$0xff]  }
  0xf1   : > { %v2495_v13 = vor.u32 %v2494_v35, %v2491_v36  ;;  %v1005_v53 = vld [vmem:[#allocation2 + $0x78] sm:$0xf]  ;;  %v2505_v30 = vor.u32 %v2504_v46, %v2500_v60  ;;  %v4862_v52 = vrot.slane %v2817_v19, 9  ;;  %v2947_v4 = vrot.slane %v2818_v9, 5  ;;  %v5082_v19 = vld [vmem:[%s5330_s23 + $0x60] sm:$0xff]  }
  0xf2   : > { %v2950_v6 = vrot.slane %v2819_v8, 5  ;;  %v788_v54 = vsel %vm5386_vm14, %v780_v58, %v787_v2  ;;  %v1006_v63 = vsel %vm5378_vm13, %v779_v59, %v1005_v53  ;;  %vm2776_vm6 = vcmask 326912  }
  0xf3   : > { %2024 = vrot.lane.b32.xlu1 %v4815_v39, %s5246_s28  ;;  %v2496_v7 = vrot.slane %v2495_v13, 4  ;;  %1007 = vst [vmem:[#allocation2 + $0x78] sm:$0xf] %v1006_v63  ;;  %1008 = vst.msk [vmem:[#allocation2 + $0x7c] sm:$0xf] %vm427_vm0, %v788_v54  ;;  %v2506_v21 = vrot.slane %v2505_v30, 4  ;;  %v6120_v62 = vsel %vm5323_vm9, %v4862_v52, %v2947_v4  ;;  %v5057_v36 = vunpack.c.l.bf16 %v5082_v19 }
  0xf4   : > { %v2949_v55 = vrot.slane %v2947_v4, 4  ;;  %vm6936_vm8 = vcmask 392512   ;;  %2778 = vst.msk [vmem:[#allocation3 + $0x8] sm:$0xff] %vm2776_vm6, %v5922_v51  ;;  %2777 = vst.msk [vmem:[#allocation3] sm:$0xff] %vm2776_vm6, %v6014_v10  ;;  %v520_v39 = vld [vmem:[#allocation2 + $0x8c] sm:$0x1]  ;;  %v4098_v10 = vpop.permute.xlu0 %4097  ;;  %v5058_v58 = vunpack.c.h.bf16 %v5082_v19  ;;  %v5062_v46 = vunpack.c.h.bf16 %v6184_v41 }
  0xf5   : > { %2779 = vst.msk [vmem:[#allocation3 + $0x10] sm:$0xff] %vm2776_vm6, %v6062_v40  ;;  %2780 = vst.msk [vmem:[#allocation3 + $0x18] sm:$0xff] %vm2776_vm6, %v6080_v16  ;;  %v2501_v17 = vsel %vm5356_vm12, %v2496_v7, %v2500_v60  ;;  %vm6935_vm10 = vcmask 458112   ;;  %vm3820_vm11 = vcmask 523712   ;;  %vm4141_vm1 = vcmask 589312  }
  0xf6   : > { %3099 = vst.msk [vmem:[#allocation3 + $0x8] sm:$0xff] %vm6936_vm8, %v5886_v31  ;;  %3098 = vst.msk [vmem:[#allocation3] sm:$0xff] %vm6936_vm8, %v5864_v57  ;;  %v5206_v51 = vld [vmem:[%s6930_s3 + $0x20] ss:$0 sps:$4 sm:$0xff]   ;;  %v2511_v40 = vsel %vm5356_vm12, %v2506_v21, %v2510_v22  ;;  %v2951_v16 = vsel %vm5323_vm9, %v2949_v55, %v2950_v6  ;;  %v368_v57 = vadd.f32 %v6051_v43, %v6040_v15  ;;  %v399_v31 = vmax.f32 %v6055_v18, 0.0 }
  0xf7   : > { %3100 = vst.msk [vmem:[#allocation3 + $0x10] sm:$0xff] %vm6936_vm8, %v6072_v45  ;;  %3101 = vst.msk [vmem:[#allocation3 + $0x18] sm:$0xff] %vm6936_vm8, %v3056_v44  ;;  %v4846_v45 = vcombine.low %v2501_v17, %v2511_v40  ;;  %v1009_v24 = vld [vmem:[#allocation2 + $0x80] sm:$0x1]  ;;  %v521_v15 = vsel %vm5306_vm7, 0, %v520_v39  ;;  %vm4259_vm15 = vcmask 1043456   ;;  %v4878_v9 = vcombine.low %v6120_v62, %v2951_v16 }
  0xf8   : > { %3277 = vst.msk [vmem:[#allocation3 + $0x8] sm:$0xff] %vm6935_vm10, %v5849_v33  ;;  %3276 = vst.msk [vmem:[#allocation3] sm:$0xff] %vm6935_vm10, %v5841_v56  ;;  %v471_v33 = vsel %vm5297_vm3, 0, %v470_v38  ;;  %v473_v56 = vld [vmem:[#allocation2 + $0x90] sm:$0x1]  ;;  %v1010_v18 = vsel %vm5297_vm3, %v789_v42, %v1009_v24  ;;  %5159 = vmatprep.subr.msk.bf16.mxu0 %vm4259_vm15, %v5206_v51  ;;  %v5054_v44 = vunpack.c.h.bf16 %v6031_v26  ;;  %5160 = vmatprep.subr.msk.bf16.mxu1 %vm4259_vm15, %v5206_v51  ;;  %v5061_v60 = vunpack.c.l.bf16 %v6184_v41 }
  0xf9   : > { %3278 = vst.msk [vmem:[#allocation3 + $0x10] sm:$0xff] %vm6935_vm10, %v6088_v61  ;;  %3279 = vst.msk [vmem:[#allocation3 + $0x18] sm:$0xff] %vm6935_vm10, %v3234_v27  ;;  %v6169_v61 = vpack.c.bf16 %v399_v31, %v399_v31  ;;  %2744 = vrot.lane.b32.xlu0 %v4846_v45, %s5252_s9  ;;  %vm4210_vm10 = vcmask 588800   ;;  %v474_v34 = vsel %vm5297_vm3, 0, %v473_v56  ;;  %v6207_v54 = vmul.f32 %v5973_v25, %v5057_v36  ;;  %v6363_v41 = vld [vmem:[%s6929_s2] ss:$0 sm:$0xff] }
  0xfa   : > { %3822 = vst.msk [vmem:[#allocation3 + $0x8] sm:$0xff] %vm3820_vm11, %v5955_v5  ;;  %3821 = vst.msk [vmem:[#allocation3] sm:$0xff] %vm3820_vm11, %v6042_v47  ;;  %v400_v5 = vmax.f32 %v368_v57, 0.0  ;;  %v523_v47 = vld [vmem:[#allocation2 + $0x98] sm:$0x1]  ;;  %v331_v26 = vmul.f32 %v5973_v25, %v5054_v44  ;;  %v4100_v59 = vpop.permute.xlu0 %4099  ;;  %v6217_v40 = vmul.f32 %v5973_v25, %v5058_v58 }
  0xfb   : > { %3823 = vst.msk [vmem:[#allocation3 + $0x10] sm:$0xff] %vm3820_vm11, %v3777_v29  ;;  %472 = vst [vmem:[#allocation2 + $0x84] sm:$0x1] %v471_v33  ;;  %v791_v20 = vshrl.u32 %v6169_v61, 16  ;;  %v794_v50 = vshll.u32 %v6169_v61, 16  ;;  %v5196_v49 = vld [vmem:[#allocation2 + $0x78] sm:$0xff]   ;;  %v3779_v6 = vpop.permute.xlu1 %3778 }
  0xfc   : > { %4143 = vst.msk [vmem:[#allocation3 + $0x8] sm:$0xff] %vm4141_vm1, %v5901_v14  ;;  %522 = vst [vmem:[#allocation2 + $0x8c] sm:$0x1] %v521_v15  ;;  %v4261_v14 = vsel %vm4259_vm15, %v5206_v51, 0  ;;  %v6191_v11 = vpack.c.bf16 %v400_v5, %v400_v5  ;;  %v2275_v35 = vld [vmem:[#allocation2 + $0x78] sm:$0xf]  ;;  %2201 = vrot.lane.b32.xlu1 %v5196_v49, %s5248_s30  ;;  %v6204_v4 = vadd.f32 %v6051_v43, %v331_v26 }
  0xfd   : > { %4142 = vst.msk [vmem:[#allocation3] sm:$0xff] %vm4141_vm1, %v5884_v37  ;;  %4144 = vst.msk [vmem:[#allocation3 + $0x10] sm:$0xff] %vm4141_vm1, %v4098_v10  ;;  %v330_v37 = vmul.f32 %v5973_v25, %v5053_v32  ;;  %5116 = vmatpush3.bf16.msra.mxu0 %v4261_v14  ;;  %v524_v32 = vsel %vm5306_vm7, 0, %v523_v47  ;;  %5158 = vmatpush3.bf16.msra.mxu1 %v4261_v14  ;;  %v2276_v0 = vld [vmem:[#allocation2 + $0x7c] sm:$0xf]  ;;  %v2513_v2 = vshrl.u32 %v2275_v35, 16 }
  0xfe   : > { %1011 = vst [vmem:[#allocation2 + $0x80] sm:$0x1] %v1010_v18  ;;  %475 = vst [vmem:[#allocation2 + $0x90] sm:$0x1] %v474_v34  ;;  %v2820_v8 = vld [vmem:[#allocation2 + $0x78] sm:$0xe]  ;;  %3065 = vrot.lane.b32.xlu0 %v4878_v9, %s5250_s7  ;;  %v2015_v16 = vpop.permute.xlu0 %2014 }
  0xff   : > { %v6197_v29 = vadd.f32 %v6051_v43, %v330_v37  ;;  %525 = vst [vmem:[#allocation2 + $0x98] sm:$0x1] %v524_v32  ;;  %v2516_v42 = vshll.u32 %v2275_v35, 16  ;;  %v2522_v13 = vshll.u32 %v2276_v0, 16  ;;  %v2526_v22 = vshrl.u32 %v2276_v0, 16  ;;  %v5199_v21 = vld [vmem:[#allocation2 + $0x78] sm:$0xff]   ;;  %v1691_v9 = vpop.permute.xlu1 %1690 }
 0x100   : > { %v2821_v53 = vld [vmem:[#allocation2 + $0x7c] sm:$0xf]  ;;  %v4863_v30 = vrot.slane %v2820_v8, 9  ;;  %v2515_v63 = vrot.slane %v2513_v2, 4  ;;  %3824 = vst.msk [vmem:[#allocation3 + $0x18] sm:$0xff] %vm3820_vm11, %v3779_v6  ;;  %v793_v10 = vrot.slane %v791_v20, 7 }
 0x101   : > { %v2954_v52 = vrot.slane %v2821_v53, 5  ;;  %v2518_v7 = vrot.slane %v2516_v42, 5  ;;  %v2524_v38 = vrot.slane %v2522_v13, 5  ;;  %v2528_v27 = vrot.slane %v2526_v22, 4  ;;  %4145 = vst.msk [vmem:[#allocation3 + $0x18] sm:$0xff] %vm4141_vm1, %v4100_v59 }
 0x102   : > { %3243 = vrot.lane.b32.xlu0 %v5199_v21, %s5249_s6  ;;  %v1012_v33 = vld [vmem:[#allocation2 + $0x84] sm:$0xf]  ;;  %v3316_v15 = vld [vmem:[#allocation2 + $0x78] sm:$0xf]  ;;  %v796_v56 = vor.u32 %v794_v50, %v793_v10  ;;  %v797_v18 = vrot.slane %v793_v10, 4  ;;  %v799_v5 = vshrl.u32 %v6191_v11, 16  ;;  %v2192_v35 = vpop.permute.xlu0 %2191 }
 0x103   : > { %v6212_v17 = vsel %vm5323_vm9, %v4863_v30, %v2954_v52  ;;  %v2956_v51 = vrot.slane %v2954_v52, 4  ;;  %v2519_v57 = vor.u32 %v2518_v7, %v2515_v63  ;;  %v2529_v31 = vor.u32 %v2528_v27, %v2524_v38  ;;  %v3317_v47 = vld [vmem:[#allocation2 + $0x7c] sm:$0xf]  ;;  %v4159_v19 = vld [vmem:[#allocation3 + $0x8] sm:$0xff]  ;;  %1735 = vst.msk [vmem:[#allocation3 + $0x20] sm:$0xff] %vm1730_vm2, %v1691_v9  ;;  %v1693_v6 = vpop.permute.xlu1 %1692 }
 0x104   : > { %v4158_v62 = vld [vmem:[#allocation3] sm:$0xff]  ;;  %v802_v61 = vshll.u32 %v6191_v11, 16  ;;  %v4160_v34 = vld [vmem:[#allocation3 + $0x10] sm:$0xff]  ;;  %v801_v49 = vrot.slane %v799_v5, 7  ;;  %v1013_v11 = vsel %vm5378_vm13, %v796_v56, %v1012_v33  ;;  %v3533_v32 = vshrl.u32 %v3316_v15, 16  ;;  %2059 = vst.msk [vmem:[#allocation3 + $0x20] sm:$0xff] %vm2054_vm4, %v2015_v16 }
 0x105   : > { %v2277_v55 = vld [vmem:[#allocation2 + $0x80] sm:$0x1]  ;;  %5117 = vmatprep.mubr.msk.bf16.mxu0 %vm4210_vm10, %v4158_v62  ;;  %v2520_v14 = vrot.slane %v2519_v57, 4  ;;  %v2530_v44 = vrot.slane %v2529_v31, 4  ;;  %v1016_v36 = vld [vmem:[#allocation2 + $0x8c] sm:$0x1] }
 0x106   : > { %v2822_v39 = vld [vmem:[#allocation2 + $0x80] sm:$0x1]  ;;  %v2532_v45 = vshll.u32 %v2277_v55, 16  ;;  %5118 = vmatmul.mubr.msk.bf16.vlgmr.msra.gmra.mrb[0].mxu0 %vm4210_vm10, %v4159_v19  ;;  %1014 = vst [vmem:[#allocation2 + $0x84] sm:$0xf] %v1013_v11  ;;  %v3536_v59 = vshll.u32 %v3316_v15, 16  ;;  %v804_v22 = vor.u32 %v802_v61, %v801_v49 }
 0x107   : > { %v2957_v24 = vrot.slane %v2822_v39, 5  ;;  %v3318_v26 = vld [vmem:[#allocation2 + $0x80] sm:$0x1]  ;;  %5121 = vmatprep.mubr.msk.bf16.mxu0 %vm4210_vm10, %v4160_v34  ;;  %v2525_v0 = vsel %vm5356_vm12, %v2520_v14, %v2524_v38  ;;  %v3542_v58 = vshll.u32 %v3317_v47, 16  ;;  %v3861_v2 = vld [vmem:[#allocation2 + $0x78] sm:$0xe] }
 0x108   : > { %v2534_v37 = vrot.slane %v2532_v45, 5  ;;  %v3862_v42 = vld [vmem:[#allocation2 + $0x7c] sm:$0xf]  ;;  %2236 = vst.msk [vmem:[#allocation3 + $0x20] sm:$0xff] %vm6937_vm5, %v2192_v35  ;;  %v806_v53 = vrot.slane %v801_v49, 4  ;;  %v3535_v30 = vrot.slane %v3533_v32, 4  ;;  %v805_v62 = vsel %vm5386_vm14, %v797_v18, %v804_v22  ;;  %v2017_v18 = vpop.permute.xlu1 %2016  ;;  %v2737_v5 = vpop.permute.xlu0 %2736 }
 0x109   : > { %v2958_v20 = vsel %vm5323_vm9, %v2956_v51, %v2957_v24  ;;  %v3863_v52 = vld [vmem:[#allocation2 + $0x80] sm:$0x1]  ;;  %v3538_v63 = vrot.slane %v3536_v59, 5  ;;  %v3544_v7 = vrot.slane %v3542_v58, 5  ;;  %v3546_v27 = vshrl.u32 %v3317_v47, 16  ;;  %1736 = vst.msk [vmem:[#allocation3 + $0x28] sm:$0xff] %vm1730_vm2, %v1693_v6 }
 0x10a   : > { %v4879_v50 = vcombine.low %v6212_v17, %v2958_v20  ;;  %v2535_v8 = vsel %vm5356_vm12, %v2530_v44, %v2534_v37  ;;  %v3552_v38 = vshll.u32 %v3318_v26, 16  ;;  %v1229_v21 = vld [vmem:[#allocation2 + $0x78] sm:$0xf]  ;;  %v1017_v55 = vsel %vm5297_vm3, %v806_v53, %v1016_v36  ;;  %v1230_v51 = vld [vmem:[#allocation2 + $0x7c] sm:$0xf]  ;;  %v4161_v45 = vld [vmem:[#allocation3 + $0x18] sm:$0xff] }
 0x10b   : > { %v4847_v13 = vcombine.low %v2525_v0, %v2535_v8  ;;  %v4926_v39 = vrot.slane %v3861_v2, 9  ;;  %v3991_v17 = vrot.slane %v3862_v42, 5  ;;  %1015 = vst.msk [vmem:[#allocation2 + $0x88] sm:$0xf] %vm427_vm0, %v805_v62  ;;  %v3539_v10 = vor.u32 %v3538_v63, %v3535_v30  ;;  %1018 = vst [vmem:[#allocation2 + $0x8c] sm:$0x1] %v1017_v55 }
 0x10c   : > { %v3548_v16 = vrot.slane %v3546_v27, 4  ;;  %v3554_v57 = vrot.slane %v3552_v38, 5  ;;  %v3994_v31 = vrot.slane %v3863_v52, 5  ;;  %v1491_v15 = vshrl.u32 %v1229_v21, 16  ;;  %v1231_v19 = vld [vmem:[#allocation2 + $0x80] sm:$0x1]  ;;  %v3058_v58 = vpop.permute.xlu0 %3057 }
 0x10d   : > { %2746 = vrot.lane.b32.xlu1 %v4847_v13, %s5252_s9  ;;  %v6245_v24 = vsel %vm5323_vm9, %v4926_v39, %v3991_v17  ;;  %v3993_v33 = vrot.slane %v3991_v17, 4  ;;  %v1494_v56 = vshll.u32 %v1229_v21, 16  ;;  %v3540_v61 = vrot.slane %v3539_v10, 4  ;;  %2060 = vst.msk [vmem:[#allocation3 + $0x28] sm:$0xff] %vm2054_vm4, %v2017_v18  ;;  %v3319_v44 = vld [vmem:[#allocation2 + $0x84] sm:$0xf]  ;;  %v2194_v27 = vpop.permute.xlu1 %2193 }
 0x10e   : > { %v3549_v47 = vor.u32 %v3548_v16, %v3544_v7  ;;  %v1500_v9 = vshll.u32 %v1230_v51, 16  ;;  %v1504_v14 = vshrl.u32 %v1230_v51, 16  ;;  %5122 = vmatmul.mubr.msk.bf16.gmra.mrb[4].mxu0 %vm4210_vm10, %v4161_v45  ;;  %2781 = vst.msk [vmem:[#allocation3 + $0x20] sm:$0xff] %vm2776_vm6, %v2737_v5  ;;  %v1493_v20 = vrot.slane %v1491_v15, 4  ;;  %v3864_v59 = vld [vmem:[#allocation2 + $0x84] sm:$0xe] }
 0x10f   : > { %v3995_v37 = vsel %vm5323_vm9, %v3993_v33, %v3994_v31  ;;  %v1496_v34 = vrot.slane %v1494_v56, 5  ;;  %v6255_v49 = vadd.f32 %v6051_v43, %v6207_v54  ;;  %v3545_v11 = vsel %vm5356_vm12, %v3540_v61, %v3544_v7  ;;  %3102 = vst.msk [vmem:[#allocation3 + $0x20] sm:$0xff] %vm6936_vm8, %v3058_v58  ;;  %v1232_v63 = vld [vmem:[#allocation2 + $0x84] sm:$0xf]  ;;  %v1777_v15 = vld [vmem:[#allocation2 + $0x78] sm:$0xe] }
 0x110   : > { %v3550_v26 = vrot.slane %v3549_v47, 4  ;;  %v3557_v32 = vshrl.u32 %v3319_v44, 16  ;;  %v3560_v36 = vshll.u32 %v3319_v44, 16  ;;  %v4942_v35 = vcombine.low %v6245_v24, %v3995_v37  ;;  %2237 = vst.msk [vmem:[#allocation3 + $0x28] sm:$0xff] %vm6937_vm5, %v2194_v27  ;;  %v1778_v44 = vld [vmem:[#allocation2 + $0x7c] sm:$0xf] }
 0x111   : > { %3067 = vrot.lane.b32.xlu1 %v4879_v50, %s5250_s7  ;;  %v1497_v0 = vor.u32 %v1496_v34, %v1493_v20  ;;  %v1502_v50 = vrot.slane %v1500_v9, 5  ;;  %v1506_v8 = vrot.slane %v1504_v14, 4  ;;  %v1510_v54 = vshll.u32 %v1231_v19, 16  ;;  %v3236_v19 = vpop.permute.xlu0 %3235  ;;  %v1779_v37 = vld [vmem:[#allocation2 + $0x80] sm:$0x1] }
 0x112   : > { %v3555_v2 = vsel %vm5356_vm12, %v3550_v26, %v3554_v57  ;;  %v3559_v42 = vrot.slane %v3557_v32, 4  ;;  %v3562_v13 = vrot.slane %v3560_v36, 5  ;;  %v5201_v22 = vld [vmem:[#allocation2 + $0x84] sm:$0xff]   ;;  %v6265_v7 = vadd.f32 %v6051_v43, %v6217_v40  ;;  %v3321_v38 = vld [vmem:[#allocation2 + $0x8c] sm:$0x1] }
 0x113   : > { %v4910_v53 = vcombine.low %v3545_v11, %v3555_v2  ;;  %v3320_v30 = vld [vmem:[#allocation2 + $0x88] sm:$0xf]  ;;  %v1498_v52 = vrot.slane %v1497_v0, 4  ;;  %v1507_v6 = vor.u32 %v1506_v8, %v1502_v50  ;;  %v1512_v39 = vrot.slane %v1510_v54, 5  ;;  %v3866_v43 = vld [vmem:[#allocation2 + $0x8c] sm:$0x1] }
 0x114   : > { %v3563_v21 = vor.u32 %v3562_v13, %v3559_v42  ;;  %v3566_v62 = vshll.u32 %v3320_v30, 16  ;;  %v3570_v55 = vshrl.u32 %v3320_v30, 16  ;;  %v3576_v17 = vshll.u32 %v3321_v38, 16  ;;  %v3865_v16 = vld [vmem:[#allocation2 + $0x88] sm:$0xf] }
 0x115   : > { %3245 = vrot.lane.b32.xlu1 %v5201_v22, %s5249_s6  ;;  %3788 = vrot.lane.b32.xlu0 %v4910_v53, %s5253_s10  ;;  %v1503_v51 = vsel %vm5356_vm12, %v1498_v52, %v1502_v50  ;;  %v1508_v10 = vrot.slane %v1507_v6, 4  ;;  %v6275_v40 = vmul.f32 %v5973_v25, %v5061_v60  ;;  %v4927_v24 = vrot.slane %v3864_v59, 9  ;;  %v1233_v33 = vld [vmem:[#allocation2 + $0x88] sm:$0xf]  ;;  %v1234_v47 = vld [vmem:[#allocation2 + $0x8c] sm:$0x1] }
 0x116   : > { %v3564_v57 = vrot.slane %v3563_v21, 4  ;;  %v3568_v31 = vrot.slane %v3566_v62, 5  ;;  %v3572_v45 = vrot.slane %v3570_v55, 4  ;;  %v3578_v56 = vrot.slane %v3576_v17, 5  ;;  %v1780_v32 = vld [vmem:[#allocation2 + $0x84] sm:$0xe] }
 0x117   : > { %v1513_v18 = vsel %vm5356_vm12, %v1508_v10, %v1512_v39  ;;  %v3998_v5 = vrot.slane %v3865_v16, 5  ;;  %v4001_v61 = vrot.slane %v3866_v43, 5  ;;  %v1515_v60 = vshrl.u32 %v1232_v63, 16  ;;  %v1781_v59 = vld [vmem:[#allocation2 + $0x88] sm:$0xf] }
 0x118   : > { %v3569_v9 = vsel %vm5356_vm12, %v3564_v57, %v3568_v31  ;;  %v3573_v14 = vor.u32 %v3572_v45, %v3568_v31  ;;  %v4784_v25 = vcombine.low %v1503_v51, %v1513_v18  ;;  %vm6950_vm15 = vcmask 458112   ;;  %v1782_v54 = vld [vmem:[#allocation2 + $0x8c] sm:$0x1]  ;;  %v2278_v39 = vld [vmem:[#allocation2 + $0x84] sm:$0xf] }
 0x119   : > { %3280 = vst.msk [vmem:[#allocation3 + $0x20] sm:$0xff] %vm6950_vm15, %v3236_v19  ;;  %4109 = vrot.lane.b32.xlu0 %v4942_v35, %s5251_s8  ;;  %v3999_v20 = vsel %vm5323_vm9, %v4927_v24, %v3998_v5  ;;  %v4000_v34 = vrot.slane %v3998_v5, 4  ;;  %v1518_v11 = vshll.u32 %v1232_v63, 16  ;;  %v1524_v26 = vshll.u32 %v1233_v33, 16  ;;  %v2279_v18 = vld [vmem:[#allocation2 + $0x88] sm:$0xf] }
 0x11a   : > { %v3574_v36 = vrot.slane %v3573_v14, 4  ;;  %v1517_v0 = vrot.slane %v1515_v60, 4  ;;  %v1528_v50 = vshrl.u32 %v1233_v33, 16  ;;  %v1534_v8 = vshll.u32 %v1234_v47, 16  ;;  %v2739_v17 = vpop.permute.xlu1 %2738  ;;  %v2280_v14 = vld [vmem:[#allocation2 + $0x8c] sm:$0x1] }
 0x11b   : > { %v4002_v58 = vsel %vm5323_vm9, %v4000_v34, %v4001_v61  ;;  %v1520_v2 = vrot.slane %v1518_v11, 5  ;;  %v1526_v42 = vrot.slane %v1524_v26, 5  ;;  %v4800_v13 = vrot.slane %v1777_v15, 9  ;;  %2782 = vst.msk [vmem:[#allocation3 + $0x28] sm:$0xff] %vm2776_vm6, %v2739_v17  ;;  %v2823_v34 = vld [vmem:[#allocation2 + $0x84] sm:$0xe] }
 0x11c   : > { %v3579_v35 = vsel %vm5356_vm12, %v3574_v36, %v3578_v56  ;;  %v4943_v22 = vcombine.low %v3999_v20, %v4002_v58  ;;  %v1530_v53 = vrot.slane %v1528_v50, 4  ;;  %v1536_v30 = vrot.slane %v1534_v8, 5  ;;  %v2824_v11 = vld [vmem:[#allocation2 + $0x88] sm:$0xf] }
 0x11d   : > { %v4911_v52 = vcombine.low %v3569_v9, %v3579_v35  ;;  %v1521_v6 = vor.u32 %v1520_v2, %v1517_v0  ;;  %v1918_v63 = vrot.slane %v1778_v44, 5  ;;  %v1921_v27 = vrot.slane %v1779_v37, 5  ;;  %v5207_v26 = vld [vmem:[#allocation2 + $0x84] sm:$0xff]   ;;  %v1019_v0 = vld [vmem:[#allocation2 + $0x90] sm:$0xf] }
 0x11e   : > { %4111 = vrot.lane.b32.xlu0 %v4943_v22, %s5251_s8  ;;  %v1531_v38 = vor.u32 %v1530_v53, %v1526_v42  ;;  %v4801_v21 = vrot.slane %v1780_v32, 9  ;;  %v1925_v62 = vrot.slane %v1781_v59, 5  ;;  %v1928_v55 = vrot.slane %v1782_v54, 5  ;;  %v1023_v35 = vld [vmem:[#allocation2 + $0x98] sm:$0x1] }
 0x11f   : > { %3790 = vrot.lane.b32.xlu1 %v4911_v52, %s5253_s10  ;;  %v1522_v51 = vrot.slane %v1521_v6, 4  ;;  %v1919_v10 = vsel %vm5323_vm9, %v4800_v13, %v1918_v63  ;;  %v1920_v16 = vrot.slane %v1918_v63, 4  ;;  %v401_v43 = vmax.f32 %v6197_v29, 0.0  ;;  %v5221_v29 = vld [vmem:[#allocation2 + $0x60] sm:$0xff]  }
 0x120   : > { %v1532_v57 = vrot.slane %v1531_v38, 4  ;;  %v6297_v31 = vsel %vm5323_vm9, %v4801_v21, %v1925_v62  ;;  %v1927_v45 = vrot.slane %v1925_v62, 4  ;;  %v402_v24 = vmax.f32 %v6204_v4, 0.0  ;;  %v3060_v4 = vpop.permute.xlu1 %3059  ;;  %v2825_v21 = vld [vmem:[#allocation2 + $0x8c] sm:$0x1] }
 0x121   : > { %v1527_v33 = vsel %vm5356_vm12, %v1522_v51, %v1526_v42  ;;  %v1922_v15 = vsel %vm5323_vm9, %v1920_v16, %v1921_v27  ;;  %v4997_v56 = vpack.c.bf16 %v401_v43, %v401_v43  ;;  %v2537_v5 = vshrl.u32 %v2278_v39, 16  ;;  %3103 = vst.msk [vmem:[#allocation3 + $0x28] sm:$0xff] %vm6936_vm8, %v3060_v4  ;;  %v5222_v42 = vld [vmem:[#allocation2 + $0x6c] sm:$0xff]   ;;  %v3781_v52 = vpop.permute.xlu0 %3780  ;;  %v476_v51 = vld [vmem:[#allocation2 + $0x9c] sm:$0x1] }
 0x122   : > { %v1537_v61 = vsel %vm5356_vm12, %v1532_v57, %v1536_v30  ;;  %v4816_v47 = vcombine.low %v1919_v10, %v1922_v15  ;;  %v1929_v19 = vsel %vm5323_vm9, %v1927_v45, %v1928_v55  ;;  %v4998_v9 = vpack.c.bf16 %v402_v24, %v402_v24  ;;  %3825 = vst.msk [vmem:[#allocation3 + $0x20] sm:$0xff] %vm3820_vm11, %v3781_v52 }
 0x123   : > { %1702 = vrot.lane.b32.xlu1 %v4784_v25, %s5247_s29  ;;  %v4785_v60 = vcombine.low %v1527_v33, %v1537_v61  ;;  %v4817_v44 = vcombine.low %v6297_v31, %v1929_v19  ;;  %v808_v37 = vshrl.u32 %v4997_v56, 16  ;;  %v811_v20 = vshll.u32 %v4997_v56, 16  ;;  %v526_v31 = vld [vmem:[#allocation2 + $0xa4] sm:$0x1]  ;;  %v479_v19 = vld [vmem:[#allocation2 + $0xa8] sm:$0x1] }
 0x124   : > { %vm6951_vm15 = vcmask 64512   ;;  %2026 = vrot.lane.b32.xlu0 %v4816_v47, %s5246_s28  ;;  %v816_v32 = vshrl.u32 %v4998_v9, 16  ;;  %v819_v36 = vshll.u32 %v4998_v9, 16  ;;  %v2539_v50 = vrot.slane %v2537_v5, 4  ;;  %v3238_v30 = vpop.permute.xlu1 %3237 }
 0x125   : > { %1191 = vst.msk [vmem:[#allocation3 + $0x40] sm:$0xff] %vm6951_vm15, %v5221_v29  ;;  %v2540_v8 = vshll.u32 %v2278_v39, 16  ;;  %v810_v25 = vrot.slane %v808_v37, 7  ;;  %v2546_v59 = vshll.u32 %v2279_v18, 16  ;;  %v2550_v58 = vshrl.u32 %v2279_v18, 16  ;;  %v4102_v56 = vpop.permute.xlu0 %4101  ;;  %v6329_v18 = vld [vmem:[%s5330_s23 + $0x70] sm:$0xff]  }
 0x126   : > { %v2556_v2 = vshll.u32 %v2280_v14, 16  ;;  %v818_v13 = vrot.slane %v816_v32, 7  ;;  %v4864_v22 = vrot.slane %v2823_v34, 9  ;;  %v2961_v53 = vrot.slane %v2824_v11, 5  ;;  %4146 = vst.msk [vmem:[#allocation3 + $0x20] sm:$0xff] %vm4141_vm1, %v4102_v56 }
 0x127   : > { %v2542_v54 = vrot.slane %v2540_v8, 5  ;;  %1704 = vrot.lane.b32.xlu1 %v4785_v60, %s5247_s29  ;;  %v813_v6 = vor.u32 %v811_v20, %v810_v25  ;;  %v814_v63 = vrot.slane %v810_v25, 4  ;;  %v2548_v27 = vrot.slane %v2546_v59, 5  ;;  %v529_v34 = vld [vmem:[#allocation2 + $0xb0] sm:$0x1] }
 0x128   : > { %v2552_v38 = vrot.slane %v2550_v58, 4  ;;  %vm6952_vm15 = vcmask 458112   ;;  %vm6953_vm8 = vcmask 64512   ;;  %2203 = vrot.lane.b32.xlu0 %v5207_v26, %s5248_s30  ;;  %v821_v62 = vor.u32 %v819_v36, %v818_v13  ;;  %v3783_v60 = vpop.permute.xlu1 %3782  ;;  %v6376_v58 = vld [vmem:[%s5330_s23 + $0x78] sm:$0xff]   ;;  %s4974_s23 = sshll.u32 %s7077_s19, 8 }
 0x129   : > { %3281 = vst.msk [vmem:[#allocation3 + $0x28] sm:$0xff] %vm6952_vm15, %v3238_v30  ;;  %v823_v55 = vrot.slane %v818_v13, 4  ;;  %v2543_v39 = vor.u32 %v2542_v54, %v2539_v50  ;;  %v2558_v17 = vrot.slane %v2556_v2, 5  ;;  %v1020_v10 = vsel %vm5378_vm13, %v813_v6, %v1019_v0  ;;  %v4104_v0 = vpop.permute.xlu0 %4103  ;;  %vm6954_vm15 = vmmov %vm6953_vm8 }
 0x12a   : > { %1192 = vst.msk [vmem:[#allocation3 + $0x48] sm:$0xff] %vm6953_vm8, %v5222_v42  ;;  %v2553_v16 = vor.u32 %v2552_v38, %v2548_v27  ;;  %v6322_v43 = vsel %vm5323_vm9, %v4864_v22, %v2961_v53  ;;  %v2963_v57 = vrot.slane %v2961_v53, 4  ;;  %v822_v45 = vsel %vm5386_vm14, %v814_v63, %v821_v62  ;;  %1021 = vst [vmem:[#allocation2 + $0x90] sm:$0xf] %v1020_v10 }
 0x12b   : > { %v2544_v24 = vrot.slane %v2543_v39, 4  ;;  %v1024_v33 = vsel %vm5297_vm3, %v823_v55, %v1023_v35  ;;  %v2964_v15 = vrot.slane %v2825_v21, 5  ;;  %2028 = vrot.lane.b32.xlu1 %v4817_v44, %s5246_s28  ;;  %1022 = vst.msk [vmem:[#allocation2 + $0x94] sm:$0xf] %vm427_vm0, %v822_v45  ;;  %v403_v29 = vmax.f32 %v6255_v49, 0.0 }
 0x12c   : > { %v2554_v5 = vrot.slane %v2553_v16, 4  ;;  %1025 = vst [vmem:[#allocation2 + $0x98] sm:$0x1] %v1024_v33  ;;  %v404_v61 = vmax.f32 %v6265_v7, 0.0  ;;  %v477_v47 = vsel %vm5297_vm3, 0, %v476_v51  ;;  %v527_v4 = vsel %vm5306_vm7, 0, %v526_v31  ;;  %v1695_v54 = vpop.permute.xlu1 %1694 }
 0x12d   : > { %v2549_v9 = vsel %vm5356_vm12, %v2544_v24, %v2548_v27  ;;  %v2965_v14 = vsel %vm5323_vm9, %v2963_v57, %v2964_v15  ;;  %478 = vst [vmem:[#allocation2 + $0x9c] sm:$0x1] %v477_v47  ;;  %v6347_v49 = vld [vmem:[%s6928_s1] ss:$0 sm:$0xff]  ;;  %v6354_v37 = vpack.c.bf16 %v403_v29, %v403_v29  ;;  %528 = vst [vmem:[#allocation2 + $0xa4] sm:$0x1] %v527_v4  ;;  %v5065_v11 = vunpack.c.l.bf16 %v6329_v18 }
 0x12e   : > { %v335_v7 = vmul.f32 %v6347_v49, %v5062_v46  ;;  %v2559_v44 = vsel %vm5356_vm12, %v2554_v5, %v2558_v17  ;;  %v6356_v20 = vpack.c.bf16 %v404_v61, %v404_v61  ;;  %3826 = vst.msk [vmem:[#allocation3 + $0x28] sm:$0xff] %vm3820_vm11, %v3783_v60  ;;  %v373_v46 = vadd.f32 %v6363_v41, %v6275_v40 }
 0x12f   : > { %v4848_v26 = vcombine.low %v2549_v9, %v2559_v44  ;;  %v480_v36 = vsel %vm5297_vm3, 0, %v479_v19  ;;  %v4880_v50 = vcombine.low %v6322_v43, %v2965_v14  ;;  %v825_v8 = vshrl.u32 %v6354_v37, 16  ;;  %4147 = vst.msk [vmem:[#allocation3 + $0x28] sm:$0xff] %vm4141_vm1, %v4104_v0  ;;  %v2019_v45 = vpop.permute.xlu0 %2018 }
 0x130   : > { %v374_v32 = vadd.f32 %v6363_v41, %v335_v7  ;;  %v828_v25 = vshll.u32 %v6354_v37, 16  ;;  %v833_v59 = vshrl.u32 %v6356_v20, 16  ;;  %481 = vst [vmem:[#allocation2 + $0xa8] sm:$0x1] %v480_v36  ;;  %v836_v40 = vshll.u32 %v6356_v20, 16  ;;  %1737 = vst.msk [vmem:[#allocation3 + $0x30] sm:$0xff] %vm1730_vm2, %v1695_v54 }
 0x131   : > { %2748 = vrot.lane.b32.xlu0 %v4848_v26, %s5252_s9  ;;  %v405_v2 = vmax.f32 %v373_v46, 0.0  ;;  %v530_v13 = vsel %vm5306_vm7, 0, %v529_v34  ;;  %v2281_v35 = vld [vmem:[#allocation2 + $0x90] sm:$0xf]  ;;  %v5066_v53 = vunpack.c.h.bf16 %v6329_v18  ;;  %v336_v63 = vmul.f32 %v6347_v49, %v5065_v11  ;;  %2061 = vst.msk [vmem:[#allocation3 + $0x30] sm:$0xff] %vm2054_vm4, %v2019_v45  ;;  %v4162_v37 = vld [vmem:[#allocation3 + $0x20] sm:$0xff] }
 0x132   : > { %v406_v42 = vmax.f32 %v374_v32, 0.0  ;;  %v2826_v22 = vld [vmem:[#allocation2 + $0x90] sm:$0xe]  ;;  %531 = vst [vmem:[#allocation2 + $0xb0] sm:$0x1] %v530_v13  ;;  %v2561_v6 = vshrl.u32 %v2281_v35, 16  ;;  %v5069_v27 = vunpack.c.l.bf16 %v6376_v58  ;;  %v5070_v38 = vunpack.c.h.bf16 %v6376_v58  ;;  %v1697_v44 = vpop.permute.xlu1 %1696  ;;  %5125 = vmatprep.mubr.msk.bf16.mxu0 %vm4210_vm10, %v4162_v37 }
 0x133   : > { %v5208_v30 = vld [vmem:[#allocation2 + $0x90] sm:$0xff]   ;;  %v2283_v21 = vld [vmem:[#allocation2 + $0x98] sm:$0x1]  ;;  %v2564_v62 = vshll.u32 %v2281_v35, 16  ;;  %v4865_v17 = vrot.slane %v2826_v22, 9  ;;  %v6389_v57 = vpack.c.bf16 %v405_v2, %v405_v2  ;;  %v827_v61 = vrot.slane %v825_v8, 7  ;;  %v2196_v36 = vpop.permute.xlu0 %2195 }
 0x134   : > { %v2282_v52 = vld [vmem:[#allocation2 + $0x94] sm:$0xf]  ;;  %2205 = vrot.lane.b32.xlu1 %v5208_v30, %s5248_s30  ;;  %v2563_v51 = vrot.slane %v2561_v6, 4  ;;  %v2580_v10 = vshll.u32 %v2283_v21, 16  ;;  %v2828_v43 = vld [vmem:[#allocation2 + $0x98] sm:$0x1]  ;;  %v6391_v31 = vpack.c.bf16 %v406_v42, %v406_v42  ;;  %v6395_v47 = vmul.f32 %v6347_v49, %v5066_v53 }
 0x135   : > { %v2570_v55 = vshll.u32 %v2282_v52, 16  ;;  %v2574_v39 = vshrl.u32 %v2282_v52, 16  ;;  %3069 = vrot.lane.b32.xlu0 %v4880_v50, %s5250_s7  ;;  %v2827_v16 = vld [vmem:[#allocation2 + $0x94] sm:$0xf]  ;;  %v2566_v24 = vrot.slane %v2564_v62, 5  ;;  %v2971_v5 = vrot.slane %v2828_v43, 5 }
 0x136   : > { %v2968_v56 = vrot.slane %v2827_v16, 5  ;;  %v2582_v18 = vrot.slane %v2580_v10, 5  ;;  %v5211_v29 = vld [vmem:[#allocation2 + $0x90] sm:$0xff]   ;;  %v1026_v7 = vld [vmem:[#allocation2 + $0x9c] sm:$0xf]  ;;  %v830_v34 = vor.u32 %v828_v25, %v827_v61  ;;  %v831_v11 = vrot.slane %v827_v61, 4  ;;  %v2021_v62 = vpop.permute.xlu1 %2020 }
 0x137   : > { %v2572_v33 = vrot.slane %v2570_v55, 5  ;;  %v2576_v15 = vrot.slane %v2574_v39, 4  ;;  %v2567_v19 = vor.u32 %v2566_v24, %v2563_v51  ;;  %v3322_v60 = vld [vmem:[#allocation2 + $0x90] sm:$0xf]  ;;  %v835_v26 = vrot.slane %v833_v59, 7  ;;  %1738 = vst.msk [vmem:[#allocation3 + $0x38] sm:$0xff] %vm1730_vm2, %v1697_v44 }
 0x138   : > { %v6399_v14 = vsel %vm5323_vm9, %v4865_v17, %v2968_v56  ;;  %v2970_v4 = vrot.slane %v2968_v56, 4  ;;  %v3323_v46 = vld [vmem:[#allocation2 + $0x94] sm:$0xf]  ;;  %v6404_v32 = vadd.f32 %v6363_v41, %v336_v63  ;;  %v3324_v2 = vld [vmem:[#allocation2 + $0x98] sm:$0x1]  ;;  %v3581_v42 = vshrl.u32 %v3322_v60, 16 }
 0x139   : > { %v2577_v9 = vor.u32 %v2576_v15, %v2572_v33  ;;  %3247 = vrot.lane.b32.xlu0 %v5211_v29, %s5249_s6  ;;  %v2568_v0 = vrot.slane %v2567_v19, 4  ;;  %2238 = vst.msk [vmem:[#allocation3 + $0x30] sm:$0xff] %vm6937_vm5, %v2196_v36  ;;  %v4163_v25 = vld [vmem:[#allocation3 + $0x28] sm:$0xff]  ;;  %v838_v13 = vor.u32 %v836_v40, %v835_v26  ;;  %v840_v54 = vrot.slane %v835_v26, 4  ;;  %v3867_v53 = vld [vmem:[#allocation2 + $0x90] sm:$0xe] }
 0x13a   : > { %v2972_v8 = vsel %vm5323_vm9, %v2970_v4, %v2971_v5  ;;  %v1027_v35 = vsel %vm5378_vm13, %v830_v34, %v1026_v7  ;;  %v1030_v22 = vld [vmem:[#allocation2 + $0xa4] sm:$0x1]  ;;  %5126 = vmatmul.mubr.msk.bf16.gmra.mrb[8].mxu0 %vm4210_vm10, %v4163_v25  ;;  %v5225_v30 = vld [vmem:[#allocation2 + $0x78] sm:$0xff]   ;;  %v3583_v63 = vrot.slane %v3581_v42, 4  ;;  %v3584_v21 = vshll.u32 %v3322_v60, 16  ;;  %2062 = vst.msk [vmem:[#allocation3 + $0x38] sm:$0xff] %vm2054_vm4, %v2021_v62  ;;  %v2198_v4 = vpop.permute.xlu1 %2197 }
 0x13b   : > { %v2578_v50 = vrot.slane %v2577_v9, 4  ;;  %v4881_v59 = vcombine.low %v6399_v14, %v2972_v8  ;;  %v2573_v52 = vsel %vm5356_vm12, %v2568_v0, %v2572_v33  ;;  %1028 = vst [vmem:[#allocation2 + $0x9c] sm:$0xf] %v1027_v35  ;;  %v3868_v20 = vld [vmem:[#allocation2 + $0x94] sm:$0xf]  ;;  %v839_v39 = vsel %vm5386_vm14, %v831_v11, %v838_v13  ;;  %1193 = vst.msk [vmem:[#allocation3 + $0x50] sm:$0xff] %vm6953_vm8, %v5225_v30 }
 0x13c   : > { %v3869_v40 = vld [vmem:[#allocation2 + $0x98] sm:$0x1]  ;;  %v3590_v17 = vshll.u32 %v3323_v46, 16  ;;  %v3594_v51 = vshrl.u32 %v3323_v46, 16  ;;  %v1235_v10 = vld [vmem:[#allocation2 + $0x90] sm:$0xf]  ;;  %v1031_v45 = vsel %vm5297_vm3, %v840_v54, %v1030_v22  ;;  %v2741_v36 = vpop.permute.xlu0 %2740  ;;  %v6441_v42 = vadd.f32 %v6363_v41, %v6395_v47 }
 0x13d   : > { %v2583_v6 = vsel %vm5356_vm12, %v2578_v50, %v2582_v18  ;;  %1029 = vst.msk [vmem:[#allocation2 + $0xa0] sm:$0xf] %vm427_vm0, %v839_v39  ;;  %v3586_v16 = vrot.slane %v3584_v21, 5  ;;  %v3600_v43 = vshll.u32 %v3324_v2, 16  ;;  %v4928_v24 = vrot.slane %v3867_v53, 9  ;;  %v5226_v15 = vld [vmem:[#allocation2 + $0x84] sm:$0xff]  }
 0x13e   : > { %v4849_v55 = vcombine.low %v2573_v52, %v2583_v6  ;;  %v1236_v33 = vld [vmem:[#allocation2 + $0x94] sm:$0xf]  ;;  %v3592_v56 = vrot.slane %v3590_v17, 5  ;;  %v3596_v18 = vrot.slane %v3594_v51, 4  ;;  %1032 = vst [vmem:[#allocation2 + $0xa4] sm:$0x1] %v1031_v45  ;;  %v6449_v22 = vmul.f32 %v6347_v49, %v5069_v27 }
 0x13f   : > { %v4005_v5 = vrot.slane %v3868_v20, 5  ;;  %v4008_v29 = vrot.slane %v3869_v40, 5  ;;  %v3587_v61 = vor.u32 %v3586_v16, %v3583_v63  ;;  %v3602_v19 = vrot.slane %v3600_v43, 5  ;;  %1194 = vst.msk [vmem:[#allocation3 + $0x58] sm:$0xff] %vm6954_vm15, %v5226_v15  ;;  %v1237_v35 = vld [vmem:[#allocation2 + $0x98] sm:$0x1] }
 0x140   : > { %2750 = vrot.lane.b32.xlu1 %v4849_v55, %s5252_s9  ;;  %v1539_v9 = vshrl.u32 %v1235_v10, 16  ;;  %v1542_v14 = vshll.u32 %v1235_v10, 16  ;;  %v3597_v7 = vor.u32 %v3596_v18, %v3592_v56  ;;  %v1548_v37 = vshll.u32 %v1236_v33, 16  ;;  %2239 = vst.msk [vmem:[#allocation3 + $0x38] sm:$0xff] %vm6937_vm5, %v2198_v4  ;;  %v3062_v17 = vpop.permute.xlu0 %3061  ;;  %v5227_v45 = vld [vmem:[#allocation2 + $0x90] sm:$0xff]   ;;  %vm6957_vm5 = vmmov %vm6954_vm15 }
 0x141   : > { %v6431_v60 = vsel %vm5323_vm9, %v4928_v24, %v4005_v5  ;;  %v4007_v44 = vrot.slane %v4005_v5, 4  ;;  %v3588_v34 = vrot.slane %v3587_v61, 4  ;;  %v1552_v46 = vshrl.u32 %v1236_v33, 16  ;;  %2783 = vst.msk [vmem:[#allocation3 + $0x30] sm:$0xff] %vm2776_vm6, %v2741_v36 }
 0x142   : > { %v1541_v11 = vrot.slane %v1539_v9, 4  ;;  %v1544_v26 = vrot.slane %v1542_v14, 5  ;;  %v3598_v0 = vrot.slane %v3597_v7, 4  ;;  %v3325_v50 = vld [vmem:[#allocation2 + $0x9c] sm:$0xf]  ;;  %v6437_v2 = vrot.slane %v1548_v37, 5 }
 0x143   : > { %v4009_v8 = vsel %vm5323_vm9, %v4007_v44, %v4008_v29  ;;  %v3593_v25 = vsel %vm5356_vm12, %v3588_v34, %v3592_v56  ;;  %v3605_v13 = vshrl.u32 %v3325_v50, 16  ;;  %v3608_v54 = vshll.u32 %v3325_v50, 16  ;;  %v1238_v39 = vld [vmem:[#allocation2 + $0x9c] sm:$0xf]  ;;  %1195 = vst.msk [vmem:[#allocation3 + $0x60] sm:$0xff] %vm6954_vm15, %v5227_v45 }
 0x144   : > { %3071 = vrot.lane.b32.xlu1 %v4881_v59, %s5250_s7  ;;  %v3870_v59 = vld [vmem:[#allocation2 + $0x9c] sm:$0xe]  ;;  %v3603_v30 = vsel %vm5356_vm12, %v3598_v0, %v3602_v19  ;;  %v3326_v47 = vld [vmem:[#allocation2 + $0xa0] sm:$0xf]  ;;  %v4944_v52 = vcombine.low %v6431_v60, %v4009_v8  ;;  %v1545_v6 = vor.u32 %v1544_v26, %v1541_v11  ;;  %v1554_v63 = vrot.slane %v1552_v46, 4  ;;  %v3240_v11 = vpop.permute.xlu0 %3239 }
 0x145   : > { %v5212_v53 = vld [vmem:[#allocation2 + $0x9c] sm:$0xff]   ;;  %v4912_v21 = vcombine.low %v3593_v25, %v3603_v30  ;;  %v3327_v20 = vld [vmem:[#allocation2 + $0xa4] sm:$0x1]  ;;  %v3607_v40 = vrot.slane %v3605_v13, 4  ;;  %v3610_v62 = vrot.slane %v3608_v54, 5  ;;  %v3614_v55 = vshll.u32 %v3326_v47, 16  ;;  %v2743_v34 = vpop.permute.xlu1 %2742 }
 0x146   : > { %v3618_v27 = vshrl.u32 %v3326_v47, 16  ;;  %v3624_v51 = vshll.u32 %v3327_v20, 16  ;;  %v1546_v10 = vrot.slane %v1545_v6, 4  ;;  %v1555_v16 = vor.u32 %v1554_v63, %v6437_v2  ;;  %v3871_v43 = vld [vmem:[#allocation2 + $0xa0] sm:$0xf]  ;;  %2784 = vst.msk [vmem:[#allocation3 + $0x38] sm:$0xff] %vm2776_vm6, %v2743_v34 }
 0x147   : > { %vm6955_vm8 = vcmask 392512   ;;  %3792 = vrot.lane.b32.xlu0 %v4912_v21, %s5253_s10  ;;  %v3611_v24 = vor.u32 %v3610_v62, %v3607_v40  ;;  %v3616_v33 = vrot.slane %v3614_v55, 5  ;;  %v1558_v15 = vshll.u32 %v1237_v35, 16  ;;  %v3872_v56 = vld [vmem:[#allocation2 + $0xa4] sm:$0x1]  ;;  %v5228_v14 = vld [vmem:[#allocation2 + $0x9c] sm:$0xff]  }
 0x148   : > { %3249 = vrot.lane.b32.xlu1 %v5212_v53, %s5249_s6  ;;  %3104 = vst.msk [vmem:[#allocation3 + $0x30] sm:$0xff] %vm6955_vm8, %v3062_v17  ;;  %v4929_v18 = vrot.slane %v3870_v59, 9  ;;  %v3620_v5 = vrot.slane %v3618_v27, 4  ;;  %v3626_v29 = vrot.slane %v3624_v51, 5  ;;  %v1551_v61 = vsel %vm5356_vm12, %v1546_v10, %v6437_v2  ;;  %v1239_v9 = vld [vmem:[#allocation2 + $0xa0] sm:$0xf] }
 0x149   : > { %v1556_v19 = vrot.slane %v1555_v16, 4  ;;  %v3612_v4 = vrot.slane %v3611_v24, 4  ;;  %v1560_v7 = vrot.slane %v1558_v15, 5  ;;  %v4012_v60 = vrot.slane %v3871_v43, 5  ;;  %v1783_v37 = vld [vmem:[#allocation2 + $0x90] sm:$0xe]  ;;  %v3064_v62 = vpop.permute.xlu1 %3063 }
 0x14a   : > { %v4015_v44 = vrot.slane %v3872_v56, 5  ;;  %v3621_v26 = vor.u32 %v3620_v5, %v3616_v33  ;;  %v1240_v46 = vld [vmem:[#allocation2 + $0xa4] sm:$0x1]  ;;  %v1563_v36 = vshrl.u32 %v1238_v39, 16  ;;  %v1566_v0 = vshll.u32 %v1238_v39, 16  ;;  %1196 = vst.msk [vmem:[#allocation3 + $0x68] sm:$0xff] %vm6957_vm5, %v5228_v14 }
 0x14b   : > { %v1572_v50 = vshll.u32 %v1239_v9, 16  ;;  %v1784_v8 = vld [vmem:[#allocation2 + $0x94] sm:$0xf]  ;;  %vm6956_vm8 = vcmask 458112   ;;  %v3617_v2 = vsel %vm5356_vm12, %v3612_v4, %v3616_v33  ;;  %4113 = vrot.lane.b32.xlu0 %v4944_v52, %s5251_s8  ;;  %v1561_v25 = vsel %vm5356_vm12, %v1556_v19, %v1560_v7  ;;  %v1785_v35 = vld [vmem:[#allocation2 + $0x98] sm:$0x1] }
 0x14c   : > { %3282 = vst.msk [vmem:[#allocation3 + $0x30] sm:$0xff] %vm6956_vm8, %v3240_v11  ;;  %v4013_v13 = vsel %vm5323_vm9, %v4929_v18, %v4012_v60  ;;  %v4014_v54 = vrot.slane %v4012_v60, 4  ;;  %v1786_v59 = vld [vmem:[#allocation2 + $0x9c] sm:$0xe]  ;;  %v1787_v53 = vld [vmem:[#allocation2 + $0xa0] sm:$0xf]  ;;  %v4786_v47 = vcombine.low %v1551_v61, %v1561_v25  ;;  %v6486_v60 = vadd.f32 %v6363_v41, %v6449_v22  ;;  %vm6959_vm15 = vmmov %vm6956_vm8 }
 0x14d   : > { %v3622_v30 = vrot.slane %v3621_v26, 4  ;;  %v1565_v6 = vrot.slane %v1563_v36, 4  ;;  %v1568_v63 = vrot.slane %v1566_v0, 5  ;;  %v1574_v20 = vrot.slane %v1572_v50, 5  ;;  %v1788_v51 = vld [vmem:[#allocation2 + $0xa4] sm:$0x1]  ;;  %v3242_v7 = vpop.permute.xlu1 %3241 }
 0x14e   : > { %v4016_v21 = vsel %vm5323_vm9, %v4014_v54, %v4015_v44  ;;  %v1576_v40 = vshrl.u32 %v1239_v9, 16  ;;  %v1582_v52 = vshll.u32 %v1240_v46, 16  ;;  %v4802_v27 = vrot.slane %v1783_v37, 9  ;;  %v2284_v19 = vld [vmem:[#allocation2 + $0x9c] sm:$0xf] }
 0x14f   : > { %v3627_v55 = vsel %vm5356_vm12, %v3622_v30, %v3626_v29  ;;  %v4945_v39 = vcombine.low %v4013_v13, %v4016_v21  ;;  %v1569_v17 = vor.u32 %v1568_v63, %v1565_v6  ;;  %vm6958_vm5 = vcmask 392512   ;;  %v3785_v26 = vpop.permute.xlu0 %3784  ;;  %v1033_v22 = vld [vmem:[#allocation2 + $0xa8] sm:$0xf]  ;;  %v2286_v13 = vld [vmem:[#allocation2 + $0xa4] sm:$0x1] }
 0x150   : > { %3105 = vst.msk [vmem:[#allocation3 + $0x38] sm:$0xff] %vm6958_vm5, %v3064_v62  ;;  %v4913_v10 = vcombine.low %v3617_v2, %v3627_v55  ;;  %v1578_v16 = vrot.slane %v1576_v40, 4  ;;  %v1584_v43 = vrot.slane %v1582_v52, 5  ;;  %v1932_v45 = vrot.slane %v1784_v8, 5  ;;  %v2285_v8 = vld [vmem:[#allocation2 + $0xa0] sm:$0xf] }
 0x151   : > { %4115 = vrot.lane.b32.xlu0 %v4945_v39, %s5251_s8  ;;  %v1570_v24 = vrot.slane %v1569_v17, 4  ;;  %v1935_v33 = vrot.slane %v1785_v35, 5  ;;  %v4803_v15 = vrot.slane %v1786_v59, 9  ;;  %v1939_v56 = vrot.slane %v1787_v53, 5  ;;  %3283 = vst.msk [vmem:[#allocation3 + $0x38] sm:$0xff] %vm6959_vm15, %v3242_v7 }
 0x152   : > { %3794 = vrot.lane.b32.xlu1 %v4913_v10, %s5253_s10  ;;  %v1579_v18 = vor.u32 %v1578_v16, %v1574_v20  ;;  %v1933_v5 = vsel %vm5323_vm9, %v4802_v27, %v1932_v45  ;;  %v1934_v29 = vrot.slane %v1932_v45, 4  ;;  %v1942_v61 = vrot.slane %v1788_v51, 5  ;;  %3827 = vst.msk [vmem:[#allocation3 + $0x30] sm:$0xff] %vm3820_vm11, %v3785_v26  ;;  %v1037_v35 = vld [vmem:[#allocation2 + $0xb0] sm:$0x1] }
 0x153   : > { %v1575_v9 = vsel %vm5356_vm12, %v1570_v24, %v1574_v20  ;;  %v1941_v14 = vrot.slane %v1939_v56, 4  ;;  %v842_v4 = vshrl.u32 %v6389_v57, 16  ;;  %v845_v34 = vshll.u32 %v6389_v57, 16  ;;  %v2829_v63 = vld [vmem:[#allocation2 + $0x9c] sm:$0xe]  ;;  %v4106_v62 = vpop.permute.xlu0 %4105 }
 0x154   : > { %v1580_v44 = vrot.slane %v1579_v18, 4  ;;  %v1936_v37 = vsel %vm5323_vm9, %v1934_v29, %v1935_v33  ;;  %v850_v11 = vshrl.u32 %v6391_v31, 16  ;;  %v1940_v36 = vsel %vm5323_vm9, %v4803_v15, %v1939_v56  ;;  %v2830_v52 = vld [vmem:[#allocation2 + $0xa0] sm:$0xf]  ;;  %v482_v51 = vld [vmem:[#allocation2 + $0xb4] sm:$0x1] }
 0x155   : > { %v4818_v46 = vcombine.low %v1933_v5, %v1936_v37  ;;  %v844_v0 = vrot.slane %v842_v4, 7  ;;  %v853_v50 = vshll.u32 %v6391_v31, 16  ;;  %v1943_v2 = vsel %vm5323_vm9, %v1941_v14, %v1942_v61  ;;  %v5213_v31 = vld [vmem:[#allocation2 + $0x9c] sm:$0xff]   ;;  %4148 = vst.msk [vmem:[#allocation3 + $0x30] sm:$0xff] %vm4141_vm1, %v4106_v62  ;;  %v2831_v24 = vld [vmem:[#allocation2 + $0xa4] sm:$0x1] }
 0x156   : > { %1706 = vrot.lane.b32.xlu1 %v4786_v47, %s5247_s29  ;;  %v1585_v57 = vsel %vm5356_vm12, %v1580_v44, %v1584_v43  ;;  %v852_v25 = vrot.slane %v850_v11, 7  ;;  %v2585_v54 = vshrl.u32 %v2284_v19, 16  ;;  %v2588_v6 = vshll.u32 %v2284_v19, 16  ;;  %v532_v5 = vld [vmem:[#allocation2 + $0xbc] sm:$0x1] }
 0x157   : > { %v4787_v59 = vcombine.low %v1575_v9, %v1585_v57  ;;  %2030 = vrot.lane.b32.xlu0 %v4818_v46, %s5246_s28  ;;  %v847_v53 = vor.u32 %v845_v34, %v844_v0  ;;  %v848_v30 = vrot.slane %v844_v0, 4  ;;  %v2594_v40 = vshll.u32 %v2285_v8, 16  ;;  %v4108_v14 = vpop.permute.xlu0 %4107 }
 0x158   : > { %v855_v21 = vor.u32 %v853_v50, %v852_v25  ;;  %v857_v47 = vrot.slane %v852_v25, 4  ;;  %v2587_v20 = vrot.slane %v2585_v54, 4  ;;  %v2590_v39 = vrot.slane %v2588_v6, 5 }
 0x159   : > { %v1034_v55 = vsel %vm5378_vm13, %v847_v53, %v1033_v22  ;;  %v2598_v17 = vshrl.u32 %v2285_v8, 16  ;;  %v2604_v27 = vshll.u32 %v2286_v13, 16  ;;  %v4819_v10 = vcombine.low %v1940_v36, %v1943_v2  ;;  %v3787_v34 = vpop.permute.xlu1 %3786 }
 0x15a   : > { %1708 = vrot.lane.b32.xlu1 %v4787_v59, %s5247_s29  ;;  %v856_v16 = vsel %vm5386_vm14, %v848_v30, %v855_v21  ;;  %1035 = vst [vmem:[#allocation2 + $0xa8] sm:$0xf] %v1034_v55  ;;  %v2596_v43 = vrot.slane %v2594_v40, 5  ;;  %v1038_v45 = vsel %vm5297_vm3, %v857_v47, %v1037_v35  ;;  %v2591_v33 = vor.u32 %v2590_v39, %v2587_v20 }
 0x15b   : > { %2207 = vrot.lane.b32.xlu0 %v5213_v31, %s5248_s30  ;;  %1036 = vst.msk [vmem:[#allocation2 + $0xac] sm:$0xf] %vm427_vm0, %v856_v16  ;;  %v2600_v15 = vrot.slane %v2598_v17, 4  ;;  %1039 = vst [vmem:[#allocation2 + $0xb0] sm:$0x1] %v1038_v45  ;;  %v4866_v56 = vrot.slane %v2829_v63, 9 }
 0x15c   : > { %v2975_v18 = vrot.slane %v2830_v52, 5  ;;  %v2606_v29 = vrot.slane %v2604_v27, 5  ;;  %v407_v61 = vmax.f32 %v6404_v32, 0.0  ;;  %v408_v19 = vmax.f32 %v6441_v42, 0.0  ;;  %3828 = vst.msk [vmem:[#allocation3 + $0x38] sm:$0xff] %vm3820_vm11, %v3787_v34  ;;  %v4164_v57 = vld [vmem:[#allocation3 + $0x30] sm:$0xff] }
 0x15d   : > { %v483_v9 = vsel %vm5297_vm3, 0, %v482_v51  ;;  %v2592_v4 = vrot.slane %v2591_v33, 4  ;;  %v2601_v7 = vor.u32 %v2600_v15, %v2596_v43  ;;  %v2978_v37 = vrot.slane %v2831_v24, 5  ;;  %4149 = vst.msk [vmem:[#allocation3 + $0x38] sm:$0xff] %vm4141_vm1, %v4108_v14  ;;  %v1699_v13 = vpop.permute.xlu1 %1698  ;;  %5129 = vmatprep.mubr.msk.bf16.mxu0 %vm4210_vm10, %v4164_v57 }
 0x15e   : > { %v2977_v44 = vrot.slane %v2975_v18, 4  ;;  %484 = vst [vmem:[#allocation2 + $0xb4] sm:$0x1] %v483_v9  ;;  %2032 = vrot.lane.b32.xlu1 %v4819_v10, %s5246_s28  ;;  %v5003_v11 = vpack.c.bf16 %v407_v61, %v407_v61  ;;  %v6518_v26 = vpack.c.bf16 %v408_v19, %v408_v19  ;;  %v533_v32 = vsel %vm5306_vm7, 0, %v532_v5  ;;  %1739 = vst.msk [vmem:[#allocation3 + $0x40] sm:$0xff] %vm1730_vm2, %v1699_v13  ;;  %v2023_v20 = vpop.permute.xlu0 %2022 }
 0x15f   : > { %v339_v42 = vmul.f32 %v6347_v49, %v5070_v38  ;;  %v2597_v46 = vsel %vm5356_vm12, %v2592_v4, %v2596_v43  ;;  %v2602_v36 = vrot.slane %v2601_v7, 4  ;;  %534 = vst [vmem:[#allocation2 + $0xbc] sm:$0x1] %v533_v32  ;;  %v409_v8 = vmax.f32 %v6486_v60, 0.0  ;;  %2063 = vst.msk [vmem:[#allocation3 + $0x40] sm:$0xff] %vm2054_vm4, %v2023_v20 }
 0x160   : > { %v859_v0 = vshrl.u32 %v5003_v11, 16  ;;  %v862_v50 = vshll.u32 %v5003_v11, 16  ;;  %v867_v22 = vshrl.u32 %v6518_v26, 16  ;;  %v2976_v38 = vsel %vm5323_vm9, %v4866_v56, %v2975_v18 }
 0x161   : > { %v2607_v58 = vsel %vm5356_vm12, %v2602_v36, %v2606_v29  ;;  %v2287_v49 = vld [vmem:[#allocation2 + $0xa8] sm:$0xf]  ;;  %v2979_v2 = vsel %vm5323_vm9, %v2977_v44, %v2978_v37  ;;  %v6539_v53 = vadd.f32 %v6363_v41, %v339_v42  ;;  %v1701_v10 = vpop.permute.xlu1 %1700  ;;  %v870_v44 = vshll.u32 %v6518_v26, 16 }
 0x162   : > { %v2832_v25 = vld [vmem:[#allocation2 + $0xa8] sm:$0xe]  ;;  %v4850_v35 = vcombine.low %v2597_v46, %v2607_v58  ;;  %v2288_v59 = vld [vmem:[#allocation2 + $0xac] sm:$0xf]  ;;  %v2609_v31 = vshrl.u32 %v2287_v49, 16  ;;  %v2612_v6 = vshll.u32 %v2287_v49, 16  ;;  %v4882_v62 = vcombine.low %v2976_v38, %v2979_v2  ;;  %v2200_v61 = vpop.permute.xlu0 %2199 }
 0x163   : > { %v5214_v54 = vld [vmem:[#allocation2 + $0xa8] sm:$0xff]   ;;  %v2289_v30 = vld [vmem:[#allocation2 + $0xb0] sm:$0x1]  ;;  %v2618_v63 = vshll.u32 %v2288_v59, 16  ;;  %v2622_v21 = vshrl.u32 %v2288_v59, 16  ;;  %v4867_v47 = vrot.slane %v2832_v25, 9 }
 0x164   : > { %2209 = vrot.lane.b32.xlu1 %v5214_v54, %s5248_s30  ;;  %2752 = vrot.lane.b32.xlu0 %v4850_v35, %s5252_s9  ;;  %v2611_v40 = vrot.slane %v2609_v31, 4  ;;  %v2628_v52 = vshll.u32 %v2289_v30, 16  ;;  %v2833_v55 = vld [vmem:[#allocation2 + $0xac] sm:$0xf]  ;;  %v2834_v39 = vld [vmem:[#allocation2 + $0xb0] sm:$0x1] }
 0x165   : > { %v2614_v41 = vrot.slane %v2612_v6, 5  ;;  %v2620_v17 = vrot.slane %v2618_v63, 5  ;;  %v2624_v27 = vrot.slane %v2622_v21, 4  ;;  %v2982_v51 = vrot.slane %v2833_v55, 5  ;;  %1740 = vst.msk [vmem:[#allocation3 + $0x48] sm:$0xff] %vm1730_vm2, %v1701_v10  ;;  %v4165_v19 = vld [vmem:[#allocation3 + $0x38] sm:$0xff]  ;;  %v2025_v36 = vpop.permute.xlu1 %2024 }
 0x166   : > { %v2630_v16 = vrot.slane %v2628_v52, 5  ;;  %v2985_v43 = vrot.slane %v2834_v39, 5  ;;  %v861_v45 = vrot.slane %v859_v0, 7  ;;  %v410_v24 = vmax.f32 %v6539_v53, 0.0  ;;  %v1040_v5 = vld [vmem:[#allocation2 + $0xb4] sm:$0xf]  ;;  %5130 = vmatmul.mubr.msk.bf16.gmra.mrb[12].mxu0 %vm4210_vm10, %v4165_v19 }
 0x167   : > { %v2615_v33 = vor.u32 %v2614_v41, %v2611_v40  ;;  %v2625_v15 = vor.u32 %v2624_v27, %v2620_v17  ;;  %v6549_v56 = vsel %vm5323_vm9, %v4867_v47, %v2982_v51  ;;  %v2984_v18 = vrot.slane %v2982_v51, 4  ;;  %v3328_v29 = vld [vmem:[#allocation2 + $0xa8] sm:$0xf]  ;;  %v3329_v37 = vld [vmem:[#allocation2 + $0xac] sm:$0xf]  ;;  %2064 = vst.msk [vmem:[#allocation3 + $0x48] sm:$0xff] %vm2054_vm4, %v2025_v36 }
 0x168   : > { %3073 = vrot.lane.b32.xlu0 %v4882_v62, %s5250_s7  ;;  %v5217_v9 = vld [vmem:[#allocation2 + $0xa8] sm:$0xff]   ;;  %v864_v14 = vor.u32 %v862_v50, %v861_v45  ;;  %v865_v4 = vrot.slane %v861_v45, 4  ;;  %v869_v7 = vrot.slane %v867_v22, 7  ;;  %vm6960_vm8 = vcmask 261312   ;;  %v3330_v42 = vld [vmem:[#allocation2 + $0xb0] sm:$0x1] }
 0x169   : > { %2240 = vst.msk [vmem:[#allocation3 + $0x40] sm:$0xff] %vm6960_vm8, %v2200_v61  ;;  %v2616_v34 = vrot.slane %v2615_v33, 4  ;;  %v2626_v11 = vrot.slane %v2625_v15, 4  ;;  %v2986_v32 = vsel %vm5323_vm9, %v2984_v18, %v2985_v43  ;;  %v3629_v46 = vshrl.u32 %v3328_v29, 16  ;;  %v1044_v22 = vld [vmem:[#allocation2 + $0xbc] sm:$0x1]  ;;  %vm6961_vm5 = vmmov %vm6960_vm8 }
 0x16a   : > { %v4883_v0 = vcombine.low %v6549_v56, %v2986_v32  ;;  %v872_v50 = vor.u32 %v870_v44, %v869_v7  ;;  %v874_v57 = vrot.slane %v869_v7, 4  ;;  %v1041_v26 = vsel %vm5378_vm13, %v864_v14, %v1040_v5  ;;  %v3873_v58 = vld [vmem:[#allocation2 + $0xa8] sm:$0xe]  ;;  %v3874_v13 = vld [vmem:[#allocation2 + $0xac] sm:$0xf] }
 0x16b   : > { %v2621_v49 = vsel %vm5356_vm12, %v2616_v34, %v2620_v17  ;;  %v2631_v38 = vsel %vm5356_vm12, %v2626_v11, %v2630_v16  ;;  %1042 = vst [vmem:[#allocation2 + $0xb4] sm:$0xf] %v1041_v26  ;;  %v3631_v2 = vrot.slane %v3629_v46, 4  ;;  %v3632_v25 = vshll.u32 %v3328_v29, 16  ;;  %v3875_v54 = vld [vmem:[#allocation2 + $0xb0] sm:$0x1]  ;;  %v2745_v10 = vpop.permute.xlu0 %2744 }
 0x16c   : > { %v4851_v35 = vcombine.low %v2621_v49, %v2631_v38  ;;  %3251 = vrot.lane.b32.xlu0 %v5217_v9, %s5249_s6  ;;  %v873_v59 = vsel %vm5386_vm14, %v865_v4, %v872_v50  ;;  %v3638_v31 = vshll.u32 %v3329_v37, 16  ;;  %v3642_v30 = vshrl.u32 %v3329_v37, 16  ;;  %v1241_v6 = vld [vmem:[#allocation2 + $0xa8] sm:$0xf]  ;;  %v1242_v40 = vld [vmem:[#allocation2 + $0xac] sm:$0xf] }
 0x16d   : > { %1043 = vst.msk [vmem:[#allocation2 + $0xb8] sm:$0xf] %vm427_vm0, %v873_v59  ;;  %v3634_v63 = vrot.slane %v3632_v25, 5  ;;  %v3648_v21 = vshll.u32 %v3330_v42, 16  ;;  %v1045_v47 = vsel %vm5297_vm3, %v874_v57, %v1044_v22  ;;  %v4930_v20 = vrot.slane %v3873_v58, 9 }
 0x16e   : > { %2754 = vrot.lane.b32.xlu1 %v4851_v35, %s5252_s9  ;;  %v3640_v52 = vrot.slane %v3638_v31, 5  ;;  %v3644_v62 = vrot.slane %v3642_v30, 4  ;;  %1046 = vst [vmem:[#allocation2 + $0xbc] sm:$0x1] %v1045_v47  ;;  %v4019_v55 = vrot.slane %v3874_v13, 5  ;;  %v4022_v39 = vrot.slane %v3875_v54, 5  ;;  %v2202_v32 = vpop.permute.xlu1 %2201 }
 0x16f   : > { %v3635_v41 = vor.u32 %v3634_v63, %v3631_v2  ;;  %v3650_v17 = vrot.slane %v3648_v21, 5  ;;  %v1587_v27 = vshrl.u32 %v1241_v6, 16  ;;  %v1590_v51 = vshll.u32 %v1241_v6, 16  ;;  %2785 = vst.msk [vmem:[#allocation3 + $0x40] sm:$0xff] %vm2776_vm6, %v2745_v10  ;;  %v1243_v37 = vld [vmem:[#allocation2 + $0xb0] sm:$0x1] }
 0x170   : > { %v3645_v16 = vor.u32 %v3644_v62, %v3640_v52  ;;  %v6574_v43 = vsel %vm5323_vm9, %v4930_v20, %v4019_v55  ;;  %v4021_v45 = vrot.slane %v4019_v55, 4  ;;  %v1596_v33 = vshll.u32 %v1242_v40, 16  ;;  %v3066_v42 = vpop.permute.xlu0 %3065  ;;  %2241 = vst.msk [vmem:[#allocation3 + $0x48] sm:$0xff] %vm6961_vm5, %v2202_v32  ;;  %v5229_v54 = vld [vmem:[#allocation2 + $0xa8] sm:$0xff]  }
 0x171   : > { %v3636_v15 = vrot.slane %v3635_v41, 4  ;;  %v1589_v56 = vrot.slane %v1587_v27, 4  ;;  %v1592_v18 = vrot.slane %v1590_v51, 5  ;;  %v1600_v5 = vshrl.u32 %v1242_v40, 16  ;;  %v1789_v27 = vld [vmem:[#allocation2 + $0xa8] sm:$0xe] }
 0x172   : > { %3075 = vrot.lane.b32.xlu1 %v4883_v0, %s5250_s7  ;;  %v3646_v29 = vrot.slane %v3645_v16, 4  ;;  %v3331_v61 = vld [vmem:[#allocation2 + $0xb4] sm:$0xf]  ;;  %v4023_v19 = vsel %vm5323_vm9, %v4021_v45, %v4022_v39  ;;  %v6580_v9 = vrot.slane %v1596_v33, 5  ;;  %v6585_v14 = vpack.c.bf16 %v409_v8, %v409_v8  ;;  %v1790_v33 = vld [vmem:[#allocation2 + $0xac] sm:$0xf] }
 0x173   : > { %v3641_v4 = vsel %vm5356_vm12, %v3636_v15, %v3640_v52  ;;  %v3653_v7 = vshrl.u32 %v3331_v61, 16  ;;  %v3656_v44 = vshll.u32 %v3331_v61, 16  ;;  %v3876_v34 = vld [vmem:[#allocation2 + $0xb4] sm:$0xe]  ;;  %v6592_v11 = vpack.c.bf16 %v410_v24, %v410_v24 }
 0x174   : > { %v5218_v46 = vld [vmem:[#allocation2 + $0xb4] sm:$0xff]   ;;  %v3651_v60 = vsel %vm5356_vm12, %v3646_v29, %v3650_v17  ;;  %v4946_v36 = vcombine.low %v6574_v43, %v4023_v19  ;;  %v1593_v0 = vor.u32 %v1592_v18, %v1589_v56  ;;  %v1602_v50 = vrot.slane %v1600_v5, 4  ;;  %v3244_v63 = vpop.permute.xlu0 %3243  ;;  %v1791_v29 = vld [vmem:[#allocation2 + $0xb0] sm:$0x1] }
 0x175   : > { %v3332_v8 = vld [vmem:[#allocation2 + $0xb8] sm:$0xf]  ;;  %vm6962_vm15 = vcmask 392512   ;;  %v4914_v57 = vcombine.low %v3641_v4, %v3651_v60  ;;  %v3333_v53 = vld [vmem:[#allocation2 + $0xbc] sm:$0x1]  ;;  %v3655_v26 = vrot.slane %v3653_v7, 4 }
 0x176   : > { %3106 = vst.msk [vmem:[#allocation3 + $0x40] sm:$0xff] %vm6962_vm15, %v3066_v42  ;;  %v3658_v24 = vrot.slane %v3656_v44, 5  ;;  %v3662_v22 = vshll.u32 %v3332_v8, 16  ;;  %v1244_v58 = vld [vmem:[#allocation2 + $0xb4] sm:$0xf]  ;;  %3253 = vrot.lane.b32.xlu1 %v5218_v46, %s5249_s6  ;;  %v3666_v49 = vshrl.u32 %v3332_v8, 16  ;;  %v1603_v25 = vor.u32 %v1602_v50, %v6580_v9 }
 0x177   : > { %v3672_v38 = vshll.u32 %v3333_v53, 16  ;;  %v1594_v2 = vrot.slane %v1593_v0, 4  ;;  %v3877_v13 = vld [vmem:[#allocation2 + $0xb8] sm:$0xf]  ;;  %3796 = vrot.lane.b32.xlu0 %v4914_v57, %s5253_s10  ;;  %v1606_v31 = vshll.u32 %v1243_v37, 16  ;;  %v4931_v6 = vrot.slane %v3876_v34, 9 }
 0x178   : > { %v3659_v35 = vor.u32 %v3658_v24, %v3655_v26  ;;  %v3664_v59 = vrot.slane %v3662_v22, 5  ;;  %v3878_v30 = vld [vmem:[#allocation2 + $0xbc] sm:$0x1]  ;;  %v3668_v21 = vrot.slane %v3666_v49, 4  ;;  %v1604_v40 = vrot.slane %v1603_v25, 4  ;;  %v5230_v62 = vld [vmem:[#allocation2 + $0xb4] sm:$0xff]  }
 0x179   : > { %v3674_v47 = vrot.slane %v3672_v38, 5  ;;  %v1599_v20 = vsel %vm5356_vm12, %v1594_v2, %v6580_v9  ;;  %v1245_v52 = vld [vmem:[#allocation2 + $0xb8] sm:$0xf]  ;;  %vm6963_vm8 = vcmask 458112   ;;  %vm6964_vm5 = vcmask 64512  }
 0x17a   : > { %3284 = vst.msk [vmem:[#allocation3 + $0x40] sm:$0xff] %vm6963_vm8, %v3244_v63  ;;  %v3660_v55 = vrot.slane %v3659_v35, 4  ;;  %v1608_v39 = vrot.slane %v1606_v31, 5  ;;  %v4026_v41 = vrot.slane %v3877_v13, 5  ;;  %v4029_v17 = vrot.slane %v3878_v30, 5  ;;  %vm6965_vm15 = vmmov %vm6964_vm5 }
 0x17b   : > { %1197 = vst.msk [vmem:[#allocation3 + $0x70] sm:$0xff] %vm6964_vm5, %v5229_v54  ;;  %v3669_v51 = vor.u32 %v3668_v21, %v3664_v59  ;;  %v1246_v10 = vld [vmem:[#allocation2 + $0xbc] sm:$0x1]  ;;  %v1611_v16 = vshrl.u32 %v1244_v58, 16  ;;  %v1614_v43 = vshll.u32 %v1244_v58, 16  ;;  %v1620_v45 = vshll.u32 %v1245_v52, 16  ;;  %4117 = vrot.lane.b32.xlu0 %v4946_v36, %s5251_s8 }
 0x17c   : > { %1198 = vst.msk [vmem:[#allocation3 + $0x78] sm:$0xff] %vm6965_vm15, %v5230_v62  ;;  %v3665_v15 = vsel %vm5356_vm12, %v3660_v55, %v3664_v59  ;;  %v1609_v56 = vsel %vm5356_vm12, %v1604_v40, %v1608_v39  ;;  %v4027_v18 = vsel %vm5323_vm9, %v4931_v6, %v4026_v41  ;;  %v4028_v5 = vrot.slane %v4026_v41, 4  ;;  %v1792_v61 = vld [vmem:[#allocation2 + $0xb4] sm:$0xe]  ;;  %v1793_v19 = vld [vmem:[#allocation2 + $0xb8] sm:$0xf] }
 0x17d   : > { %v3670_v9 = vrot.slane %v3669_v51, 4  ;;  %v4788_v4 = vcombine.low %v1599_v20, %v1609_v56  ;;  %v1613_v7 = vrot.slane %v1611_v16, 4  ;;  %v1616_v44 = vrot.slane %v1614_v43, 5  ;;  %v1794_v0 = vld [vmem:[#allocation2 + $0xbc] sm:$0x1] }
 0x17e   : > { %v4030_v37 = vsel %vm5323_vm9, %v4028_v5, %v4029_v17  ;;  %v1622_v34 = vrot.slane %v1620_v45, 5  ;;  %v1624_v32 = vshrl.u32 %v1245_v52, 16  ;;  %v1630_v42 = vshll.u32 %v1246_v10, 16  ;;  %v485_v22 = vld [vmem:[#allocation2 + $0xc0] sm:$0x1]  ;;  %v5219_v45 = vld [vmem:[#allocation2 + $0xb4] sm:$0xff]  }
 0x17f   : > { %v3675_v46 = vsel %vm5356_vm12, %v3670_v9, %v3674_v47  ;;  %v4947_v60 = vcombine.low %v4027_v18, %v4030_v37  ;;  %v1617_v8 = vor.u32 %v1616_v44, %v1613_v7  ;;  %v4804_v36 = vrot.slane %v1789_v27, 9  ;;  %v2747_v50 = vpop.permute.xlu1 %2746  ;;  %v2290_v59 = vld [vmem:[#allocation2 + $0xb4] sm:$0xf]  ;;  %v2291_v52 = vld [vmem:[#allocation2 + $0xb8] sm:$0xf] }
 0x180   : > { %v4915_v57 = vcombine.low %v3665_v15, %v3675_v46  ;;  %v1626_v53 = vrot.slane %v1624_v32, 4  ;;  %v1632_v26 = vrot.slane %v1630_v42, 5  ;;  %v1946_v24 = vrot.slane %v1790_v33, 5  ;;  %2786 = vst.msk [vmem:[#allocation3 + $0x48] sm:$0xff] %vm2776_vm6, %v2747_v50  ;;  %v2292_v51 = vld [vmem:[#allocation2 + $0xbc] sm:$0x1] }
 0x181   : > { %4119 = vrot.lane.b32.xlu0 %v4947_v60, %s5251_s8  ;;  %v1618_v58 = vrot.slane %v1617_v8, 4  ;;  %v1949_v49 = vrot.slane %v1791_v29, 5  ;;  %v4805_v38 = vrot.slane %v1792_v61, 9  ;;  %v1953_v2 = vrot.slane %v1793_v19, 5  ;;  %v535_v16 = vld [vmem:[#allocation2 + $0xc8] sm:$0x1] }
 0x182   : > { %3798 = vrot.lane.b32.xlu1 %v4915_v57, %s5253_s10  ;;  %v1627_v25 = vor.u32 %v1626_v53, %v1622_v34  ;;  %v1947_v13 = vsel %vm5323_vm9, %v4804_v36, %v1946_v24  ;;  %v1948_v54 = vrot.slane %v1946_v24, 4  ;;  %v1956_v35 = vrot.slane %v1794_v0, 5  ;;  %v2836_v19 = vld [vmem:[#allocation2 + $0xb8] sm:$0xf]  ;;  %v2837_v44 = vld [vmem:[#allocation2 + $0xbc] sm:$0x1] }
 0x183   : > { %v1623_v31 = vsel %vm5356_vm12, %v1618_v58, %v1622_v34  ;;  %v1955_v30 = vrot.slane %v1953_v2, 4  ;;  %v486_v6 = vsel %vm5297_vm3, 0, %v485_v22  ;;  %v3068_v63 = vpop.permute.xlu1 %3067  ;;  %v876_v20 = vshrl.u32 %v6585_v14, 16  ;;  %v3337_v8 = vld [vmem:[#allocation2 + $0xcc] sm:$0xf] }
 0x184   : > { %v1628_v21 = vrot.slane %v1627_v25, 4  ;;  %v1950_v47 = vsel %vm5323_vm9, %v1948_v54, %v1949_v49  ;;  %487 = vst [vmem:[#allocation2 + $0xc0] sm:$0x1] %v486_v6  ;;  %v879_v40 = vshll.u32 %v6585_v14, 16  ;;  %vm6966_vm8 = vcmask 392512  }
 0x185   : > { %3107 = vst.msk [vmem:[#allocation3 + $0x48] sm:$0xff] %vm6966_vm8, %v3068_v63  ;;  %v4820_v62 = vcombine.low %v1947_v13, %v1950_v47  ;;  %v1954_v55 = vsel %vm5323_vm9, %v4805_v38, %v1953_v2  ;;  %v884_v39 = vshrl.u32 %v6592_v11, 16  ;;  %v887_v41 = vshll.u32 %v6592_v11, 16  ;;  %v2835_v11 = vld [vmem:[#allocation2 + $0xb4] sm:$0xe] }
 0x186   : > { %1710 = vrot.lane.b32.xlu1 %v4788_v4, %s5247_s29  ;;  %v1633_v17 = vsel %vm5356_vm12, %v1628_v21, %v1632_v26  ;;  %v1957_v27 = vsel %vm5323_vm9, %v1955_v30, %v1956_v35  ;;  %v878_v14 = vrot.slane %v876_v20, 7  ;;  %v2633_v10 = vshrl.u32 %v2290_v59, 16  ;;  %v3338_v54 = vld [vmem:[#allocation2 + $0xd0] sm:$0xf]  ;;  %v6658_v35 = vld [vmem:[#allocation2 + $0xd4] sm:$0x1] }
 0x187   : > { %v4789_v43 = vcombine.low %v1623_v31, %v1633_v17  ;;  %2034 = vrot.lane.b32.xlu0 %v4820_v62, %s5246_s28  ;;  %v886_v33 = vrot.slane %v884_v39, 7  ;;  %v2636_v15 = vshll.u32 %v2290_v59, 16  ;;  %v2642_v56 = vshll.u32 %v2291_v52, 16  ;;  %v3246_v37 = vpop.permute.xlu1 %3245  ;;  %v3789_v34 = vpop.permute.xlu0 %3788 }
 0x188   : > { %v881_v18 = vor.u32 %v879_v40, %v878_v14  ;;  %v882_v5 = vrot.slane %v878_v14, 4  ;;  %v2635_v29 = vrot.slane %v2633_v10, 4  ;;  %v2646_v61 = vshrl.u32 %v2291_v52, 16  ;;  %3829 = vst.msk [vmem:[#allocation3 + $0x40] sm:$0xff] %vm3820_vm11, %v3789_v34 }
 0x189   : > { %v889_v9 = vor.u32 %v887_v41, %v886_v33  ;;  %v2638_v4 = vrot.slane %v2636_v15, 5  ;;  %v2644_v7 = vrot.slane %v2642_v56, 5  ;;  %v4821_v32 = vcombine.low %v1954_v55, %v1957_v27 }
 0x18a   : > { %1712 = vrot.lane.b32.xlu1 %v4789_v43, %s5247_s29  ;;  %v2648_v42 = vrot.slane %v2646_v61, 4  ;;  %v2652_v46 = vshll.u32 %v2292_v51, 16  ;;  %v536_v60 = vsel %vm5306_vm7, 0, %v535_v16  ;;  %vm6967_vm5 = vcmask 458112   ;;  %vm6970_vm7 = vmmov %vm6966_vm8 }
 0x18b   : > { %3285 = vst.msk [vmem:[#allocation3 + $0x48] sm:$0xff] %vm6967_vm5, %v3246_v37  ;;  %2211 = vrot.lane.b32.xlu0 %v5219_v45, %s5248_s30  ;;  %v890_v36 = vsel %vm5386_vm14, %v882_v5, %v889_v9  ;;  %v1047_v0 = vld [vmem:[#allocation2 + $0xc0] sm:$0xf]  ;;  %v2639_v50 = vor.u32 %v2638_v4, %v2635_v29  ;;  %537 = vst [vmem:[#allocation2 + $0xc8] sm:$0x1] %v536_v60  ;;  %v4868_v57 = vrot.slane %v2835_v11, 9  ;;  %v4110_v2 = vpop.permute.xlu0 %4109 }
 0x18c   : > { %v2989_v53 = vrot.slane %v2836_v19, 5  ;;  %v1048_v26 = vsel %vm5378_vm13, %v881_v18, %v1047_v0  ;;  %1050 = vst.msk [vmem:[#allocation2 + $0xc4] sm:$0xf] %vm427_vm0, %v890_v36  ;;  %v2649_v3 = vor.u32 %v2648_v42, %v2644_v7  ;;  %v2654_v24 = vrot.slane %v2652_v46, 5  ;;  %vm6972_vm13 = vmmov %vm6970_vm7 }
 0x18d   : > { %v2992_v22 = vrot.slane %v2837_v44, 5  ;;  %1049 = vst [vmem:[#allocation2 + $0xc0] sm:$0xf] %v1048_v26  ;;  %v2640_v58 = vrot.slane %v2639_v50, 4  ;;  %v3701_v38 = vshrl.u32 %v3337_v8, 16  ;;  %v3704_v25 = vshll.u32 %v3337_v8, 16  ;;  %vm6973_vm14 = vmmov %vm6967_vm5 }
 0x18e   : > { %v2991_v49 = vrot.slane %v2989_v53, 4  ;;  %2036 = vrot.lane.b32.xlu1 %v4821_v32, %s5246_s28  ;;  %v2650_v28 = vrot.slane %v2649_v3, 4  ;;  %4150 = vst.msk [vmem:[#allocation3 + $0x40] sm:$0xff] %vm4141_vm1, %v4110_v2  ;;  %v891_v13 = vrot.slane %v886_v33, 4  ;;  %v2990_v31 = vsel %vm5323_vm9, %v4868_v57, %v2989_v53  ;;  %vm6976_vm8 = vmmov %vm6970_vm7 }
 0x18f   : > { %v2645_v23 = vsel %vm5356_vm12, %v2640_v58, %v2644_v7  ;;  %v6666_v63 = vrot.slane %v3701_v38, 4  ;;  %v6668_v47 = vrot.slane %v3704_v25, 5  ;;  %v3710_v20 = vshll.u32 %v3338_v54, 16 }
 0x190   : > { %v2655_v59 = vsel %vm5356_vm12, %v2650_v28, %v2654_v24  ;;  %v2993_v30 = vsel %vm5323_vm9, %v2991_v49, %v2992_v22  ;;  %v3714_v40 = vshrl.u32 %v3338_v54, 16  ;;  %v3720_v52 = vshll.u32 %v6658_v35, 16  ;;  %v4112_v62 = vpop.permute.xlu0 %4111  ;;  %v3884_v35 = vld [vmem:[#allocation2 + $0xd4] sm:$0x1] }
 0x191   : > { %v4852_v6 = vcombine.low %v2645_v23, %v2655_v59  ;;  %v4884_v41 = vcombine.low %v2990_v31, %v2993_v30  ;;  %v3791_v27 = vpop.permute.xlu1 %3790  ;;  %v6682_v56 = vrot.slane %v3710_v20, 5  ;;  %v3707_v24 = vor.u32 %v6668_v47, %v6666_v63 }
 0x192   : > { %v1051_v21 = vld [vmem:[#allocation2 + $0xc8] sm:$0x1]  ;;  %3830 = vst.msk [vmem:[#allocation3 + $0x48] sm:$0xff] %vm3820_vm11, %v3791_v27  ;;  %v6685_v61 = vrot.slane %v3714_v40, 4  ;;  %vm6968_vm0 = vcmask 261312  }
 0x193   : > { %2756 = vrot.lane.b32.xlu0 %v4852_v6, %s5252_s9  ;;  %v1052_v55 = vsel %vm5297_vm3, %v891_v13, %v1051_v21  ;;  %v2294_v39 = vld [vmem:[#allocation2 + $0xc4] sm:$0xf]  ;;  %4151 = vst.msk [vmem:[#allocation3 + $0x48] sm:$0xff] %vm4141_vm1, %v4112_v62  ;;  %vm6969_vm3 = vmmov %vm6968_vm0 }
 0x194   : > { %v6674_v17 = vld [vmem:[#allocation2 + $0xc4] sm:$0xf]  ;;  %1053 = vst [vmem:[#allocation2 + $0xc8] sm:$0x1] %v1052_v55  ;;  %v2293_v51 = vld [vmem:[#allocation2 + $0xc0] sm:$0xf]  ;;  %v3717_v59 = vor.u32 %v6685_v61, %v6682_v56  ;;  %vm6975_vm15 = vmmov %vm6968_vm0 }
 0x195   : > { %v5220_v14 = vld [vmem:[#allocation2 + $0xc0] sm:$0xff]   ;;  %v2666_v10 = vshll.u32 %v2294_v39, 16  ;;  %v2657_v16 = vshrl.u32 %v2293_v51, 16  ;;  %v2660_v43 = vshll.u32 %v2293_v51, 16  ;;  %v2670_v45 = vshrl.u32 %v2294_v39, 16  ;;  %v1703_v19 = vpop.permute.xlu1 %1702  ;;  %v4166_v9 = vld [vmem:[#allocation3 + $0x40] sm:$0xff] }
 0x196   : > { %v2838_v33 = vld [vmem:[#allocation2 + $0xc0] sm:$0xe]  ;;  %v2996_v15 = vrot.slane %v6674_v17, 5  ;;  %2213 = vrot.lane.b32.xlu1 %v5220_v14, %s5248_s30  ;;  %v3335_v37 = vld [vmem:[#allocation2 + $0xc4] sm:$0xf]  ;;  %1741 = vst.msk [vmem:[#allocation3 + $0x50] sm:$0xff] %vm1730_vm2, %v1703_v19  ;;  %v2027_v34 = vpop.permute.xlu0 %2026  ;;  %5133 = vmatprep.mubr.msk.bf16.mxu1 %vm4210_vm10, %v4166_v9  ;;  %s6759_s30 = scalar_lea.vmem %s6931_s4, %s4974_s23 }
 0x197   : > { %v6680_v1 = vrot.slane %v2666_v10, 5  ;;  %v2659_v11 = vrot.slane %v2657_v16, 4  ;;  %v2662_v18 = vrot.slane %v2660_v43, 5  ;;  %v2672_v5 = vrot.slane %v2670_v45, 4  ;;  %3077 = vrot.lane.b32.xlu0 %v4884_v41, %s5250_s7  ;;  %v5223_v29 = vld [vmem:[#allocation2 + $0xc0] sm:$0xff]   ;;  %2065 = vst.msk [vmem:[#allocation3 + $0x50] sm:$0xff] %vm2054_vm4, %v2027_v34 }
 0x198   : > { %v4869_v4 = vrot.slane %v2838_v33, 9  ;;  %v2998_v7 = vrot.slane %v2996_v15, 4  ;;  %v3334_v44 = vld [vmem:[#allocation2 + $0xc0] sm:$0xf]  ;;  %v3686_v8 = vshll.u32 %v3335_v37, 16  ;;  %v3690_v36 = vshrl.u32 %v3335_v37, 16 }
 0x199   : > { %v2663_v32 = vor.u32 %v2662_v18, %v2659_v11  ;;  %v2673_v42 = vor.u32 %v2672_v5, %v6680_v1  ;;  %v3677_v46 = vshrl.u32 %v3334_v44, 16  ;;  %v3680_v60 = vshll.u32 %v3334_v44, 16  ;;  %v3879_v0 = vld [vmem:[#allocation2 + $0xc0] sm:$0xe]  ;;  %v3880_v50 = vld [vmem:[#allocation2 + $0xc4] sm:$0xf]  ;;  %v1705_v22 = vpop.permute.xlu1 %1704 }
 0x19a   : > { %1742 = vst.msk [vmem:[#allocation3 + $0x58] sm:$0xff] %vm1730_vm2, %v1705_v22  ;;  %v2204_v25 = vpop.permute.xlu0 %2203  ;;  %v3688_v13 = vrot.slane %v3686_v8, 5  ;;  %v3692_v23 = vrot.slane %v3690_v36, 4  ;;  %v4167_v30 = vld [vmem:[#allocation3 + $0x48] sm:$0xff]  ;;  %v2997_v21 = vsel %vm5323_vm9, %v4869_v4, %v2996_v15  ;;  %v4932_v62 = vrot.slane %v3879_v0, 9 }
 0x19b   : > { %v2295_v57 = vld [vmem:[#allocation2 + $0xc8] sm:$0x1]  ;;  %v2664_v53 = vrot.slane %v2663_v32, 4  ;;  %v2674_v26 = vrot.slane %v2673_v42, 4  ;;  %3255 = vrot.lane.b32.xlu0 %v5223_v29, %s5249_s6  ;;  %v3679_v2 = vrot.slane %v3677_v46, 4  ;;  %v3682_v28 = vrot.slane %v3680_v60, 5  ;;  %5134 = vmatmul.mubr.msk.bf16.vlgmr.msra.gmra.mrb[0].mxu1 %vm4210_vm10, %v4167_v30 }
 0x19c   : > { %v2840_v3 = vld [vmem:[#allocation2 + $0xc8] sm:$0x1]  ;;  %v2676_v58 = vshll.u32 %v2295_v57, 16  ;;  %2242 = vst.msk [vmem:[#allocation3 + $0x50] sm:$0xff] %vm6968_vm0, %v2204_v25  ;;  %v3693_v20 = vor.u32 %v3692_v23, %v3688_v13  ;;  %v4033_v55 = vrot.slane %v3880_v50, 5  ;;  %v3722_v33 = vrot.slane %v3720_v52, 5 }
 0x19d   : > { %v2999_v49 = vrot.slane %v2840_v3, 5  ;;  %v3336_v38 = vld [vmem:[#allocation2 + $0xc8] sm:$0x1]  ;;  %v2669_v6 = vsel %vm5356_vm12, %v2664_v53, %v6680_v1  ;;  %v3683_v47 = vor.u32 %v3682_v28, %v3679_v2  ;;  %v2029_v39 = vpop.permute.xlu1 %2028  ;;  %v3883_v43 = vld [vmem:[#allocation2 + $0xd0] sm:$0xf]  ;;  %v3708_v29 = vrot.slane %v3707_v24, 4 }
 0x19e   : > { %v3696_v54 = vshll.u32 %v3336_v38, 16  ;;  %v3881_v31 = vld [vmem:[#allocation2 + $0xc8] sm:$0x1]  ;;  %v2678_v63 = vrot.slane %v2676_v58, 5  ;;  %2066 = vst.msk [vmem:[#allocation3 + $0x58] sm:$0xff] %vm2054_vm4, %v2029_v39  ;;  %v3694_v10 = vrot.slane %v3693_v20, 4  ;;  %v4034_v11 = vsel %vm5323_vm9, %v4932_v62, %v4033_v55 }
 0x19f   : > { %v3000_v17 = vsel %vm5323_vm9, %v2998_v7, %v2999_v49  ;;  %v3684_v27 = vrot.slane %v3683_v47, 4  ;;  %v4036_v14 = vrot.slane %v3881_v31, 5  ;;  %v4035_v16 = vrot.slane %v4033_v55, 4  ;;  %v3882_v19 = vld [vmem:[#allocation2 + $0xcc] sm:$0xe] }
 0x1a0   : > { %v3698_v40 = vrot.slane %v3696_v54, 5  ;;  %v2679_v41 = vsel %vm5356_vm12, %v2674_v26, %v2678_v63  ;;  %v4885_v15 = vcombine.low %v2997_v21, %v3000_v17  ;;  %v3718_v61 = vrot.slane %v3717_v59, 4  ;;  %v5224_v7 = vld [vmem:[#allocation2 + $0xcc] sm:$0xff]  }
 0x1a1   : > { %v4853_v51 = vcombine.low %v2669_v6, %v2679_v41  ;;  %v3689_v45 = vsel %vm5356_vm12, %v3684_v27, %v3688_v13  ;;  %v4037_v18 = vsel %vm5323_vm9, %v4035_v16, %v4036_v14  ;;  %v4040_v9 = vrot.slane %v3883_v43, 5 }
 0x1a2   : > { %v3699_v1 = vsel %vm5356_vm12, %v3694_v10, %v3698_v40  ;;  %v4948_v52 = vcombine.low %v4034_v11, %v4037_v18  ;;  %v4933_v44 = vrot.slane %v3882_v19, 9  ;;  %v3713_v37 = vsel %vm5356_vm12, %v3708_v29, %v6682_v56 }
 0x1a3   : > { %2758 = vrot.lane.b32.xlu1 %v4853_v51, %s5252_s9  ;;  %v4916_v5 = vcombine.low %v3689_v45, %v3699_v1  ;;  %v2749_v4 = vpop.permute.xlu0 %2748  ;;  %v3723_v34 = vsel %vm5356_vm12, %v3718_v61, %v3722_v33  ;;  %v4042_v32 = vrot.slane %v4040_v9, 4  ;;  %v4043_v42 = vrot.slane %v3884_v35, 5  ;;  %vm6971_vm12 = vmmov %vm6967_vm5 }
 0x1a4   : > { %2787 = vst.msk [vmem:[#allocation3 + $0x50] sm:$0xff] %vm2776_vm6, %v2749_v4  ;;  %v4917_v8 = vcombine.low %v3713_v37, %v3723_v34  ;;  %v4041_v36 = vsel %vm5323_vm9, %v4933_v44, %v4040_v9  ;;  %vm6977_vm5 = vcmask 64512  }
 0x1a5   : > { %3800 = vrot.lane.b32.xlu0 %v4916_v5, %s5253_s10  ;;  %v4044_v48 = vsel %vm5323_vm9, %v4042_v32, %v4043_v42  ;;  %vm6974_vm9 = vmmov %vm6968_vm0 }
 0x1a6   : > { %v2206_v46 = vpop.permute.xlu1 %2205  ;;  %v4949_v0 = vcombine.low %v4041_v36, %v4044_v48  ;;  %vm6978_vm0 = vmmov %vm6977_vm5 }
 0x1a7   : > { %3079 = vrot.lane.b32.xlu1 %v4885_v15, %s5250_s7  ;;  %v3070_v60 = vpop.permute.xlu0 %3069  ;;  %2243 = vst.msk [vmem:[#allocation3 + $0x58] sm:$0xff] %vm6969_vm3, %v2206_v46  ;;  %vm6979_vm3 = vmmov %vm6978_vm0 }
 0x1a8   : > { %3108 = vst.msk [vmem:[#allocation3 + $0x50] sm:$0xff] %vm6970_vm7, %v3070_v60  ;;  %vm6980_vm7 = vmmov %vm6978_vm0 }
 0x1a9   : > { %4121 = vrot.lane.b32.xlu0 %v4948_v52, %s5251_s8 }
 0x1ab   : > { %3257 = vrot.lane.b32.xlu1 %v5224_v7, %s5249_s6  ;;  %v3248_v56 = vpop.permute.xlu0 %3247  ;;  %s4723_s6 = sshll.u32 %s7077_s19, 1 }
 0x1ac   : > { %3286 = vst.msk [vmem:[#allocation3 + $0x50] sm:$0xff] %vm6971_vm12, %v3248_v56  ;;  %vm6981_vm12 = vmmov %vm6978_vm0  ;;  %s235_s9 = scalar_lea.vmem %s6932_s5, %s4723_s6 }
 0x1af   : > { %3802 = vrot.lane.b32.xlu1 %v4917_v8, %s5253_s10 }
 0x1b2   : > { %v2751_v50 = vpop.permute.xlu1 %2750 }
 0x1b3   : > { %4123 = vrot.lane.b32.xlu1 %v4949_v0, %s5251_s8  ;;  %2788 = vst.msk [vmem:[#allocation3 + $0x58] sm:$0xff] %vm2776_vm6, %v2751_v50 }
 0x1b6   : > { %v3072_v57 = vpop.permute.xlu1 %3071 }
 0x1b7   : > { %3109 = vst.msk [vmem:[#allocation3 + $0x58] sm:$0xff] %vm6972_vm13, %v3072_v57  ;;  %vm6982_vm13 = vmmov %vm6978_vm0 }
 0x1b9   : > { %v3793_v26 = vpop.permute.xlu0 %3792 }
 0x1ba   : > { %v3250_v53 = vpop.permute.xlu1 %3249  ;;  %3831 = vst.msk [vmem:[#allocation3 + $0x50] sm:$0xff] %vm3820_vm11, %v3793_v26 }
 0x1bb   : > { %3287 = vst.msk [vmem:[#allocation3 + $0x58] sm:$0xff] %vm6973_vm14, %v3250_v53 }
 0x1bd   : > { %v4114_v12 = vpop.permute.xlu0 %4113 }
 0x1be   : > { %4152 = vst.msk [vmem:[#allocation3 + $0x50] sm:$0xff] %vm4141_vm1, %v4114_v12 }
 0x1c3   : > { %v4116_v3 = vpop.permute.xlu0 %4115 }
 0x1c4   : > { %v3795_v24 = vpop.permute.xlu1 %3794 }
 0x1c5   : > { %3832 = vst.msk [vmem:[#allocation3 + $0x58] sm:$0xff] %vm3820_vm11, %v3795_v24  ;;  %v4168_v22 = vld [vmem:[#allocation3 + $0x50] sm:$0xff] }
 0x1c6   : > { %4153 = vst.msk [vmem:[#allocation3 + $0x58] sm:$0xff] %vm4141_vm1, %v4116_v3  ;;  %5137 = vmatprep.mubr.msk.bf16.mxu1 %vm4210_vm10, %v4168_v22 }
 0x1c8   : > { %v1707_v58 = vpop.permute.xlu1 %1706 }
 0x1c9   : > { %1743 = vst.msk [vmem:[#allocation3 + $0x60] sm:$0xff] %vm1730_vm2, %v1707_v58  ;;  %v2031_v49 = vpop.permute.xlu0 %2030 }
 0x1ca   : > { %2067 = vst.msk [vmem:[#allocation3 + $0x60] sm:$0xff] %vm2054_vm4, %v2031_v49 }
 0x1cc   : > { %v1709_v38 = vpop.permute.xlu1 %1708 }
 0x1cd   : > { %1744 = vst.msk [vmem:[#allocation3 + $0x68] sm:$0xff] %vm1730_vm2, %v1709_v38  ;;  %v2208_v2 = vpop.permute.xlu0 %2207  ;;  %v4169_v28 = vld [vmem:[#allocation3 + $0x58] sm:$0xff] }
 0x1ce   : > { %2244 = vst.msk [vmem:[#allocation3 + $0x60] sm:$0xff] %vm6974_vm9, %v2208_v2  ;;  %5138 = vmatmul.mubr.msk.bf16.gmra.mrb[4].mxu1 %vm4210_vm10, %v4169_v28  ;;  %vm6983_vm9 = vmmov %vm6978_vm0 }
 0x1d0   : > { %v2033_v25 = vpop.permute.xlu1 %2032 }
 0x1d1   : > { %2068 = vst.msk [vmem:[#allocation3 + $0x68] sm:$0xff] %vm2054_vm4, %v2033_v25 }
 0x1d6   : > { %v2210_v13 = vpop.permute.xlu1 %2209  ;;  %v2753_v23 = vpop.permute.xlu0 %2752 }
 0x1d7   : > { %2245 = vst.msk [vmem:[#allocation3 + $0x68] sm:$0xff] %vm6975_vm15, %v2210_v13  ;;  %vm6984_vm15 = vmmov %vm6978_vm0 }
 0x1d8   : > { %2789 = vst.msk [vmem:[#allocation3 + $0x60] sm:$0xff] %vm2776_vm6, %v2753_v23 }
 0x1d9   : > { %v5119_v59 = vpop.f32.mrb[0].mxu0 }
 0x1da   : > { %v3074_v54 = vpop.permute.xlu0 %3073  ;;  %4426 = vst.msk [vmem:[%s6759_s30 + $0x10] sm:$0xff] %vm6977_vm5, %v5119_v59  ;;  %v4297_v31 = vpop.f32.mrb[1].mxu0  ;;  %v4528_v47 = vmul.f32 %v5119_v59, %v5119_v59  ;;  %v4459_v41 = vsel %vm6983_vm9, %v5119_v59, 0.0  ;;  %vm6986_vm5 = vmmov %vm6978_vm0 }
 0x1db   : > { %3110 = vst.msk [vmem:[#allocation3 + $0x60] sm:$0xff] %vm6976_vm8, %v3074_v54  ;;  %v4526_v30 = vmul.f32 %v4297_v31, %v4297_v31  ;;  %v5120_v6 = vpop.f32.mrb[2].mxu0  ;;  %v4456_v20 = vsel %vm6980_vm7, %v4297_v31, 0.0  ;;  %vm6985_vm8 = vmmov %vm6978_vm0 }
 0x1dc   : > { %4424 = vst.msk [vmem:[%s6759_s30] sm:$0xff] %vm6978_vm0, %v4297_v31  ;;  %v4300_v63 = vpop.f32.mrb[3].mxu0  ;;  %v4529_v27 = vmul.f32 %v5120_v6, %v5120_v6  ;;  %v4561_v16 = vsel %vm6986_vm5, %v4528_v47, 0.0  ;;  %v4461_v43 = vsel %vm6978_vm0, %v5120_v6, 0.0  ;;  %vm6988_vm7 = vmmov %vm6978_vm0 }
 0x1dd   : > { %4427 = vst.msk [vmem:[%s6759_s30 + $0x18] sm:$0xff] %vm6979_vm3, %v5120_v6  ;;  %v4457_v40 = vsel %vm6982_vm13, %v4300_v63, 0.0  ;;  %v4527_v62 = vmul.f32 %v4300_v63, %v4300_v63  ;;  %v4558_v17 = vsel %vm6984_vm15, %v4526_v30, 0.0  ;;  %vm6987_vm3 = vmmov %vm6978_vm0 }
 0x1de   : > { %v3252_v21 = vpop.permute.xlu0 %3251  ;;  %4425 = vst.msk [vmem:[%s6759_s30 + $0x8] sm:$0xff] %vm6981_vm12, %v4300_v63  ;;  %v4458_v55 = vadd.f32 %v4457_v40, %v4456_v20  ;;  %v4563_v18 = vsel %vm6988_vm7, %v4529_v27, 0.0  ;;  %vm6989_vm12 = vmmov %vm6978_vm0  ;;  %vm6997_vm7 = vcmask 458112  }
 0x1df   : > { %3288 = vst.msk [vmem:[#allocation3 + $0x60] sm:$0xff] %vm6973_vm14, %v3252_v21  ;;  %v4559_v14 = vsel %vm6985_vm8, %v4527_v62, 0.0  ;;  %vm6990_vm13 = vmmov %vm6978_vm0  ;;  %vm6991_vm14 = vcmask 392512  }
 0x1e0   : > { %v2755_v39 = vpop.permute.xlu1 %2754  ;;  %v4460_v51 = vadd.f32 %v4459_v41, %v4458_v55  ;;  %v4560_v10 = vadd.f32 %v4559_v14, %v4558_v17  ;;  %vm6992_vm9 = vmmov %vm6978_vm0 }
 0x1e1   : > { %2790 = vst.msk [vmem:[#allocation3 + $0x68] sm:$0xff] %vm2776_vm6, %v2755_v39  ;;  %v5123_v45 = vpop.f32.mrb[4].mxu0  ;;  %vm6993_vm15 = vmmov %vm6978_vm0 }
 0x1e2   : > { %v4562_v33 = vadd.f32 %v4561_v16, %v4560_v10  ;;  %4430 = vst.msk [vmem:[%s6759_s30 + $0x30] sm:$0xff] %vm6987_vm3, %v5123_v45  ;;  %v4313_v15 = vpop.f32.mrb[5].mxu0  ;;  %v4462_v1 = vadd.f32 %v4461_v43, %v4460_v51  ;;  %v4532_v35 = vmul.f32 %v5123_v45, %v5123_v45  ;;  %vm6994_vm8 = vmmov %vm6978_vm0  ;;  %v4467_v42 = vsel %vm6978_vm0, %v5123_v45, 0.0 }
 0x1e3   : > { %4428 = vst.msk [vmem:[%s6759_s30 + $0x20] sm:$0xff] %vm6989_vm12, %v4313_v15  ;;  %v4463_v5 = vsel %vm6990_vm13, %v4313_v15, 0.0  ;;  %v4530_v29 = vmul.f32 %v4313_v15, %v4313_v15  ;;  %v5124_v61 = vpop.f32.mrb[6].mxu0  ;;  %vm6995_vm5 = vmmov %vm6978_vm0 }
 0x1e4   : > { %v3076_v11 = vpop.permute.xlu1 %3075  ;;  %v4464_v19 = vadd.f32 %v4463_v5, %v4462_v1  ;;  %v4564_v9 = vadd.f32 %v4563_v18, %v4562_v33  ;;  %4431 = vst.msk [vmem:[%s6759_s30 + $0x38] sm:$0xff] %vm6992_vm9, %v5124_v61  ;;  %v4316_v4 = vpop.f32.mrb[7].mxu0  ;;  %v4533_v46 = vmul.f32 %v5124_v61, %v5124_v61  ;;  %vm6996_vm3 = vmmov %vm6978_vm0  ;;  %vm7001_vm9 = vcmask 261312  }
 0x1e5   : > { %3111 = vst.msk [vmem:[#allocation3 + $0x68] sm:$0xff] %vm6991_vm14, %v3076_v11  ;;  %v4565_v52 = vsel %vm6993_vm15, %v4530_v29, 0.0  ;;  %v4465_v7 = vsel %vm6995_vm5, %v4316_v4, 0.0  ;;  %v4531_v44 = vmul.f32 %v4316_v4, %v4316_v4  ;;  %vm6998_vm12 = vmmov %vm6978_vm0 }
 0x1e6   : > { %4429 = vst.msk [vmem:[%s6759_s30 + $0x28] sm:$0xff] %vm6994_vm8, %v4316_v4  ;;  %v4566_v37 = vadd.f32 %v4565_v52, %v4564_v9  ;;  %v4466_v34 = vadd.f32 %v4465_v7, %v4464_v19  ;;  %v4569_v56 = vsel %vm6998_vm12, %v4532_v35, 0.0  ;;  %vm6999_vm13 = vmmov %vm6978_vm0 }
 0x1e7   : > { %v4567_v60 = vsel %vm6996_vm3, %v4531_v44, 0.0  ;;  %v4469_v0 = vsel %vm6999_vm13, %v5124_v61, 0.0  ;;  %vm7000_vm14 = vmmov %vm6978_vm0 }
 0x1e8   : > { %v3254_v32 = vpop.permute.xlu1 %3253  ;;  %v4468_v36 = vadd.f32 %v4467_v42, %v4466_v34  ;;  %v4568_v48 = vadd.f32 %v4567_v60, %v4566_v37  ;;  %v4571_v53 = vsel %vm7000_vm14, %v4533_v46, 0.0  ;;  %vm7002_vm15 = vmmov %vm7001_vm9 }
 0x1e9   : > { %3289 = vst.msk [vmem:[#allocation3 + $0x68] sm:$0xff] %vm6997_vm7, %v3254_v32  ;;  %v3797_v8 = vpop.permute.xlu0 %3796  ;;  %vm7004_vm8 = vmmov %vm6997_vm7 }
 0x1ea   : > { %3833 = vst.msk [vmem:[#allocation3 + $0x60] sm:$0xff] %vm3820_vm11, %v3797_v8  ;;  %v4570_v50 = vadd.f32 %v4569_v56, %v4568_v48  ;;  %v4470_v57 = vadd.f32 %v4469_v0, %v4468_v36  ;;  %vm7005_vm5 = vmmov %vm6978_vm0 }
 0x1eb   : > { %vm7007_vm3 = vmmov %vm6978_vm0 }
 0x1ec   : > { %v4572_v12 = vadd.f32 %v4571_v53, %v4570_v50  ;;  %vm7008_vm7 = vmmov %vm6978_vm0 }
 0x1ed   : > { %v4118_v26 = vpop.permute.xlu0 %4117  ;;  %vm7009_vm12 = vmmov %vm6978_vm0 }
 0x1ee   : > { %4154 = vst.msk [vmem:[#allocation3 + $0x60] sm:$0xff] %vm4141_vm1, %v4118_v26  ;;  %vm7010_vm13 = vmmov %vm6978_vm0 }
 0x1ef   : > { %vm7011_vm14 = vmmov %vm6978_vm0 }
 0x1f3   : > { %v4120_v3 = vpop.permute.xlu0 %4119 }
 0x1f4   : > { %v3799_v24 = vpop.permute.xlu1 %3798 }
 0x1f5   : > { %3834 = vst.msk [vmem:[#allocation3 + $0x68] sm:$0xff] %vm3820_vm11, %v3799_v24  ;;  %v4170_v22 = vld [vmem:[#allocation3 + $0x60] sm:$0xff] }
 0x1f6   : > { %4155 = vst.msk [vmem:[#allocation3 + $0x68] sm:$0xff] %vm4141_vm1, %v4120_v3  ;;  %5141 = vmatprep.mubr.msk.bf16.mxu1 %vm4210_vm10, %v4170_v22 }
 0x1f8   : > { %v1711_v58 = vpop.permute.xlu1 %1710 }
 0x1f9   : > { %1745 = vst.msk [vmem:[#allocation3 + $0x70] sm:$0xff] %vm1730_vm2, %v1711_v58  ;;  %v2035_v49 = vpop.permute.xlu0 %2034 }
 0x1fa   : > { %2069 = vst.msk [vmem:[#allocation3 + $0x70] sm:$0xff] %vm2054_vm4, %v2035_v49 }
 0x1fc   : > { %v1713_v38 = vpop.permute.xlu1 %1712 }
 0x1fd   : > { %1746 = vst.msk [vmem:[#allocation3 + $0x78] sm:$0xff] %vm1730_vm2, %v1713_v38  ;;  %v2212_v2 = vpop.permute.xlu0 %2211  ;;  %v4171_v28 = vld [vmem:[#allocation3 + $0x68] sm:$0xff]  ;;  %vm7003_vm2 = vcmask 392512  }
 0x1fe   : > { %2246 = vst.msk [vmem:[#allocation3 + $0x70] sm:$0xff] %vm7001_vm9, %v2212_v2  ;;  %5142 = vmatmul.mubr.msk.bf16.gmra.mrb[8].mxu1 %vm4210_vm10, %v4171_v28  ;;  %vm7012_vm9 = vmmov %vm6978_vm0 }
 0x200   : > { %v2037_v25 = vpop.permute.xlu1 %2036 }
 0x201   : > { %2070 = vst.msk [vmem:[#allocation3 + $0x78] sm:$0xff] %vm2054_vm4, %v2037_v25  ;;  %vm7006_vm4 = vmmov %vm6978_vm0 }
 0x205   : > { %v2757_v13 = vpop.permute.xlu0 %2756 }
 0x206   : > { %2791 = vst.msk [vmem:[#allocation3 + $0x70] sm:$0xff] %vm2776_vm6, %v2757_v13 }
 0x208   : > { %v2214_v23 = vpop.permute.xlu1 %2213 }
 0x209   : > { %2247 = vst.msk [vmem:[#allocation3 + $0x78] sm:$0xff] %vm7002_vm15, %v2214_v23  ;;  %v3078_v54 = vpop.permute.xlu0 %3077  ;;  %vm7013_vm15 = vmmov %vm6978_vm0 }
 0x20a   : > { %3112 = vst.msk [vmem:[#allocation3 + $0x70] sm:$0xff] %vm7003_vm2, %v3078_v54  ;;  %vm7014_vm2 = vmmov %vm6978_vm0 }
 0x20d   : > { %v3256_v59 = vpop.permute.xlu0 %3255  ;;  %v5127_v31 = vpop.f32.mrb[8].mxu0 }
 0x20e   : > { %3290 = vst.msk [vmem:[#allocation3 + $0x70] sm:$0xff] %vm7004_vm8, %v3256_v59  ;;  %v4329_v30 = vpop.f32.mrb[9].mxu0  ;;  %v4536_v40 = vmul.f32 %v5127_v31, %v5127_v31  ;;  %v4475_v14 = vsel %vm7011_vm14, %v5127_v31, 0.0  ;;  %vm7015_vm8 = vmmov %vm6978_vm0 }
 0x20f   : > { %4434 = vst.msk [vmem:[%s6759_s30 + $0x50] sm:$0xff] %vm7005_vm5, %v5127_v31  ;;  %v4471_v6 = vsel %vm7006_vm4, %v4329_v30, 0.0  ;;  %v4534_v63 = vmul.f32 %v4329_v30, %v4329_v30  ;;  %v5128_v21 = vpop.f32.mrb[10].mxu0  ;;  %vm7016_vm5 = vcmask 392512   ;;  %vm7018_vm4 = vmmov %vm6978_vm0 }
 0x210   : > { %4432 = vst.msk [vmem:[%s6759_s30 + $0x40] sm:$0xff] %vm6978_vm0, %v4329_v30  ;;  %v4472_v47 = vadd.f32 %v4471_v6, %v4470_v57  ;;  %v4332_v20 = vpop.f32.mrb[11].mxu0  ;;  %v4537_v51 = vmul.f32 %v5128_v21, %v5128_v21  ;;  %v4577_v45 = vsel %vm7013_vm15, %v4536_v40, 0.0  ;;  %v4477_v33 = vsel %vm7014_vm2, %v5128_v21, 0.0  ;;  %vm7026_vm14 = vmmov %vm6978_vm0 }
 0x211   : > { %4435 = vst.msk [vmem:[%s6759_s30 + $0x58] sm:$0xff] %vm7007_vm3, %v5128_v21  ;;  %v4573_v62 = vsel %vm7008_vm7, %v4534_v63, 0.0  ;;  %v4473_v55 = vsel %vm7010_vm13, %v4332_v20, 0.0  ;;  %v4535_v39 = vmul.f32 %v4332_v20, %v4332_v20  ;;  %vm7019_vm3 = vmmov %vm6978_vm0 }
 0x212   : > { %4433 = vst.msk [vmem:[%s6759_s30 + $0x48] sm:$0xff] %vm7009_vm12, %v4332_v20  ;;  %v4574_v41 = vadd.f32 %v4573_v62, %v4572_v12  ;;  %v4474_v17 = vadd.f32 %v4473_v55, %v4472_v47  ;;  %v4579_v5 = vsel %vm7015_vm8, %v4537_v51, 0.0  ;;  %vm7021_vm7 = vmmov %vm6978_vm0 }
 0x213   : > { %v4575_v10 = vsel %vm7012_vm9, %v4535_v39, 0.0  ;;  %vm7024_vm12 = vmmov %vm6978_vm0 }
 0x214   : > { %v4476_v16 = vadd.f32 %v4475_v14, %v4474_v17  ;;  %v4576_v43 = vadd.f32 %v4575_v10, %v4574_v41  ;;  %vm7025_vm13 = vmmov %vm6978_vm0 }
 0x215   : > { %v2759_v27 = vpop.permute.xlu1 %2758  ;;  %vm7027_vm9 = vmmov %vm6978_vm0 }
 0x216   : > { %2792 = vst.msk [vmem:[#allocation3 + $0x78] sm:$0xff] %vm2776_vm6, %v2759_v27  ;;  %v4578_v1 = vadd.f32 %v4577_v45, %v4576_v43  ;;  %v4478_v11 = vadd.f32 %v4477_v33, %v4476_v16  ;;  %vm7017_vm6 = vcmask 458112   ;;  %vm7028_vm15 = vmmov %vm6978_vm0 }
 0x217   : > { %v3801_v15 = vpop.permute.xlu0 %3800  ;;  %vm7029_vm2 = vmmov %vm6978_vm0 }
 0x218   : > { %3835 = vst.msk [vmem:[#allocation3 + $0x70] sm:$0xff] %vm3820_vm11, %v3801_v15  ;;  %v4580_v29 = vadd.f32 %v4579_v5, %v4578_v1  ;;  %vm7030_vm8 = vmmov %vm6978_vm0 }
 0x219   : > { %v3080_v18 = vpop.permute.xlu1 %3079 }
 0x21a   : > { %3113 = vst.msk [vmem:[#allocation3 + $0x78] sm:$0xff] %vm7016_vm5, %v3080_v18  ;;  %vm7031_vm5 = vmmov %vm6978_vm0 }
 0x21b   : > { %v4122_v61 = vpop.permute.xlu0 %4121 }
 0x21c   : > { %4156 = vst.msk [vmem:[#allocation3 + $0x70] sm:$0xff] %vm4141_vm1, %v4122_v61 }
 0x21d   : > { %v3258_v19 = vpop.permute.xlu1 %3257 }
 0x21e   : > { %3291 = vst.msk [vmem:[#allocation3 + $0x78] sm:$0xff] %vm7017_vm6, %v3258_v19  ;;  %vm7032_vm6 = vmmov %vm6978_vm0 }
 0x221   : > { %v3803_v9 = vpop.permute.xlu1 %3802 }
 0x222   : > { %3836 = vst.msk [vmem:[#allocation3 + $0x78] sm:$0xff] %vm3820_vm11, %v3803_v9  ;;  %vm7020_vm11 = vmmov %vm6978_vm0 }
 0x223   : > { %v4172_v4 = vld [vmem:[#allocation3 + $0x70] sm:$0xff] }
 0x224   : > { %5145 = vmatprep.mubr.msk.bf16.mxu1 %vm4210_vm10, %v4172_v4 }
 0x225   : > { %v4124_v35 = vpop.permute.xlu1 %4123 }
 0x226   : > { %4157 = vst.msk [vmem:[#allocation3 + $0x78] sm:$0xff] %vm4141_vm1, %v4124_v35  ;;  %vm7022_vm1 = vmmov %vm6978_vm0 }
 0x22d   : > { %v4173_v52 = vld [vmem:[#allocation3 + $0x78] sm:$0xff] }
 0x22e   : > { %5146 = vmatmul.mubr.msk.bf16.gmra.mrb[12].mxu1 %vm4210_vm10, %v4173_v52  ;;  %vm7023_vm10 = vmmov %vm6978_vm0 }
 0x239   : > { %v5131_v7 = vpop.f32.mrb[12].mxu0 }
 0x23a   : > { %4438 = vst.msk [vmem:[%s6759_s30 + $0x70] sm:$0xff] %vm6978_vm0, %v5131_v7  ;;  %v4345_v44 = vpop.f32.mrb[13].mxu0  ;;  %v4540_v60 = vmul.f32 %v5131_v7, %v5131_v7  ;;  %v4483_v50 = vsel %vm7024_vm12, %v5131_v7, 0.0  ;;  %vm7039_vm12 = vmmov %vm6978_vm0 }
 0x23b   : > { %4436 = vst.msk [vmem:[%s6759_s30 + $0x60] sm:$0xff] %vm7018_vm4, %v4345_v44  ;;  %v4479_v37 = vsel %vm7019_vm3, %v4345_v44, 0.0  ;;  %v4538_v34 = vmul.f32 %v4345_v44, %v4345_v44  ;;  %v5132_v32 = vpop.f32.mrb[14].mxu0  ;;  %vm7033_vm4 = vmmov %vm6978_vm0 }
 0x23c   : > { %v4480_v42 = vadd.f32 %v4479_v37, %v4478_v11  ;;  %4439 = vst.msk [vmem:[%s6759_s30 + $0x78] sm:$0xff] %vm7020_vm11, %v5132_v32  ;;  %v4348_v46 = vpop.f32.mrb[15].mxu0  ;;  %v4541_v57 = vmul.f32 %v5132_v32, %v5132_v32  ;;  %v4585_v3 = vsel %vm7026_vm14, %v4540_v60, 0.0  ;;  %v4485_v24 = vsel %vm7027_vm9, %v5132_v32, 0.0  ;;  %vm7034_vm3 = vmmov %vm6978_vm0 }
 0x23d   : > { %v4581_v8 = vsel %vm7021_vm7, %v4538_v34, 0.0  ;;  %4437 = vst.msk [vmem:[%s6759_s30 + $0x68] sm:$0xff] %vm7022_vm1, %v4348_v46  ;;  %v4481_v36 = vsel %vm7023_vm10, %v4348_v46, 0.0  ;;  %v4539_v48 = vmul.f32 %v4348_v46, %v4348_v46  ;;  %vm7035_vm11 = vmmov %vm6978_vm0 }
 0x23e   : > { %v4582_v56 = vadd.f32 %v4581_v8, %v4580_v29  ;;  %v4482_v0 = vadd.f32 %v4481_v36, %v4480_v42  ;;  %v4587_v49 = vsel %vm7028_vm15, %v4541_v57, 0.0  ;;  %vm7036_vm7 = vmmov %vm6978_vm0 }
 0x23f   : > { %v4583_v53 = vsel %vm7025_vm13, %v4539_v48, 0.0  ;;  %vm7037_vm1 = vmmov %vm6978_vm0 }
 0x240   : > { %v4484_v26 = vadd.f32 %v4483_v50, %v4482_v0  ;;  %v4584_v12 = vadd.f32 %v4583_v53, %v4582_v56  ;;  %vm7038_vm10 = vmmov %vm6978_vm0 }
 0x241   : > { %vm7040_vm13 = vmmov %vm6978_vm0 }
 0x242   : > { %v4586_v22 = vadd.f32 %v4585_v3, %v4584_v12  ;;  %v4486_v58 = vadd.f32 %v4485_v24, %v4484_v26  ;;  %vm7041_vm14 = vmmov %vm6978_vm0 }
 0x243   : > { %vm7042_vm9 = vmmov %vm6978_vm0 }
 0x244   : > { %v4588_v38 = vadd.f32 %v4587_v49, %v4586_v22  ;;  %vm7043_vm15 = vmmov %vm6978_vm0 }
 0x26e   : > { %v5135_v2 = vpop.f32.mrb[0].mxu1 }
 0x26f   : > { %4442 = vst.msk [vmem:[%s6759_s30 + $0x90] sm:$0xff] %vm7029_vm2, %v5135_v2  ;;  %v4361_v28 = vpop.f32.mrb[1].mxu1  ;;  %v4544_v31 = vmul.f32 %v5135_v2, %v5135_v2  ;;  %v4491_v20 = vsel %vm7035_vm11, %v5135_v2, 0.0  ;;  %vm7044_vm2 = vmmov %vm6978_vm0 }
 0x270   : > { %4440 = vst.msk [vmem:[%s6759_s30 + $0x80] sm:$0xff] %vm7030_vm8, %v4361_v28  ;;  %v4487_v25 = vsel %vm7031_vm5, %v4361_v28, 0.0  ;;  %v4542_v13 = vmul.f32 %v4361_v28, %v4361_v28  ;;  %v5136_v23 = vpop.f32.mrb[2].mxu1  ;;  %vm7045_vm8 = vmmov %vm6978_vm0 }
 0x271   : > { %v4488_v54 = vadd.f32 %v4487_v25, %v4486_v58  ;;  %4443 = vst.msk [vmem:[%s6759_s30 + $0x98] sm:$0xff] %vm7032_vm6, %v5136_v23  ;;  %v4364_v59 = vpop.f32.mrb[3].mxu1  ;;  %v4545_v40 = vmul.f32 %v5136_v23, %v5136_v23  ;;  %v4593_v41 = vsel %vm7037_vm1, %v4544_v31, 0.0  ;;  %v4493_v17 = vsel %vm7038_vm10, %v5136_v23, 0.0  ;;  %vm7046_vm5 = vmmov %vm6978_vm0 }
 0x272   : > { %v4589_v30 = vsel %vm6978_vm0, %v4542_v13, 0.0  ;;  %4441 = vst.msk [vmem:[%s6759_s30 + $0x88] sm:$0xff] %vm7033_vm4, %v4364_v59  ;;  %v4489_v6 = vsel %vm7034_vm3, %v4364_v59, 0.0  ;;  %v4543_v63 = vmul.f32 %v4364_v59, %v4364_v59  ;;  %vm7047_vm6 = vmmov %vm6978_vm0 }
 0x273   : > { %v4590_v21 = vadd.f32 %v4589_v30, %v4588_v38  ;;  %v4490_v47 = vadd.f32 %v4489_v6, %v4488_v54  ;;  %v4595_v51 = vsel %vm7039_vm12, %v4545_v40, 0.0  ;;  %vm7048_vm4 = vmmov %vm6978_vm0 }
 0x274   : > { %v4591_v62 = vsel %vm7036_vm7, %v4543_v63, 0.0  ;;  %vm7049_vm3 = vmmov %vm6978_vm0 }
 0x275   : > { %v4492_v55 = vadd.f32 %v4491_v20, %v4490_v47  ;;  %v4592_v39 = vadd.f32 %v4591_v62, %v4590_v21  ;;  %vm7050_vm11 = vmmov %vm6978_vm0 }
 0x276   : > { %vm7051_vm7 = vmmov %vm6978_vm0 }
 0x277   : > { %v4594_v27 = vadd.f32 %v4593_v41, %v4592_v39  ;;  %v4494_v14 = vadd.f32 %v4493_v17, %v4492_v55  ;;  %vm7052_vm1 = vmmov %vm6978_vm0 }
 0x278   : > { %vm7053_vm10 = vmmov %vm6978_vm0 }
 0x279   : > { %v4596_v10 = vadd.f32 %v4595_v51, %v4594_v27  ;;  %vm7054_vm12 = vmmov %vm6978_vm0 }
 0x2a1   : > { %v5139_v16 = vpop.f32.mrb[4].mxu1 }
 0x2a2   : > { %4446 = vst.msk [vmem:[%s6759_s30 + $0xb0] sm:$0xff] %vm7040_vm13, %v5139_v16  ;;  %v4377_v43 = vpop.f32.mrb[5].mxu1  ;;  %v4548_v18 = vmul.f32 %v5139_v16, %v5139_v16  ;;  %v4499_v4 = vsel %vm7047_vm6, %v5139_v16, 0.0  ;;  %vm7055_vm13 = vmmov %vm6978_vm0 }
 0x2a3   : > { %4444 = vst.msk [vmem:[%s6759_s30 + $0xa0] sm:$0xff] %vm7041_vm14, %v4377_v43  ;;  %v4495_v45 = vsel %vm7042_vm9, %v4377_v43, 0.0  ;;  %v4546_v33 = vmul.f32 %v4377_v43, %v4377_v43  ;;  %v5140_v15 = vpop.f32.mrb[6].mxu1  ;;  %vm7056_vm14 = vmmov %vm6978_vm0 }
 0x2a4   : > { %v4496_v1 = vadd.f32 %v4495_v45, %v4494_v14  ;;  %4447 = vst.msk [vmem:[%s6759_s30 + $0xb8] sm:$0xff] %vm7043_vm15, %v5140_v15  ;;  %v4380_v11 = vpop.f32.mrb[7].mxu1  ;;  %v4549_v35 = vmul.f32 %v5140_v15, %v5140_v15  ;;  %v4601_v37 = vsel %vm7048_vm4, %v4548_v18, 0.0  ;;  %v4501_v34 = vsel %vm7049_vm3, %v5140_v15, 0.0  ;;  %vm7057_vm9 = vmmov %vm6978_vm0 }
 0x2a5   : > { %v4597_v5 = vsel %vm7044_vm2, %v4546_v33, 0.0  ;;  %4445 = vst.msk [vmem:[%s6759_s30 + $0xa8] sm:$0xff] %vm7045_vm8, %v4380_v11  ;;  %v4497_v29 = vsel %vm7046_vm5, %v4380_v11, 0.0  ;;  %v4547_v61 = vmul.f32 %v4380_v11, %v4380_v11  ;;  %vm7058_vm15 = vmmov %vm6978_vm0 }
 0x2a6   : > { %v4598_v19 = vadd.f32 %v4597_v5, %v4596_v10  ;;  %v4498_v9 = vadd.f32 %v4497_v29, %v4496_v1  ;;  %v4603_v46 = vsel %vm7050_vm11, %v4549_v35, 0.0  ;;  %vm7059_vm2 = vmmov %vm6978_vm0 }
 0x2a7   : > { %v4599_v52 = vsel %vm6978_vm0, %v4547_v61, 0.0  ;;  %vm7060_vm8 = vmmov %vm6978_vm0 }
 0x2a8   : > { %v4500_v7 = vadd.f32 %v4499_v4, %v4498_v9  ;;  %v4600_v44 = vadd.f32 %v4599_v52, %v4598_v19  ;;  %vm7061_vm5 = vmmov %vm6978_vm0 }
 0x2a9   : > { %vm7062_vm6 = vmmov %vm6978_vm0 }
 0x2aa   : > { %v4602_v32 = vadd.f32 %v4601_v37, %v4600_v44  ;;  %v4502_v42 = vadd.f32 %v4501_v34, %v4500_v7  ;;  %vm7063_vm4 = vmmov %vm6978_vm0 }
 0x2ab   : > { %vm7064_vm3 = vmmov %vm6978_vm0 }
 0x2ac   : > { %v4604_v60 = vadd.f32 %v4603_v46, %v4602_v32  ;;  %vm7065_vm11 = vmmov %vm6978_vm0 }
 0x2d1   : > { %v5143_v8 = vpop.f32.mrb[8].mxu1 }
 0x2d2   : > { %4450 = vst.msk [vmem:[%s6759_s30 + $0xd0] sm:$0xff] %vm7051_vm7, %v5143_v8  ;;  %v4393_v36 = vpop.f32.mrb[9].mxu1  ;;  %v4552_v53 = vmul.f32 %v5143_v8, %v5143_v8  ;;  %v4507_v58 = vsel %vm7058_vm15, %v5143_v8, 0.0  ;;  %vm7066_vm7 = vmmov %vm6978_vm0 }
 0x2d3   : > { %4448 = vst.msk [vmem:[%s6759_s30 + $0xc0] sm:$0xff] %vm7052_vm1, %v4393_v36  ;;  %v4503_v48 = vsel %vm7053_vm10, %v4393_v36, 0.0  ;;  %v4550_v56 = vmul.f32 %v4393_v36, %v4393_v36  ;;  %v5144_v0 = vpop.f32.mrb[10].mxu1  ;;  %vm7067_vm1 = vmmov %vm6978_vm0 }
 0x2d4   : > { %v4504_v50 = vadd.f32 %v4503_v48, %v4502_v42  ;;  %4451 = vst.msk [vmem:[%s6759_s30 + $0xd8] sm:$0xff] %vm7054_vm12, %v5144_v0  ;;  %v4396_v57 = vpop.f32.mrb[11].mxu1  ;;  %v4553_v49 = vmul.f32 %v5144_v0, %v5144_v0  ;;  %v4609_v25 = vsel %vm7060_vm8, %v4552_v53, 0.0  ;;  %v4509_v13 = vsel %vm7061_vm5, %v5144_v0, 0.0  ;;  %vm7068_vm10 = vmmov %vm6978_vm0 }
 0x2d5   : > { %v4605_v26 = vsel %vm7055_vm13, %v4550_v56, 0.0  ;;  %4449 = vst.msk [vmem:[%s6759_s30 + $0xc8] sm:$0xff] %vm7056_vm14, %v4396_v57  ;;  %v4505_v12 = vsel %vm7057_vm9, %v4396_v57, 0.0  ;;  %v4551_v3 = vmul.f32 %v4396_v57, %v4396_v57  ;;  %vm7069_vm12 = vmmov %vm6978_vm0 }
 0x2d6   : > { %v4606_v24 = vadd.f32 %v4605_v26, %v4604_v60  ;;  %v4506_v22 = vadd.f32 %v4505_v12, %v4504_v50  ;;  %v4611_v59 = vsel %vm7062_vm6, %v4553_v49, 0.0  ;;  %vm7070_vm13 = vmmov %vm6978_vm0 }
 0x2d7   : > { %v4607_v38 = vsel %vm7059_vm2, %v4551_v3, 0.0  ;;  %vm7071_vm14 = vmmov %vm6978_vm0  ;;  %vm7074_vm2 = vcmask 57344  }
 0x2d8   : > { %v4508_v2 = vadd.f32 %v4507_v58, %v4506_v22  ;;  %v4608_v28 = vadd.f32 %v4607_v38, %v4606_v24  ;;  %vm7072_vm9 = vmmov %vm6978_vm0 }
 0x2d9   : > { %vm7073_vm15 = vmmov %vm6978_vm0 }
 0x2da   : > { %v4610_v23 = vadd.f32 %v4609_v25, %v4608_v28  ;;  %v4510_v54 = vadd.f32 %v4509_v13, %v4508_v2  ;;  %vm7075_vm8 = vmmov %vm7074_vm2 }
 0x2dc   : > { %v4612_v31 = vadd.f32 %v4611_v59, %v4610_v23 }
 0x301   : > { %v5147_v30 = vpop.f32.mrb[12].mxu1 }
 0x302   : > { %4454 = vst.msk [vmem:[%s6759_s30 + $0xf0] sm:$0xff] %vm6978_vm0, %v5147_v30  ;;  %v4409_v6 = vpop.f32.mrb[13].mxu1  ;;  %v4556_v62 = vmul.f32 %v5147_v30, %v5147_v30  ;;  %v4515_v14 = vsel %vm7069_vm12, %v5147_v30, 0.0 }
 0x303   : > { %4452 = vst.msk [vmem:[%s6759_s30 + $0xe0] sm:$0xff] %vm7063_vm4, %v4409_v6  ;;  %v4511_v63 = vsel %vm7064_vm3, %v4409_v6, 0.0  ;;  %v4554_v21 = vmul.f32 %v4409_v6, %v4409_v6  ;;  %v5148_v47 = vpop.f32.mrb[14].mxu1 }
 0x304   : > { %v4512_v20 = vadd.f32 %v4511_v63, %v4510_v54  ;;  %4455 = vst.msk [vmem:[%s6759_s30 + $0xf8] sm:$0xff] %vm7065_vm11, %v5148_v47  ;;  %v4412_v40 = vpop.f32.mrb[15].mxu1  ;;  %v4557_v51 = vmul.f32 %v5148_v47, %v5148_v47  ;;  %v4617_v45 = vsel %vm7071_vm14, %v4556_v62, 0.0  ;;  %v4517_v33 = vsel %vm7072_vm9, %v5148_v47, 0.0 }
 0x305   : > { %v4613_v55 = vsel %vm7066_vm7, %v4554_v21, 0.0  ;;  %4453 = vst.msk [vmem:[%s6759_s30 + $0xe8] sm:$0xff] %vm7067_vm1, %v4412_v40  ;;  %v4513_v39 = vsel %vm7068_vm10, %v4412_v40, 0.0  ;;  %v4555_v41 = vmul.f32 %v4412_v40, %v4412_v40 }
 0x306   : > { %v4614_v17 = vadd.f32 %v4613_v55, %v4612_v31  ;;  %v4514_v27 = vadd.f32 %v4513_v39, %v4512_v20  ;;  %v4619_v11 = vsel %vm7073_vm15, %v4557_v51, 0.0 }
 0x307   : > { %v4615_v10 = vsel %vm7070_vm13, %v4555_v41, 0.0 }
 0x308   : > { %v4516_v16 = vadd.f32 %v4515_v14, %v4514_v27  ;;  %v4616_v43 = vadd.f32 %v4615_v10, %v4614_v17 }
 0x30a   : > { %v4518_v15 = vadd.f32 %v4517_v33, %v4516_v16  ;;  %v4618_v1 = vadd.f32 %v4617_v45, %v4616_v43 }
 0x30c   : > { %v4519_v18 = vrot.slane %v4518_v15, 4  ;;  %v4620_v5 = vadd.f32 %v4619_v11, %v4618_v1 }
 0x30e   : > { %v4520_v29 = vadd.f32 %v4519_v18, %v4518_v15  ;;  %v4621_v61 = vrot.slane %v4620_v5, 4 }
 0x310   : > { %v4521_v19 = vrot.slane %v4520_v29, 2  ;;  %v4622_v9 = vadd.f32 %v4621_v61, %v4620_v5 }
 0x312   : > { %v4522_v4 = vadd.f32 %v4521_v19, %v4520_v29  ;;  %v4623_v35 = vrot.slane %v4622_v9, 2 }
 0x314   : > { %v4523_v52 = vrot.slane %v4522_v4, 1  ;;  %v4624_v7 = vadd.f32 %v4623_v35, %v4622_v9 }
 0x316   : > { %v4524_v44 = vadd.f32 %v4523_v52, %v4522_v4  ;;  %v4625_v37 = vrot.slane %v4624_v7, 1 }
 0x318   : > { %4525 = vst.msk [vmem:[%s235_s9] sm:$0x1] %vm7074_vm2, %v4524_v44  ;;  %v4626_v34 = vadd.f32 %v4625_v37, %v4624_v7 }
 0x31a   : > { %4627 = vst.msk [vmem:[%s235_s9 + $0x1] sm:$0x1] %vm7075_vm8, %v4626_v34 }
 0x31b PF: > { %s16_s18 = sadd.s32 1, %s5243_s18  }
 0x31c   : > { %p13_p4 = scmp.ge.s32.totalorder %s16_s18, 4  }
 0x31e   :  { %15 = sbr.rel (!%p13_p4) target bundleno = 1 (0x1), region = 81 }

// kernel: conv_block_forward.3
= control target key start
LH: loop header
LB: loop body
LE: loop exit
PB: predicated region body
PF: predicated region fallthrough
CT: control target
= control target key end

     0   :  { %s4996_s12 = smov 0   ;;  %s6374_s0 = inlined_call_operand.vmem [shape: bf16[2,16,16,4], index: 0, kind: input, shape index: {}]   ;;  %s6375_s1 = inlined_call_operand.vmem [shape: bf16[36,8], index: 1, kind: input, shape index: {}]   ;;  %s6376_s2 = inlined_call_operand.vmem [shape: bf16[2,256,8], index: 2, kind: output, shape index: {0}]   ;;  %s6377_s3 = inlined_call_operand.vmem [shape: f32[2,2,8], index: 3, kind: output, shape index: {1}]  }
   0x1 LB: > { %s4537_s13 = sadd.s32 4294967295, %s4965_s12   ;;  %p4541_p0 = scmp.ge.s32.totalorder %s4965_s12, 1  ;;  %s4965_s12 = sphi %s4996_s12, %s14_s12  }
   0x2   : > { %p140_p1 = scmp.lt.s32.totalorder %s4965_s12, 3 }
   0x4   : > { %p141_p2 = pnand %p4541_p0, %p140_p1 }
   0x5   : > { %vm183_vm0 = vcmask (!%p141_p2), 27648   ;;  %vm186_vm1 = vcmask (!%p141_p2), 24576   ;;  %vm194_vm2 = vsmask.f32 (!%p141_p2), 256  ;;  %v4967_v0 = vmov (!%p141_p2), 0   ;;  %p168_p3 = scmp.lt.s32.totalorder (!%p141_p2), %s4537_s13, 1 }
   0x6   : > { %144 = sbr.rel (%p141_p2) target bundleno = 764 (0x2fc), region = 28  ;;  %184 = vst.msk [vmem:[#allocation2] sm:$0xf] (!%p141_p2), %vm183_vm0, %v4967_v0  ;;  %185 = vst.msk [vmem:[#allocation2 + $0x4] sm:$0xf] (!%p141_p2), %vm183_vm0, %v4967_v0  ;;  %vm1551_vm8 = vcmask (!%p141_p2), 1042432  }
   0x7   : > { %187 = vst.msk [vmem:[#allocation2 + $0x8] sm:$0x1] (!%p141_p2), %vm186_vm1, %v4967_v0  ;;  %vm5007_vm3 = vmand (!%p141_p2), %vm186_vm1, %vm194_vm2  ;;  %vm244_vm4 = vsmask.f32 (!%p141_p2), 7938  ;;  %v196_v3 = vld [vmem:[#allocation2 + $0xc] sm:$0x1] (!%p141_p2) }
   0x8   : > { %189 = vst.msk [vmem:[#allocation2 + $0xcc] sm:$0xf] (!%p141_p2), %vm183_vm0, %v4967_v0  ;;  %190 = vst.msk [vmem:[#allocation2 + $0xd0] sm:$0xf] (!%p141_p2), %vm183_vm0, %v4967_v0  ;;  %v197_v4 = vsel (!%p141_p2), %vm5007_vm3, 0, %v196_v3  ;;  %vm1552_vm9 = vcmask (!%p141_p2), 1046532  }
   0x9   : > { %191 = vst.msk [vmem:[#allocation2 + $0xd4] sm:$0x1] (!%p141_p2), %vm186_vm1, %v4967_v0  ;;  %vm5014_vm5 = vmand (!%p141_p2), %vm186_vm1, %vm244_vm4  ;;  %v199_v5 = vld [vmem:[#allocation2 + $0x18] sm:$0x1] (!%p141_p2)  ;;  %v202_v7 = vld [vmem:[#allocation2 + $0x24] sm:$0x1] (!%p141_p2) }
   0xa   : > { %198 = vst [vmem:[#allocation2 + $0xc] sm:$0x1] (!%p141_p2), %v197_v4  ;;  %v200_v6 = vsel (!%p141_p2), %vm5007_vm3, 0, %v199_v5  ;;  %v246_v8 = vld [vmem:[#allocation2 + $0x14] sm:$0x1] (!%p141_p2)  ;;  %v203_v9 = vsel (!%p141_p2), %vm5007_vm3, 0, %v202_v7  ;;  %vm5042_vm11 = vmor (!%p141_p2), %vm1551_vm8, %vm1552_vm9 }
   0xb   : > { %vm955_vm6 = vsmask.f32 (!%p141_p2), 3328  ;;  %201 = vst [vmem:[#allocation2 + $0x18] sm:$0x1] (!%p141_p2), %v200_v6  ;;  %v247_v10 = vsel (!%p141_p2), %vm5014_vm5, 0, %v246_v8  ;;  %vm5059_vm13 = vmand (!%p141_p2), %vm183_vm0, %vm244_vm4  ;;  %s4968_s18 = smov (!%p141_p2), 8  }
   0xc   : > { %v249_v11 = vld [vmem:[#allocation2 + $0x20] sm:$0x1] (!%p141_p2)  ;;  %vm956_vm7 = vsmask.f32 (!%p141_p2), 7440  ;;  %204 = vst [vmem:[#allocation2 + $0x24] sm:$0x1] (!%p141_p2), %v203_v9 }
   0xd   : > { %s6425_s13 = smov (!%p168_p3, %s4537_s13), 1  ;;  %248 = vst [vmem:[#allocation2 + $0x14] sm:$0x1] %v247_v10  ;;  %v250_v12 = vsel %vm5014_vm5, 0, %v249_v11  ;;  %v252_v13 = vld [vmem:[#allocation2 + $0x2c] sm:$0x1]  ;;  %vm5051_vm12 = vmor %vm955_vm6, %vm956_vm7 }
   0xe   : > { %s4792_s14 = sshll.u32 %s6425_s13, 7  ;;  %vm326_vm10 = vsmask.f32 4368  ;;  %251 = vst [vmem:[#allocation2 + $0x20] sm:$0x1] %v250_v12  ;;  %v253_v14 = vsel %vm5014_vm5, 0, %v252_v13 }
   0xf   : > { %v907_v15 = vld [vmem:[#allocation2] sm:$0xf]  ;;  %v908_v16 = vld [vmem:[#allocation2 + $0x4] sm:$0xf]  ;;  %v909_v17 = vld [vmem:[#allocation2 + $0x8] sm:$0x1]  ;;  %s5038_s17 = scalar_lea.vmem %s6374_s0, %s4792_s14  ;;  %s6214_s7 = scalar_lea.vmem %s6376_s2, %s4792_s14 }
  0x10   : > { %254 = vst [vmem:[#allocation2 + $0x2c] sm:$0x1] %v253_v14  ;;  %v959_v18 = vshrl.u32 %v907_v15, 16  ;;  %v962_v19 = vshll.u32 %v907_v15, 16  ;;  %v968_v20 = vshll.u32 %v908_v16, 16  ;;  %v972_v21 = vshrl.u32 %v908_v16, 16  ;;  %vm5067_vm14 = vmor %vm194_vm2, %vm326_vm10 }
  0x11   : > { %v1455_v22 = vld [vmem:[#allocation2] sm:$0xe]  ;;  %v978_v23 = vshll.u32 %v909_v17, 16  ;;  %v1456_v24 = vld [vmem:[#allocation2 + $0x4] sm:$0xf]  ;;  %s4969_s19 = smov 4  }
  0x12   : > { %v1457_v25 = vld [vmem:[#allocation2 + $0x8] sm:$0x1]  ;;  %v4579_v26 = vrot.slane %v1455_v22, 9  ;;  %v961_v27 = vrot.slane %v959_v18, 4  ;;  %v964_v28 = vrot.slane %v962_v19, 5  ;;  %v970_v29 = vrot.slane %v968_v20, 5 }
  0x13   : > { %v974_v30 = vrot.slane %v972_v21, 4  ;;  %v294_v32 = vld [vmem:[%s5038_s17] sm:$0xf]  ;;  %v980_v33 = vrot.slane %v978_v23, 5  ;;  %v1556_v34 = vrot.slane %v1456_v24, 5  ;;  %v1559_v35 = vrot.slane %v1457_v25, 5 }
  0x14   : > { %v295_v36 = vld [vmem:[%s5038_s17 + $0x4] sm:$0xf]  ;;  %v329_v37 = vshrl.u32 %v294_v32, 16  ;;  %v965_v38 = vor.u32 %v964_v28, %v961_v27  ;;  %v332_v40 = vshll.u32 %v294_v32, 16  ;;  %v296_v42 = vld [vmem:[%s5038_s17 + $0x8] sm:$0xf] }
  0x15   : > { %v975_v39 = vor.u32 %v974_v30, %v970_v29  ;;  %v337_v41 = vshrl.u32 %v295_v36, 16  ;;  %v1557_v44 = vsel %vm5042_vm11, %v4579_v26, %v1556_v34  ;;  %v1558_v45 = vrot.slane %v1556_v34, 4  ;;  %v650_v52 = vld [vmem:[#allocation2 + $0xc] sm:$0xf]  ;;  %v298_v60 = vld [vmem:[%s5038_s17 + $0x10] sm:$0xf] }
  0x16   : > { %v331_v46 = vrot.slane %v329_v37, 7  ;;  %v340_v47 = vshll.u32 %v295_v36, 16  ;;  %v966_v49 = vrot.slane %v965_v38, 4  ;;  %v346_v53 = vshrl.u32 %v296_v42, 16  ;;  %v297_v58 = vld [vmem:[%s5038_s17 + $0xc] sm:$0xf] }
  0x17   : > { %v976_v50 = vrot.slane %v975_v39, 4  ;;  %v339_v51 = vrot.slane %v337_v41, 7  ;;  %v1560_v54 = vsel %vm5042_vm11, %v1558_v45, %v1559_v35  ;;  %v349_v59 = vshll.u32 %v296_v42, 16  ;;  %v299_v3 = vld [vmem:[%s5038_s17 + $0x14] sm:$0xf]  ;;  %s4970_s20 = smov 12  }
  0x18   : > { %v334_v56 = vor.u32 %v332_v40, %v331_v46  ;;  %v335_v57 = vrot.slane %v331_v46, 4  ;;  %v971_v61 = vsel %vm5051_vm12, %v966_v49, %v970_v29  ;;  %v4595_v63 = vcombine.low %v1557_v44, %v1560_v54  ;;  %v205_v4 = vld [vmem:[#allocation2 + $0x30] sm:$0x1]  ;;  %v657_v9 = vld [vmem:[#allocation2 + $0x18] sm:$0xf]  ;;  %s4971_s21 = smov 24  }
  0x19   : > { %v981_v62 = vsel %vm5051_vm12, %v976_v50, %v980_v33  ;;  %v342_v0 = vor.u32 %v340_v47, %v339_v51  ;;  %v344_v6 = vrot.slane %v339_v51, 4  ;;  %v348_v8 = vrot.slane %v346_v53, 7  ;;  %v654_v10 = vld [vmem:[#allocation2 + $0x14] sm:$0x1]  ;;  %v5084_v15 = vld [vmem:[%s5038_s17 + $0x18] sm:$0xf] }
  0x1a   : > { %v4563_v5 = vcombine.low %v971_v61, %v981_v62  ;;  %v651_v7 = vsel %vm5059_vm13, %v334_v56, %v650_v52  ;;  %1714 = vrot.lane.b32.xlu1 %v4595_v63, %s4968_s18  ;;  %v354_v12 = vshrl.u32 %v297_v58, 16  ;;  %v357_v13 = vshll.u32 %v297_v58, 16  ;;  %v664_v23 = vld [vmem:[#allocation2 + $0x24] sm:$0xf]  ;;  %v661_v27 = vld [vmem:[#allocation2 + $0x20] sm:$0x1] }
  0x1b   : > { %v343_v11 = vsel %vm5067_vm14, %v335_v57, %v342_v0  ;;  %652 = vst [vmem:[#allocation2 + $0xc] sm:$0xf] %v651_v7  ;;  %v363_v14 = vshrl.u32 %v298_v60, 16  ;;  %v351_v16 = vor.u32 %v349_v59, %v348_v8  ;;  %v352_v17 = vrot.slane %v348_v8, 4  ;;  %v668_v35 = vld [vmem:[#allocation2 + $0x2c] sm:$0x1] }
  0x1c   : > { %1390 = vrot.lane.b32.xlu0 %v4563_v5, %s4969_s19  ;;  %653 = vst.msk [vmem:[#allocation2 + $0x10] sm:$0xf] %vm183_vm0, %v343_v11  ;;  %v366_v18 = vshll.u32 %v298_v60, 16  ;;  %v371_v19 = vshrl.u32 %v299_v3, 16  ;;  %v356_v20 = vrot.slane %v354_v12, 7  ;;  %v374_v22 = vshll.u32 %v299_v3, 16 }
  0x1d   : > { %v365_v21 = vrot.slane %v363_v14, 7  ;;  %v655_v24 = vsel %vm5007_vm3, %v344_v6, %v654_v10  ;;  %v658_v25 = vsel %vm5059_vm13, %v351_v16, %v657_v9  ;;  %v206_v28 = vsel %vm5007_vm3, 0, %v205_v4  ;;  %v5102_v41 = vld [vmem:[%s5038_s17 + $0x1c] sm:$0xf]  ;;  %s4972_s22 = smov 20   ;;  %s4973_s23 = smov 32  }
  0x1e   : > { %v373_v26 = vrot.slane %v371_v19, 7  ;;  %656 = vst [vmem:[#allocation2 + $0x14] sm:$0x1] %v655_v24  ;;  %v380_v29 = vshrl.u32 %v5084_v15, 16  ;;  %v359_v30 = vor.u32 %v357_v13, %v356_v20  ;;  %v361_v32 = vrot.slane %v356_v20, 4  ;;  %s4974_s24 = smov 16  }
  0x1f   : > { %659 = vst [vmem:[#allocation2 + $0x18] sm:$0xf] %v658_v25  ;;  %v368_v33 = vor.u32 %v366_v18, %v365_v21  ;;  %v369_v34 = vrot.slane %v365_v21, 4  ;;  %207 = vst [vmem:[#allocation2 + $0x30] sm:$0x1] %v206_v28  ;;  %v383_v51 = vshll.u32 %v5084_v15, 16 }
  0x20   : > { %v376_v36 = vor.u32 %v374_v22, %v373_v26  ;;  %v378_v37 = vrot.slane %v373_v26, 4  ;;  %v360_v38 = vsel %vm5067_vm14, %v352_v17, %v359_v30  ;;  %v662_v40 = vsel %vm5007_vm3, %v361_v32, %v661_v27  ;;  %s4975_s25 = smov 28   ;;  %s4546_s8 = sshll.u32 %s6425_s13, 1 }
  0x21   : > { %v665_v39 = vsel %vm5059_vm13, %v368_v33, %v664_v23  ;;  %v5104_v42 = vrot.slane %v380_v29, 7  ;;  %660 = vst.msk [vmem:[#allocation2 + $0x1c] sm:$0xf] %vm183_vm0, %v360_v38  ;;  %663 = vst [vmem:[#allocation2 + $0x20] sm:$0x1] %v662_v40  ;;  %v388_v56 = vshrl.u32 %v5102_v41, 16  ;;  %s181_s11 = scalar_lea.vmem %s6377_s3, %s4546_s8 }
  0x22   : > { %v377_v44 = vsel %vm5067_vm14, %v369_v34, %v376_v36  ;;  %666 = vst [vmem:[#allocation2 + $0x24] sm:$0xf] %v665_v39  ;;  %v2501_v45 = vld [vmem:[#allocation2 + $0xc] sm:$0xe]  ;;  %v669_v47 = vsel %vm5007_vm3, %v378_v37, %v668_v35  ;;  %vm6378_vm15 = vcmask 31744   ;;  %vm1438_vm1 = vcmask 64544  }
  0x23   : > { %v1458_v46 = vld [vmem:[#allocation2 + $0xc] sm:$0xe]  ;;  %667 = vst.msk [vmem:[#allocation2 + $0x28] sm:$0xf] %vm183_vm0, %v377_v44  ;;  %v2502_v50 = vld [vmem:[#allocation2 + $0x10] sm:$0xf]  ;;  %v5129_v32 = vor.u32 %v383_v51, %v5104_v42 }
  0x24   : > { %v4908_v49 = vld [vmem:[#allocation2 + $0xc] sm:$0xff]   ;;  %670 = vst [vmem:[#allocation2 + $0x2c] sm:$0x1] %v669_v47  ;;  %v2599_v52 = vrot.slane %v2502_v50, 5  ;;  %v4643_v58 = vrot.slane %v2501_v45, 9  ;;  %v4580_v63 = vrot.slane %v1458_v46, 9 }
  0x25   : > { %v1459_v53 = vld [vmem:[#allocation2 + $0x10] sm:$0xf]  ;;  %v5113_v54 = vld [vmem:[#allocation2 + $0xc] sm:$0xf]  ;;  %1891 = vrot.lane.b32.xlu0 %v4908_v49, %s4970_s20  ;;  %v2503_v57 = vld [vmem:[#allocation2 + $0x14] sm:$0x1] }
  0x26   : > { %v1460_v59 = vld [vmem:[#allocation2 + $0x14] sm:$0x1]  ;;  %v1563_v60 = vrot.slane %v1459_v53, 5  ;;  %v2601_v61 = vrot.slane %v2599_v52, 4  ;;  %v2602_v62 = vrot.slane %v2503_v57, 5  ;;  %v983_v4 = vshrl.u32 %v5113_v54, 16 }
  0x27   : > { %v3545_v0 = vld [vmem:[#allocation2 + $0x18] sm:$0xe]  ;;  %v1566_v6 = vrot.slane %v1460_v59, 5  ;;  %v2600_v11 = vsel %vm5042_vm11, %v4643_v58, %v2599_v52  ;;  %v911_v59 = vld [vmem:[#allocation2 + $0x10] sm:$0xf]  ;;  %vm6381_vm2 = vcmask 97344  }
  0x28   : > { %v2504_v3 = vld [vmem:[#allocation2 + $0x18] sm:$0xe]  ;;  %v1565_v5 = vrot.slane %v1563_v60, 4  ;;  %v4707_v7 = vrot.slane %v3545_v0, 9  ;;  %v2603_v12 = vsel %vm5042_vm11, %v2601_v61, %v2602_v62  ;;  %v1564_v17 = vsel %vm5042_vm11, %v4580_v63, %v1563_v60  ;;  %v3546_v18 = vld [vmem:[#allocation2 + $0x1c] sm:$0xf] }
  0x29   : > { %v4644_v8 = vrot.slane %v2504_v3, 9  ;;  %v1959_v9 = vld [vmem:[#allocation2 + $0x18] sm:$0xf]  ;;  %v3547_v19 = vld [vmem:[#allocation2 + $0x20] sm:$0x1]  ;;  %v4659_v21 = vcombine.low %v2600_v11, %v2603_v12  ;;  %v3643_v23 = vrot.slane %v3546_v18, 5 }
  0x2a   : > { %v4909_v10 = vld [vmem:[#allocation2 + $0x18] sm:$0xff]   ;;  %v2029_v13 = vshrl.u32 %v1959_v9, 16  ;;  %v2032_v15 = vshll.u32 %v1959_v9, 16  ;;  %v4911_v16 = vld [vmem:[#allocation2 + $0x24] sm:$0xff]   ;;  %v1567_v22 = vsel %vm5042_vm11, %v1565_v5, %v1566_v6  ;;  %v3646_v24 = vrot.slane %v3547_v19, 5 }
  0x2b   : > { %v4910_v14 = vld [vmem:[#allocation2 + $0x18] sm:$0xff]   ;;  %1893 = vrot.lane.b32.xlu1 %v4909_v10, %s4970_s20  ;;  %v2506_v26 = vld [vmem:[#allocation2 + $0x20] sm:$0x1]  ;;  %v3548_v29 = vld [vmem:[#allocation2 + $0x24] sm:$0xe]  ;;  %v3644_v33 = vsel %vm5042_vm11, %v4707_v7, %v3643_v23  ;;  %v3645_v34 = vrot.slane %v3643_v23, 4  ;;  %v4596_v38 = vcombine.low %v1564_v17, %v1567_v22 }
  0x2c   : > { %v2031_v20 = vrot.slane %v2029_v13, 4  ;;  %2935 = vrot.lane.b32.xlu0 %v4910_v14, %s4971_s21  ;;  %v2505_v25 = vld [vmem:[#allocation2 + $0x1c] sm:$0xf]  ;;  %v2609_v28 = vrot.slane %v2506_v26, 5  ;;  %v3549_v30 = vld [vmem:[#allocation2 + $0x28] sm:$0xf] }
  0x2d   : > { %v2606_v27 = vrot.slane %v2505_v25, 5  ;;  %v3550_v35 = vld [vmem:[#allocation2 + $0x2c] sm:$0x1]  ;;  %v4708_v36 = vrot.slane %v3548_v29, 9  ;;  %v3650_v37 = vrot.slane %v3549_v30, 5  ;;  %v3647_v47 = vsel %vm5042_vm11, %v3645_v34, %v3646_v24 }
  0x2e   : > { %v3653_v44 = vrot.slane %v3550_v35, 5  ;;  %v1960_v45 = vld [vmem:[#allocation2 + $0x1c] sm:$0xf]  ;;  %v1961_v46 = vld [vmem:[#allocation2 + $0x20] sm:$0x1]  ;;  %v2034_v51 = vrot.slane %v2032_v15, 5  ;;  %v4723_v52 = vcombine.low %v3644_v33, %v3647_v47 }
  0x2f   : > { %2937 = vrot.lane.b32.xlu1 %v4911_v16, %s4971_s21  ;;  %v2607_v39 = vsel %vm5042_vm11, %v4644_v8, %v2606_v27  ;;  %v2608_v40 = vrot.slane %v2606_v27, 4  ;;  %v3651_v49 = vsel %vm5042_vm11, %v4708_v36, %v3650_v37  ;;  %v3652_v50 = vrot.slane %v3650_v37, 4  ;;  %v912_v0 = vld [vmem:[#allocation2 + $0x14] sm:$0x1]  ;;  %v3003_v3 = vld [vmem:[#allocation2 + $0x24] sm:$0xf] }
  0x30   : > { %2757 = vrot.lane.b32.xlu0 %v4659_v21, %s4972_s22  ;;  %v2038_v57 = vshll.u32 %v1960_v45, 16  ;;  %v2042_v58 = vshrl.u32 %v1960_v45, 16  ;;  %v2035_v62 = vor.u32 %v2034_v51, %v2031_v20  ;;  %v2048_v63 = vshll.u32 %v1961_v46, 16  ;;  %v3004_v13 = vld [vmem:[#allocation2 + $0x28] sm:$0xf] }
  0x31   : > { %v2610_v53 = vsel %vm5042_vm11, %v2608_v40, %v2609_v28  ;;  %v3654_v61 = vsel %vm5042_vm11, %v3652_v50, %v3653_v44  ;;  %v985_v8 = vrot.slane %v983_v4, 4  ;;  %v986_v11 = vshll.u32 %v5113_v54, 16  ;;  %v3005_v17 = vld [vmem:[#allocation2 + $0x2c] sm:$0x1]  ;;  %v1957_v35 = vld [vmem:[#allocation2 + $0x10] sm:$0xf] }
  0x32   : > { %v4660_v60 = vcombine.low %v2607_v39, %v2610_v53  ;;  %v4724_v5 = vcombine.low %v3651_v49, %v3654_v61  ;;  %v2040_v6 = vrot.slane %v2038_v57, 5  ;;  %v2044_v7 = vrot.slane %v2042_v58, 4  ;;  %v1956_v22 = vld [vmem:[#allocation2 + $0xc] sm:$0xf]  ;;  %v1958_v44 = vld [vmem:[#allocation2 + $0x14] sm:$0x1] }
  0x33   : > { %1716 = vrot.lane.b32.xlu1 %v4596_v38, %s4968_s18  ;;  %v2036_v9 = vrot.slane %v2035_v62, 4  ;;  %v2050_v10 = vrot.slane %v2048_v63, 5  ;;  %v992_v12 = vshll.u32 %v911_v59, 16  ;;  %v996_v15 = vshrl.u32 %v911_v59, 16  ;;  %v913_v57 = vld [vmem:[#allocation2 + $0x18] sm:$0xf] }
  0x34   : > { %3801 = vrot.lane.b32.xlu0 %v4723_v52, %s4973_s23  ;;  %v2045_v14 = vor.u32 %v2044_v7, %v2040_v6  ;;  %v1002_v16 = vshll.u32 %v912_v0, 16  ;;  %v3073_v18 = vshrl.u32 %v3003_v3, 16  ;;  %v988_v20 = vrot.slane %v986_v11, 5  ;;  %v914_v62 = vld [vmem:[#allocation2 + $0x1c] sm:$0xf] }
  0x35   : > { %v2041_v19 = vsel %vm5051_vm12, %v2036_v9, %v2040_v6  ;;  %v994_v21 = vrot.slane %v992_v12, 5  ;;  %v3076_v4 = vshll.u32 %v3003_v3, 16  ;;  %v998_v24 = vrot.slane %v996_v15, 4  ;;  %v915_v6 = vld [vmem:[#allocation2 + $0x20] sm:$0x1] }
  0x36   : > { %v2046_v23 = vrot.slane %v2045_v14, 4  ;;  %v1004_v25 = vrot.slane %v1002_v16, 5  ;;  %v3075_v54 = vrot.slane %v3073_v18, 4  ;;  %v989_v26 = vor.u32 %v988_v20, %v985_v8  ;;  %v3000_v7 = vld [vmem:[#allocation2 + $0x18] sm:$0xf] }
  0x37   : > { %2759 = vrot.lane.b32.xlu1 %v4660_v60, %s4972_s22  ;;  %v3078_v27 = vrot.slane %v3076_v4, 5  ;;  %v3082_v28 = vshll.u32 %v3004_v13, 16  ;;  %v3086_v29 = vshrl.u32 %v3004_v13, 16  ;;  %v999_v33 = vor.u32 %v998_v24, %v994_v21  ;;  %v3001_v20 = vld [vmem:[#allocation2 + $0x1c] sm:$0xf] }
  0x38   : > { %3803 = vrot.lane.b32.xlu0 %v4724_v5, %s4973_s23  ;;  %v2051_v30 = vsel %vm5051_vm12, %v2046_v23, %v2050_v10  ;;  %v3092_v34 = vshll.u32 %v3005_v17, 16  ;;  %v2005_v36 = vshrl.u32 %v1956_v22, 16  ;;  %v990_v38 = vrot.slane %v989_v26, 4 }
  0x39   : > { %v4628_v37 = vcombine.low %v2041_v19, %v2051_v30  ;;  %v3079_v39 = vor.u32 %v3078_v27, %v3075_v54  ;;  %v3084_v40 = vrot.slane %v3082_v28, 5  ;;  %v1000_v45 = vrot.slane %v999_v33, 4 }
  0x3a   : > { %v3088_v46 = vrot.slane %v3086_v29, 4  ;;  %v3094_v47 = vrot.slane %v3092_v34, 5  ;;  %v2007_v49 = vrot.slane %v2005_v36, 4  ;;  %v995_v50 = vsel %vm5051_vm12, %v990_v38, %v994_v21  ;;  %v3002_v29 = vld [vmem:[#allocation2 + $0x20] sm:$0x1] }
  0x3b   : > { %2438 = vrot.lane.b32.xlu1 %v4628_v37, %s4974_s24  ;;  %v3080_v51 = vrot.slane %v3079_v39, 4  ;;  %v2008_v52 = vshll.u32 %v1956_v22, 16  ;;  %v2014_v53 = vshll.u32 %v1957_v35, 16  ;;  %v1005_v58 = vsel %vm5051_vm12, %v1000_v45, %v1004_v25  ;;  %v916_v34 = vld [vmem:[#allocation2 + $0x24] sm:$0xf] }
  0x3c   : > { %v3089_v59 = vor.u32 %v3088_v46, %v3084_v40  ;;  %v2018_v60 = vshrl.u32 %v1957_v35, 16  ;;  %v2024_v61 = vshll.u32 %v1958_v44, 16  ;;  %v4564_v63 = vcombine.low %v995_v50, %v1005_v58  ;;  %v917_v39 = vld [vmem:[#allocation2 + $0x28] sm:$0xf] }
  0x3d   : > { %v3085_v0 = vsel %vm5051_vm12, %v3080_v51, %v3084_v40  ;;  %v2010_v3 = vrot.slane %v2008_v52, 5  ;;  %v2016_v5 = vrot.slane %v2014_v53, 5  ;;  %v1007_v11 = vshrl.u32 %v913_v57, 16  ;;  %v918_v51 = vld [vmem:[#allocation2 + $0x2c] sm:$0x1] }
  0x3e   : > { %v3090_v8 = vrot.slane %v3089_v59, 4  ;;  %v2020_v9 = vrot.slane %v2018_v60, 4  ;;  %v2026_v10 = vrot.slane %v2024_v61, 5  ;;  %1392 = vrot.lane.b32.xlu0 %v4564_v63, %s4969_s19  ;;  %v1010_v13 = vshll.u32 %v913_v57, 16  ;;  %v1461_v60 = vld [vmem:[#allocation2 + $0x18] sm:$0xe] }
  0x3f   : > { %v2011_v12 = vor.u32 %v2010_v3, %v2007_v49  ;;  %v1016_v14 = vshll.u32 %v914_v62, 16  ;;  %v1020_v15 = vshrl.u32 %v914_v62, 16  ;;  %v1009_v18 = vrot.slane %v1007_v11, 4  ;;  %v1462_v61 = vld [vmem:[#allocation2 + $0x1c] sm:$0xf] }
  0x40   : > { %v3095_v16 = vsel %vm5051_vm12, %v3090_v8, %v3094_v47  ;;  %v2021_v17 = vor.u32 %v2020_v9, %v2016_v5  ;;  %v1026_v19 = vshll.u32 %v915_v6, 16  ;;  %v1012_v22 = vrot.slane %v1010_v13, 5  ;;  %v1464_v6 = vld [vmem:[#allocation2 + $0x24] sm:$0xe]  ;;  %v1465_v11 = vld [vmem:[#allocation2 + $0x28] sm:$0xf] }
  0x41   : > { %v4692_v21 = vcombine.low %v3085_v0, %v3095_v16  ;;  %v2012_v4 = vrot.slane %v2011_v12, 4  ;;  %v1018_v23 = vrot.slane %v1016_v14, 5  ;;  %v1022_v25 = vrot.slane %v1020_v15, 4 }
  0x42   : > { %v2022_v24 = vrot.slane %v2021_v17, 4  ;;  %v1028_v54 = vrot.slane %v1026_v19, 5  ;;  %v3049_v26 = vshrl.u32 %v3000_v7, 16  ;;  %v1013_v28 = vor.u32 %v1012_v22, %v1009_v18 }
  0x43   : > { %3482 = vrot.lane.b32.xlu1 %v4692_v21, %s4975_s25  ;;  %v2017_v27 = vsel %vm5051_vm12, %v2012_v4, %v2016_v5  ;;  %v3052_v30 = vshll.u32 %v3000_v7, 16  ;;  %v3058_v33 = vshll.u32 %v3001_v20, 16  ;;  %v1023_v36 = vor.u32 %v1022_v25, %v1018_v23  ;;  %v1463_v5 = vld [vmem:[#allocation2 + $0x20] sm:$0x1] }
  0x44   : > { %v2027_v35 = vsel %vm5051_vm12, %v2022_v24, %v2026_v10  ;;  %v3051_v37 = vrot.slane %v3049_v26, 4  ;;  %v3062_v38 = vshrl.u32 %v3001_v20, 16  ;;  %v1014_v44 = vrot.slane %v1013_v28, 4  ;;  %v1466_v20 = vld [vmem:[#allocation2 + $0x2c] sm:$0x1] }
  0x45   : > { %v4627_v40 = vcombine.low %v2017_v27, %v2027_v35  ;;  %v3054_v45 = vrot.slane %v3052_v30, 5  ;;  %v3060_v46 = vrot.slane %v3058_v33, 5  ;;  %v1024_v47 = vrot.slane %v1023_v36, 4  ;;  %v671_v27 = vld [vmem:[#allocation2 + $0x30] sm:$0xf] }
  0x46   : > { %v3064_v49 = vrot.slane %v3062_v38, 4  ;;  %v3068_v50 = vshll.u32 %v3002_v29, 16  ;;  %v1031_v52 = vshrl.u32 %v916_v34, 16  ;;  %v1019_v53 = vsel %vm5051_vm12, %v1014_v44, %v1018_v23  ;;  %v1962_v28 = vld [vmem:[#allocation2 + $0x24] sm:$0xf] }
  0x47   : > { %2436 = vrot.lane.b32.xlu0 %v4627_v40, %s4974_s24  ;;  %v3055_v57 = vor.u32 %v3054_v45, %v3051_v37  ;;  %v1034_v58 = vshll.u32 %v916_v34, 16  ;;  %v1040_v59 = vshll.u32 %v917_v39, 16  ;;  %v1029_v62 = vsel %vm5051_vm12, %v1024_v47, %v1028_v54  ;;  %v1963_v35 = vld [vmem:[#allocation2 + $0x28] sm:$0xf]  ;;  %v2507_v47 = vld [vmem:[#allocation2 + $0x24] sm:$0xe] }
  0x48   : > { %v3065_v63 = vor.u32 %v3064_v49, %v3060_v46  ;;  %v3070_v0 = vrot.slane %v3068_v50, 5  ;;  %v1033_v3 = vrot.slane %v1031_v52, 4  ;;  %v4565_v7 = vcombine.low %v1019_v53, %v1029_v62  ;;  %v2508_v49 = vld [vmem:[#allocation2 + $0x28] sm:$0xf]  ;;  %v2509_v53 = vld [vmem:[#allocation2 + $0x2c] sm:$0x1] }
  0x49   : > { %v3056_v8 = vrot.slane %v3055_v57, 4  ;;  %v1036_v9 = vrot.slane %v1034_v58, 5  ;;  %v1042_v10 = vrot.slane %v1040_v59, 5  ;;  %v1044_v13 = vshrl.u32 %v917_v39, 16  ;;  %v1964_v39 = vld [vmem:[#allocation2 + $0x2c] sm:$0x1] }
  0x4a   : > { %v3066_v12 = vrot.slane %v3065_v63, 4  ;;  %v1050_v14 = vshll.u32 %v918_v51, 16  ;;  %v4581_v15 = vrot.slane %v1461_v60, 9  ;;  %1394 = vrot.lane.b32.xlu1 %v4565_v7, %s4969_s19  ;;  %v1570_v18 = vrot.slane %v1462_v61, 5  ;;  %v4912_v51 = vld [vmem:[#allocation2 + $0x24] sm:$0xff]  }
  0x4b   : > { %v3061_v16 = vsel %vm5051_vm12, %v3056_v8, %v3060_v46  ;;  %v1037_v17 = vor.u32 %v1036_v9, %v1033_v3  ;;  %v1573_v19 = vrot.slane %v1463_v5, 5  ;;  %v1046_v4 = vrot.slane %v1044_v13, 4  ;;  %v208_v57 = vld [vmem:[#allocation2 + $0x3c] sm:$0x1]  ;;  %v5205_v62 = vld [vmem:[%s5038_s17 + $0x20] sm:$0xf] }
  0x4c   : > { %v3071_v21 = vsel %vm5051_vm12, %v3066_v12, %v3070_v0  ;;  %v1052_v22 = vrot.slane %v1050_v14, 5  ;;  %v4582_v23 = vrot.slane %v1464_v6, 9  ;;  %v1571_v54 = vsel %vm5042_vm11, %v4581_v15, %v1570_v18  ;;  %v5212_v5 = vld [vmem:[%s5038_s17 + $0x24] sm:$0xf] }
  0x4d   : > { %v4691_v24 = vcombine.low %v3061_v16, %v3071_v21  ;;  %v1038_v25 = vrot.slane %v1037_v17, 4  ;;  %v1572_v26 = vrot.slane %v1570_v18, 4  ;;  %v1047_v29 = vor.u32 %v1046_v4, %v1042_v10 }
  0x4e   : > { %v1577_v30 = vrot.slane %v1465_v11, 5  ;;  %v1580_v33 = vrot.slane %v1466_v20, 5  ;;  %v386_v34 = vrot.slane %v5104_v42, 4  ;;  %v5189_v37 = vrot.slane %v388_v56, 7  ;;  %v255_v42 = vld [vmem:[#allocation2 + $0x38] sm:$0x1] }
  0x4f   : > { %3480 = vrot.lane.b32.xlu0 %v4691_v24, %s4975_s25  ;;  %v1574_v36 = vsel %vm5042_vm11, %v1572_v26, %v1573_v19  ;;  %v391_v38 = vshll.u32 %v5102_v41, 16  ;;  %v1043_v40 = vsel %vm5051_vm12, %v1038_v25, %v1042_v10  ;;  %v1048_v44 = vrot.slane %v1047_v29, 4 }
  0x50   : > { %v4597_v45 = vcombine.low %v1571_v54, %v1574_v36  ;;  %v1579_v46 = vrot.slane %v1577_v30, 4  ;;  %v1578_v50 = vsel %vm5042_vm11, %v4582_v23, %v1577_v30  ;;  %v672_v41 = vsel %vm5059_vm13, %v5129_v32, %v671_v27 }
  0x51   : > { %v393_v56 = vor.u32 %v391_v38, %v5189_v37  ;;  %v2053_v52 = vshrl.u32 %v1962_v28, 16  ;;  %v1053_v58 = vsel %vm5051_vm12, %v1048_v44, %v1052_v22  ;;  %673 = vst [vmem:[#allocation2 + $0x30] sm:$0xf] %v672_v41  ;;  %v2056_v60 = vshll.u32 %v1962_v28, 16 }
  0x52   : > { %v1581_v59 = vsel %vm5042_vm11, %v1579_v46, %v1580_v33  ;;  %v2062_v61 = vshll.u32 %v1963_v35, 16  ;;  %v4566_v63 = vcombine.low %v1043_v40, %v1053_v58  ;;  %v395_v0 = vrot.slane %v5189_v37, 4 }
  0x53   : > { %1718 = vrot.lane.b32.xlu0 %v4597_v45, %s4968_s18  ;;  %v394_v32 = vsel %vm5067_vm14, %v386_v34, %v393_v56  ;;  %v2055_v3 = vrot.slane %v2053_v52, 4  ;;  %v2058_v6 = vrot.slane %v2056_v60, 5  ;;  %v2066_v8 = vshrl.u32 %v1963_v35, 16 }
  0x54   : > { %674 = vst.msk [vmem:[#allocation2 + $0x34] sm:$0xf] %vm183_vm0, %v394_v32  ;;  %v2064_v7 = vrot.slane %v2062_v61, 5  ;;  %v2072_v9 = vshll.u32 %v1964_v39, 16  ;;  %1396 = vrot.lane.b32.xlu1 %v4566_v63, %s4969_s19  ;;  %v4598_v10 = vcombine.low %v1578_v50, %v1581_v59  ;;  %v256_v11 = vsel %vm5014_vm5, 0, %v255_v42 }
  0x55   : > { %v4645_v12 = vrot.slane %v2507_v47, 9  ;;  %v2613_v13 = vrot.slane %v2508_v49, 5  ;;  %v2059_v14 = vor.u32 %v2058_v6, %v2055_v3  ;;  %v2068_v15 = vrot.slane %v2066_v8, 4  ;;  %257 = vst [vmem:[#allocation2 + $0x38] sm:$0x1] %v256_v11 }
  0x56   : > { %v2616_v16 = vrot.slane %v2509_v53, 5  ;;  %v209_v17 = vsel %vm5007_vm3, 0, %v208_v57  ;;  %v2074_v18 = vrot.slane %v2072_v9, 5  ;;  %v397_v20 = vshrl.u32 %v5205_v62, 16  ;;  %v258_v32 = vld [vmem:[#allocation2 + $0x44] sm:$0x1] }
  0x57   : > { %1895 = vrot.lane.b32.xlu0 %v4912_v51, %s4970_s20  ;;  %v2615_v19 = vrot.slane %v2613_v13, 4  ;;  %210 = vst [vmem:[#allocation2 + $0x3c] sm:$0x1] %v209_v17  ;;  %v400_v21 = vshll.u32 %v5205_v62, 16  ;;  %v2060_v4 = vrot.slane %v2059_v14, 4  ;;  %v2069_v22 = vor.u32 %v2068_v15, %v2064_v7 }
  0x58   : > { %v405_v23 = vshrl.u32 %v5212_v5, 16  ;;  %v408_v24 = vshll.u32 %v5212_v5, 16  ;;  %1720 = vrot.lane.b32.xlu1 %v4598_v10, %s4968_s18  ;;  %v1965_v25 = vld [vmem:[#allocation2 + $0x30] sm:$0xf]  ;;  %v2614_v34 = vsel %vm5042_vm11, %v4645_v12, %v2613_v13  ;;  %v399_v56 = vrot.slane %v397_v20, 7 }
  0x59   : > { %v5226_v54 = vld [vmem:[#allocation2 + $0x30] sm:$0xe]  ;;  %v2065_v26 = vsel %vm5051_vm12, %v2060_v4, %v2064_v7  ;;  %v2070_v27 = vrot.slane %v2069_v22, 4  ;;  %v2077_v28 = vshrl.u32 %v1965_v25, 16  ;;  %v2080_v29 = vshll.u32 %v1965_v25, 16 }
  0x5a   : > { %v2617_v35 = vsel %vm5042_vm11, %v2615_v19, %v2616_v16  ;;  %v4646_v36 = vrot.slane %v5226_v54, 9  ;;  %v3006_v41 = vld [vmem:[#allocation2 + $0x30] sm:$0xf]  ;;  %v5243_v57 = vrot.slane %v405_v23, 7  ;;  %v402_v61 = vor.u32 %v400_v21, %v399_v56 }
  0x5b   : > { %v4913_v30 = vld [vmem:[#allocation2 + $0x30] sm:$0xff]   ;;  %v2075_v37 = vsel %vm5051_vm12, %v2070_v27, %v2074_v18  ;;  %v2079_v38 = vrot.slane %v2077_v28, 4  ;;  %v2082_v39 = vrot.slane %v2080_v29, 5  ;;  %v4661_v53 = vcombine.low %v2614_v34, %v2617_v35 }
  0x5c   : > { %v1966_v33 = vld [vmem:[#allocation2 + $0x34] sm:$0xf]  ;;  %1897 = vrot.lane.b32.xlu1 %v4913_v30, %s4970_s20  ;;  %v4629_v45 = vcombine.low %v2065_v26, %v2075_v37  ;;  %v675_v46 = vld [vmem:[#allocation2 + $0x38] sm:$0x1]  ;;  %v403_v62 = vrot.slane %v399_v56, 4  ;;  %v3097_v63 = vshrl.u32 %v3006_v41, 16  ;;  %v410_v5 = vor.u32 %v408_v24, %v5243_v57 }
  0x5d   : > { %v2086_v40 = vshll.u32 %v1966_v33, 16  ;;  %v2511_v44 = vld [vmem:[#allocation2 + $0x34] sm:$0xf]  ;;  %v2090_v42 = vshrl.u32 %v1966_v33, 16  ;;  %v676_v49 = vsel %vm5007_vm3, %v395_v0, %v675_v46  ;;  %v2083_v50 = vor.u32 %v2082_v39, %v2079_v38  ;;  %v3551_v7 = vld [vmem:[#allocation2 + $0x30] sm:$0xe] }
  0x5e   : > { %v2620_v47 = vrot.slane %v2511_v44, 5  ;;  %2440 = vrot.lane.b32.xlu0 %v4629_v45, %s4974_s24  ;;  %677 = vst [vmem:[#allocation2 + $0x38] sm:$0x1] %v676_v49  ;;  %v678_v58 = vld [vmem:[#allocation2 + $0x3c] sm:$0xf]  ;;  %v3100_v6 = vshll.u32 %v3006_v41, 16  ;;  %v411_v16 = vsel %vm5067_vm14, %v403_v62, %v410_v5 }
  0x5f   : > { %v5240_v51 = vrot.slane %v2086_v40, 5  ;;  %v2092_v52 = vrot.slane %v2090_v42, 4  ;;  %v3007_v59 = vld [vmem:[#allocation2 + $0x34] sm:$0xf]  ;;  %v2084_v0 = vrot.slane %v2083_v50, 4  ;;  %v412_v9 = vrot.slane %v5243_v57, 4 }
  0x60   : > { %v2622_v60 = vrot.slane %v2620_v47, 4  ;;  %v3552_v8 = vld [vmem:[#allocation2 + $0x34] sm:$0xf]  ;;  %v679_v10 = vsel %vm5059_vm13, %v402_v61, %v678_v58  ;;  %v3099_v11 = vrot.slane %v3097_v63, 4  ;;  %v3106_v12 = vshll.u32 %v3007_v59, 16 }
  0x61   : > { %v2093_v3 = vor.u32 %v2092_v52, %v5240_v51  ;;  %v919_v13 = vld [vmem:[#allocation2 + $0x30] sm:$0xf]  ;;  %680 = vst [vmem:[#allocation2 + $0x3c] sm:$0xf] %v679_v10  ;;  %v3102_v17 = vrot.slane %v3100_v6, 5  ;;  %v3110_v18 = vshrl.u32 %v3007_v59, 16  ;;  %v2621_v27 = vsel %vm5042_vm11, %v4646_v36, %v2620_v47 }
  0x62   : > { %2761 = vrot.lane.b32.xlu0 %v4661_v53, %s4972_s22  ;;  %v4914_v15 = vld [vmem:[#allocation2 + $0x30] sm:$0xff]   ;;  %681 = vst.msk [vmem:[#allocation2 + $0x40] sm:$0xf] %vm183_vm0, %v411_v16  ;;  %v3108_v19 = vrot.slane %v3106_v12, 5  ;;  %v259_v20 = vsel %vm5014_vm5, 0, %v258_v32  ;;  %v4709_v21 = vrot.slane %v3551_v7, 9  ;;  %v2089_v37 = vsel %vm5051_vm12, %v2084_v0, %v5240_v51 }
  0x63   : > { %v2094_v14 = vrot.slane %v2093_v3, 4  ;;  %v3657_v4 = vrot.slane %v3552_v8, 5  ;;  %v3103_v22 = vor.u32 %v3102_v17, %v3099_v11  ;;  %v3112_v23 = vrot.slane %v3110_v18, 4  ;;  %260 = vst [vmem:[#allocation2 + $0x44] sm:$0x1] %v259_v20 }
  0x64   : > { %v1055_v24 = vshrl.u32 %v919_v13, 16  ;;  %v1058_v25 = vshll.u32 %v919_v13, 16  ;;  %v920_v46 = vld [vmem:[#allocation2 + $0x34] sm:$0xf]  ;;  %vm6379_vm4 = vcmask 130144   ;;  %vm2484_vm6 = vcmask 162944  }
  0x65   : > { %v1967_v54 = vld [vmem:[#allocation2 + $0x38] sm:$0x1]  ;;  %v3104_v33 = vrot.slane %v3103_v22, 4  ;;  %v3113_v34 = vor.u32 %v3112_v23, %v3108_v19  ;;  %v3659_v39 = vrot.slane %v3657_v4, 4  ;;  %v3658_v56 = vsel %vm5042_vm11, %v4709_v21, %v3657_v4 }
  0x66   : > { %v2512_v26 = vld [vmem:[#allocation2 + $0x38] sm:$0x1]  ;;  %v2096_v29 = vshll.u32 %v1967_v54, 16  ;;  %2939 = vrot.lane.b32.xlu0 %v4914_v15, %s4971_s21  ;;  %v1057_v42 = vrot.slane %v1055_v24, 4  ;;  %v1060_v41 = vrot.slane %v1058_v25, 5  ;;  %v1064_v13 = vshll.u32 %v920_v46, 16 }
  0x67   : > { %v3008_v28 = vld [vmem:[#allocation2 + $0x38] sm:$0x1]  ;;  %v2623_v30 = vrot.slane %v2512_v26, 5  ;;  %v3114_v36 = vrot.slane %v3113_v34, 4  ;;  %v3109_v47 = vsel %vm5051_vm12, %v3104_v33, %v3108_v19  ;;  %v1068_v17 = vshrl.u32 %v920_v46, 16 }
  0x68   : > { %v3553_v35 = vld [vmem:[#allocation2 + $0x38] sm:$0x1]  ;;  %v3116_v38 = vshll.u32 %v3008_v28, 16  ;;  %v2098_v44 = vrot.slane %v2096_v29, 5  ;;  %v3009_v50 = vld [vmem:[#allocation2 + $0x3c] sm:$0xf]  ;;  %v1061_v12 = vor.u32 %v1060_v41, %v1057_v42 }
  0x69   : > { %v3660_v40 = vrot.slane %v3553_v35, 5  ;;  %v2624_v45 = vsel %vm5042_vm11, %v2622_v60, %v2623_v30  ;;  %v3010_v53 = vld [vmem:[#allocation2 + $0x40] sm:$0xf]  ;;  %v3121_v57 = vshrl.u32 %v3009_v50, 16  ;;  %v3124_v62 = vshll.u32 %v3009_v50, 16 }
  0x6a   : > { %v3118_v49 = vrot.slane %v3116_v38, 5  ;;  %v2099_v51 = vsel %vm5051_vm12, %v2094_v14, %v2098_v44  ;;  %v4662_v52 = vcombine.low %v2621_v27, %v2624_v45  ;;  %v682_v61 = vld [vmem:[#allocation2 + $0x44] sm:$0x1]  ;;  %v3130_v63 = vshll.u32 %v3010_v53, 16  ;;  %v921_v32 = vld [vmem:[#allocation2 + $0x38] sm:$0x1] }
  0x6b   : > { %v3661_v58 = vsel %vm5042_vm11, %v3659_v39, %v3660_v40  ;;  %v4630_v59 = vcombine.low %v2089_v37, %v2099_v51  ;;  %v683_v3 = vsel %vm5007_vm3, %v412_v9, %v682_v61  ;;  %v3123_v5 = vrot.slane %v3121_v57, 4  ;;  %v3554_v7 = vld [vmem:[#allocation2 + $0x3c] sm:$0xe]  ;;  %v3555_v8 = vld [vmem:[#allocation2 + $0x40] sm:$0xf] }
  0x6c   : > { %v3119_v60 = vsel %vm5051_vm12, %v3114_v36, %v3118_v49  ;;  %v3134_v6 = vshrl.u32 %v3010_v53, 16  ;;  %684 = vst [vmem:[#allocation2 + $0x44] sm:$0x1] %v683_v3  ;;  %v3126_v10 = vrot.slane %v3124_v62, 5  ;;  %v5277_v11 = vrot.slane %v3130_v63, 5  ;;  %v4915_v26 = vld [vmem:[#allocation2 + $0x3c] sm:$0xff]  }
  0x6d   : > { %v4693_v0 = vcombine.low %v3109_v47, %v3119_v60  ;;  %2442 = vrot.lane.b32.xlu1 %v4630_v59, %s4974_s24  ;;  %v922_v14 = vld [vmem:[#allocation2 + $0x3c] sm:$0xf]  ;;  %v4725_v16 = vcombine.low %v3658_v56, %v3661_v58  ;;  %v1074_v18 = vshll.u32 %v921_v32, 16  ;;  %v1467_v9 = vld [vmem:[#allocation2 + $0x30] sm:$0xe]  ;;  %v1066_v20 = vrot.slane %v1064_v13, 5 }
  0x6e   : > { %v3136_v15 = vrot.slane %v3134_v6, 4  ;;  %v3127_v19 = vor.u32 %v3126_v10, %v3123_v5  ;;  %v4710_v21 = vrot.slane %v3554_v7, 9  ;;  %v3664_v4 = vrot.slane %v3555_v8, 5  ;;  %v923_v22 = vld [vmem:[#allocation2 + $0x40] sm:$0xf] }
  0x6f   : > { %3484 = vrot.lane.b32.xlu0 %v4693_v0, %s4975_s25  ;;  %v1062_v24 = vrot.slane %v1061_v12, 4  ;;  %v1070_v25 = vrot.slane %v1068_v17, 4  ;;  %v1079_v54 = vshrl.u32 %v922_v14, 16  ;;  %v1076_v28 = vrot.slane %v1074_v18, 5  ;;  %v1468_v39 = vld [vmem:[#allocation2 + $0x34] sm:$0xf] }
  0x70   : > { %v3137_v23 = vor.u32 %v3136_v15, %v5277_v11  ;;  %v3128_v27 = vrot.slane %v3127_v19, 4  ;;  %v3666_v30 = vrot.slane %v3664_v4, 4  ;;  %v1082_v34 = vshll.u32 %v922_v14, 16  ;;  %v1469_v58 = vld [vmem:[#allocation2 + $0x38] sm:$0x1]  ;;  %v4929_v17 = vld [vmem:[%s6375_s1] sm:$0xff]  }
  0x71   : > { %2763 = vrot.lane.b32.xlu1 %v4662_v52, %s4972_s22  ;;  %v1071_v29 = vor.u32 %v1070_v25, %v1066_v20  ;;  %v1081_v33 = vrot.slane %v1079_v54, 4  ;;  %v1088_v37 = vshll.u32 %v923_v22, 16  ;;  %v1092_v38 = vshrl.u32 %v923_v22, 16  ;;  %v211_v60 = vld [vmem:[#allocation2 + $0x48] sm:$0x1]  ;;  %4845 = vmatprep.subr.bf16.mxu0 %v4929_v17 }
  0x72   : > { %v3138_v35 = vrot.slane %v3137_v23, 4  ;;  %v4583_v40 = vrot.slane %v1467_v9, 9  ;;  %v1067_v45 = vsel %vm5051_vm12, %v1062_v24, %v1066_v20  ;;  %v3665_v42 = vsel %vm5042_vm11, %v4710_v21, %v3664_v4  ;;  %v1470_v0 = vld [vmem:[#allocation2 + $0x3c] sm:$0xe]  ;;  %v1471_v3 = vld [vmem:[#allocation2 + $0x40] sm:$0xf]  ;;  %4883 = vmatprep.subr.bf16.mxu1 %v4929_v17  ;;  %4846 = vmatpush3.bf16.msra.mxu0 %v4929_v17 }
  0x73   : > { %3805 = vrot.lane.b32.xlu0 %v4725_v16, %s4973_s23  ;;  %v3011_v44 = vld [vmem:[#allocation2 + $0x44] sm:$0x1]  ;;  %v1072_v36 = vrot.slane %v1071_v29, 4  ;;  %v1084_v47 = vrot.slane %v1082_v34, 5  ;;  %v1090_v41 = vrot.slane %v1088_v37, 5  ;;  %v1094_v51 = vrot.slane %v1092_v38, 4  ;;  %4886 = vmatpush3.bf16.msra.mxu1 %v4929_v17 }
  0x74   : > { %v3556_v46 = vld [vmem:[#allocation2 + $0x44] sm:$0x1]  ;;  %v3140_v49 = vshll.u32 %v3011_v44, 16  ;;  %v3133_v52 = vsel %vm5051_vm12, %v3128_v27, %v5277_v11  ;;  %v1584_v59 = vrot.slane %v1468_v39, 5  ;;  %v304_v11 = vld [vmem:[%s5038_s17 + $0x28] sm:$0xf] }
  0x75   : > { %2941 = vrot.lane.b32.xlu1 %v4915_v26, %s4971_s21  ;;  %v3667_v50 = vrot.slane %v3556_v46, 5  ;;  %v924_v56 = vld [vmem:[#allocation2 + $0x44] sm:$0x1]  ;;  %v1085_v53 = vor.u32 %v1084_v47, %v1081_v33  ;;  %v1077_v62 = vsel %vm5051_vm12, %v1072_v36, %v1076_v28  ;;  %v1095_v32 = vor.u32 %v1094_v51, %v1090_v41  ;;  %v305_v16 = vld [vmem:[%s5038_s17 + $0x2c] sm:$0xf] }
  0x76   : > { %v1098_v57 = vshll.u32 %v924_v56, 16  ;;  %v3142_v61 = vrot.slane %v3140_v49, 5  ;;  %v1585_v8 = vsel %vm5042_vm11, %v4583_v40, %v1584_v59  ;;  %v1472_v10 = vld [vmem:[#allocation2 + $0x44] sm:$0x1]  ;;  %v1586_v14 = vrot.slane %v1584_v59, 4  ;;  %v4932_v38 = vld [vmem:[%s6375_s1 + $0x8] sm:$0xff]  }
  0x77   : > { %v3668_v63 = vsel %vm5042_vm11, %v3666_v30, %v3667_v50  ;;  %v1086_v6 = vrot.slane %v1085_v53, 4  ;;  %v1096_v13 = vrot.slane %v1095_v32, 4  ;;  %v1587_v15 = vrot.slane %v1469_v58, 5  ;;  %v1968_v21 = vld [vmem:[#allocation2 + $0x3c] sm:$0xf]  ;;  %4847 = vmatprep.subr.bf16.mxu0 %v4932_v38  ;;  %4884 = vmatprep.subr.bf16.mxu1 %v4932_v38 }
  0x78   : > { %v4726_v5 = vcombine.low %v3665_v42, %v3668_v63  ;;  %v1100_v7 = vrot.slane %v1098_v57, 5  ;;  %v3143_v12 = vsel %vm5051_vm12, %v3138_v35, %v3142_v61  ;;  %v4567_v9 = vcombine.low %v1067_v45, %v1077_v62  ;;  %v1969_v4 = vld [vmem:[#allocation2 + $0x40] sm:$0xf]  ;;  %v1970_v54 = vld [vmem:[#allocation2 + $0x44] sm:$0x1]  ;;  %4848 = vmatpush3.bf16.msra.mxu0 %v4932_v38  ;;  %4887 = vmatpush3.bf16.msra.mxu1 %v4932_v38 }
  0x79   : > { %v4694_v18 = vcombine.low %v3133_v52, %v3143_v12  ;;  %v4584_v19 = vrot.slane %v1470_v0, 9  ;;  %v1591_v20 = vrot.slane %v1471_v3, 5  ;;  %v1091_v22 = vsel %vm5051_vm12, %v1086_v6, %v1090_v41  ;;  %v261_v37 = vld [vmem:[#allocation2 + $0x50] sm:$0x1]  ;;  %v4916_v40 = vld [vmem:[#allocation2 + $0x3c] sm:$0xff]  }
  0x7a   : > { %3807 = vrot.lane.b32.xlu0 %v4726_v5, %s4973_s23  ;;  %v1588_v23 = vsel %vm5042_vm11, %v1586_v14, %v1587_v15  ;;  %v1594_v24 = vrot.slane %v1472_v10, 5  ;;  %v212_v25 = vsel %vm5007_vm3, 0, %v211_v60  ;;  %v1101_v26 = vsel %vm5051_vm12, %v1096_v13, %v1100_v7  ;;  %v2513_v46 = vld [vmem:[#allocation2 + $0x3c] sm:$0xe]  ;;  %v2514_v56 = vld [vmem:[#allocation2 + $0x40] sm:$0xf] }
  0x7b   : > { %3486 = vrot.lane.b32.xlu1 %v4694_v18, %s4975_s25  ;;  %v4599_v27 = vcombine.low %v1585_v8, %v1588_v23  ;;  %v5316_v28 = vsel %vm5042_vm11, %v4584_v19, %v1591_v20  ;;  %v1593_v29 = vrot.slane %v1591_v20, 4  ;;  %213 = vst [vmem:[#allocation2 + $0x48] sm:$0x1] %v212_v25  ;;  %v414_v30 = vshrl.u32 %v304_v11, 16  ;;  %v2515_v57 = vld [vmem:[#allocation2 + $0x44] sm:$0x1] }
  0x7c   : > { %v417_v33 = vshll.u32 %v304_v11, 16  ;;  %v422_v34 = vshrl.u32 %v305_v16, 16  ;;  %v425_v35 = vshll.u32 %v305_v16, 16  ;;  %v2101_v44 = vshrl.u32 %v1968_v21, 16  ;;  %v214_v62 = vld [vmem:[#allocation2 + $0x54] sm:$0x1] }
  0x7d   : > { %v1595_v39 = vsel %vm5042_vm11, %v1593_v29, %v1594_v24  ;;  %v2104_v45 = vshll.u32 %v1968_v21, 16  ;;  %v2110_v36 = vshll.u32 %v1969_v4, 16  ;;  %v4568_v42 = vcombine.low %v1091_v22, %v1101_v26  ;;  %v306_v63 = vld [vmem:[%s5038_s17 + $0x30] sm:$0xf]  ;;  %v307_v6 = vld [vmem:[%s5038_s17 + $0x34] sm:$0xf] }
  0x7e   : > { %1722 = vrot.lane.b32.xlu0 %v4599_v27, %s4968_s18  ;;  %v416_v47 = vrot.slane %v414_v30, 7  ;;  %v5324_v49 = vrot.slane %v422_v34, 7  ;;  %v2114_v50 = vshrl.u32 %v1969_v4, 16  ;;  %v2103_v41 = vrot.slane %v2101_v44, 4  ;;  %v264_v17 = vld [vmem:[#allocation2 + $0x5c] sm:$0x1] }
  0x7f   : > { %1398 = vrot.lane.b32.xlu1 %v4567_v9, %s4969_s19  ;;  %v2106_v51 = vrot.slane %v2104_v45, 5  ;;  %v2112_v52 = vrot.slane %v2110_v36, 5  ;;  %v2120_v53 = vshll.u32 %v1970_v54, 16  ;;  %v4600_v58 = vcombine.low %v5316_v28, %v1595_v39  ;;  %v217_v18 = vld [vmem:[#allocation2 + $0x60] sm:$0x1] }
  0x80   : > { %v419_v59 = vor.u32 %v417_v33, %v416_v47  ;;  %v420_v60 = vrot.slane %v416_v47, 4  ;;  %v427_v61 = vor.u32 %v425_v35, %v5324_v49  ;;  %v2116_v0 = vrot.slane %v2114_v50, 4  ;;  %v5346_v4 = vld [vmem:[%s5038_s17 + $0x38] sm:$0xf] }
  0x81   : > { %v2107_v32 = vor.u32 %v2106_v51, %v2103_v41  ;;  %v2122_v3 = vrot.slane %v2120_v53, 5  ;;  %v262_v5 = vsel %vm5014_vm5, 0, %v261_v37  ;;  %v4647_v10 = vrot.slane %v2513_v46, 9 }
  0x82   : > { %1899 = vrot.lane.b32.xlu0 %v4916_v40, %s4970_s20  ;;  %v428_v7 = vsel %vm5067_vm14, %v420_v60, %v427_v61  ;;  %v685_v8 = vld [vmem:[#allocation2 + $0x48] sm:$0xf]  ;;  %263 = vst [vmem:[#allocation2 + $0x50] sm:$0x1] %v262_v5  ;;  %v2627_v11 = vrot.slane %v2514_v56, 5  ;;  %v2630_v12 = vrot.slane %v2515_v57, 5  ;;  %v2117_v15 = vor.u32 %v2116_v0, %v2112_v52 }
  0x83   : > { %1400 = vrot.lane.b32.xlu1 %v4568_v42, %s4969_s19  ;;  %v686_v13 = vsel %vm5059_vm13, %v419_v59, %v685_v8  ;;  %688 = vst.msk [vmem:[#allocation2 + $0x4c] sm:$0xf] %vm183_vm0, %v428_v7  ;;  %v2108_v14 = vrot.slane %v2107_v32, 4  ;;  %v215_v16 = vsel %vm5007_vm3, 0, %v214_v62  ;;  %v429_v9 = vrot.slane %v5324_v49, 4 }
  0x84   : > { %687 = vst [vmem:[#allocation2 + $0x48] sm:$0xf] %v686_v13  ;;  %v2628_v19 = vsel %vm5042_vm11, %v4647_v10, %v2627_v11  ;;  %v2629_v20 = vrot.slane %v2627_v11, 4  ;;  %216 = vst [vmem:[#allocation2 + $0x54] sm:$0x1] %v215_v16  ;;  %v431_v21 = vshrl.u32 %v306_v63, 16 }
  0x85   : > { %v2113_v22 = vsel %vm5051_vm12, %v2108_v14, %v2112_v52  ;;  %v2118_v23 = vrot.slane %v2117_v15, 4  ;;  %v439_v24 = vshrl.u32 %v307_v6, 16  ;;  %v442_v25 = vshll.u32 %v307_v6, 16 }
  0x86   : > { %v433_v54 = vrot.slane %v431_v21, 7  ;;  %v434_v26 = vshll.u32 %v306_v63, 16  ;;  %v265_v27 = vsel %vm5014_vm5, 0, %v264_v17  ;;  %v218_v28 = vsel %vm5007_vm3, 0, %v217_v18 }
  0x87   : > { %1724 = vrot.lane.b32.xlu1 %v4600_v58, %s4968_s18  ;;  %v2123_v29 = vsel %vm5051_vm12, %v2118_v23, %v2122_v3  ;;  %v2631_v30 = vsel %vm5042_vm11, %v2629_v20, %v2630_v12  ;;  %v441_v33 = vrot.slane %v439_v24, 7  ;;  %266 = vst [vmem:[#allocation2 + $0x5c] sm:$0x1] %v265_v27  ;;  %219 = vst [vmem:[#allocation2 + $0x60] sm:$0x1] %v218_v28  ;;  %v448_v34 = vshrl.u32 %v5346_v4, 16 }
  0x88   : > { %v4631_v35 = vcombine.low %v2113_v22, %v2123_v29  ;;  %v437_v37 = vrot.slane %v433_v54, 4  ;;  %v451_v45 = vshll.u32 %v5346_v4, 16  ;;  %v4663_v42 = vcombine.low %v2628_v19, %v2631_v30 }
  0x89   : > { %v689_v38 = vld [vmem:[#allocation2 + $0x50] sm:$0x1]  ;;  %v444_v39 = vor.u32 %v442_v25, %v441_v33  ;;  %v446_v40 = vrot.slane %v441_v33, 4  ;;  %v5360_v44 = vrot.slane %v448_v34, 7  ;;  %v436_v41 = vor.u32 %v434_v26, %v433_v54 }
  0x8a   : > { %2444 = vrot.lane.b32.xlu0 %v4631_v35, %s4974_s24  ;;  %v690_v36 = vsel %vm5007_vm3, %v429_v9, %v689_v38  ;;  %v1972_v46 = vld [vmem:[#allocation2 + $0x4c] sm:$0xf]  ;;  %v5378_v9 = vld [vmem:[%s5038_s17 + $0x3c] sm:$0xf]  ;;  %vm2805_vm7 = vcmask 195744   ;;  %vm6380_vm8 = vcmask 228544  }
  0x8b   : > { %v2517_v47 = vld [vmem:[#allocation2 + $0x4c] sm:$0xf]  ;;  %691 = vst [vmem:[#allocation2 + $0x50] sm:$0x1] %v690_v36  ;;  %v1971_v50 = vld [vmem:[#allocation2 + $0x48] sm:$0xf]  ;;  %v445_v51 = vsel %vm5067_vm14, %v437_v37, %v444_v39 }
  0x8c   : > { %v4917_v49 = vld [vmem:[#allocation2 + $0x48] sm:$0xff]   ;;  %v2134_v56 = vshll.u32 %v1972_v46, 16  ;;  %v2125_v52 = vshrl.u32 %v1971_v50, 16  ;;  %v2128_v53 = vshll.u32 %v1971_v50, 16  ;;  %v2138_v57 = vshrl.u32 %v1972_v46, 16  ;;  %v5385_v33 = vpop.permute.xlu1 %1714 }
  0x8d   : > { %v2516_v58 = vld [vmem:[#allocation2 + $0x48] sm:$0xe]  ;;  %v2634_v59 = vrot.slane %v2517_v47, 5  ;;  %695 = vst.msk [vmem:[#allocation2 + $0x58] sm:$0xf] %vm183_vm0, %v445_v51  ;;  %1901 = vrot.lane.b32.xlu1 %v4917_v49, %s4970_s20  ;;  %v456_v47 = vshrl.u32 %v5378_v9, 16 }
  0x8e   : > { %v2136_v60 = vrot.slane %v2134_v56, 5  ;;  %v4648_v61 = vrot.slane %v2516_v58, 9  ;;  %v2127_v62 = vrot.slane %v2125_v52, 4  ;;  %v2130_v63 = vrot.slane %v2128_v53, 5  ;;  %2765 = vrot.lane.b32.xlu0 %v4663_v42, %s4972_s22  ;;  %v4918_v3 = vld [vmem:[#allocation2 + $0x48] sm:$0xff]   ;;  %v5371_v8 = vpop.permute.xlu0 %1390 }
  0x8f   : > { %v2140_v32 = vrot.slane %v2138_v57, 4  ;;  %v2636_v0 = vrot.slane %v2634_v59, 4  ;;  %v692_v5 = vld [vmem:[#allocation2 + $0x54] sm:$0xf]  ;;  %v3012_v6 = vld [vmem:[#allocation2 + $0x48] sm:$0xf]  ;;  %v5397_v52 = vor.u32 %v451_v45, %v5360_v44 }
  0x90   : > { %v3013_v7 = vld [vmem:[#allocation2 + $0x4c] sm:$0xf]  ;;  %v2131_v10 = vor.u32 %v2130_v63, %v2127_v62  ;;  %v693_v12 = vsel %vm5059_vm13, %v436_v41, %v692_v5  ;;  %v3145_v13 = vshrl.u32 %v3012_v6, 16  ;;  %v696_v14 = vld [vmem:[#allocation2 + $0x5c] sm:$0x1]  ;;  %v3148_v15 = vshll.u32 %v3012_v6, 16 }
  0x91   : > { %v2141_v11 = vor.u32 %v2140_v32, %v2136_v60  ;;  %694 = vst [vmem:[#allocation2 + $0x54] sm:$0xf] %v693_v12  ;;  %v3154_v16 = vshll.u32 %v3013_v7, 16  ;;  %v3158_v17 = vshrl.u32 %v3013_v7, 16  ;;  %v697_v18 = vsel %vm5007_vm3, %v446_v40, %v696_v14  ;;  %v3557_v39 = vld [vmem:[#allocation2 + $0x48] sm:$0xe] }
  0x92   : > { %v1973_v19 = vld [vmem:[#allocation2 + $0x50] sm:$0x1]  ;;  %v2132_v20 = vrot.slane %v2131_v10, 4  ;;  %2943 = vrot.lane.b32.xlu0 %v4918_v3, %s4971_s21  ;;  %698 = vst [vmem:[#allocation2 + $0x5c] sm:$0x1] %v697_v18  ;;  %v2635_v24 = vsel %vm5042_vm11, %v4648_v61, %v2634_v59  ;;  %v3147_v27 = vrot.slane %v3145_v13, 4 }
  0x93   : > { %v2142_v21 = vrot.slane %v2141_v11, 4  ;;  %v2518_v22 = vld [vmem:[#allocation2 + $0x50] sm:$0x1]  ;;  %v2144_v23 = vshll.u32 %v1973_v19, 16  ;;  %v3150_v28 = vrot.slane %v3148_v15, 5  ;;  %v3156_v29 = vrot.slane %v3154_v16, 5 }
  0x94   : > { %v2637_v25 = vrot.slane %v2518_v22, 5  ;;  %v3014_v54 = vld [vmem:[#allocation2 + $0x50] sm:$0x1]  ;;  %v2137_v26 = vsel %vm5051_vm12, %v2132_v20, %v2136_v60  ;;  %v3016_v30 = vld [vmem:[#allocation2 + $0x58] sm:$0xf]  ;;  %v3160_v37 = vrot.slane %v3158_v17, 4 }
  0x95   : > { %v2146_v34 = vrot.slane %v2144_v23, 5  ;;  %v3164_v38 = vshll.u32 %v3014_v54, 16  ;;  %v3151_v36 = vor.u32 %v3150_v28, %v3147_v27  ;;  %v3178_v46 = vshll.u32 %v3016_v30, 16  ;;  %v3558_v41 = vld [vmem:[#allocation2 + $0x4c] sm:$0xf] }
  0x96   : > { %v2638_v35 = vsel %vm5042_vm11, %v2636_v0, %v2637_v25  ;;  %v3182_v42 = vshrl.u32 %v3016_v30, 16  ;;  %v3161_v50 = vor.u32 %v3160_v37, %v3156_v29  ;;  %v3559_v51 = vld [vmem:[#allocation2 + $0x50] sm:$0x1]  ;;  %v4711_v60 = vrot.slane %v3557_v39, 9  ;;  %v925_v61 = vld [vmem:[#allocation2 + $0x48] sm:$0xf] }
  0x97   : > { %v5389_v40 = vpop.permute.xlu0 %1891  ;;  %v2147_v49 = vsel %vm5051_vm12, %v2142_v21, %v2146_v34  ;;  %v3166_v56 = vrot.slane %v3164_v38, 5  ;;  %v4664_v57 = vcombine.low %v2635_v24, %v2638_v35  ;;  %v3152_v58 = vrot.slane %v3151_v36, 4  ;;  %v926_v7 = vld [vmem:[#allocation2 + $0x4c] sm:$0xf]  ;;  %v927_v15 = vld [vmem:[#allocation2 + $0x50] sm:$0x1] }
  0x98   : > { %v4632_v53 = vcombine.low %v2137_v26, %v2147_v49  ;;  %v3015_v59 = vld [vmem:[#allocation2 + $0x54] sm:$0xf]  ;;  %v3162_v62 = vrot.slane %v3161_v50, 4  ;;  %v3180_v3 = vrot.slane %v3178_v46, 5  ;;  %v3184_v6 = vrot.slane %v3182_v42, 4 }
  0x99   : > { %v3017_v63 = vld [vmem:[#allocation2 + $0x5c] sm:$0x1]  ;;  %v3169_v32 = vshrl.u32 %v3015_v59, 16  ;;  %v3172_v0 = vshll.u32 %v3015_v59, 16  ;;  %v3157_v5 = vsel %vm5051_vm12, %v3152_v58, %v3156_v29  ;;  %v3671_v45 = vrot.slane %v3558_v41, 5  ;;  %v4919_v21 = vld [vmem:[#allocation2 + $0x54] sm:$0xff]  }
  0x9a   : > { %2446 = vrot.lane.b32.xlu1 %v4632_v53, %s4974_s24  ;;  %v3188_v4 = vshll.u32 %v3017_v63, 16  ;;  %v3167_v11 = vsel %vm5051_vm12, %v3162_v62, %v3166_v56  ;;  %v3674_v14 = vrot.slane %v3559_v51, 5  ;;  %v3185_v18 = vor.u32 %v3184_v6, %v3180_v3  ;;  %v3561_v54 = vld [vmem:[#allocation2 + $0x58] sm:$0xf]  ;;  %v3560_v30 = vld [vmem:[#allocation2 + $0x54] sm:$0xe] }
  0x9b   : > { %v3171_v12 = vrot.slane %v3169_v32, 4  ;;  %v3174_v13 = vrot.slane %v3172_v0, 5  ;;  %v4695_v17 = vcombine.low %v3157_v5, %v3167_v11  ;;  %v3672_v20 = vsel %vm5042_vm11, %v4711_v60, %v3671_v45  ;;  %v3562_v36 = vld [vmem:[#allocation2 + $0x5c] sm:$0x1]  ;;  %v928_v41 = vld [vmem:[#allocation2 + $0x54] sm:$0xf] }
  0x9c   : > { %v3190_v19 = vrot.slane %v3188_v4, 5  ;;  %v3673_v23 = vrot.slane %v3671_v45, 4  ;;  %v1103_v24 = vshrl.u32 %v925_v61, 16  ;;  %v1106_v25 = vshll.u32 %v925_v61, 16  ;;  %v929_v51 = vld [vmem:[#allocation2 + $0x58] sm:$0xf] }
  0x9d   : > { %v5402_v10 = vpop.permute.xlu1 %1893  ;;  %v3175_v22 = vor.u32 %v3174_v13, %v3171_v12  ;;  %3488 = vrot.lane.b32.xlu0 %v4695_v17, %s4975_s25  ;;  %v3186_v26 = vrot.slane %v3185_v18, 4  ;;  %v1112_v27 = vshll.u32 %v926_v7, 16  ;;  %v1116_v28 = vshrl.u32 %v926_v7, 16  ;;  %v930_v60 = vld [vmem:[#allocation2 + $0x5c] sm:$0x1] }
  0x9e   : > { %v5406_v16 = vpop.permute.xlu0 %2935  ;;  %2767 = vrot.lane.b32.xlu1 %v4664_v57, %s4972_s22  ;;  %v1122_v29 = vshll.u32 %v927_v15, 16  ;;  %v3675_v37 = vsel %vm5042_vm11, %v3673_v23, %v3674_v14  ;;  %v1105_v38 = vrot.slane %v1103_v24, 4  ;;  %v1108_v39 = vrot.slane %v1106_v25, 5  ;;  %v1473_v0 = vld [vmem:[#allocation2 + $0x48] sm:$0xe] }
  0x9f   : > { %v3176_v35 = vrot.slane %v3175_v22, 4  ;;  %v3191_v42 = vsel %vm5051_vm12, %v3186_v26, %v3190_v19  ;;  %v4727_v49 = vcombine.low %v3672_v20, %v3675_v37  ;;  %v1114_v50 = vrot.slane %v1112_v27, 5  ;;  %v1474_v7 = vld [vmem:[#allocation2 + $0x4c] sm:$0xf]  ;;  %v1475_v15 = vld [vmem:[#allocation2 + $0x50] sm:$0x1] }
  0xa0   : > { %v1118_v56 = vrot.slane %v1116_v28, 4  ;;  %v1109_v57 = vor.u32 %v1108_v39, %v1105_v38  ;;  %v1124_v58 = vrot.slane %v1122_v29, 5  ;;  %v4712_v59 = vrot.slane %v3560_v30, 9  ;;  %v1477_v26 = vld [vmem:[#allocation2 + $0x58] sm:$0xf] }
  0xa1   : > { %v5412_v34 = vpop.permute.xlu1 %2937  ;;  %v3181_v53 = vsel %vm5051_vm12, %v3176_v35, %v3180_v3  ;;  %3809 = vrot.lane.b32.xlu0 %v4727_v49, %s4973_s23  ;;  %v3678_v63 = vrot.slane %v3561_v54, 5  ;;  %v3681_v32 = vrot.slane %v3562_v36, 5  ;;  %v1127_v6 = vshrl.u32 %v928_v41, 16  ;;  %v1478_v27 = vld [vmem:[#allocation2 + $0x5c] sm:$0x1] }
  0xa2   : > { %v5416_v46 = vpop.permute.xlu0 %2757  ;;  %2945 = vrot.lane.b32.xlu1 %v4919_v21, %s4971_s21  ;;  %v4696_v61 = vcombine.low %v3181_v53, %v3191_v42  ;;  %v1119_v62 = vor.u32 %v1118_v56, %v1114_v50  ;;  %v1110_v5 = vrot.slane %v1109_v57, 4  ;;  %v1130_v4 = vshll.u32 %v928_v41, 16  ;;  %v1476_v21 = vld [vmem:[#allocation2 + $0x54] sm:$0xe]  ;;  %v699_v41 = vld [vmem:[#allocation2 + $0x60] sm:$0xf] }
  0xa3   : > { %v1136_v45 = vshll.u32 %v929_v51, 16  ;;  %v3679_v12 = vsel %vm5042_vm11, %v4712_v59, %v3678_v63  ;;  %v3680_v13 = vrot.slane %v3678_v63, 4  ;;  %v1140_v14 = vshrl.u32 %v929_v51, 16 }
  0xa4   : > { %v1120_v3 = vrot.slane %v1119_v62, 4  ;;  %v1115_v17 = vsel %vm5051_vm12, %v1110_v5, %v1114_v50  ;;  %v1129_v18 = vrot.slane %v1127_v6, 4  ;;  %v1132_v19 = vrot.slane %v1130_v4, 5 }
  0xa5   : > { %v5424_v11 = vpop.permute.xlu1 %1716  ;;  %v1138_v20 = vrot.slane %v1136_v45, 5  ;;  %v3682_v24 = vsel %vm5042_vm11, %v3680_v13, %v3681_v32  ;;  %v1142_v25 = vrot.slane %v1140_v14, 4  ;;  %v1146_v54 = vshll.u32 %v930_v60, 16  ;;  %v1974_v32 = vld [vmem:[#allocation2 + $0x54] sm:$0xf] }
  0xa6   : > { %v5430_v22 = vpop.permute.xlu0 %3801  ;;  %3490 = vrot.lane.b32.xlu1 %v4696_v61, %s4975_s25  ;;  %v1125_v23 = vsel %vm5051_vm12, %v1120_v3, %v1124_v58  ;;  %v4728_v29 = vcombine.low %v3679_v12, %v3682_v24  ;;  %v1133_v30 = vor.u32 %v1132_v19, %v1129_v18  ;;  %v4585_v35 = vrot.slane %v1473_v0, 9  ;;  %v267_v0 = vld [vmem:[#allocation2 + $0x68] sm:$0x1]  ;;  %v1976_v3 = vld [vmem:[#allocation2 + $0x5c] sm:$0x1]  ;;  %v4920_v14 = vld [vmem:[#allocation2 + $0x54] sm:$0xff]  }
  0xa7   : > { %v4569_v28 = vcombine.low %v1115_v17, %v1125_v23  ;;  %v1143_v37 = vor.u32 %v1142_v25, %v1138_v20  ;;  %v1148_v38 = vrot.slane %v1146_v54, 5  ;;  %v1598_v39 = vrot.slane %v1474_v7, 5  ;;  %v1975_v7 = vld [vmem:[#allocation2 + $0x58] sm:$0xf]  ;;  %v5468_v18 = vld [vmem:[#allocation2 + $0x5c] sm:$0x1] }
  0xa8   : > { %v1601_v36 = vrot.slane %v1475_v15, 5  ;;  %3811 = vrot.lane.b32.xlu0 %v4728_v29, %s4973_s23  ;;  %v1134_v42 = vrot.slane %v1133_v30, 4  ;;  %v4586_v49 = vrot.slane %v1476_v21, 9  ;;  %v1605_v50 = vrot.slane %v1477_v26, 5  ;;  %v5464_v15 = vld [vmem:[#allocation2 + $0x54] sm:$0xe] }
  0xa9   : > { %v1608_v56 = vrot.slane %v1478_v27, 5  ;;  %v5438_v51 = vpop.permute.xlu1 %2759  ;;  %v1144_v53 = vrot.slane %v1143_v37, 4  ;;  %v1599_v57 = vsel %vm5042_vm11, %v4585_v35, %v1598_v39  ;;  %v1600_v58 = vrot.slane %v1598_v39, 4  ;;  %v5466_v17 = vld [vmem:[#allocation2 + $0x58] sm:$0xf]  ;;  %v4927_v19 = vld [vmem:[#allocation2 + $0xc] sm:$0xff]  }
  0xaa   : > { %1402 = vrot.lane.b32.xlu1 %v4569_v28, %s4969_s19  ;;  %v454_v59 = vrot.slane %v5360_v44, 4  ;;  %v1139_v60 = vsel %vm5051_vm12, %v1134_v42, %v1138_v20  ;;  %v1606_v61 = vsel %vm5042_vm11, %v4586_v49, %v1605_v50  ;;  %v1607_v62 = vrot.slane %v1605_v50, 4  ;;  %v5452_v5 = vpop.permute.xlu0 %3803  ;;  %v4928_v20 = vld [vmem:[#allocation2 + $0x18] sm:$0xff]   ;;  %v4930_v21 = vld [vmem:[#allocation2 + $0x24] sm:$0xff]   ;;  %v4937_v30 = vld [vmem:[#allocation2 + $0x30] sm:$0xff]   ;;  %892 = vst.msk [vmem:[#allocation3 + $0x8] sm:$0xff] %vm6378_vm15, %v4927_v19 }
  0xab   : > { %v5450_v63 = vrot.slane %v456_v47, 7  ;;  %v1149_v6 = vsel %vm5051_vm12, %v1144_v53, %v1148_v38  ;;  %v1602_v44 = vsel %vm5042_vm11, %v1600_v58, %v1601_v36  ;;  %v459_v4 = vshll.u32 %v5378_v9, 16  ;;  %v4922_v9 = vld [vmem:[#allocation2] sm:$0xff]   ;;  %v220_v42 = vld [vmem:[#allocation2 + $0x6c] sm:$0x1]  ;;  %893 = vst.msk [vmem:[#allocation3 + $0x10] sm:$0xff] %vm6378_vm15, %v4928_v20 }
  0xac   : > { %v700_v45 = vsel %vm5059_vm13, %v5397_v52, %v699_v41  ;;  %v4570_v47 = vcombine.low %v1139_v60, %v1149_v6  ;;  %v4601_v12 = vcombine.low %v1599_v57, %v1602_v44  ;;  %v1609_v13 = vsel %vm5042_vm11, %v1607_v62, %v1608_v56  ;;  %v4938_v35 = vld [vmem:[#allocation2 + $0x3c] sm:$0xff]   ;;  %891 = vst.msk [vmem:[#allocation3] sm:$0xff] %vm6378_vm15, %v4922_v9 }
  0xad   : > { %701 = vst [vmem:[#allocation2 + $0x60] sm:$0xf] %v700_v45  ;;  %v4602_v52 = vcombine.low %v1606_v61, %v1609_v13  ;;  %v461_v23 = vor.u32 %v459_v4, %v5450_v63  ;;  %v2149_v24 = vshrl.u32 %v1974_v32, 16  ;;  %v2152_v25 = vshll.u32 %v1974_v32, 16  ;;  %v5475_v29 = vpop.permute.xlu1 %2438  ;;  %v310_v62 = vld [vmem:[%s5038_s17 + $0x40] sm:$0xf] }
  0xae   : > { %1404 = vrot.lane.b32.xlu1 %v4570_v47, %s4969_s19  ;;  %1726 = vrot.lane.b32.xlu0 %v4601_v12, %s4968_s18  ;;  %v2158_v54 = vshll.u32 %v1975_v7, 16  ;;  %v2162_v26 = vshrl.u32 %v1975_v7, 16  ;;  %v2168_v27 = vshll.u32 %v1976_v3, 16  ;;  %v268_v28 = vsel %vm5014_vm5, 0, %v267_v0  ;;  %894 = vst.msk [vmem:[#allocation3 + $0x18] sm:$0xff] %vm6378_vm15, %v4930_v21  ;;  %895 = vst.msk [vmem:[#allocation3 + $0x20] sm:$0xff] %vm6378_vm15, %v4937_v30 }
  0xaf   : > { %v462_v37 = vsel %vm5067_vm14, %v454_v59, %v461_v23  ;;  %v463_v38 = vrot.slane %v5450_v63, 4  ;;  %v2151_v39 = vrot.slane %v2149_v24, 4  ;;  %v2154_v36 = vrot.slane %v2152_v25, 5  ;;  %269 = vst [vmem:[#allocation2 + $0x68] sm:$0x1] %v268_v28  ;;  %896 = vst.msk [vmem:[#allocation3 + $0x28] sm:$0xff] %vm6378_vm15, %v4938_v35 }
  0xb0   : > { %702 = vst.msk [vmem:[#allocation2 + $0x64] sm:$0xf] %vm183_vm0, %v462_v37  ;;  %v2160_v49 = vrot.slane %v2158_v54, 5  ;;  %v2164_v50 = vrot.slane %v2162_v26, 4  ;;  %v4649_v56 = vrot.slane %v5464_v15, 9  ;;  %v2641_v41 = vrot.slane %v5466_v17, 5  ;;  %v1393_v53 = vpop.permute.xlu0 %1392 }
  0xb1   : > { %v2155_v57 = vor.u32 %v2154_v36, %v2151_v39  ;;  %v2644_v58 = vrot.slane %v5468_v18, 5  ;;  %v2170_v60 = vrot.slane %v2168_v27, 5  ;;  %1439 = vst.msk [vmem:[#allocation3] sm:$0xff] %vm1438_vm1, %v5371_v8  ;;  %v221_v0 = vsel %vm5007_vm3, 0, %v220_v42  ;;  %1440 = vst.msk [vmem:[#allocation3 + $0x8] sm:$0xff] %vm1438_vm1, %v1393_v53 }
  0xb2   : > { %1728 = vrot.lane.b32.xlu1 %v4602_v52, %s4968_s18  ;;  %1903 = vrot.lane.b32.xlu0 %v4920_v14, %s4970_s20  ;;  %v2165_v59 = vor.u32 %v2164_v50, %v2160_v49  ;;  %v2643_v61 = vrot.slane %v2641_v41, 4  ;;  %1763 = vst.msk [vmem:[#allocation3] sm:$0xff] %vm6381_vm2, %v5385_v33  ;;  %222 = vst [vmem:[#allocation2 + $0x6c] sm:$0x1] %v221_v0  ;;  %v311_v45 = vld [vmem:[%s5038_s17 + $0x44] sm:$0xf]  ;;  %v2642_v3 = vsel %vm5042_vm11, %v4649_v56, %v2641_v41 }
  0xb3   : > { %v2156_v63 = vrot.slane %v2155_v57, 4  ;;  %1764 = vst.msk [vmem:[#allocation3 + $0x8] sm:$0xff] %vm6381_vm2, %v5424_v11  ;;  %v465_v13 = vshrl.u32 %v310_v62, 16  ;;  %v468_v11 = vshll.u32 %v310_v62, 16  ;;  %v473_v30 = vshrl.u32 %v311_v45, 16 }
  0xb4   : > { %v1977_v32 = vld [vmem:[#allocation2 + $0x60] sm:$0xf]  ;;  %v2166_v6 = vrot.slane %v2165_v59, 4  ;;  %v2645_v47 = vsel %vm5042_vm11, %v2643_v61, %v2644_v58  ;;  %v270_v37 = vld [vmem:[#allocation2 + $0x74] sm:$0x1]  ;;  %v476_v42 = vshll.u32 %v311_v45, 16 }
  0xb5   : > { %v2173_v44 = vshrl.u32 %v1977_v32, 16  ;;  %v2176_v4 = vshll.u32 %v1977_v32, 16  ;;  %v5503_v7 = vpop.permute.xlu1 %3482  ;;  %v2161_v8 = vsel %vm5051_vm12, %v2156_v63, %v2160_v49  ;;  %v2522_v12 = vld [vmem:[#allocation2 + $0x60] sm:$0xe]  ;;  %v467_v21 = vrot.slane %v465_v13, 7  ;;  %1940 = vst.msk [vmem:[#allocation3] sm:$0xff] %vm6379_vm4, %v5389_v40 }
  0xb6   : > { %v2171_v33 = vsel %vm5051_vm12, %v2166_v6, %v2170_v60  ;;  %v703_v14 = vld [vmem:[#allocation2 + $0x68] sm:$0x1]  ;;  %v4665_v26 = vcombine.low %v2642_v3, %v2645_v47  ;;  %v3018_v35 = vld [vmem:[#allocation2 + $0x60] sm:$0xf]  ;;  %v4650_v36 = vrot.slane %v2522_v12, 9  ;;  %v5521_v53 = vrot.slane %v473_v30, 7 }
  0xb7   : > { %v2175_v15 = vrot.slane %v2173_v44, 4  ;;  %v2178_v17 = vrot.slane %v2176_v4, 5  ;;  %v4921_v18 = vld [vmem:[#allocation2 + $0x60] sm:$0xff]   ;;  %v4633_v9 = vcombine.low %v2161_v8, %v2171_v33  ;;  %v704_v19 = vsel %vm5007_vm3, %v463_v38, %v703_v14  ;;  %1941 = vst.msk [vmem:[#allocation3 + $0x8] sm:$0xff] %vm6379_vm4, %v5402_v10 }
  0xb8   : > { %v1978_v20 = vld [vmem:[#allocation2 + $0x64] sm:$0xf]  ;;  %705 = vst [vmem:[#allocation2 + $0x68] sm:$0x1] %v704_v19  ;;  %1905 = vrot.lane.b32.xlu1 %v4921_v18, %s4970_s20  ;;  %v470_v28 = vor.u32 %v468_v11, %v467_v21  ;;  %v471_v41 = vrot.slane %v467_v21, 4  ;;  %v3193_v60 = vshrl.u32 %v3018_v35, 16  ;;  %v478_v63 = vor.u32 %v476_v42, %v5521_v53 }
  0xb9   : > { %v2179_v52 = vor.u32 %v2178_v17, %v2175_v15  ;;  %v2182_v23 = vshll.u32 %v1978_v20, 16  ;;  %v2186_v24 = vshrl.u32 %v1978_v20, 16  ;;  %v2523_v25 = vld [vmem:[#allocation2 + $0x64] sm:$0xf]  ;;  %v5515_v54 = vpop.permute.xlu0 %2436  ;;  %2448 = vrot.lane.b32.xlu0 %v4633_v9, %s4974_s24  ;;  %v706_v57 = vld [vmem:[#allocation2 + $0x6c] sm:$0xf] }
  0xba   : > { %v2648_v27 = vrot.slane %v2523_v25, 5  ;;  %v3019_v49 = vld [vmem:[#allocation2 + $0x64] sm:$0xf]  ;;  %v707_v59 = vsel %vm5059_vm13, %v470_v28, %v706_v57  ;;  %v3196_v32 = vshll.u32 %v3018_v35, 16  ;;  %v3563_v6 = vld [vmem:[#allocation2 + $0x60] sm:$0xe]  ;;  %v479_v33 = vsel %vm5067_vm14, %v471_v41, %v478_v63 }
  0xbb   : > { %v5519_v38 = vrot.slane %v2182_v23, 5  ;;  %v2188_v39 = vrot.slane %v2186_v24, 4  ;;  %v2180_v56 = vrot.slane %v2179_v52, 4  ;;  %v4923_v62 = vld [vmem:[#allocation2 + $0x60] sm:$0xff]   ;;  %708 = vst [vmem:[#allocation2 + $0x6c] sm:$0xf] %v707_v59 }
  0xbc   : > { %v1395_v50 = vpop.permute.xlu1 %1394  ;;  %v2650_v61 = vrot.slane %v2648_v27, 4  ;;  %v3202_v0 = vshll.u32 %v3019_v49, 16  ;;  %v3195_v4 = vrot.slane %v3193_v60, 4  ;;  %v3206_v45 = vshrl.u32 %v3019_v49, 16  ;;  %v3564_v8 = vld [vmem:[#allocation2 + $0x64] sm:$0xf] }
  0xbd   : > { %1441 = vst.msk [vmem:[#allocation3 + $0x10] sm:$0xff] %vm1438_vm1, %v1395_v50  ;;  %v2189_v58 = vor.u32 %v2188_v39, %v5519_v38  ;;  %2769 = vrot.lane.b32.xlu0 %v4665_v26, %s4972_s22  ;;  %v271_v40 = vsel %vm5014_vm5, 0, %v270_v37  ;;  %v2185_v47 = vsel %vm5051_vm12, %v2180_v56, %v5519_v38  ;;  %v5542_v13 = vsel %vm5042_vm11, %v4650_v36, %v2648_v27  ;;  %v931_v38 = vld [vmem:[#allocation2 + $0x60] sm:$0xf] }
  0xbe   : > { %272 = vst [vmem:[#allocation2 + $0x74] sm:$0x1] %v271_v40  ;;  %709 = vst.msk [vmem:[#allocation2 + $0x70] sm:$0xf] %vm183_vm0, %v479_v33  ;;  %v3198_v11 = vrot.slane %v3196_v32, 5  ;;  %v3204_v18 = vrot.slane %v3202_v0, 5 }
  0xbf   : > { %v2190_v44 = vrot.slane %v2189_v58, 4  ;;  %v1979_v10 = vld [vmem:[#allocation2 + $0x68] sm:$0x1]  ;;  %v3208_v19 = vrot.slane %v3206_v45, 4  ;;  %v4713_v21 = vrot.slane %v3563_v6, 9  ;;  %v3685_v52 = vrot.slane %v3564_v8, 5 }
  0xc0   : > { %v2524_v12 = vld [vmem:[#allocation2 + $0x68] sm:$0x1]  ;;  %v2192_v15 = vshll.u32 %v1979_v10, 16  ;;  %v3199_v25 = vor.u32 %v3198_v11, %v3195_v4  ;;  %v480_v30 = vrot.slane %v5521_v53, 4  ;;  %v932_v53 = vld [vmem:[#allocation2 + $0x64] sm:$0xf] }
  0xc1   : > { %v5535_v3 = vpop.permute.xlu0 %3480  ;;  %v3020_v14 = vld [vmem:[#allocation2 + $0x68] sm:$0x1]  ;;  %v2651_v17 = vrot.slane %v2524_v12, 5  ;;  %2947 = vrot.lane.b32.xlu0 %v4923_v62, %s4971_s21  ;;  %v3209_v35 = vor.u32 %v3208_v19, %v3204_v18  ;;  %v3686_v49 = vsel %vm5042_vm11, %v4713_v21, %v3685_v52  ;;  %v3687_v50 = vrot.slane %v3685_v52, 4  ;;  %2486 = vst.msk [vmem:[#allocation3 + $0x8] sm:$0xff] %vm2484_vm6, %v5475_v29  ;;  %2485 = vst.msk [vmem:[#allocation3] sm:$0xff] %vm2484_vm6, %v5515_v54 }
  0xc2   : > { %v3565_v9 = vld [vmem:[#allocation2 + $0x68] sm:$0x1]  ;;  %v3212_v20 = vshll.u32 %v3020_v14, 16  ;;  %v2194_v23 = vrot.slane %v2192_v15, 5  ;;  %v3200_v36 = vrot.slane %v3199_v25, 4  ;;  %v1151_v32 = vshrl.u32 %v931_v38, 16 }
  0xc3   : > { %v2652_v24 = vsel %vm5042_vm11, %v2650_v61, %v2651_v17  ;;  %v3688_v26 = vrot.slane %v3565_v9, 5  ;;  %v3021_v42 = vld [vmem:[#allocation2 + $0x6c] sm:$0xf]  ;;  %v3210_v57 = vrot.slane %v3209_v35, 4  ;;  %v933_v63 = vld [vmem:[#allocation2 + $0x68] sm:$0x1] }
  0xc4   : > { %v4666_v28 = vcombine.low %v5542_v13, %v2652_v24  ;;  %v3214_v37 = vrot.slane %v3212_v20, 5  ;;  %v2195_v39 = vsel %vm5051_vm12, %v2190_v44, %v2194_v23  ;;  %v3217_v58 = vshrl.u32 %v3021_v42, 16  ;;  %v3566_v33 = vld [vmem:[#allocation2 + $0x6c] sm:$0xe]  ;;  %2807 = vst.msk [vmem:[#allocation3 + $0x8] sm:$0xff] %vm2805_vm7, %v5438_v51  ;;  %2806 = vst.msk [vmem:[#allocation3] sm:$0xff] %vm2805_vm7, %v5416_v46 }
  0xc5   : > { %v1719_v27 = vpop.permute.xlu0 %1718  ;;  %v4634_v41 = vcombine.low %v2185_v47, %v2195_v39  ;;  %v3220_v59 = vshll.u32 %v3021_v42, 16  ;;  %v3205_v60 = vsel %vm5051_vm12, %v3200_v36, %v3204_v18  ;;  %v710_v61 = vld [vmem:[#allocation2 + $0x74] sm:$0x1]  ;;  %v3689_v62 = vsel %vm5042_vm11, %v3687_v50, %v3688_v26  ;;  %v3022_v45 = vld [vmem:[#allocation2 + $0x70] sm:$0xf]  ;;  %2985 = vst.msk [vmem:[#allocation3 + $0x8] sm:$0xff] %vm6380_vm8, %v5412_v34 }
  0xc6   : > { %1765 = vst.msk [vmem:[#allocation3 + $0x10] sm:$0xff] %vm6381_vm2, %v1719_v27  ;;  %v1397_v56 = vpop.permute.xlu1 %1396  ;;  %v1154_v0 = vshll.u32 %v931_v38, 16  ;;  %v3215_v44 = vsel %vm5051_vm12, %v3210_v57, %v3214_v37  ;;  %v711_v4 = vsel %vm5007_vm3, %v480_v30, %v710_v61  ;;  %v3219_v40 = vrot.slane %v3217_v58, 4  ;;  %v3567_v9 = vld [vmem:[#allocation2 + $0x70] sm:$0xf] }
  0xc7   : > { %1442 = vst.msk [vmem:[#allocation3 + $0x18] sm:$0xff] %vm1438_vm1, %v1397_v56  ;;  %2450 = vrot.lane.b32.xlu1 %v4634_v41, %s4974_s24  ;;  %v4729_v8 = vcombine.low %v3686_v49, %v3689_v62  ;;  %v4697_v10 = vcombine.low %v3205_v60, %v3215_v44  ;;  %712 = vst [vmem:[#allocation2 + $0x74] sm:$0x1] %v711_v4  ;;  %v3222_v47 = vrot.slane %v3220_v59, 5  ;;  %v3226_v12 = vshll.u32 %v3022_v45, 16  ;;  %v4924_v24 = vld [vmem:[#allocation2 + $0x6c] sm:$0xff]  }
  0xc8   : > { %v3230_v13 = vshrl.u32 %v3022_v45, 16  ;;  %v1153_v15 = vrot.slane %v1151_v32, 4  ;;  %v1156_v17 = vrot.slane %v1154_v0, 5  ;;  %v1160_v11 = vshll.u32 %v932_v53, 16  ;;  %v934_v23 = vld [vmem:[#allocation2 + $0x6c] sm:$0xf] }
  0xc9   : > { %v1896_v6 = vpop.permute.xlu0 %1895  ;;  %v1164_v18 = vshrl.u32 %v932_v53, 16  ;;  %3492 = vrot.lane.b32.xlu0 %v4697_v10, %s4975_s25  ;;  %v3223_v19 = vor.u32 %v3222_v47, %v3219_v40  ;;  %v5570_v20 = vrot.slane %v3226_v12, 5  ;;  %v1170_v52 = vshll.u32 %v933_v63, 16  ;;  %v935_v35 = vld [vmem:[#allocation2 + $0x70] sm:$0xf]  ;;  %2984 = vst.msk [vmem:[#allocation3] sm:$0xff] %vm6380_vm8, %v5406_v16 }
  0xca   : > { %1942 = vst.msk [vmem:[#allocation3 + $0x10] sm:$0xff] %vm6379_vm4, %v1896_v6  ;;  %v1721_v14 = vpop.permute.xlu1 %1720  ;;  %v3232_v21 = vrot.slane %v3230_v13, 4  ;;  %v1157_v25 = vor.u32 %v1156_v17, %v1153_v15  ;;  %v1162_v26 = vrot.slane %v1160_v11, 5  ;;  %v4714_v30 = vrot.slane %v3566_v33, 9  ;;  %v1479_v59 = vld [vmem:[#allocation2 + $0x60] sm:$0xe] }
  0xcb   : > { %1766 = vst.msk [vmem:[#allocation3 + $0x18] sm:$0xff] %vm6381_vm2, %v1721_v14  ;;  %2771 = vrot.lane.b32.xlu1 %v4666_v28, %s4972_s22  ;;  %v1166_v27 = vrot.slane %v1164_v18, 4  ;;  %v3224_v37 = vrot.slane %v3223_v19, 4  ;;  %v1172_v39 = vrot.slane %v1170_v52, 5  ;;  %v3692_v36 = vrot.slane %v3567_v9, 5  ;;  %v4943_v14 = vld [vmem:[#allocation2 + $0x48] sm:$0xff]  }
  0xcc   : > { %v3233_v38 = vor.u32 %v3232_v21, %v5570_v20  ;;  %v1158_v49 = vrot.slane %v1157_v25, 4  ;;  %v1175_v56 = vshrl.u32 %v934_v23, 16  ;;  %v1178_v41 = vshll.u32 %v934_v23, 16  ;;  %v1480_v6 = vld [vmem:[#allocation2 + $0x64] sm:$0xf]  ;;  %897 = vst.msk [vmem:[#allocation3 + $0x30] sm:$0xff] %vm6378_vm15, %v4943_v14 }
  0xcd   : > { %v1167_v50 = vor.u32 %v1166_v27, %v1162_v26  ;;  %v3229_v28 = vsel %vm5051_vm12, %v3224_v37, %v5570_v20  ;;  %3813 = vrot.lane.b32.xlu0 %v4729_v8, %s4973_s23  ;;  %v3694_v58 = vrot.slane %v3692_v36, 4  ;;  %v3693_v32 = vsel %vm5042_vm11, %v4714_v30, %v3692_v36  ;;  %v1481_v13 = vld [vmem:[#allocation2 + $0x68] sm:$0x1]  ;;  %v1482_v9 = vld [vmem:[#allocation2 + $0x6c] sm:$0xe] }
  0xce   : > { %v1898_v42 = vpop.permute.xlu1 %1897  ;;  %v3234_v57 = vrot.slane %v3233_v38, 4  ;;  %v3023_v60 = vld [vmem:[#allocation2 + $0x74] sm:$0x1]  ;;  %v1163_v61 = vsel %vm5051_vm12, %v1158_v49, %v1162_v26  ;;  %v1177_v0 = vrot.slane %v1175_v56, 4  ;;  %v1180_v40 = vrot.slane %v1178_v41, 5 }
  0xcf   : > { %1943 = vst.msk [vmem:[#allocation3 + $0x18] sm:$0xff] %vm6379_vm4, %v1898_v42  ;;  %2949 = vrot.lane.b32.xlu1 %v4924_v24, %s4971_s21  ;;  %v1168_v62 = vrot.slane %v1167_v50, 4  ;;  %v3568_v63 = vld [vmem:[#allocation2 + $0x74] sm:$0x1]  ;;  %v3236_v44 = vshll.u32 %v3023_v60, 16  ;;  %v1184_v8 = vshll.u32 %v935_v35, 16 }
  0xd0   : > { %v5579_v53 = vpop.permute.xlu0 %2440  ;;  %v3695_v4 = vrot.slane %v3568_v63, 5  ;;  %v936_v45 = vld [vmem:[#allocation2 + $0x74] sm:$0x1]  ;;  %v1188_v47 = vshrl.u32 %v935_v35, 16  ;;  %v4587_v33 = vrot.slane %v1479_v59, 9  ;;  %v1181_v18 = vor.u32 %v1180_v40, %v1177_v0 }
  0xd1   : > { %v1173_v10 = vsel %vm5051_vm12, %v1168_v62, %v1172_v39  ;;  %v1194_v12 = vshll.u32 %v936_v45, 16  ;;  %v3238_v15 = vrot.slane %v3236_v44, 5  ;;  %v1483_v19 = vld [vmem:[#allocation2 + $0x70] sm:$0xf]  ;;  %v1186_v52 = vrot.slane %v1184_v8, 5  ;;  %v4944_v38 = vld [vmem:[#allocation2 + $0x54] sm:$0xff]  }
  0xd2   : > { %v4571_v17 = vcombine.low %v1163_v61, %v1173_v10  ;;  %v3696_v11 = vsel %vm5042_vm11, %v3694_v58, %v3695_v4  ;;  %v1190_v23 = vrot.slane %v1188_v47, 4  ;;  %v1484_v25 = vld [vmem:[#allocation2 + $0x74] sm:$0x1]  ;;  %v1182_v27 = vrot.slane %v1181_v18, 4  ;;  %v223_v37 = vld [vmem:[#allocation2 + $0x78] sm:$0x1] }
  0xd3   : > { %v4730_v21 = vcombine.low %v3693_v32, %v3696_v11  ;;  %v1196_v24 = vrot.slane %v1194_v12, 5  ;;  %v3239_v26 = vsel %vm5051_vm12, %v3234_v57, %v3238_v15  ;;  %v1612_v30 = vrot.slane %v1480_v6, 5  ;;  %v312_v50 = vld [vmem:[%s5038_s17 + $0x48] sm:$0xf]  ;;  %v313_v56 = vld [vmem:[%s5038_s17 + $0x4c] sm:$0xf] }
  0xd4   : > { %v5590_v20 = vpop.permute.xlu0 %2761  ;;  %v1615_v35 = vrot.slane %v1481_v13, 5  ;;  %v4698_v39 = vcombine.low %v3229_v28, %v3239_v26  ;;  %v1191_v36 = vor.u32 %v1190_v23, %v1186_v52  ;;  %v4588_v42 = vrot.slane %v1482_v9, 9  ;;  %898 = vst.msk [vmem:[#allocation3 + $0x38] sm:$0xff] %vm6378_vm15, %v4944_v38  ;;  %v273_v10 = vld [vmem:[#allocation2 + $0x80] sm:$0x1]  ;;  %v4925_v11 = vld [vmem:[#allocation2 + $0x6c] sm:$0xff]  }
  0xd5   : > { %3815 = vrot.lane.b32.xlu0 %v4730_v21, %s4973_s23  ;;  %v1619_v49 = vrot.slane %v1483_v19, 5  ;;  %v1187_v41 = vsel %vm5051_vm12, %v1182_v27, %v1186_v52  ;;  %v1613_v58 = vsel %vm5042_vm11, %v4587_v33, %v1612_v30  ;;  %v1614_v57 = vrot.slane %v1612_v30, 4  ;;  %v1980_v33 = vld [vmem:[#allocation2 + $0x6c] sm:$0xf]  ;;  %v1981_v14 = vld [vmem:[#allocation2 + $0x70] sm:$0xf] }
  0xd6   : > { %v1622_v59 = vrot.slane %v1484_v25, 5  ;;  %3494 = vrot.lane.b32.xlu1 %v4698_v39, %s4975_s25  ;;  %v1192_v28 = vrot.slane %v1191_v36, 4  ;;  %v224_v62 = vsel %vm5007_vm3, 0, %v223_v37  ;;  %v482_v32 = vshrl.u32 %v312_v50, 16  ;;  %v1982_v18 = vld [vmem:[#allocation2 + $0x74] sm:$0x1] }
  0xd7   : > { %v5606_v60 = vsel %vm5042_vm11, %v4588_v42, %v1619_v49  ;;  %v1621_v61 = vrot.slane %v1619_v49, 4  ;;  %v1616_v63 = vsel %vm5042_vm11, %v1614_v57, %v1615_v35  ;;  %225 = vst [vmem:[#allocation2 + $0x78] sm:$0x1] %v224_v62  ;;  %v485_v0 = vshll.u32 %v312_v50, 16  ;;  %v226_v52 = vld [vmem:[#allocation2 + $0x84] sm:$0x1] }
  0xd8   : > { %v490_v6 = vshrl.u32 %v313_v56, 16  ;;  %v2940_v44 = vpop.permute.xlu0 %2939  ;;  %v1197_v4 = vsel %vm5051_vm12, %v1192_v28, %v1196_v24  ;;  %v4603_v45 = vcombine.low %v1613_v58, %v1616_v63  ;;  %v493_v8 = vshll.u32 %v313_v56, 16  ;;  %v5630_v23 = vld [vmem:[%s5038_s17 + $0x50] sm:$0xf]  ;;  %2487 = vst.msk [vmem:[#allocation3 + $0x10] sm:$0xff] %vm2484_vm6, %v5579_v53 }
  0xd9   : > { %v5616_v40 = vsel %vm5042_vm11, %v1621_v61, %v1622_v59  ;;  %v4572_v47 = vcombine.low %v1187_v41, %v1197_v4  ;;  %v484_v12 = vrot.slane %v482_v32, 7  ;;  %vm3528_vm9 = vcmask 261344   ;;  %v2526_v29 = vld [vmem:[#allocation2 + $0x70] sm:$0xf]  ;;  %2808 = vst.msk [vmem:[#allocation3 + $0x10] sm:$0xff] %vm2805_vm7, %v5590_v20 }
  0xda   : > { %v5618_v13 = vrot.slane %v490_v6, 7  ;;  %1406 = vrot.lane.b32.xlu1 %v4571_v17, %s4969_s19  ;;  %1730 = vrot.lane.b32.xlu0 %v4603_v45, %s4968_s18  ;;  %v4604_v15 = vcombine.low %v5606_v60, %v5616_v40  ;;  %v2525_v17 = vld [vmem:[#allocation2 + $0x6c] sm:$0xe]  ;;  %vm3849_vm10 = vcmask 294144   ;;  %v2197_v24 = vshrl.u32 %v1980_v33, 16  ;;  %2986 = vst.msk [vmem:[#allocation3 + $0x10] sm:$0xff] %vm6380_vm8, %v2940_v44 }
  0xdb   : > { %v487_v9 = vor.u32 %v485_v0, %v484_v12  ;;  %v488_v19 = vrot.slane %v484_v12, 4  ;;  %v2200_v25 = vshll.u32 %v1980_v33, 16  ;;  %v2206_v26 = vshll.u32 %v1981_v14, 16  ;;  %v2527_v46 = vld [vmem:[#allocation2 + $0x74] sm:$0x1]  ;;  %3530 = vst.msk [vmem:[#allocation3 + $0x8] sm:$0xff] %vm3528_vm9, %v5503_v7 }
  0xdc   : > { %v495_v21 = vor.u32 %v493_v8, %v5618_v13  ;;  %v2210_v53 = vshrl.u32 %v1981_v14, 16  ;;  %v2216_v30 = vshll.u32 %v1982_v18, 16  ;;  %v274_v51 = vsel %vm5014_vm5, 0, %v273_v10  ;;  %3529 = vst.msk [vmem:[#allocation3] sm:$0xff] %vm3528_vm9, %v5535_v3  ;;  %v276_v7 = vld [vmem:[#allocation2 + $0x8c] sm:$0x1] }
  0xdd   : > { %v2199_v34 = vrot.slane %v2197_v24, 4  ;;  %v2202_v37 = vrot.slane %v2200_v25, 5  ;;  %v2208_v38 = vrot.slane %v2206_v26, 5  ;;  %275 = vst [vmem:[#allocation2 + $0x80] sm:$0x1] %v274_v51  ;;  %v4651_v16 = vrot.slane %v2525_v17, 9 }
  0xde   : > { %v496_v54 = vsel %vm5067_vm14, %v488_v19, %v495_v21  ;;  %1408 = vrot.lane.b32.xlu1 %v4572_v47, %s4969_s19  ;;  %1907 = vrot.lane.b32.xlu0 %v4925_v11, %s4970_s20  ;;  %v713_v35 = vld [vmem:[#allocation2 + $0x78] sm:$0xf]  ;;  %3851 = vst.msk [vmem:[#allocation3 + $0x8] sm:$0xff] %vm3849_vm10, %v5452_v5  ;;  %v2212_v36 = vrot.slane %v2210_v53, 4  ;;  %v2655_v42 = vrot.slane %v2526_v29, 5  ;;  %3850 = vst.msk [vmem:[#allocation3] sm:$0xff] %vm3849_vm10, %v5430_v22 }
  0xdf   : > { %v2443_v27 = vpop.permute.xlu1 %2442  ;;  %716 = vst.msk [vmem:[#allocation2 + $0x7c] sm:$0xf] %vm183_vm0, %v496_v54  ;;  %v714_v39 = vsel %vm5059_vm13, %v487_v9, %v713_v35  ;;  %v2203_v49 = vor.u32 %v2202_v37, %v2199_v34  ;;  %v2658_v50 = vrot.slane %v2527_v46, 5  ;;  %v227_v3 = vsel %vm5007_vm3, 0, %v226_v52  ;;  %v315_v22 = vld [vmem:[%s5038_s17 + $0x54] sm:$0xf] }
  0xe0   : > { %2488 = vst.msk [vmem:[#allocation3 + $0x18] sm:$0xff] %vm2484_vm6, %v2443_v27  ;;  %715 = vst [vmem:[#allocation2 + $0x78] sm:$0xf] %v714_v39  ;;  %v499_v56 = vshrl.u32 %v5630_v23, 16  ;;  %v2213_v58 = vor.u32 %v2212_v36, %v2208_v38  ;;  %v2218_v57 = vrot.slane %v2216_v30, 5  ;;  %v2657_v59 = vrot.slane %v2655_v42, 4 }
  0xe1   : > { %v3485_v20 = vpop.permute.xlu0 %3484  ;;  %v5670_v41 = vld [vmem:[%s6375_s1 + $0x10] ss:$0 sps:$4 sm:$0x33]   ;;  %228 = vst [vmem:[#allocation2 + $0x84] sm:$0x1] %v227_v3  ;;  %v497_v61 = vrot.slane %v5618_v13, 4  ;;  %v2656_v63 = vsel %vm5042_vm11, %v4651_v16, %v2655_v42 }
  0xe2   : > { %3531 = vst.msk [vmem:[#allocation3 + $0x10] sm:$0xff] %vm3528_vm9, %v3485_v20  ;;  %1732 = vrot.lane.b32.xlu1 %v4604_v15, %s4968_s18  ;;  %v2204_v62 = vrot.slane %v2203_v49, 4  ;;  %v502_v32 = vshll.u32 %v5630_v23, 16  ;;  %v2214_v0 = vrot.slane %v2213_v58, 4  ;;  %v501_v6 = vrot.slane %v499_v56, 7 }
  0xe3   : > { %v2764_v5 = vpop.permute.xlu1 %2763  ;;  %vm3951_vm15 = vcmask 1041408   ;;  %v277_v44 = vsel %vm5014_vm5, 0, %v276_v7  ;;  %v2659_v4 = vsel %vm5042_vm11, %v2657_v59, %v2658_v50  ;;  %v507_v45 = vshrl.u32 %v315_v22, 16 }
  0xe4   : > { %2809 = vst.msk [vmem:[#allocation3 + $0x18] sm:$0xff] %vm2805_vm7, %v2764_v5  ;;  %v2209_v60 = vsel %vm5051_vm12, %v2204_v62, %v2208_v38  ;;  %v510_v40 = vshll.u32 %v315_v22, 16  ;;  %4889 = vmatprep.subr.msk.bf16.mxu0 %vm3951_vm15, %v5670_v41  ;;  %278 = vst [vmem:[#allocation2 + $0x8c] sm:$0x1] %v277_v44  ;;  %4890 = vmatprep.subr.msk.bf16.mxu1 %vm3951_vm15, %v5670_v41  ;;  %v2219_v10 = vsel %vm5051_vm12, %v2214_v0, %v2218_v57  ;;  %v717_v47 = vld [vmem:[#allocation2 + $0x80] sm:$0x1] }
  0xe5   : > { %v3806_v28 = vpop.permute.xlu0 %3805  ;;  %v4635_v13 = vcombine.low %v2209_v60, %v2219_v10  ;;  %v718_v33 = vsel %vm5007_vm3, %v497_v61, %v717_v47  ;;  %v4667_v19 = vcombine.low %v2656_v63, %v2659_v4  ;;  %v504_v17 = vor.u32 %v502_v32, %v501_v6 }
  0xe6   : > { %3852 = vst.msk [vmem:[#allocation3 + $0x10] sm:$0xff] %vm3849_vm10, %v3806_v28  ;;  %v1984_v12 = vld [vmem:[#allocation2 + $0x7c] sm:$0xf]  ;;  %719 = vst [vmem:[#allocation2 + $0x80] sm:$0x1] %v718_v33  ;;  %v505_v27 = vrot.slane %v501_v6, 4 }
  0xe7   : > { %v2942_v8 = vpop.permute.xlu1 %2941  ;;  %v2230_v14 = vshll.u32 %v1984_v12, 16  ;;  %v2234_v15 = vshrl.u32 %v1984_v12, 16  ;;  %v2529_v11 = vld [vmem:[#allocation2 + $0x7c] sm:$0xf]  ;;  %v1983_v9 = vld [vmem:[#allocation2 + $0x78] sm:$0xf]  ;;  %2452 = vrot.lane.b32.xlu0 %v4635_v13, %s4974_s24 }
  0xe8   : > { %2987 = vst.msk [vmem:[#allocation3 + $0x18] sm:$0xff] %vm6380_vm8, %v2942_v8  ;;  %v4926_v18 = vld [vmem:[#allocation2 + $0x78] sm:$0xff]   ;;  %v2662_v21 = vrot.slane %v2529_v11, 5  ;;  %v2221_v52 = vshrl.u32 %v1983_v9, 16  ;;  %v2224_v23 = vshll.u32 %v1983_v9, 16  ;;  %v509_v54 = vrot.slane %v507_v45, 7 }
  0xe9   : > { %v5699_v24 = vrot.slane %v2230_v14, 5  ;;  %v2236_v25 = vrot.slane %v2234_v15, 4  ;;  %v2528_v26 = vld [vmem:[#allocation2 + $0x78] sm:$0xe]  ;;  %1909 = vrot.lane.b32.xlu1 %v4926_v18, %s4970_s20  ;;  %v720_v20 = vld [vmem:[#allocation2 + $0x84] sm:$0xf] }
  0xea   : > { %v4652_v29 = vrot.slane %v2528_v26, 9  ;;  %v2223_v30 = vrot.slane %v2221_v52, 4  ;;  %v2226_v51 = vrot.slane %v2224_v23, 5  ;;  %v3024_v35 = vld [vmem:[#allocation2 + $0x78] sm:$0xf]  ;;  %v2664_v34 = vrot.slane %v2662_v21, 4 }
  0xeb   : > { %v2237_v46 = vor.u32 %v2236_v25, %v5699_v24  ;;  %v512_v37 = vor.u32 %v510_v40, %v509_v54  ;;  %v514_v38 = vrot.slane %v509_v54, 4  ;;  %v721_v16 = vsel %vm5059_vm13, %v504_v17, %v720_v20  ;;  %v3025_v39 = vld [vmem:[#allocation2 + $0x7c] sm:$0xf]  ;;  %v724_v36 = vld [vmem:[#allocation2 + $0x8c] sm:$0x1]  ;;  %2773 = vrot.lane.b32.xlu0 %v4667_v19, %s4972_s22 }
  0xec   : > { %v3808_v53 = vpop.permute.xlu0 %3807  ;;  %v2227_v7 = vor.u32 %v2226_v51, %v2223_v30  ;;  %v4931_v50 = vld [vmem:[#allocation2 + $0x78] sm:$0xff]   ;;  %722 = vst [vmem:[#allocation2 + $0x84] sm:$0xf] %v721_v16  ;;  %v3241_v3 = vshrl.u32 %v3024_v35, 16  ;;  %v3244_v56 = vshll.u32 %v3024_v35, 16  ;;  %v3250_v58 = vshll.u32 %v3025_v39, 16 }
  0xed   : > { %v3487_v42 = vpop.permute.xlu1 %3486  ;;  %v2238_v49 = vrot.slane %v2237_v46, 4  ;;  %v513_v5 = vsel %vm5067_vm14, %v505_v27, %v512_v37  ;;  %v3254_v57 = vshrl.u32 %v3025_v39, 16  ;;  %v725_v59 = vsel %vm5007_vm3, %v514_v38, %v724_v36  ;;  %v3569_v22 = vld [vmem:[#allocation2 + $0x78] sm:$0xe]  ;;  %v3570_v28 = vld [vmem:[#allocation2 + $0x7c] sm:$0xf] }
  0xee   : > { %3532 = vst.msk [vmem:[#allocation3 + $0x18] sm:$0xff] %vm3528_vm9, %v3487_v42  ;;  %v1985_v62 = vld [vmem:[#allocation2 + $0x80] sm:$0x1]  ;;  %v2228_v63 = vrot.slane %v2227_v7, 4  ;;  %v3243_v0 = vrot.slane %v3241_v3, 4  ;;  %v3246_v4 = vrot.slane %v3244_v56, 5  ;;  %v5715_v8 = vsel %vm5042_vm11, %v4652_v29, %v2662_v21 }
  0xef   : > { %3853 = vst.msk [vmem:[#allocation3 + $0x18] sm:$0xff] %vm3849_vm10, %v3808_v53  ;;  %v2530_v32 = vld [vmem:[#allocation2 + $0x80] sm:$0x1]  ;;  %726 = vst [vmem:[#allocation2 + $0x8c] sm:$0x1] %v725_v59  ;;  %v2240_v6 = vshll.u32 %v1985_v62, 16  ;;  %2951 = vrot.lane.b32.xlu0 %v4931_v50, %s4971_s21 }
  0xf0   : > { %v1723_v61 = vpop.permute.xlu0 %1722  ;;  %723 = vst.msk [vmem:[#allocation2 + $0x88] sm:$0xf] %vm183_vm0, %v513_v5  ;;  %v2665_v44 = vrot.slane %v2530_v32, 5  ;;  %v3026_v60 = vld [vmem:[#allocation2 + $0x80] sm:$0x1]  ;;  %v3252_v45 = vrot.slane %v3250_v58, 5  ;;  %v2233_v33 = vsel %vm5051_vm12, %v2228_v63, %v5699_v24  ;;  %v3247_v15 = vor.u32 %v3246_v4, %v3243_v0 }
  0xf1   : > { %v1399_v40 = vpop.permute.xlu1 %1398  ;;  %v3256_v10 = vrot.slane %v3254_v57, 4  ;;  %v3260_v47 = vshll.u32 %v3026_v60, 16  ;;  %v3953_v12 = vsel %vm3951_vm15, %v5670_v41, 0  ;;  %v3571_v13 = vld [vmem:[#allocation2 + $0x80] sm:$0x1]  ;;  %v2242_v14 = vrot.slane %v2240_v6, 5 }
  0xf2   : > { %1443 = vst.msk [vmem:[#allocation3 + $0x20] sm:$0xff] %vm1438_vm1, %v1399_v40  ;;  %4850 = vmatpush3.bf16.msra.mxu0 %v3953_v12  ;;  %v4715_v11 = vrot.slane %v3569_v22, 9  ;;  %4888 = vmatpush3.bf16.msra.mxu1 %v3953_v12  ;;  %v2666_v9 = vsel %vm5042_vm11, %v2664_v34, %v2665_v44  ;;  %v3699_v21 = vrot.slane %v3570_v28, 5  ;;  %v3248_v52 = vrot.slane %v3247_v15, 4  ;;  %v937_v53 = vld [vmem:[#allocation2 + $0x78] sm:$0xf] }
  0xf3   : > { %1767 = vst.msk [vmem:[#allocation3 + $0x20] sm:$0xff] %vm6381_vm2, %v1723_v61  ;;  %v3257_v19 = vor.u32 %v3256_v10, %v3252_v45  ;;  %v3262_v41 = vrot.slane %v3260_v47, 5  ;;  %v2243_v17 = vsel %vm5051_vm12, %v2238_v49, %v2242_v14  ;;  %v3027_v23 = vld [vmem:[#allocation2 + $0x84] sm:$0xf]  ;;  %v3702_v24 = vrot.slane %v3571_v13, 5  ;;  %v3866_v42 = vld [vmem:[#allocation3] sm:$0xff] }
  0xf4   : > { %v1900_v18 = vpop.permute.xlu0 %1899  ;;  %v4636_v26 = vcombine.low %v2233_v33, %v2243_v17  ;;  %v3265_v27 = vshrl.u32 %v3027_v23, 16  ;;  %v3268_v54 = vshll.u32 %v3027_v23, 16  ;;  %v4668_v30 = vcombine.low %v5715_v8, %v2666_v9  ;;  %v938_v34 = vld [vmem:[#allocation2 + $0x7c] sm:$0xf]  ;;  %v939_v56 = vld [vmem:[#allocation2 + $0x80] sm:$0x1] }
  0xf5   : > { %1944 = vst.msk [vmem:[#allocation3 + $0x20] sm:$0xff] %vm6379_vm4, %v1900_v18  ;;  %v1401_v25 = vpop.permute.xlu1 %1400  ;;  %v3258_v29 = vrot.slane %v3257_v19, 4  ;;  %v3253_v51 = vsel %vm5051_vm12, %v3248_v52, %v3252_v45  ;;  %v3700_v20 = vsel %vm5042_vm11, %v4715_v11, %v3699_v21  ;;  %v3701_v35 = vrot.slane %v3699_v21, 4  ;;  %v3867_v5 = vld [vmem:[#allocation3 + $0x8] sm:$0xff]  ;;  %v3868_v63 = vld [vmem:[#allocation3 + $0x10] sm:$0xff] }
  0xf6   : > { %1444 = vst.msk [vmem:[#allocation3 + $0x28] sm:$0xff] %vm1438_vm1, %v1401_v25  ;;  %2454 = vrot.lane.b32.xlu1 %v4636_v26, %s4974_s24  ;;  %v3029_v38 = vld [vmem:[#allocation2 + $0x8c] sm:$0x1]  ;;  %v3267_v16 = vrot.slane %v3265_v27, 4  ;;  %v3270_v39 = vrot.slane %v3268_v54, 5  ;;  %vm3902_vm15 = vcmask 293888  }
  0xf7   : > { %v3028_v46 = vld [vmem:[#allocation2 + $0x88] sm:$0xf]  ;;  %v3263_v37 = vsel %vm5051_vm12, %v3258_v29, %v3262_v41  ;;  %v3284_v50 = vshll.u32 %v3029_v38, 16  ;;  %v3703_v3 = vsel %vm5042_vm11, %v3701_v35, %v3702_v24  ;;  %v3572_v58 = vld [vmem:[#allocation2 + $0x84] sm:$0xe]  ;;  %4851 = vmatprep.mubr.msk.bf16.mxu0 %vm3902_vm15, %v3866_v42  ;;  %v1199_v6 = vshrl.u32 %v937_v53, 16 }
  0xf8   : > { %v3274_v36 = vshll.u32 %v3028_v46, 16  ;;  %v4699_v7 = vcombine.low %v3253_v51, %v3263_v37  ;;  %v3278_v49 = vshrl.u32 %v3028_v46, 16  ;;  %v4933_v59 = vld [vmem:[#allocation2 + $0x84] sm:$0xff]   ;;  %v3271_v22 = vor.u32 %v3270_v39, %v3267_v16  ;;  %v3574_v60 = vld [vmem:[#allocation2 + $0x8c] sm:$0x1]  ;;  %4852 = vmatmul.mubr.msk.bf16.vlgmr.msra.gmra.mrb[0].mxu0 %vm3902_vm15, %v3867_v5  ;;  %v3869_v54 = vld [vmem:[#allocation3 + $0x18] sm:$0xff] }
  0xf9   : > { %v1725_v57 = vpop.permute.xlu1 %1724  ;;  %v4731_v61 = vcombine.low %v3700_v20, %v3703_v3  ;;  %v3573_v62 = vld [vmem:[#allocation2 + $0x88] sm:$0xf]  ;;  %v3286_v0 = vrot.slane %v3284_v50, 5  ;;  %v1202_v44 = vshll.u32 %v937_v53, 16  ;;  %v1208_v45 = vshll.u32 %v938_v34, 16  ;;  %4855 = vmatprep.mubr.msk.bf16.mxu0 %vm3902_vm15, %v3868_v63 }
  0xfa   : > { %v3276_v28 = vrot.slane %v3274_v36, 5  ;;  %1768 = vst.msk [vmem:[#allocation3 + $0x28] sm:$0xff] %vm6381_vm2, %v1725_v57  ;;  %3496 = vrot.lane.b32.xlu0 %v4699_v7, %s4975_s25  ;;  %v3280_v32 = vrot.slane %v3278_v49, 4  ;;  %2775 = vrot.lane.b32.xlu1 %v4668_v30, %s4972_s22  ;;  %v3272_v4 = vrot.slane %v3271_v22, 4  ;;  %v1212_v40 = vshrl.u32 %v938_v34, 16 }
  0xfb   : > { %v1218_v8 = vshll.u32 %v939_v56, 16  ;;  %v940_v10 = vld [vmem:[#allocation2 + $0x84] sm:$0xf]  ;;  %v1201_v13 = vrot.slane %v1199_v6, 4  ;;  %v1204_v33 = vrot.slane %v1202_v44, 5  ;;  %v4716_v14 = vrot.slane %v3572_v58, 9 }
  0xfc   : > { %v2445_v47 = vpop.permute.xlu0 %2444  ;;  %v3281_v12 = vor.u32 %v3280_v32, %v3276_v28  ;;  %v941_v15 = vld [vmem:[#allocation2 + $0x88] sm:$0xf]  ;;  %v3277_v11 = vsel %vm5051_vm12, %v3272_v4, %v3276_v28  ;;  %v1210_v18 = vrot.slane %v1208_v45, 5  ;;  %v1214_v9 = vrot.slane %v1212_v40, 4  ;;  %v1485_v27 = vld [vmem:[#allocation2 + $0x78] sm:$0xe] }
  0xfd   : > { %2489 = vst.msk [vmem:[#allocation3 + $0x20] sm:$0xff] %vm2484_vm6, %v2445_v47  ;;  %v1220_v19 = vrot.slane %v1218_v8, 5  ;;  %v1205_v21 = vor.u32 %v1204_v33, %v1201_v13  ;;  %v3706_v17 = vrot.slane %v3573_v62, 5  ;;  %v3709_v52 = vrot.slane %v3574_v60, 5  ;;  %v942_v35 = vld [vmem:[#allocation2 + $0x8c] sm:$0x1] }
  0xfe   : > { %v3282_v41 = vrot.slane %v3281_v12, 4  ;;  %3817 = vrot.lane.b32.xlu0 %v4731_v61, %s4973_s23  ;;  %2953 = vrot.lane.b32.xlu1 %v4933_v59, %s4971_s21  ;;  %v1215_v24 = vor.u32 %v1214_v9, %v1210_v18  ;;  %v1223_v25 = vshrl.u32 %v940_v10, 16  ;;  %v1226_v26 = vshll.u32 %v940_v10, 16  ;;  %v1486_v39 = vld [vmem:[#allocation2 + $0x7c] sm:$0xf]  ;;  %v4949_v44 = vld [vmem:[#allocation2 + $0x60] sm:$0xff]  }
  0xff   : > { %v1902_v23 = vpop.permute.xlu1 %1901  ;;  %v1232_v29 = vshll.u32 %v941_v15, 16  ;;  %v1206_v51 = vrot.slane %v1205_v21, 4  ;;  %v3707_v46 = vsel %vm5042_vm11, %v4716_v14, %v3706_v17  ;;  %v3708_v20 = vrot.slane %v3706_v17, 4  ;;  %v1487_v50 = vld [vmem:[#allocation2 + $0x80] sm:$0x1] }
 0x100   : > { %1945 = vst.msk [vmem:[#allocation3 + $0x28] sm:$0xff] %vm6379_vm4, %v1902_v23  ;;  %v2766_v53 = vpop.permute.xlu0 %2765  ;;  %v3287_v30 = vsel %vm5051_vm12, %v3282_v41, %v3286_v0  ;;  %v1216_v37 = vrot.slane %v1215_v24, 4  ;;  %v1225_v38 = vrot.slane %v1223_v25, 4  ;;  %v1228_v16 = vrot.slane %v1226_v26, 5  ;;  %v1488_v3 = vld [vmem:[#allocation2 + $0x84] sm:$0xe]  ;;  %4856 = vmatmul.mubr.msk.bf16.gmra.mrb[4].mxu0 %vm3902_vm15, %v3869_v54 }
 0x101   : > { %2810 = vst.msk [vmem:[#allocation3 + $0x20] sm:$0xff] %vm2805_vm7, %v2766_v53  ;;  %v4700_v34 = vcombine.low %v3277_v11, %v3287_v30  ;;  %v1211_v36 = vsel %vm5051_vm12, %v1206_v51, %v1210_v18  ;;  %v3710_v42 = vsel %vm5042_vm11, %v3708_v20, %v3709_v52  ;;  %v1234_v7 = vrot.slane %v1232_v29, 5  ;;  %v229_v56 = vld [vmem:[#allocation2 + $0x90] sm:$0x1]  ;;  %v1489_v22 = vld [vmem:[#allocation2 + $0x88] sm:$0xf] }
 0x102   : > { %v1236_v49 = vshrl.u32 %v941_v15, 16  ;;  %v1221_v5 = vsel %vm5051_vm12, %v1216_v37, %v1220_v19  ;;  %v4732_v58 = vcombine.low %v3707_v46, %v3710_v42  ;;  %v1229_v57 = vor.u32 %v1228_v16, %v1225_v38  ;;  %v316_v28 = vld [vmem:[%s5038_s17 + $0x58] sm:$0xf]  ;;  %v1490_v6 = vld [vmem:[#allocation2 + $0x8c] sm:$0x1]  ;;  %v4935_v20 = vld [vmem:[#allocation2 + $0x84] sm:$0xff]  }
 0x103   : > { %3498 = vrot.lane.b32.xlu1 %v4700_v34, %s4975_s25  ;;  %v1242_v59 = vshll.u32 %v942_v35, 16  ;;  %v4573_v62 = vcombine.low %v1211_v36, %v1221_v5  ;;  %v4589_v32 = vrot.slane %v1485_v27, 9  ;;  %v1626_v0 = vrot.slane %v1486_v39, 5  ;;  %v317_v13 = vld [vmem:[%s5038_s17 + $0x5c] sm:$0xf]  ;;  %v4950_v24 = vld [vmem:[#allocation2 + $0x6c] sm:$0xff]  }
 0x104   : > { %v2944_v61 = vpop.permute.xlu0 %2943  ;;  %v1238_v63 = vrot.slane %v1236_v49, 4  ;;  %3819 = vrot.lane.b32.xlu0 %v4732_v58, %s4973_s23  ;;  %v1230_v60 = vrot.slane %v1229_v57, 4  ;;  %v1629_v45 = vrot.slane %v1487_v50, 5  ;;  %v4590_v40 = vrot.slane %v1488_v3, 9  ;;  %v1986_v33 = vld [vmem:[#allocation2 + $0x84] sm:$0xf] }
 0x105   : > { %2988 = vst.msk [vmem:[#allocation3 + $0x20] sm:$0xff] %vm6380_vm8, %v2944_v61  ;;  %v1244_v4 = vrot.slane %v1242_v59, 5  ;;  %v1627_v10 = vsel %vm5042_vm11, %v4589_v32, %v1626_v0  ;;  %v1628_v47 = vrot.slane %v1626_v0, 4  ;;  %v1633_v12 = vrot.slane %v1489_v22, 5  ;;  %v1987_v9 = vld [vmem:[#allocation2 + $0x88] sm:$0xf] }
 0x106   : > { %v1239_v8 = vor.u32 %v1238_v63, %v1234_v7  ;;  %vm6394_vm4 = vcmask 31744   ;;  %v1235_v14 = vsel %vm5051_vm12, %v1230_v60, %v1234_v7  ;;  %v1636_v15 = vrot.slane %v1490_v6, 5  ;;  %v1988_v52 = vld [vmem:[#allocation2 + $0x8c] sm:$0x1]  ;;  %v279_v23 = vld [vmem:[#allocation2 + $0x98] sm:$0x1] }
 0x107   : > { %899 = vst.msk [vmem:[#allocation3 + $0x40] sm:$0xff] %vm6394_vm4, %v4949_v44  ;;  %1410 = vrot.lane.b32.xlu1 %v4573_v62, %s4969_s19  ;;  %v230_v11 = vsel %vm5007_vm3, 0, %v229_v56  ;;  %v516_v18 = vshrl.u32 %v316_v28, 16  ;;  %v1630_v41 = vsel %vm5042_vm11, %v1628_v47, %v1629_v45  ;;  %v1634_v21 = vsel %vm5042_vm11, %v4590_v40, %v1633_v12  ;;  %900 = vst.msk [vmem:[#allocation3 + $0x48] sm:$0xff] %vm6394_vm4, %v4950_v24  ;;  %v2531_v37 = vld [vmem:[#allocation2 + $0x84] sm:$0xe] }
 0x108   : > { %v1240_v19 = vrot.slane %v1239_v8, 4  ;;  %v1635_v17 = vrot.slane %v1633_v12, 4  ;;  %231 = vst [vmem:[#allocation2 + $0x90] sm:$0x1] %v230_v11  ;;  %v4605_v25 = vcombine.low %v1627_v10, %v1630_v41  ;;  %v519_v29 = vshll.u32 %v316_v28, 16 }
 0x109   : > { %v518_v26 = vrot.slane %v516_v18, 7  ;;  %v524_v27 = vshrl.u32 %v317_v13, 16  ;;  %v527_v30 = vshll.u32 %v317_v13, 16  ;;  %v2245_v51 = vshrl.u32 %v1986_v33, 16  ;;  %v232_v38 = vld [vmem:[#allocation2 + $0x9c] sm:$0x1] }
 0x10a   : > { %v1245_v54 = vsel %vm5051_vm12, %v1240_v19, %v1244_v4  ;;  %v1637_v53 = vsel %vm5042_vm11, %v1635_v17, %v1636_v15  ;;  %1734 = vrot.lane.b32.xlu0 %v4605_v25, %s4968_s18  ;;  %v2248_v42 = vshll.u32 %v1986_v33, 16  ;;  %v2254_v7 = vshll.u32 %v1987_v9, 16  ;;  %v2532_v49 = vld [vmem:[#allocation2 + $0x88] sm:$0xf]  ;;  %v5795_v58 = vld [vmem:[%s5038_s17 + $0x60] sm:$0xf] }
 0x10b   : > { %v4574_v46 = vcombine.low %v1235_v14, %v1245_v54  ;;  %v521_v35 = vor.u32 %v519_v29, %v518_v26  ;;  %v522_v34 = vrot.slane %v518_v26, 4  ;;  %v5788_v39 = vrot.slane %v524_v27, 7  ;;  %v2533_v28 = vld [vmem:[#allocation2 + $0x8c] sm:$0x1]  ;;  %v319_v61 = vld [vmem:[%s5038_s17 + $0x64] sm:$0xf] }
 0x10c   : > { %v2447_v16 = vpop.permute.xlu1 %2446  ;;  %v2247_v36 = vrot.slane %v2245_v51, 4  ;;  %v4606_v50 = vcombine.low %v1634_v21, %v1637_v53  ;;  %v2258_v3 = vshrl.u32 %v1987_v9, 16  ;;  %v2264_v56 = vshll.u32 %v1988_v52, 16  ;;  %v282_v10 = vld [vmem:[#allocation2 + $0xa4] sm:$0x1]  ;;  %v4953_v53 = vld [vmem:[#allocation2 + $0x78] sm:$0xff]  }
 0x10d   : > { %2490 = vst.msk [vmem:[#allocation3 + $0x28] sm:$0xff] %vm2484_vm6, %v2447_v16  ;;  %1412 = vrot.lane.b32.xlu1 %v4574_v46, %s4969_s19  ;;  %v280_v5 = vsel %vm5014_vm5, 0, %v279_v23  ;;  %v529_v57 = vor.u32 %v527_v30, %v5788_v39  ;;  %v2250_v59 = vrot.slane %v2248_v42, 5  ;;  %v2256_v22 = vrot.slane %v2254_v7, 5  ;;  %v235_v14 = vld [vmem:[#allocation2 + $0xa8] sm:$0x1] }
 0x10e   : > { %281 = vst [vmem:[#allocation2 + $0x98] sm:$0x1] %v280_v5  ;;  %1911 = vrot.lane.b32.xlu0 %v4935_v20, %s4970_s20  ;;  %v2260_v63 = vrot.slane %v2258_v3, 4  ;;  %v2266_v32 = vrot.slane %v2264_v56, 5  ;;  %v4653_v0 = vrot.slane %v2531_v37, 9  ;;  %v2669_v6 = vrot.slane %v2532_v49, 5 }
 0x10f   : > { %v727_v62 = vld [vmem:[#allocation2 + $0x90] sm:$0xf]  ;;  %v3489_v60 = vpop.permute.xlu0 %3488  ;;  %v530_v4 = vsel %vm5067_vm14, %v522_v34, %v529_v57  ;;  %v2251_v40 = vor.u32 %v2250_v59, %v2247_v36  ;;  %v233_v8 = vsel %vm5007_vm3, 0, %v232_v38  ;;  %v2672_v13 = vrot.slane %v2533_v28, 5  ;;  %v5813_v19 = vld [vmem:[%s5038_s17 + $0x68] sm:$0xf] }
 0x110   : > { %v2768_v44 = vpop.permute.xlu1 %2767  ;;  %v728_v45 = vsel %vm5059_vm13, %v521_v35, %v727_v62  ;;  %3533 = vst.msk [vmem:[#allocation3 + $0x20] sm:$0xff] %vm3528_vm9, %v3489_v60  ;;  %v2261_v47 = vor.u32 %v2260_v63, %v2256_v22  ;;  %v2671_v12 = vrot.slane %v2669_v6, 4  ;;  %234 = vst [vmem:[#allocation2 + $0x9c] sm:$0x1] %v233_v8  ;;  %v533_v33 = vshrl.u32 %v5795_v58, 16  ;;  %v4954_v30 = vld [vmem:[#allocation2 + $0x84] sm:$0xff]  }
 0x111   : > { %2811 = vst.msk [vmem:[#allocation3 + $0x28] sm:$0xff] %vm2805_vm7, %v2768_v44  ;;  %1736 = vrot.lane.b32.xlu1 %v4606_v50, %s4968_s18  ;;  %729 = vst [vmem:[#allocation2 + $0x90] sm:$0xf] %v728_v45  ;;  %v531_v15 = vrot.slane %v5788_v39, 4  ;;  %v2252_v11 = vrot.slane %v2251_v40, 4  ;;  %v541_v18 = vshrl.u32 %v319_v61, 16  ;;  %v2670_v21 = vsel %vm5042_vm11, %v4653_v0, %v2669_v6 }
 0x112   : > { %730 = vst.msk [vmem:[#allocation2 + $0x94] sm:$0xf] %vm183_vm0, %v530_v4  ;;  %v544_v9 = vshll.u32 %v319_v61, 16  ;;  %v2262_v41 = vrot.slane %v2261_v47, 4  ;;  %v535_v17 = vrot.slane %v533_v33, 7  ;;  %v283_v52 = vsel %vm5014_vm5, 0, %v282_v10 }
 0x113   : > { %v5820_v24 = vld [vmem:[%s5038_s17 + $0x6c] sm:$0xf]  ;;  %v3810_v25 = vpop.permute.xlu0 %3809  ;;  %v2257_v26 = vsel %vm5051_vm12, %v2252_v11, %v2256_v22  ;;  %v536_v29 = vshll.u32 %v5795_v58, 16  ;;  %v5825_v27 = vrot.slane %v541_v18, 7  ;;  %284 = vst [vmem:[#allocation2 + $0xa4] sm:$0x1] %v283_v52  ;;  %v2673_v20 = vsel %vm5042_vm11, %v2671_v12, %v2672_v13 }
 0x114   : > { %v2946_v23 = vpop.permute.xlu1 %2945  ;;  %v236_v54 = vsel %vm5007_vm3, 0, %v235_v14  ;;  %3854 = vst.msk [vmem:[#allocation3 + $0x20] sm:$0xff] %vm3849_vm10, %v3810_v25  ;;  %v2267_v51 = vsel %vm5051_vm12, %v2262_v41, %v2266_v32  ;;  %v539_v35 = vrot.slane %v535_v17, 4  ;;  %v550_v34 = vshrl.u32 %v5813_v19, 16  ;;  %v285_v37 = vld [vmem:[#allocation2 + $0xb0] sm:$0x1] }
 0x115   : > { %2989 = vst.msk [vmem:[#allocation3 + $0x28] sm:$0xff] %vm6380_vm8, %v2946_v23  ;;  %v731_v46 = vld [vmem:[#allocation2 + $0x98] sm:$0x1]  ;;  %237 = vst [vmem:[#allocation2 + $0xa8] sm:$0x1] %v236_v54  ;;  %v4637_v38 = vcombine.low %v2257_v26, %v2267_v51  ;;  %v546_v39 = vor.u32 %v544_v9, %v5825_v27  ;;  %v548_v36 = vrot.slane %v5825_v27, 4  ;;  %v4669_v56 = vcombine.low %v2670_v21, %v2673_v20 }
 0x116   : > { %v732_v16 = vsel %vm5007_vm3, %v531_v15, %v731_v46  ;;  %901 = vst.msk [vmem:[#allocation3 + $0x50] sm:$0xff] %vm6394_vm4, %v4953_v53  ;;  %vm6395_vm8 = vmmov %vm6394_vm4  ;;  %v5842_v42 = vrot.slane %v550_v34, 7  ;;  %v553_v7 = vshll.u32 %v5813_v19, 16  ;;  %v558_v49 = vshrl.u32 %v5820_v24, 16 }
 0x117   : > { %902 = vst.msk [vmem:[#allocation3 + $0x58] sm:$0xff] %vm6395_vm8, %v4954_v30  ;;  %733 = vst [vmem:[#allocation2 + $0x98] sm:$0x1] %v732_v16  ;;  %2456 = vrot.lane.b32.xlu0 %v4637_v38, %s4974_s24  ;;  %v547_v5 = vsel %vm5067_vm14, %v539_v35, %v546_v39  ;;  %v286_v58 = vsel %vm5014_vm5, 0, %v285_v37  ;;  %v538_v28 = vor.u32 %v536_v29, %v535_v17  ;;  %v561_v60 = vshll.u32 %v5820_v24, 16 }
 0x118   : > { %v3491_v50 = vpop.permute.xlu1 %3490  ;;  %v1989_v57 = vld [vmem:[#allocation2 + $0x90] sm:$0xf]  ;;  %737 = vst.msk [vmem:[#allocation2 + $0xa0] sm:$0xf] %vm183_vm0, %v547_v5  ;;  %287 = vst [vmem:[#allocation2 + $0xb0] sm:$0x1] %v286_v58 }
 0x119   : > { %v4936_v3 = vld [vmem:[#allocation2 + $0x90] sm:$0xff]   ;;  %3534 = vst.msk [vmem:[#allocation3 + $0x28] sm:$0xff] %vm3528_vm9, %v3491_v50  ;;  %v2269_v61 = vshrl.u32 %v1989_v57, 16  ;;  %v2272_v62 = vshll.u32 %v1989_v57, 16  ;;  %v734_v14 = vld [vmem:[#allocation2 + $0x9c] sm:$0xf] }
 0x11a   : > { %v1990_v59 = vld [vmem:[#allocation2 + $0x94] sm:$0xf]  ;;  %v2534_v22 = vld [vmem:[#allocation2 + $0x90] sm:$0xe]  ;;  %1913 = vrot.lane.b32.xlu1 %v4936_v3, %s4970_s20  ;;  %v3812_v6 = vpop.permute.xlu0 %3811  ;;  %v735_v21 = vsel %vm5059_vm13, %v538_v28, %v734_v14  ;;  %v738_v16 = vld [vmem:[#allocation2 + $0xa4] sm:$0x1] }
 0x11b   : > { %v2278_v63 = vshll.u32 %v1990_v59, 16  ;;  %v2282_v32 = vshrl.u32 %v1990_v59, 16  ;;  %v2535_v0 = vld [vmem:[#allocation2 + $0x94] sm:$0xf]  ;;  %3855 = vst.msk [vmem:[#allocation3 + $0x28] sm:$0xff] %vm3849_vm10, %v3812_v6  ;;  %v2271_v45 = vrot.slane %v2269_v61, 4  ;;  %2777 = vrot.lane.b32.xlu0 %v4669_v56, %s4972_s22  ;;  %v739_v28 = vsel %vm5007_vm3, %v548_v36, %v738_v16 }
 0x11c   : > { %v2676_v44 = vrot.slane %v2535_v0, 5  ;;  %v1403_v4 = vpop.permute.xlu1 %1402  ;;  %v2274_v40 = vrot.slane %v2272_v62, 5  ;;  %v4939_v47 = vld [vmem:[#allocation2 + $0x90] sm:$0xff]   ;;  %v3870_v12 = vld [vmem:[#allocation3 + $0x20] sm:$0xff]  ;;  %v4654_v13 = vrot.slane %v2534_v22, 9  ;;  %vm6396_vm8 = vcmask 130144  }
 0x11d   : > { %v2280_v8 = vrot.slane %v2278_v63, 5  ;;  %v2284_v10 = vrot.slane %v2282_v32, 4  ;;  %1445 = vst.msk [vmem:[#allocation3 + $0x30] sm:$0xff] %vm1438_vm1, %v1403_v4  ;;  %v3030_v15 = vld [vmem:[#allocation2 + $0x90] sm:$0xf]  ;;  %4859 = vmatprep.mubr.msk.bf16.mxu0 %vm3902_vm15, %v3870_v12  ;;  %v556_v14 = vrot.slane %v5842_v42, 4 }
 0x11e   : > { %v2678_v33 = vrot.slane %v2676_v44, 4  ;;  %v1991_v11 = vld [vmem:[#allocation2 + $0x98] sm:$0x1]  ;;  %v2275_v18 = vor.u32 %v2274_v40, %v2271_v45  ;;  %v3031_v17 = vld [vmem:[#allocation2 + $0x94] sm:$0xf]  ;;  %v3289_v26 = vshrl.u32 %v3030_v15, 16  ;;  %v2677_v34 = vsel %vm5042_vm11, %v4654_v13, %v2676_v44 }
 0x11f   : > { %v2285_v9 = vor.u32 %v2284_v10, %v2280_v8  ;;  %v2536_v41 = vld [vmem:[#allocation2 + $0x98] sm:$0x1]  ;;  %v2288_v52 = vshll.u32 %v1991_v11, 16  ;;  %736 = vst [vmem:[#allocation2 + $0x9c] sm:$0xf] %v735_v21  ;;  %v3292_v29 = vshll.u32 %v3030_v15, 16  ;;  %2955 = vrot.lane.b32.xlu0 %v4939_v47, %s4971_s21 }
 0x120   : > { %v2679_v23 = vrot.slane %v2536_v41, 5  ;;  %v3032_v25 = vld [vmem:[#allocation2 + $0x98] sm:$0x1]  ;;  %v2276_v54 = vrot.slane %v2275_v18, 4  ;;  %v3298_v30 = vshll.u32 %v3031_v17, 16  ;;  %v3302_v51 = vshrl.u32 %v3031_v17, 16  ;;  %v1405_v46 = vpop.permute.xlu1 %1404  ;;  %v1727_v20 = vpop.permute.xlu0 %1726 }
 0x121   : > { %v2286_v53 = vrot.slane %v2285_v9, 4  ;;  %v2290_v35 = vrot.slane %v2288_v52, 5  ;;  %v3291_v37 = vrot.slane %v3289_v26, 4  ;;  %v3294_v38 = vrot.slane %v3292_v29, 5  ;;  %1446 = vst.msk [vmem:[#allocation3 + $0x38] sm:$0xff] %vm1438_vm1, %v1405_v46 }
 0x122   : > { %1769 = vst.msk [vmem:[#allocation3 + $0x30] sm:$0xff] %vm6381_vm2, %v1727_v20  ;;  %v2281_v39 = vsel %vm5051_vm12, %v2276_v54, %v2280_v8  ;;  %v2680_v50 = vsel %vm5042_vm11, %v2678_v33, %v2679_v23  ;;  %v3300_v3 = vrot.slane %v3298_v30, 5  ;;  %v3304_v56 = vrot.slane %v3302_v51, 4  ;;  %v3034_v5 = vld [vmem:[#allocation2 + $0xa0] sm:$0xf] }
 0x123   : > { %v3575_v58 = vld [vmem:[#allocation2 + $0x90] sm:$0xe]  ;;  %v2291_v57 = vsel %vm5051_vm12, %v2286_v53, %v2290_v35  ;;  %v3295_v59 = vor.u32 %v3294_v38, %v3291_v37  ;;  %v3308_v22 = vshll.u32 %v3032_v25, 16  ;;  %v3576_v61 = vld [vmem:[#allocation2 + $0x94] sm:$0xf]  ;;  %v3871_v62 = vld [vmem:[#allocation3 + $0x28] sm:$0xff]  ;;  %v4670_v36 = vcombine.low %v2677_v34, %v2680_v50 }
 0x124   : > { %v4638_v63 = vcombine.low %v2281_v39, %v2291_v57  ;;  %v3305_v32 = vor.u32 %v3304_v56, %v3300_v3  ;;  %740 = vst [vmem:[#allocation2 + $0xa4] sm:$0x1] %v739_v28  ;;  %v3322_v0 = vshll.u32 %v3034_v5, 16  ;;  %v3326_v6 = vshrl.u32 %v3034_v5, 16  ;;  %v3577_v44 = vld [vmem:[#allocation2 + $0x98] sm:$0x1]  ;;  %v1729_v4 = vpop.permute.xlu1 %1728  ;;  %v1904_v45 = vpop.permute.xlu0 %1903  ;;  %4860 = vmatmul.mubr.msk.bf16.gmra.mrb[8].mxu0 %vm3902_vm15, %v3871_v62 }
 0x125   : > { %v3296_v40 = vrot.slane %v3295_v59, 4  ;;  %v3310_v8 = vrot.slane %v3308_v22, 5  ;;  %v4717_v10 = vrot.slane %v3575_v58, 9  ;;  %v3713_v47 = vrot.slane %v3576_v61, 5  ;;  %v943_v27 = vld [vmem:[#allocation2 + $0x90] sm:$0xf] }
 0x126   : > { %1770 = vst.msk [vmem:[#allocation3 + $0x38] sm:$0xff] %vm6381_vm2, %v1729_v4  ;;  %2458 = vrot.lane.b32.xlu1 %v4638_v63, %s4974_s24  ;;  %v3306_v12 = vrot.slane %v3305_v32, 4  ;;  %v3033_v13 = vld [vmem:[#allocation2 + $0x9c] sm:$0xf]  ;;  %v5883_v33 = vor.u32 %v553_v7, %v5842_v42  ;;  %v5888_v9 = vrot.slane %v3322_v0, 5  ;;  %v3328_v17 = vrot.slane %v3326_v6, 4  ;;  %vm6397_vm2 = vmmov %vm6394_vm4 }
 0x127   : > { %1946 = vst.msk [vmem:[#allocation3 + $0x30] sm:$0xff] %vm6396_vm8, %v1904_v45  ;;  %v3301_v15 = vsel %vm5051_vm12, %v3296_v40, %v3300_v3  ;;  %v3313_v11 = vshrl.u32 %v3033_v13, 16  ;;  %v3316_v18 = vshll.u32 %v3033_v13, 16  ;;  %v944_v41 = vld [vmem:[#allocation2 + $0x94] sm:$0xf]  ;;  %v3714_v52 = vsel %vm5042_vm11, %v4717_v10, %v3713_v47  ;;  %v4940_v23 = vld [vmem:[#allocation2 + $0x9c] sm:$0xff]  }
 0x128   : > { %v3311_v21 = vsel %vm5051_vm12, %v3306_v12, %v3310_v8  ;;  %v3715_v19 = vrot.slane %v3713_v47, 4  ;;  %v945_v7 = vld [vmem:[#allocation2 + $0x98] sm:$0x1]  ;;  %v3716_v54 = vrot.slane %v3577_v44, 5  ;;  %v4955_v53 = vld [vmem:[#allocation2 + $0x90] sm:$0xff]   ;;  %v3329_v30 = vor.u32 %v3328_v17, %v5888_v9  ;;  %v4956_v34 = vld [vmem:[#allocation2 + $0x9c] sm:$0xff]  }
 0x129   : > { %v4701_v25 = vcombine.low %v3301_v15, %v3311_v21  ;;  %v3315_v26 = vrot.slane %v3313_v11, 4  ;;  %v3318_v29 = vrot.slane %v3316_v18, 5  ;;  %v1247_v51 = vshrl.u32 %v943_v27, 16  ;;  %v3578_v35 = vld [vmem:[#allocation2 + $0x9c] sm:$0xe]  ;;  %903 = vst.msk [vmem:[#allocation3 + $0x60] sm:$0xff] %vm6394_vm4, %v4955_v53 }
 0x12a   : > { %2779 = vrot.lane.b32.xlu1 %v4670_v36, %s4972_s22  ;;  %v1250_v46 = vshll.u32 %v943_v27, 16  ;;  %v1256_v20 = vshll.u32 %v944_v41, 16  ;;  %v3717_v16 = vsel %vm5042_vm11, %v3715_v19, %v3716_v54  ;;  %v1260_v39 = vshrl.u32 %v944_v41, 16  ;;  %v3579_v3 = vld [vmem:[#allocation2 + $0xa0] sm:$0xf]  ;;  %v1906_v56 = vpop.permute.xlu1 %1905  ;;  %904 = vst.msk [vmem:[#allocation3 + $0x68] sm:$0xff] %vm6397_vm2, %v4956_v34 }
 0x12b   : > { %3500 = vrot.lane.b32.xlu0 %v4701_v25, %s4975_s25  ;;  %v3035_v37 = vld [vmem:[#allocation2 + $0xa4] sm:$0x1]  ;;  %v3319_v38 = vor.u32 %v3318_v29, %v3315_v26  ;;  %v1266_v50 = vshll.u32 %v945_v7, 16  ;;  %v2449_v5 = vpop.permute.xlu0 %2448  ;;  %v3330_v58 = vrot.slane %v3329_v30, 4  ;;  %v4733_v59 = vcombine.low %v3714_v52, %v3717_v16  ;;  %1947 = vst.msk [vmem:[#allocation3 + $0x38] sm:$0xff] %vm6396_vm8, %v1906_v56 }
 0x12c   : > { %v3332_v57 = vshll.u32 %v3035_v37, 16  ;;  %v1249_v22 = vrot.slane %v1247_v51, 4  ;;  %v3580_v28 = vld [vmem:[#allocation2 + $0xa4] sm:$0x1]  ;;  %2491 = vst.msk [vmem:[#allocation3 + $0x30] sm:$0xff] %vm2484_vm6, %v2449_v5  ;;  %v1252_v62 = vrot.slane %v1250_v46, 5 }
 0x12d   : > { %v3320_v61 = vrot.slane %v3319_v38, 4  ;;  %v1258_v63 = vrot.slane %v1256_v20, 5  ;;  %v1262_v32 = vrot.slane %v1260_v39, 4  ;;  %v946_v0 = vld [vmem:[#allocation2 + $0x9c] sm:$0xf]  ;;  %v1268_v44 = vrot.slane %v1266_v50, 5 }
 0x12e   : > { %2957 = vrot.lane.b32.xlu1 %v4940_v23, %s4971_s21  ;;  %v3334_v6 = vrot.slane %v3332_v57, 5  ;;  %v4718_v4 = vrot.slane %v3578_v35, 9  ;;  %v3720_v45 = vrot.slane %v3579_v3, 5  ;;  %v1253_v8 = vor.u32 %v1252_v62, %v1249_v22  ;;  %v947_v27 = vld [vmem:[#allocation2 + $0xa0] sm:$0xf] }
 0x12f   : > { %v3325_v40 = vsel %vm5051_vm12, %v3320_v61, %v5888_v9  ;;  %3821 = vrot.lane.b32.xlu0 %v4733_v59, %s4973_s23  ;;  %v1263_v10 = vor.u32 %v1262_v32, %v1258_v63  ;;  %v3723_v47 = vrot.slane %v3580_v28, 5  ;;  %v948_v36 = vld [vmem:[#allocation2 + $0xa4] sm:$0x1]  ;;  %v2770_v12 = vpop.permute.xlu0 %2769  ;;  %v1271_v18 = vshrl.u32 %v946_v0, 16  ;;  %v1491_v41 = vld [vmem:[#allocation2 + $0x90] sm:$0xe] }
 0x130   : > { %v3335_v13 = vsel %vm5051_vm12, %v3330_v58, %v3334_v6  ;;  %v3721_v15 = vsel %vm5042_vm11, %v4718_v4, %v3720_v45  ;;  %v3722_v11 = vrot.slane %v3720_v45, 4  ;;  %v1492_v21 = vld [vmem:[#allocation2 + $0x94] sm:$0xf]  ;;  %2812 = vst.msk [vmem:[#allocation3 + $0x30] sm:$0xff] %vm2805_vm7, %v2770_v12  ;;  %v1254_v17 = vrot.slane %v1253_v8, 4 }
 0x131   : > { %v4702_v9 = vcombine.low %v3325_v40, %v3335_v13  ;;  %v1264_v52 = vrot.slane %v1263_v10, 4  ;;  %v1274_v19 = vshll.u32 %v946_v0, 16  ;;  %v1273_v23 = vrot.slane %v1271_v18, 4  ;;  %v1493_v29 = vld [vmem:[#allocation2 + $0x98] sm:$0x1] }
 0x132   : > { %v3724_v7 = vsel %vm5042_vm11, %v3722_v11, %v3723_v47  ;;  %v1280_v25 = vshll.u32 %v947_v27, 16  ;;  %v1284_v26 = vshrl.u32 %v947_v27, 16  ;;  %v1259_v54 = vsel %vm5051_vm12, %v1254_v17, %v1258_v63  ;;  %v1494_v46 = vld [vmem:[#allocation2 + $0x9c] sm:$0xe]  ;;  %v1495_v20 = vld [vmem:[#allocation2 + $0xa0] sm:$0xf] }
 0x133   : > { %3502 = vrot.lane.b32.xlu1 %v4702_v9, %s4975_s25  ;;  %v1269_v53 = vsel %vm5051_vm12, %v1264_v52, %v1268_v44  ;;  %v4734_v30 = vcombine.low %v3721_v15, %v3724_v7  ;;  %v1276_v51 = vrot.slane %v1274_v19, 5  ;;  %v2948_v35 = vpop.permute.xlu0 %2947  ;;  %v1290_v16 = vshll.u32 %v948_v36, 16  ;;  %v1496_v39 = vld [vmem:[#allocation2 + $0xa4] sm:$0x1]  ;;  %v741_v58 = vld [vmem:[#allocation2 + $0xa8] sm:$0xf] }
 0x134   : > { %v4575_v34 = vcombine.low %v1259_v54, %v1269_v53  ;;  %v1282_v37 = vrot.slane %v1280_v25, 5  ;;  %v1286_v38 = vrot.slane %v1284_v26, 4  ;;  %vm6398_vm2 = vcmask 228544   ;;  %v1992_v61 = vld [vmem:[#allocation2 + $0x9c] sm:$0xf] }
 0x135   : > { %2990 = vst.msk [vmem:[#allocation3 + $0x30] sm:$0xff] %vm6398_vm2, %v2948_v35  ;;  %3823 = vrot.lane.b32.xlu0 %v4734_v30, %s4973_s23  ;;  %v1277_v50 = vor.u32 %v1276_v51, %v1273_v23  ;;  %v4591_v3 = vrot.slane %v1491_v41, 9  ;;  %v1640_v56 = vrot.slane %v1492_v21, 5  ;;  %v1643_v5 = vrot.slane %v1493_v29, 5  ;;  %v1993_v6 = vld [vmem:[#allocation2 + $0xa0] sm:$0xf]  ;;  %vm6399_vm4 = vmmov %vm6398_vm2 }
 0x136   : > { %v1287_v57 = vor.u32 %v1286_v38, %v1282_v37  ;;  %v1292_v59 = vrot.slane %v1290_v16, 5  ;;  %v4592_v22 = vrot.slane %v1494_v46, 9  ;;  %v1647_v28 = vrot.slane %v1495_v20, 5  ;;  %v1994_v8 = vld [vmem:[#allocation2 + $0xa4] sm:$0x1]  ;;  %v4941_v7 = vld [vmem:[#allocation2 + $0x9c] sm:$0xff]  }
 0x137   : > { %1414 = vrot.lane.b32.xlu1 %v4575_v34, %s4969_s19  ;;  %v1278_v62 = vrot.slane %v1277_v50, 4  ;;  %v1641_v63 = vsel %vm5042_vm11, %v4591_v3, %v1640_v56  ;;  %v1642_v32 = vrot.slane %v1640_v56, 4  ;;  %v1650_v0 = vrot.slane %v1496_v39, 5  ;;  %v745_v10 = vld [vmem:[#allocation2 + $0xb0] sm:$0x1] }
 0x138   : > { %v1288_v44 = vrot.slane %v1287_v57, 4  ;;  %v1648_v4 = vsel %vm5042_vm11, %v4592_v22, %v1647_v28  ;;  %v1649_v45 = vrot.slane %v1647_v28, 4  ;;  %v560_v40 = vrot.slane %v558_v49, 7  ;;  %v2537_v47 = vld [vmem:[#allocation2 + $0x9c] sm:$0xe] }
 0x139   : > { %v1283_v27 = vsel %vm5051_vm12, %v1278_v62, %v1282_v37  ;;  %v1644_v36 = vsel %vm5042_vm11, %v1642_v32, %v1643_v5  ;;  %v742_v12 = vsel %vm5059_vm13, %v5883_v33, %v741_v58  ;;  %v2293_v13 = vshrl.u32 %v1992_v61, 16  ;;  %v2451_v15 = vpop.permute.xlu1 %2450  ;;  %v2538_v21 = vld [vmem:[#allocation2 + $0xa0] sm:$0xf]  ;;  %v238_v19 = vld [vmem:[#allocation2 + $0xb4] sm:$0x1] }
 0x13a   : > { %v1293_v11 = vsel %vm5051_vm12, %v1288_v44, %v1292_v59  ;;  %v4607_v18 = vcombine.low %v1641_v63, %v1644_v36  ;;  %v1651_v49 = vsel %vm5042_vm11, %v1649_v45, %v1650_v0  ;;  %v563_v41 = vor.u32 %v561_v60, %v560_v40  ;;  %743 = vst [vmem:[#allocation2 + $0xa8] sm:$0xf] %v742_v12  ;;  %v2539_v26 = vld [vmem:[#allocation2 + $0xa4] sm:$0x1]  ;;  %v322_v46 = vld [vmem:[%s5038_s17 + $0x70] sm:$0xf] }
 0x13b   : > { %2492 = vst.msk [vmem:[#allocation3 + $0x38] sm:$0xff] %vm2484_vm6, %v2451_v15  ;;  %v4576_v9 = vcombine.low %v1283_v27, %v1293_v11  ;;  %v4608_v17 = vcombine.low %v1648_v4, %v1651_v49  ;;  %v565_v52 = vrot.slane %v560_v40, 4  ;;  %v2295_v33 = vrot.slane %v2293_v13, 4  ;;  %v3493_v29 = vpop.permute.xlu0 %3492  ;;  %v323_v3 = vld [vmem:[%s5038_s17 + $0x74] sm:$0xf] }
 0x13c   : > { %1738 = vrot.lane.b32.xlu0 %v4607_v18, %s4968_s18  ;;  %v564_v23 = vsel %vm5067_vm14, %v556_v14, %v563_v41  ;;  %v2296_v24 = vshll.u32 %v1992_v61, 16  ;;  %v2302_v60 = vshll.u32 %v1993_v6, 16  ;;  %v2306_v25 = vshrl.u32 %v1993_v6, 16  ;;  %3535 = vst.msk [vmem:[#allocation3 + $0x30] sm:$0xff] %vm3528_vm9, %v3493_v29 }
 0x13d   : > { %1416 = vrot.lane.b32.xlu1 %v4576_v9, %s4969_s19  ;;  %744 = vst.msk [vmem:[#allocation2 + $0xac] sm:$0xf] %vm183_vm0, %v564_v23  ;;  %v2312_v54 = vshll.u32 %v1994_v8, 16  ;;  %v746_v53 = vsel %vm5007_vm3, %v565_v52, %v745_v10  ;;  %v4655_v30 = vrot.slane %v2537_v47, 9  ;;  %v2683_v51 = vrot.slane %v2538_v21, 5  ;;  %v2772_v42 = vpop.permute.xlu1 %2771 }
 0x13e   : > { %v2298_v14 = vrot.slane %v2296_v24, 5  ;;  %v2304_v20 = vrot.slane %v2302_v60, 5  ;;  %v2308_v35 = vrot.slane %v2306_v25, 4  ;;  %747 = vst [vmem:[#allocation2 + $0xb0] sm:$0x1] %v746_v53  ;;  %2813 = vst.msk [vmem:[#allocation3 + $0x38] sm:$0xff] %vm2805_vm7, %v2772_v42 }
 0x13f   : > { %v2314_v34 = vrot.slane %v2312_v54, 5  ;;  %v2685_v37 = vrot.slane %v2683_v51, 4  ;;  %v2686_v38 = vrot.slane %v2539_v26, 5  ;;  %v239_v16 = vsel %vm5007_vm3, 0, %v238_v19  ;;  %v3814_v58 = vpop.permute.xlu0 %3813 }
 0x140   : > { %1915 = vrot.lane.b32.xlu0 %v4941_v7, %s4970_s20  ;;  %v2299_v39 = vor.u32 %v2298_v14, %v2295_v33  ;;  %v2309_v50 = vor.u32 %v2308_v35, %v2304_v20  ;;  %240 = vst [vmem:[#allocation2 + $0xb4] sm:$0x1] %v239_v16  ;;  %v567_v56 = vshrl.u32 %v322_v46, 16  ;;  %v570_v5 = vshll.u32 %v322_v46, 16  ;;  %3856 = vst.msk [vmem:[#allocation3 + $0x30] sm:$0xff] %vm3849_vm10, %v3814_v58 }
 0x141   : > { %1740 = vrot.lane.b32.xlu1 %v4608_v17, %s4968_s18  ;;  %v1995_v57 = vld [vmem:[#allocation2 + $0xa8] sm:$0xf]  ;;  %v2684_v59 = vsel %vm5042_vm11, %v4655_v30, %v2683_v51  ;;  %v2950_v28 = vpop.permute.xlu1 %2949  ;;  %v2687_v0 = vsel %vm5042_vm11, %v2685_v37, %v2686_v38  ;;  %v575_v4 = vshrl.u32 %v323_v3, 16  ;;  %v578_v26 = vshll.u32 %v323_v3, 16  ;;  %v288_v38 = vld [vmem:[#allocation2 + $0xbc] sm:$0x1] }
 0x142   : > { %v2540_v22 = vld [vmem:[#allocation2 + $0xa8] sm:$0xe]  ;;  %v2300_v61 = vrot.slane %v2299_v39, 4  ;;  %v2310_v62 = vrot.slane %v2309_v50, 4  ;;  %v2317_v63 = vshrl.u32 %v1995_v57, 16  ;;  %v2320_v32 = vshll.u32 %v1995_v57, 16 }
 0x143   : > { %2991 = vst.msk [vmem:[#allocation3 + $0x38] sm:$0xff] %vm6399_vm4, %v2950_v28  ;;  %v4656_v6 = vrot.slane %v2540_v22, 9  ;;  %v569_v44 = vrot.slane %v567_v56, 7  ;;  %v3036_v11 = vld [vmem:[#allocation2 + $0xa8] sm:$0xf]  ;;  %v4671_v49 = vcombine.low %v2684_v59, %v2687_v0  ;;  %v5972_v25 = vrot.slane %v575_v4, 7 }
 0x144   : > { %v4942_v45 = vld [vmem:[#allocation2 + $0xa8] sm:$0xff]   ;;  %v2305_v40 = vsel %vm5051_vm12, %v2300_v61, %v2304_v20  ;;  %v2315_v8 = vsel %vm5051_vm12, %v2310_v62, %v2314_v34  ;;  %v2319_v47 = vrot.slane %v2317_v63, 4  ;;  %v2322_v12 = vrot.slane %v2320_v32, 5 }
 0x145   : > { %v1996_v10 = vld [vmem:[#allocation2 + $0xac] sm:$0xf]  ;;  %v4639_v27 = vcombine.low %v2305_v40, %v2315_v8  ;;  %v1997_v36 = vld [vmem:[#allocation2 + $0xb0] sm:$0x1]  ;;  %1917 = vrot.lane.b32.xlu1 %v4942_v45, %s4970_s20  ;;  %v572_v9 = vor.u32 %v570_v5, %v569_v44  ;;  %v573_v17 = vrot.slane %v569_v44, 4  ;;  %v580_v14 = vor.u32 %v578_v26, %v5972_v25 }
 0x146   : > { %v2326_v13 = vshll.u32 %v1996_v10, 16  ;;  %v2330_v15 = vshrl.u32 %v1996_v10, 16  ;;  %v2336_v18 = vshll.u32 %v1997_v36, 16  ;;  %v2541_v41 = vld [vmem:[#allocation2 + $0xac] sm:$0xf]  ;;  %v2323_v52 = vor.u32 %v2322_v12, %v2319_v47 }
 0x147   : > { %v2542_v21 = vld [vmem:[#allocation2 + $0xb0] sm:$0x1]  ;;  %2460 = vrot.lane.b32.xlu0 %v4639_v27, %s4974_s24  ;;  %v2690_v7 = vrot.slane %v2541_v41, 5  ;;  %v3816_v23 = vpop.permute.xlu0 %3815  ;;  %v748_v29 = vld [vmem:[#allocation2 + $0xb4] sm:$0xf]  ;;  %v582_v20 = vrot.slane %v5972_v25, 4  ;;  %v581_v58 = vsel %vm5067_vm14, %v573_v17, %v580_v14 }
 0x148   : > { %v2328_v33 = vrot.slane %v2326_v13, 5  ;;  %v2332_v19 = vrot.slane %v2330_v15, 4  ;;  %v2338_v24 = vrot.slane %v2336_v18, 5  ;;  %v2693_v60 = vrot.slane %v2542_v21, 5  ;;  %v3037_v46 = vld [vmem:[#allocation2 + $0xac] sm:$0xf]  ;;  %v3495_v42 = vpop.permute.xlu1 %3494 }
 0x149   : > { %v2324_v54 = vrot.slane %v2323_v52, 4  ;;  %v5976_v30 = vsel %vm5042_vm11, %v4656_v6, %v2690_v7  ;;  %v2692_v51 = vrot.slane %v2690_v7, 4  ;;  %v749_v35 = vsel %vm5059_vm13, %v572_v9, %v748_v29  ;;  %v3038_v34 = vld [vmem:[#allocation2 + $0xb0] sm:$0x1]  ;;  %3536 = vst.msk [vmem:[#allocation3 + $0x38] sm:$0xff] %vm3528_vm9, %v3495_v42  ;;  %v4945_v3 = vld [vmem:[#allocation2 + $0xa8] sm:$0xff]  }
 0x14a   : > { %v2333_v53 = vor.u32 %v2332_v19, %v2328_v33  ;;  %v3337_v37 = vshrl.u32 %v3036_v11, 16  ;;  %750 = vst [vmem:[#allocation2 + $0xb4] sm:$0xf] %v749_v35  ;;  %v3340_v56 = vshll.u32 %v3036_v11, 16  ;;  %v3581_v5 = vld [vmem:[#allocation2 + $0xa8] sm:$0xe] }
 0x14b   : > { %v2329_v16 = vsel %vm5051_vm12, %v2324_v54, %v2328_v33  ;;  %2781 = vrot.lane.b32.xlu0 %v4671_v49, %s4972_s22  ;;  %v2694_v50 = vsel %vm5042_vm11, %v2692_v51, %v2693_v60  ;;  %3857 = vst.msk [vmem:[#allocation3 + $0x38] sm:$0xff] %vm3849_vm10, %v3816_v23  ;;  %v3346_v59 = vshll.u32 %v3037_v46, 16  ;;  %v3582_v22 = vld [vmem:[#allocation2 + $0xac] sm:$0xf]  ;;  %v3583_v28 = vld [vmem:[#allocation2 + $0xb0] sm:$0x1] }
 0x14c   : > { %v2334_v39 = vrot.slane %v2333_v53, 4  ;;  %v3339_v57 = vrot.slane %v3337_v37, 4  ;;  %751 = vst.msk [vmem:[#allocation2 + $0xb8] sm:$0xf] %vm183_vm0, %v581_v58  ;;  %v3342_v62 = vrot.slane %v3340_v56, 5  ;;  %v3350_v63 = vshrl.u32 %v3037_v46, 16  ;;  %v1407_v6 = vpop.permute.xlu1 %1406  ;;  %v1731_v44 = vpop.permute.xlu0 %1730 }
 0x14d   : > { %v3356_v32 = vshll.u32 %v3038_v34, 16  ;;  %v949_v0 = vld [vmem:[#allocation2 + $0xa8] sm:$0xf]  ;;  %v4672_v40 = vcombine.low %v5976_v30, %v2694_v50  ;;  %v3348_v8 = vrot.slane %v3346_v59, 5  ;;  %v289_v10 = vsel %vm5014_vm5, 0, %v288_v38  ;;  %1447 = vst.msk [vmem:[#allocation3 + $0x40] sm:$0xff] %vm1438_vm1, %v1407_v6 }
 0x14e   : > { %v2339_v61 = vsel %vm5051_vm12, %v2334_v39, %v2338_v24  ;;  %v3872_v4 = vld [vmem:[#allocation3 + $0x30] sm:$0xff]  ;;  %v3343_v27 = vor.u32 %v3342_v62, %v3339_v57  ;;  %v3352_v36 = vrot.slane %v3350_v63, 4  ;;  %290 = vst [vmem:[#allocation2 + $0xbc] sm:$0x1] %v289_v10  ;;  %v4719_v12 = vrot.slane %v3581_v5, 9 }
 0x14f   : > { %v4640_v45 = vcombine.low %v2329_v16, %v2339_v61  ;;  %v5997_v47 = vld [vmem:[#allocation2 + $0xac] sm:$0xf]  ;;  %4863 = vmatprep.mubr.msk.bf16.mxu0 %vm3902_vm15, %v3872_v4  ;;  %2959 = vrot.lane.b32.xlu0 %v4945_v3, %s4971_s21  ;;  %v3727_v13 = vrot.slane %v3582_v22, 5  ;;  %vm6400_vm8 = vcmask 97344   ;;  %v3358_v15 = vrot.slane %v3356_v32, 5 }
 0x150   : > { %1771 = vst.msk [vmem:[#allocation3 + $0x40] sm:$0xff] %vm6400_vm8, %v1731_v44  ;;  %v3730_v11 = vrot.slane %v3583_v28, 5  ;;  %v1295_v18 = vshrl.u32 %v949_v0, 16  ;;  %v1298_v49 = vshll.u32 %v949_v0, 16  ;;  %v3344_v41 = vrot.slane %v3343_v27, 4  ;;  %v1409_v52 = vpop.permute.xlu1 %1408  ;;  %v1908_v33 = vpop.permute.xlu0 %1907  ;;  %vm6402_vm4 = vmmov %vm6400_vm8 }
 0x151   : > { %2462 = vrot.lane.b32.xlu1 %v4640_v45, %s4974_s24  ;;  %v3353_v21 = vor.u32 %v3352_v36, %v3348_v8  ;;  %v3729_v9 = vrot.slane %v3727_v13, 4  ;;  %v1304_v17 = vshll.u32 %v5997_v47, 16  ;;  %v3039_v19 = vld [vmem:[#allocation2 + $0xb4] sm:$0xf]  ;;  %1448 = vst.msk [vmem:[#allocation3 + $0x48] sm:$0xff] %vm1438_vm1, %v1409_v52  ;;  %vm6401_vm2 = vcmask 130144  }
 0x152   : > { %v1297_v7 = vrot.slane %v1295_v18, 4  ;;  %v1300_v23 = vrot.slane %v1298_v49, 5  ;;  %1948 = vst.msk [vmem:[#allocation3 + $0x40] sm:$0xff] %vm6401_vm2, %v1908_v33  ;;  %v3349_v24 = vsel %vm5051_vm12, %v3344_v41, %v3348_v8  ;;  %v3361_v26 = vshrl.u32 %v3039_v19, 16  ;;  %v951_v54 = vld [vmem:[#allocation2 + $0xb0] sm:$0x1] }
 0x153   : > { %v3354_v60 = vrot.slane %v3353_v21, 4  ;;  %v3364_v29 = vshll.u32 %v3039_v19, 16  ;;  %v3873_v53 = vld [vmem:[#allocation3 + $0x38] sm:$0xff]  ;;  %v3040_v51 = vld [vmem:[#allocation2 + $0xb8] sm:$0xf]  ;;  %v3728_v46 = vsel %vm5042_vm11, %v4719_v12, %v3727_v13  ;;  %v3731_v42 = vsel %vm5042_vm11, %v3729_v9, %v3730_v11 }
 0x154   : > { %v4946_v30 = vld [vmem:[#allocation2 + $0xb4] sm:$0xff]   ;;  %4864 = vmatmul.mubr.msk.bf16.gmra.mrb[12].mxu0 %vm3902_vm15, %v3873_v53  ;;  %v3363_v35 = vrot.slane %v3361_v26, 4  ;;  %v3370_v37 = vshll.u32 %v3040_v51, 16  ;;  %v1733_v16 = vpop.permute.xlu1 %1732  ;;  %v3374_v3 = vshrl.u32 %v3040_v51, 16  ;;  %v1301_v56 = vor.u32 %v1300_v23, %v1297_v7  ;;  %v1497_v0 = vld [vmem:[#allocation2 + $0xa8] sm:$0xe] }
 0x155   : > { %2783 = vrot.lane.b32.xlu1 %v4672_v40, %s4972_s22  ;;  %v3359_v14 = vsel %vm5051_vm12, %v3354_v60, %v3358_v15  ;;  %v3366_v34 = vrot.slane %v3364_v29, 5  ;;  %v6017_v38 = vld [vmem:[#allocation2 + $0xb8] sm:$0xf]  ;;  %v752_v50 = vld [vmem:[#allocation2 + $0xbc] sm:$0x1]  ;;  %1772 = vst.msk [vmem:[#allocation3 + $0x48] sm:$0xff] %vm6402_vm4, %v1733_v16  ;;  %v4735_v63 = vcombine.low %v3728_v46, %v3731_v42 }
 0x156   : > { %v4703_v39 = vcombine.low %v3349_v24, %v3359_v14  ;;  %v952_v5 = vld [vmem:[#allocation2 + $0xb4] sm:$0xf]  ;;  %v753_v58 = vsel %vm5007_vm3, %v582_v20, %v752_v50  ;;  %v6024_v59 = vrot.slane %v1304_v17, 5  ;;  %v1308_v22 = vshrl.u32 %v5997_v47, 16  ;;  %v953_v28 = vld [vmem:[#allocation2 + $0xb8] sm:$0xf] }
 0x157   : > { %v3367_v57 = vor.u32 %v3366_v34, %v3363_v35  ;;  %754 = vst [vmem:[#allocation2 + $0xbc] sm:$0x1] %v753_v58  ;;  %v6029_v61 = vrot.slane %v3370_v37, 5  ;;  %v3376_v62 = vrot.slane %v3374_v3, 4  ;;  %v1314_v32 = vshll.u32 %v951_v54, 16  ;;  %v4957_v47 = vld [vmem:[#allocation2 + $0xa8] sm:$0xff]  }
 0x158   : > { %3504 = vrot.lane.b32.xlu0 %v4703_v39, %s4975_s25  ;;  %v3584_v25 = vld [vmem:[#allocation2 + $0xb4] sm:$0xe]  ;;  %v1498_v6 = vld [vmem:[#allocation2 + $0xac] sm:$0xf]  ;;  %v1310_v20 = vrot.slane %v1308_v22, 4  ;;  %v3734_v44 = vrot.slane %v6017_v38, 5 }
 0x159   : > { %2961 = vrot.lane.b32.xlu1 %v4946_v30, %s4971_s21  ;;  %v1319_v4 = vshrl.u32 %v952_v5, 16  ;;  %v1499_v45 = vld [vmem:[#allocation2 + $0xb0] sm:$0x1]  ;;  %v1302_v40 = vrot.slane %v1301_v56, 4  ;;  %v1322_v8 = vshll.u32 %v952_v5, 16  ;;  %v1328_v10 = vshll.u32 %v953_v28, 16  ;;  %v2453_v11 = vpop.permute.xlu0 %2452 }
 0x15a   : > { %v6032_v27 = vrot.slane %v3367_v57, 4  ;;  %v1311_v36 = vor.u32 %v1310_v20, %v6024_v59  ;;  %v1316_v12 = vrot.slane %v1314_v32, 5  ;;  %v4720_v13 = vrot.slane %v3584_v25, 9  ;;  %v6035_v15 = vld [vmem:[#allocation2 + $0xb8] sm:$0xf]  ;;  %2493 = vst.msk [vmem:[#allocation3 + $0x40] sm:$0xff] %vm2484_vm6, %v2453_v11 }
 0x15b   : > { %v3377_v18 = vor.u32 %v3376_v62, %v6029_v61  ;;  %v3736_v49 = vrot.slane %v3734_v44, 4  ;;  %v1321_v41 = vrot.slane %v1319_v4, 4  ;;  %v1324_v21 = vrot.slane %v1322_v8, 5  ;;  %v1910_v9 = vpop.permute.xlu1 %1909  ;;  %v1500_v7 = vld [vmem:[#allocation2 + $0xb4] sm:$0xe] }
 0x15c   : > { %3825 = vrot.lane.b32.xlu0 %v4735_v63, %s4973_s23  ;;  %vm6403_vm8 = vcmask 31744   ;;  %v1312_v17 = vrot.slane %v1311_v36, 4  ;;  %v1332_v52 = vshrl.u32 %v953_v28, 16  ;;  %v4593_v33 = vrot.slane %v1497_v0, 9  ;;  %1949 = vst.msk [vmem:[#allocation3 + $0x48] sm:$0xff] %vm6401_vm2, %v1910_v9  ;;  %v4958_v29 = vld [vmem:[#allocation2 + $0xb4] sm:$0xff]  }
 0x15d   : > { %905 = vst.msk [vmem:[#allocation3 + $0x70] sm:$0xff] %vm6403_vm8, %v4957_v47  ;;  %v1654_v19 = vrot.slane %v1498_v6, 5  ;;  %v1325_v23 = vor.u32 %v1324_v21, %v1321_v41  ;;  %v6042_v24 = vrot.slane %v1328_v10, 5  ;;  %v1657_v60 = vrot.slane %v1499_v45, 5  ;;  %v2774_v35 = vpop.permute.xlu0 %2773  ;;  %v241_v39 = vld [vmem:[#allocation2 + $0xc0] sm:$0x1]  ;;  %vm6404_vm4 = vmmov %vm6403_vm8 }
 0x15e   : > { %v1661_v26 = vrot.slane %v6035_v15, 5  ;;  %v3041_v54 = vld [vmem:[#allocation2 + $0xbc] sm:$0x1]  ;;  %v3373_v53 = vsel %vm5051_vm12, %v6032_v27, %v6029_v61  ;;  %v1307_v30 = vsel %vm5051_vm12, %v1302_v40, %v6024_v59  ;;  %v1317_v51 = vsel %vm5051_vm12, %v1312_v17, %v1316_v12  ;;  %2814 = vst.msk [vmem:[#allocation3 + $0x40] sm:$0xff] %vm2805_vm7, %v2774_v35  ;;  %v324_v58 = vld [vmem:[%s5038_s17 + $0x78] sm:$0xf] }
 0x15f   : > { %v3586_v46 = vld [vmem:[#allocation2 + $0xbc] sm:$0x1]  ;;  %v3735_v42 = vsel %vm5042_vm11, %v4720_v13, %v3734_v44  ;;  %v3378_v34 = vrot.slane %v3377_v18, 4  ;;  %v3380_v37 = vshll.u32 %v3041_v54, 16  ;;  %v4594_v16 = vrot.slane %v1500_v7, 9  ;;  %906 = vst.msk [vmem:[#allocation3 + $0x78] sm:$0xff] %vm6404_vm4, %v4958_v29 }
 0x160   : > { %v954_v14 = vld [vmem:[#allocation2 + $0xbc] sm:$0x1]  ;;  %v3737_v38 = vrot.slane %v3586_v46, 5  ;;  %v1334_v50 = vrot.slane %v1332_v52, 4  ;;  %v1655_v56 = vsel %vm5042_vm11, %v4593_v33, %v1654_v19  ;;  %v1656_v5 = vrot.slane %v1654_v19, 4 }
 0x161   : > { %v1338_v3 = vshll.u32 %v954_v14, 16  ;;  %v3382_v57 = vrot.slane %v3380_v37, 5  ;;  %v4577_v59 = vcombine.low %v1307_v30, %v1317_v51  ;;  %v1326_v28 = vrot.slane %v1325_v23, 4  ;;  %v325_v61 = vld [vmem:[%s5038_s17 + $0x7c] sm:$0xf]  ;;  %v2952_v20 = vpop.permute.xlu0 %2951 }
 0x162   : > { %v3738_v22 = vsel %vm5042_vm11, %v3736_v49, %v3737_v38  ;;  %v1335_v63 = vor.u32 %v1334_v50, %v6042_v24  ;;  %v1658_v32 = vsel %vm5042_vm11, %v1656_v5, %v1657_v60  ;;  %v1502_v25 = vld [vmem:[#allocation2 + $0xbc] sm:$0x1]  ;;  %v1663_v0 = vrot.slane %v1661_v26, 4  ;;  %v1998_v6 = vld [vmem:[#allocation2 + $0xb4] sm:$0xf] }
 0x163   : > { %v4736_v62 = vcombine.low %v3735_v42, %v3738_v22  ;;  %v3383_v44 = vsel %vm5051_vm12, %v3378_v34, %v3382_v57  ;;  %v1340_v4 = vrot.slane %v1338_v3, 5  ;;  %v4609_v45 = vcombine.low %v1655_v56, %v1658_v32  ;;  %v1999_v36 = vld [vmem:[#allocation2 + $0xb8] sm:$0xf]  ;;  %v2000_v21 = vld [vmem:[#allocation2 + $0xbc] sm:$0x1] }
 0x164   : > { %v242_v40 = vsel %vm5007_vm3, 0, %v241_v39  ;;  %vm6405_vm8 = vcmask 228544   ;;  %v4704_v8 = vcombine.low %v3373_v53, %v3383_v44  ;;  %v1336_v10 = vrot.slane %v1335_v63, 4  ;;  %v291_v17 = vld [vmem:[#allocation2 + $0xc8] sm:$0x1]  ;;  %v4947_v60 = vld [vmem:[#allocation2 + $0xb4] sm:$0xff]  }
 0x165   : > { %2992 = vst.msk [vmem:[#allocation3 + $0x40] sm:$0xff] %vm6405_vm8, %v2952_v20  ;;  %3827 = vrot.lane.b32.xlu0 %v4736_v62, %s4973_s23  ;;  %243 = vst [vmem:[#allocation2 + $0xc0] sm:$0x1] %v242_v40  ;;  %v584_v47 = vshrl.u32 %v324_v58, 16  ;;  %v587_v27 = vshll.u32 %v324_v58, 16  ;;  %v1664_v12 = vrot.slane %v1502_v25, 5  ;;  %v1331_v18 = vsel %vm5051_vm12, %v1326_v28, %v6042_v24 }
 0x166   : > { %v592_v13 = vshrl.u32 %v325_v61, 16  ;;  %v595_v15 = vshll.u32 %v325_v61, 16  ;;  %v2341_v11 = vshrl.u32 %v1998_v6, 16  ;;  %3506 = vrot.lane.b32.xlu1 %v4704_v8, %s4975_s25  ;;  %v6079_v49 = vsel %vm5042_vm11, %v4594_v16, %v1661_v26  ;;  %v2543_v23 = vld [vmem:[#allocation2 + $0xb4] sm:$0xe] }
 0x167   : > { %v586_v41 = vrot.slane %v584_v47, 7  ;;  %v2344_v9 = vshll.u32 %v1998_v6, 16  ;;  %v1341_v52 = vsel %vm5051_vm12, %v1336_v10, %v1340_v4  ;;  %v2350_v7 = vshll.u32 %v1999_v36, 16  ;;  %v2544_v53 = vld [vmem:[#allocation2 + $0xb8] sm:$0xf] }
 0x168   : > { %v6083_v33 = vrot.slane %v592_v13, 7  ;;  %v2343_v19 = vrot.slane %v2341_v11, 4  ;;  %v2354_v26 = vshrl.u32 %v1999_v36, 16  ;;  %v2455_v30 = vpop.permute.xlu1 %2454  ;;  %v1665_v51 = vsel %vm5042_vm11, %v1663_v0, %v1664_v12  ;;  %v2545_v35 = vld [vmem:[#allocation2 + $0xbc] sm:$0x1] }
 0x169   : > { %1742 = vrot.lane.b32.xlu0 %v4609_v45, %s4968_s18  ;;  %v589_v24 = vor.u32 %v587_v27, %v586_v41  ;;  %v590_v29 = vrot.slane %v586_v41, 4  ;;  %v2346_v54 = vrot.slane %v2344_v9, 5  ;;  %v2352_v42 = vrot.slane %v2350_v7, 5  ;;  %2494 = vst.msk [vmem:[#allocation3 + $0x48] sm:$0xff] %vm2484_vm6, %v2455_v30  ;;  %v3045_v39 = vld [vmem:[#allocation2 + $0xcc] sm:$0xf] }
 0x16a   : > { %v597_v46 = vor.u32 %v595_v15, %v6083_v33  ;;  %v2360_v14 = vshll.u32 %v2000_v21, 16  ;;  %1418 = vrot.lane.b32.xlu1 %v4577_v59, %s4969_s19  ;;  %v4578_v34 = vcombine.low %v1331_v18, %v1341_v52  ;;  %v2356_v38 = vrot.slane %v2354_v26, 4  ;;  %v6093_v50 = vld [vmem:[#allocation2 + $0xd0] sm:$0xf]  ;;  %v6116_v47 = vld [vmem:[#allocation2 + $0xd4] sm:$0x1] }
 0x16b   : > { %v2347_v37 = vor.u32 %v2346_v54, %v2343_v19  ;;  %v292_v16 = vsel %vm5014_vm5, 0, %v291_v17  ;;  %v4657_v58 = vrot.slane %v2543_v23, 9  ;;  %v2697_v57 = vrot.slane %v2544_v53, 5  ;;  %vm6408_vm5 = vmmov %vm6401_vm2 }
 0x16c   : > { %v598_v3 = vsel %vm5067_vm14, %v590_v29, %v597_v46  ;;  %v755_v56 = vld [vmem:[#allocation2 + $0xc0] sm:$0xf]  ;;  %v2362_v5 = vrot.slane %v2360_v14, 5  ;;  %293 = vst [vmem:[#allocation2 + $0xc8] sm:$0x1] %v292_v16  ;;  %v3497_v22 = vpop.permute.xlu0 %3496  ;;  %v2357_v28 = vor.u32 %v2356_v38, %v2352_v42  ;;  %v2700_v61 = vrot.slane %v2545_v35, 5  ;;  %v2776_v62 = vpop.permute.xlu1 %2775  ;;  %vm6410_vm14 = vmmov %vm6401_vm2 }
 0x16d   : > { %1919 = vrot.lane.b32.xlu0 %v4947_v60, %s4970_s20  ;;  %v756_v59 = vsel %vm5059_vm13, %v589_v24, %v755_v56  ;;  %758 = vst.msk [vmem:[#allocation2 + $0xc4] sm:$0xf] %vm183_vm0, %v598_v3  ;;  %v2348_v2 = vrot.slane %v2347_v37, 4  ;;  %v4610_v55 = vcombine.low %v6079_v49, %v1665_v51  ;;  %v2699_v63 = vrot.slane %v2697_v57, 4  ;;  %vm6406_vm0 = vmmov %vm6405_vm8 }
 0x16e   : > { %3537 = vst.msk [vmem:[#allocation3 + $0x40] sm:$0xff] %vm3528_vm9, %v3497_v22  ;;  %757 = vst [vmem:[#allocation2 + $0xc0] sm:$0xf] %v756_v59  ;;  %v3409_v32 = vshrl.u32 %v3045_v39, 16  ;;  %1420 = vrot.lane.b32.xlu1 %v4578_v34, %s4969_s19  ;;  %v2358_v25 = vrot.slane %v2357_v28, 4  ;;  %v3412_v0 = vshll.u32 %v3045_v39, 16  ;;  %v2698_v45 = vsel %vm5042_vm11, %v4657_v58, %v2697_v57 }
 0x16f   : > { %2815 = vst.msk [vmem:[#allocation3 + $0x48] sm:$0xff] %vm2805_vm7, %v2776_v62  ;;  %v2353_v48 = vsel %vm5051_vm12, %v2348_v2, %v2352_v42  ;;  %v3418_v6 = vshll.u32 %v6093_v50, 16  ;;  %v599_v20 = vrot.slane %v6083_v33, 4  ;;  %v2701_v40 = vsel %vm5042_vm11, %v2699_v63, %v2700_v61  ;;  %vm6414_vm4 = vmmov %vm6408_vm5 }
 0x170   : > { %v3818_v44 = vpop.permute.xlu0 %3817  ;;  %v2363_v4 = vsel %vm5051_vm12, %v2358_v25, %v2362_v5  ;;  %v2954_v8 = vpop.permute.xlu1 %2953  ;;  %v6120_v36 = vrot.slane %v3409_v32, 4  ;;  %v6122_v12 = vrot.slane %v3412_v0, 5  ;;  %v3422_v15 = vshrl.u32 %v6093_v50, 16 }
 0x171   : > { %3858 = vst.msk [vmem:[#allocation3 + $0x40] sm:$0xff] %vm3849_vm10, %v3818_v44  ;;  %v4641_v10 = vcombine.low %v2353_v48, %v2363_v4  ;;  %v6124_v13 = vrot.slane %v3418_v6, 5  ;;  %v4673_v49 = vcombine.low %v2698_v45, %v2701_v40  ;;  %v3428_v1 = vshll.u32 %v6116_v47, 16  ;;  %v3590_v47 = vld [vmem:[#allocation2 + $0xcc] sm:$0xe] }
 0x172   : > { %2993 = vst.msk [vmem:[#allocation3 + $0x48] sm:$0xff] %vm6406_vm0, %v2954_v8  ;;  %1744 = vrot.lane.b32.xlu1 %v4610_v55, %s4968_s18  ;;  %v6134_v51 = vrot.slane %v3422_v15, 4  ;;  %v3415_v28 = vor.u32 %v6122_v12, %v6120_v36 }
 0x173   : > { %v759_v27 = vld [vmem:[#allocation2 + $0xc8] sm:$0x1]  ;;  %2464 = vrot.lane.b32.xlu0 %v4641_v10, %s4974_s24 }
 0x174   : > { %v760_v11 = vsel %vm5007_vm3, %v599_v20, %v759_v27  ;;  %v2002_v18 = vld [vmem:[#allocation2 + $0xc4] sm:$0xf]  ;;  %v3425_v20 = vor.u32 %v6134_v51, %v6124_v13  ;;  %vm6407_vm3 = vcmask 97344  }
 0x175   : > { %v2547_v41 = vld [vmem:[#allocation2 + $0xc4] sm:$0xf]  ;;  %761 = vst [vmem:[#allocation2 + $0xc8] sm:$0x1] %v760_v11  ;;  %v2001_v9 = vld [vmem:[#allocation2 + $0xc0] sm:$0xf]  ;;  %v3499_v52 = vpop.permute.xlu1 %3498  ;;  %vm6409_vm13 = vmmov %vm6407_vm3 }
 0x176   : > { %v4948_v21 = vld [vmem:[#allocation2 + $0xc0] sm:$0xff]   ;;  %v2374_v17 = vshll.u32 %v2002_v18, 16  ;;  %v2365_v33 = vshrl.u32 %v2001_v9, 16  ;;  %v2368_v19 = vshll.u32 %v2001_v9, 16  ;;  %v2378_v7 = vshrl.u32 %v2002_v18, 16  ;;  %3538 = vst.msk [vmem:[#allocation3 + $0x48] sm:$0xff] %vm3528_vm9, %v3499_v52  ;;  %v3820_v29 = vpop.permute.xlu0 %3819  ;;  %vm6413_vm2 = vmmov %vm6407_vm3 }
 0x177   : > { %v2546_v23 = vld [vmem:[#allocation2 + $0xc0] sm:$0xe]  ;;  %v2704_v60 = vrot.slane %v2547_v41, 5  ;;  %1921 = vrot.lane.b32.xlu1 %v4948_v21, %s4970_s20  ;;  %2785 = vrot.lane.b32.xlu0 %v4673_v49, %s4972_s22  ;;  %3859 = vst.msk [vmem:[#allocation3 + $0x48] sm:$0xff] %vm3849_vm10, %v3820_v29  ;;  %v3043_v34 = vld [vmem:[#allocation2 + $0xc4] sm:$0xf]  ;;  %vm6415_vm8 = vmmov %vm6413_vm2 }
 0x178   : > { %v2376_v24 = vrot.slane %v2374_v17, 5  ;;  %v2367_v54 = vrot.slane %v2365_v33, 4  ;;  %v2370_v26 = vrot.slane %v2368_v19, 5  ;;  %v2380_v53 = vrot.slane %v2378_v7, 4  ;;  %v4951_v30 = vld [vmem:[#allocation2 + $0xc0] sm:$0xff]   ;;  %v3874_v46 = vld [vmem:[#allocation3 + $0x40] sm:$0xff] }
 0x179   : > { %v4658_v42 = vrot.slane %v2546_v23, 9  ;;  %v2706_v14 = vrot.slane %v2704_v60, 4  ;;  %v3042_v35 = vld [vmem:[#allocation2 + $0xc0] sm:$0xf]  ;;  %v1411_v37 = vpop.permute.xlu1 %1410  ;;  %4867 = vmatprep.mubr.msk.bf16.mxu1 %vm3902_vm15, %v3874_v46  ;;  %v3394_v3 = vshll.u32 %v3043_v34, 16  ;;  %v3398_v56 = vshrl.u32 %v3043_v34, 16 }
 0x17a   : > { %v2371_v38 = vor.u32 %v2370_v26, %v2367_v54  ;;  %v2381_v16 = vor.u32 %v2380_v53, %v2376_v24  ;;  %v3385_v39 = vshrl.u32 %v3042_v35, 16  ;;  %v3388_v50 = vshll.u32 %v3042_v35, 16  ;;  %1449 = vst.msk [vmem:[#allocation3 + $0x50] sm:$0xff] %vm1438_vm1, %v1411_v37  ;;  %v3587_v5 = vld [vmem:[#allocation2 + $0xc0] sm:$0xe] }
 0x17b   : > { %v3588_v58 = vld [vmem:[#allocation2 + $0xc4] sm:$0xf]  ;;  %2963 = vrot.lane.b32.xlu0 %v4951_v30, %s4971_s21  ;;  %v3396_v25 = vrot.slane %v3394_v3, 5  ;;  %v3400_v0 = vrot.slane %v3398_v56, 4  ;;  %v2705_v40 = vsel %vm5042_vm11, %v4658_v42, %v2704_v60  ;;  %v4721_v15 = vrot.slane %v3587_v5, 9 }
 0x17c   : > { %v2003_v57 = vld [vmem:[#allocation2 + $0xc8] sm:$0x1]  ;;  %v2372_v22 = vrot.slane %v2371_v38, 4  ;;  %v2382_v59 = vrot.slane %v2381_v16, 4  ;;  %v3387_v63 = vrot.slane %v3385_v39, 4  ;;  %v3390_v32 = vrot.slane %v3388_v50, 5  ;;  %v1735_v48 = vpop.permute.xlu0 %1734 }
 0x17d   : > { %v2548_v2 = vld [vmem:[#allocation2 + $0xc8] sm:$0x1]  ;;  %v2384_v61 = vshll.u32 %v2003_v57, 16  ;;  %1773 = vst.msk [vmem:[#allocation3 + $0x50] sm:$0xff] %vm6407_vm3, %v1735_v48  ;;  %v3401_v36 = vor.u32 %v3400_v0, %v3396_v25  ;;  %v3741_v11 = vrot.slane %v3588_v58, 5  ;;  %v3430_v23 = vrot.slane %v3428_v1, 5 }
 0x17e   : > { %v2707_v62 = vrot.slane %v2548_v2, 5  ;;  %v3044_v55 = vld [vmem:[#allocation2 + $0xc8] sm:$0x1]  ;;  %v2377_v4 = vsel %vm5051_vm12, %v2372_v22, %v2376_v24  ;;  %v3391_v8 = vor.u32 %v3390_v32, %v3387_v63  ;;  %v3875_v27 = vld [vmem:[#allocation3 + $0x48] sm:$0xff]  ;;  %v3591_v19 = vld [vmem:[#allocation2 + $0xd0] sm:$0xf] }
 0x17f   : > { %v3404_v6 = vshll.u32 %v3044_v55, 16  ;;  %v3589_v44 = vld [vmem:[#allocation2 + $0xc8] sm:$0x1]  ;;  %v2386_v45 = vrot.slane %v2384_v61, 5  ;;  %v1413_v10 = vpop.permute.xlu1 %1412  ;;  %4868 = vmatmul.mubr.msk.bf16.vlgmr.msra.gmra.mrb[0].mxu1 %vm3902_vm15, %v3875_v27  ;;  %v3402_v52 = vrot.slane %v3401_v36, 4  ;;  %v3743_v33 = vrot.slane %v3741_v11, 4 }
 0x180   : > { %1450 = vst.msk [vmem:[#allocation3 + $0x58] sm:$0xff] %vm1438_vm1, %v1413_v10  ;;  %v2708_v49 = vsel %vm5042_vm11, %v2706_v14, %v2707_v62  ;;  %v3392_v41 = vrot.slane %v3391_v8, 4  ;;  %v3744_v21 = vrot.slane %v3589_v44, 5  ;;  %v1912_v9 = vpop.permute.xlu0 %1911  ;;  %v3742_v54 = vsel %vm5042_vm11, %v4721_v15, %v3741_v11  ;;  %v3592_v46 = vld [vmem:[#allocation2 + $0xd4] sm:$0x1]  ;;  %v4952_v14 = vld [vmem:[#allocation2 + $0xcc] sm:$0xff]  }
 0x181   : > { %v3406_v12 = vrot.slane %v3404_v6, 5  ;;  %v2387_v18 = vsel %vm5051_vm12, %v2382_v59, %v2386_v45  ;;  %1950 = vst.msk [vmem:[#allocation3 + $0x50] sm:$0xff] %vm6408_vm5, %v1912_v9  ;;  %v4674_v24 = vcombine.low %v2705_v40, %v2708_v49  ;;  %v3416_v30 = vrot.slane %v3415_v28, 4 }
 0x182   : > { %v4642_v17 = vcombine.low %v2377_v4, %v2387_v18  ;;  %v3397_v7 = vsel %vm5051_vm12, %v3392_v41, %v3396_v25  ;;  %v3745_v26 = vsel %vm5042_vm11, %v3743_v33, %v3744_v21  ;;  %v3426_v51 = vrot.slane %v3425_v20, 4 }
 0x183   : > { %v1737_v60 = vpop.permute.xlu1 %1736  ;;  %v3407_v29 = vsel %vm5051_vm12, %v3402_v52, %v3406_v12  ;;  %v3748_v1 = vrot.slane %v3591_v19, 5  ;;  %v4737_v42 = vcombine.low %v3742_v54, %v3745_v26  ;;  %v4722_v35 = vrot.slane %v3590_v47, 9 }
 0x184   : > { %2466 = vrot.lane.b32.xlu1 %v4642_v17, %s4974_s24  ;;  %1774 = vst.msk [vmem:[#allocation3 + $0x58] sm:$0xff] %vm6409_vm13, %v1737_v60  ;;  %v4705_v53 = vcombine.low %v3397_v7, %v3407_v29  ;;  %v3421_v34 = vsel %vm5051_vm12, %v3416_v30, %v6124_v13  ;;  %v3431_v37 = vsel %vm5051_vm12, %v3426_v51, %v3430_v23  ;;  %v3751_v16 = vrot.slane %v3592_v46, 5  ;;  %vm6411_vm12 = vmmov %vm6406_vm0 }
 0x185   : > { %v3750_v38 = vrot.slane %v3748_v1, 4  ;;  %v4706_v50 = vcombine.low %v3421_v34, %v3431_v37  ;;  %v3749_v56 = vsel %vm5042_vm11, %v4722_v35, %v3748_v1  ;;  %vm4418_vm13 = vcmask 60416  }
 0x186   : > { %3508 = vrot.lane.b32.xlu0 %v4705_v53, %s4975_s25 }
 0x187   : > { %v3752_v13 = vsel %vm5042_vm11, %v3750_v38, %v3751_v16  ;;  %vm6412_vm11 = vmmov %vm6406_vm0 }
 0x188   : > { %2787 = vrot.lane.b32.xlu1 %v4674_v24, %s4972_s22  ;;  %v4738_v5 = vcombine.low %v3749_v56, %v3752_v13  ;;  %vm6416_vm0 = vmmov %vm6414_vm4 }
 0x189   : > { %v2457_v39 = vpop.permute.xlu0 %2456  ;;  %vm6417_vm3 = vmmov %vm6412_vm11 }
 0x18a   : > { %3829 = vrot.lane.b32.xlu0 %v4737_v42, %s4973_s23  ;;  %2495 = vst.msk [vmem:[#allocation3 + $0x50] sm:$0xff] %vm2484_vm6, %v2457_v39  ;;  %vm6418_vm5 = vmmov %vm6417_vm3 }
 0x18c   : > { %2965 = vrot.lane.b32.xlu1 %v4952_v14, %s4971_s21  ;;  %v1914_v3 = vpop.permute.xlu1 %1913 }
 0x18d   : > { %1951 = vst.msk [vmem:[#allocation3 + $0x58] sm:$0xff] %vm6410_vm14, %v1914_v3  ;;  %v2778_v43 = vpop.permute.xlu0 %2777  ;;  %vm4116_vm14 = vcmask 64512  }
 0x18e   : > { %2816 = vst.msk [vmem:[#allocation3 + $0x50] sm:$0xff] %vm2805_vm7, %v2778_v43 }
 0x190   : > { %3510 = vrot.lane.b32.xlu1 %v4706_v50, %s4975_s25 }
 0x191   : > { %v2956_v58 = vpop.permute.xlu0 %2955 }
 0x192   : > { %2994 = vst.msk [vmem:[#allocation3 + $0x50] sm:$0xff] %vm6411_vm12, %v2956_v58  ;;  %vm6419_vm12 = vmmov %vm6413_vm2 }
 0x194   : > { %3831 = vrot.lane.b32.xlu1 %v4738_v5, %s4973_s23 }
 0x198   : > { %v2459_v57 = vpop.permute.xlu1 %2458 }
 0x199   : > { %2496 = vst.msk [vmem:[#allocation3 + $0x58] sm:$0xff] %vm2484_vm6, %v2459_v57 }
 0x19c   : > { %v2780_v22 = vpop.permute.xlu1 %2779 }
 0x19d   : > { %2817 = vst.msk [vmem:[#allocation3 + $0x58] sm:$0xff] %vm2805_vm7, %v2780_v22  ;;  %v3501_v31 = vpop.permute.xlu0 %3500 }
 0x19e   : > { %3539 = vst.msk [vmem:[#allocation3 + $0x50] sm:$0xff] %vm3528_vm9, %v3501_v31 }
 0x1a0   : > { %v2958_v59 = vpop.permute.xlu1 %2957 }
 0x1a1   : > { %2995 = vst.msk [vmem:[#allocation3 + $0x58] sm:$0xff] %vm6412_vm11, %v2958_v59  ;;  %v3822_v2 = vpop.permute.xlu0 %3821  ;;  %vm6420_vm11 = vmmov %vm6416_vm0 }
 0x1a2   : > { %3860 = vst.msk [vmem:[#allocation3 + $0x50] sm:$0xff] %vm3849_vm10, %v3822_v2 }
 0x1a5   : > { %v3503_v28 = vpop.permute.xlu1 %3502 }
 0x1a6   : > { %3540 = vst.msk [vmem:[#allocation3 + $0x58] sm:$0xff] %vm3528_vm9, %v3503_v28 }
 0x1a7   : > { %v3824_v61 = vpop.permute.xlu0 %3823 }
 0x1a8   : > { %3861 = vst.msk [vmem:[#allocation3 + $0x58] sm:$0xff] %vm3849_vm10, %v3824_v61 }
 0x1a9   : > { %v1415_v62 = vpop.permute.xlu1 %1414  ;;  %v3876_v55 = vld [vmem:[#allocation3 + $0x50] sm:$0xff] }
 0x1aa   : > { %1451 = vst.msk [vmem:[#allocation3 + $0x60] sm:$0xff] %vm1438_vm1, %v1415_v62  ;;  %4871 = vmatprep.mubr.msk.bf16.mxu1 %vm3902_vm15, %v3876_v55 }
 0x1ae   : > { %v1739_v63 = vpop.permute.xlu0 %1738 }
 0x1af   : > { %v1417_v32 = vpop.permute.xlu1 %1416  ;;  %1775 = vst.msk [vmem:[#allocation3 + $0x60] sm:$0xff] %vm6413_vm2, %v1739_v63  ;;  %v3877_v48 = vld [vmem:[#allocation3 + $0x58] sm:$0xff] }
 0x1b0   : > { %1452 = vst.msk [vmem:[#allocation3 + $0x68] sm:$0xff] %vm1438_vm1, %v1417_v32  ;;  %4872 = vmatmul.mubr.msk.bf16.gmra.mrb[4].mxu1 %vm3902_vm15, %v3877_v48 }
 0x1b2   : > { %v1916_v25 = vpop.permute.xlu0 %1915 }
 0x1b3   : > { %v1741_v0 = vpop.permute.xlu1 %1740  ;;  %1952 = vst.msk [vmem:[#allocation3 + $0x60] sm:$0xff] %vm6414_vm4, %v1916_v25  ;;  %vm6421_vm4 = vmmov %vm6416_vm0 }
 0x1b4   : > { %1776 = vst.msk [vmem:[#allocation3 + $0x68] sm:$0xff] %vm6415_vm8, %v1741_v0  ;;  %vm6422_vm8 = vmmov %vm6417_vm3 }
 0x1b7   : > { %v1918_v6 = vpop.permute.xlu1 %1917 }
 0x1b8   : > { %1953 = vst.msk [vmem:[#allocation3 + $0x68] sm:$0xff] %vm6416_vm0, %v1918_v6 }
 0x1b9   : > { %v2461_v20 = vpop.permute.xlu0 %2460 }
 0x1ba   : > { %2497 = vst.msk [vmem:[#allocation3 + $0x60] sm:$0xff] %vm2484_vm6, %v2461_v20 }
 0x1bd   : > { %v2782_v44 = vpop.permute.xlu0 %2781 }
 0x1be   : > { %2818 = vst.msk [vmem:[#allocation3 + $0x60] sm:$0xff] %vm2805_vm7, %v2782_v44 }
 0x1c1   : > { %v2960_v4 = vpop.permute.xlu0 %2959 }
 0x1c2   : > { %2996 = vst.msk [vmem:[#allocation3 + $0x60] sm:$0xff] %vm6417_vm3, %v2960_v4 }
 0x1c3   : > { %v2463_v45 = vpop.permute.xlu1 %2462 }
 0x1c4   : > { %2498 = vst.msk [vmem:[#allocation3 + $0x68] sm:$0xff] %vm2484_vm6, %v2463_v45 }
 0x1c7   : > { %v2784_v40 = vpop.permute.xlu1 %2783 }
 0x1c8   : > { %2819 = vst.msk [vmem:[#allocation3 + $0x68] sm:$0xff] %vm2805_vm7, %v2784_v40 }
 0x1ca   : > { %v3505_v10 = vpop.permute.xlu0 %3504 }
 0x1cb   : > { %v2962_v8 = vpop.permute.xlu1 %2961  ;;  %3541 = vst.msk [vmem:[#allocation3 + $0x60] sm:$0xff] %vm3528_vm9, %v3505_v10  ;;  %v4853_v36 = vpop.f32.mrb[0].mxu0 }
 0x1cc   : > { %2997 = vst.msk [vmem:[#allocation3 + $0x68] sm:$0xff] %vm6418_vm5, %v2962_v8  ;;  %v4796_v12 = vpack.c.bf16 %v4853_v36, %v4853_v36  ;;  %v3989_v15 = vpop.f32.mrb[1].mxu0  ;;  %v4190_v41 = vmul.f32 %v4853_v36, %v4853_v36  ;;  %v4120_v60 = vsel %vm4116_vm14, %v4853_v36, 0.0 }
 0x1cd   : > { %v4188_v11 = vmul.f32 %v3989_v15, %v3989_v15  ;;  %v4794_v18 = vpack.c.bf16 %v3989_v15, %v3989_v15  ;;  %v4854_v49 = vpop.f32.mrb[2].mxu0  ;;  %v4117_v17 = vsel %vm4116_vm14, %v3989_v15, 0.0 }
 0x1ce   : > { %v3826_v27 = vpop.permute.xlu0 %3825  ;;  %4421 = vst.msk [vmem:[%s6214_s7 + $0x8] sm:$0xf] %vm4418_vm13, %v4796_v12  ;;  %v4797_v21 = vpack.c.bf16 %v4854_v49, %v4854_v49  ;;  %v3992_v9 = vpop.f32.mrb[3].mxu0  ;;  %v4191_v7 = vmul.f32 %v4854_v49, %v4854_v49  ;;  %v4223_v30 = vsel %vm4116_vm14, %v4190_v41, 0.0  ;;  %v4122_v1 = vsel %vm4116_vm14, %v4854_v49, 0.0 }
 0x1cf   : > { %3862 = vst.msk [vmem:[#allocation3 + $0x60] sm:$0xff] %vm3849_vm10, %v3826_v27  ;;  %v4118_v52 = vsel %vm4116_vm14, %v3992_v9, 0.0  ;;  %v4189_v33 = vmul.f32 %v3992_v9, %v3992_v9  ;;  %v4795_v19 = vpack.c.bf16 %v3992_v9, %v3992_v9  ;;  %v4220_v24 = vsel %vm4116_vm14, %v4188_v11, 0.0 }
 0x1d0   : > { %4419 = vst.msk [vmem:[%s6214_s7] sm:$0xf] %vm4418_vm13, %v4794_v18  ;;  %4422 = vst.msk [vmem:[%s6214_s7 + $0xc] sm:$0xf] %vm4418_vm13, %v4797_v21  ;;  %v4119_v23 = vadd.f32 %v4118_v52, %v4117_v17  ;;  %v4225_v46 = vsel %vm4116_vm14, %v4191_v7, 0.0 }
 0x1d1   : > { %v4221_v29 = vsel %vm4116_vm14, %v4189_v33, 0.0  ;;  %4420 = vst.msk [vmem:[%s6214_s7 + $0x4] sm:$0xf] %vm4418_vm13, %v4795_v19 }
 0x1d2   : > { %v4121_v54 = vadd.f32 %v4120_v60, %v4119_v23  ;;  %v4222_v26 = vadd.f32 %v4221_v29, %v4220_v24 }
 0x1d3   : > { %v4857_v51 = vpop.f32.mrb[4].mxu0 }
 0x1d4   : > { %v4224_v42 = vadd.f32 %v4223_v30, %v4222_v26  ;;  %v4800_v14 = vpack.c.bf16 %v4857_v51, %v4857_v51  ;;  %v4005_v35 = vpop.f32.mrb[5].mxu0  ;;  %v4123_v34 = vadd.f32 %v4122_v1, %v4121_v54  ;;  %v4194_v22 = vmul.f32 %v4857_v51, %v4857_v51 }
 0x1d5   : > { %v4124_v37 = vsel %vm4116_vm14, %v4005_v35, 0.0  ;;  %v4192_v38 = vmul.f32 %v4005_v35, %v4005_v35  ;;  %v4798_v16 = vpack.c.bf16 %v4005_v35, %v4005_v35  ;;  %v4858_v39 = vpop.f32.mrb[6].mxu0  ;;  %v4128_v62 = vsel %vm4116_vm14, %v4857_v51, 0.0 }
 0x1d6   : > { %v3878_v53 = vld [vmem:[#allocation3 + $0x60] sm:$0xff]  ;;  %4425 = vst.msk [vmem:[%s6214_s7 + $0x18] sm:$0xf] %vm4418_vm13, %v4800_v14  ;;  %v4226_v3 = vadd.f32 %v4225_v46, %v4224_v42  ;;  %v4008_v56 = vpop.f32.mrb[7].mxu0  ;;  %v4125_v13 = vadd.f32 %v4124_v37, %v4123_v34  ;;  %v4801_v5 = vpack.c.bf16 %v4858_v39, %v4858_v39  ;;  %v4195_v55 = vmul.f32 %v4858_v39, %v4858_v39 }
 0x1d7   : > { %v3828_v47 = vpop.permute.xlu0 %3827  ;;  %4875 = vmatprep.mubr.msk.bf16.mxu1 %vm3902_vm15, %v3878_v53  ;;  %v4227_v43 = vsel %vm4116_vm14, %v4192_v38, 0.0  ;;  %4423 = vst.msk [vmem:[%s6214_s7 + $0x10] sm:$0xf] %vm4418_vm13, %v4798_v16  ;;  %v4126_v58 = vsel %vm4116_vm14, %v4008_v56, 0.0  ;;  %v4193_v59 = vmul.f32 %v4008_v56, %v4008_v56  ;;  %v4799_v2 = vpack.c.bf16 %v4008_v56, %v4008_v56 }
 0x1d8   : > { %v3507_v50 = vpop.permute.xlu1 %3506  ;;  %v4228_v31 = vadd.f32 %v4227_v43, %v4226_v3  ;;  %4426 = vst.msk [vmem:[%s6214_s7 + $0x1c] sm:$0xf] %vm4418_vm13, %v4801_v5  ;;  %v4127_v28 = vadd.f32 %v4126_v58, %v4125_v13  ;;  %v4231_v0 = vsel %vm4116_vm14, %v4194_v22, 0.0  ;;  %v4130_v6 = vsel %vm4116_vm14, %v4858_v39, 0.0 }
 0x1d9   : > { %3542 = vst.msk [vmem:[#allocation3 + $0x68] sm:$0xff] %vm3528_vm9, %v3507_v50  ;;  %v4229_v63 = vsel %vm4116_vm14, %v4193_v59, 0.0  ;;  %v4233_v45 = vsel %vm4116_vm14, %v4195_v55, 0.0 }
 0x1da   : > { %3863 = vst.msk [vmem:[#allocation3 + $0x68] sm:$0xff] %vm3849_vm10, %v3828_v47  ;;  %v4129_v32 = vadd.f32 %v4128_v62, %v4127_v28  ;;  %v4230_v48 = vadd.f32 %v4229_v63, %v4228_v31 }
 0x1db   : > { %v1743_v57 = vpop.permute.xlu0 %1742  ;;  %4424 = vst.msk [vmem:[%s6214_s7 + $0x14] sm:$0xf] %vm4418_vm13, %v4799_v2 }
 0x1dc   : > { %v1419_v61 = vpop.permute.xlu1 %1418  ;;  %v4232_v20 = vadd.f32 %v4231_v0, %v4230_v48  ;;  %v4131_v44 = vadd.f32 %v4130_v6, %v4129_v32 }
 0x1dd   : > { %1453 = vst.msk [vmem:[#allocation3 + $0x70] sm:$0xff] %vm1438_vm1, %v1419_v61 }
 0x1de   : > { %1777 = vst.msk [vmem:[#allocation3 + $0x70] sm:$0xff] %vm6419_vm12, %v1743_v57  ;;  %v4234_v8 = vadd.f32 %v4233_v45, %v4232_v20 }
 0x1df   : > { %v1920_v25 = vpop.permute.xlu0 %1919 }
 0x1e0   : > { %1954 = vst.msk [vmem:[#allocation3 + $0x70] sm:$0xff] %vm6420_vm11, %v1920_v25  ;;  %v1421_v4 = vpop.permute.xlu1 %1420 }
 0x1e1   : > { %1454 = vst.msk [vmem:[#allocation3 + $0x78] sm:$0xff] %vm1438_vm1, %v1421_v4  ;;  %v3879_v40 = vld [vmem:[#allocation3 + $0x68] sm:$0xff]  ;;  %vm6423_vm1 = vmmov %vm6417_vm3 }
 0x1e2   : > { %4876 = vmatmul.mubr.msk.bf16.gmra.mrb[8].mxu1 %vm3902_vm15, %v3879_v40 }
 0x1e4   : > { %v1745_v10 = vpop.permute.xlu1 %1744 }
 0x1e5   : > { %1778 = vst.msk [vmem:[#allocation3 + $0x78] sm:$0xff] %vm6413_vm2, %v1745_v10  ;;  %v2465_v27 = vpop.permute.xlu0 %2464 }
 0x1e6   : > { %2499 = vst.msk [vmem:[#allocation3 + $0x70] sm:$0xff] %vm2484_vm6, %v2465_v27 }
 0x1e9   : > { %v1922_v36 = vpop.permute.xlu1 %1921  ;;  %v2786_v12 = vpop.permute.xlu0 %2785 }
 0x1ea   : > { %1955 = vst.msk [vmem:[#allocation3 + $0x78] sm:$0xff] %vm6421_vm4, %v1922_v36 }
 0x1eb   : > { %2820 = vst.msk [vmem:[#allocation3 + $0x70] sm:$0xff] %vm2805_vm7, %v2786_v12 }
 0x1ed   : > { %v2964_v15 = vpop.permute.xlu0 %2963 }
 0x1ee   : > { %2998 = vst.msk [vmem:[#allocation3 + $0x70] sm:$0xff] %vm6422_vm8, %v2964_v15 }
 0x1f6   : > { %v2467_v11 = vpop.permute.xlu1 %2466 }
 0x1f7   : > { %2500 = vst.msk [vmem:[#allocation3 + $0x78] sm:$0xff] %vm2484_vm6, %v2467_v11  ;;  %v4861_v18 = vpop.f32.mrb[8].mxu0  ;;  %vm4186_vm6 = vcmask 57344  }
 0x1f8   : > { %v4804_v49 = vpack.c.bf16 %v4861_v18, %v4861_v18  ;;  %v4021_v41 = vpop.f32.mrb[9].mxu0  ;;  %v3509_v21 = vpop.permute.xlu0 %3508  ;;  %v4198_v7 = vmul.f32 %v4861_v18, %v4861_v18  ;;  %v4136_v1 = vsel %vm4116_vm14, %v4861_v18, 0.0 }
 0x1f9   : > { %v4132_v9 = vsel %vm4116_vm14, %v4021_v41, 0.0  ;;  %v4196_v17 = vmul.f32 %v4021_v41, %v4021_v41  ;;  %v4802_v52 = vpack.c.bf16 %v4021_v41, %v4021_v41  ;;  %v4862_v33 = vpop.f32.mrb[10].mxu0  ;;  %3543 = vst.msk [vmem:[#allocation3 + $0x70] sm:$0xff] %vm3528_vm9, %v3509_v21 }
 0x1fa   : > { %v2788_v19 = vpop.permute.xlu1 %2787  ;;  %4429 = vst.msk [vmem:[%s6214_s7 + $0x28] sm:$0xf] %vm4418_vm13, %v4804_v49  ;;  %v4133_v23 = vadd.f32 %v4132_v9, %v4131_v44  ;;  %v4024_v60 = vpop.f32.mrb[11].mxu0  ;;  %v4805_v29 = vpack.c.bf16 %v4862_v33, %v4862_v33  ;;  %v4199_v46 = vmul.f32 %v4862_v33, %v4862_v33  ;;  %v4239_v37 = vsel %vm4116_vm14, %v4198_v7, 0.0 }
 0x1fb   : > { %2821 = vst.msk [vmem:[#allocation3 + $0x78] sm:$0xff] %vm2805_vm7, %v2788_v19  ;;  %v4235_v24 = vsel %vm4116_vm14, %v4196_v17, 0.0  ;;  %v4134_v54 = vsel %vm4116_vm14, %v4024_v60, 0.0  ;;  %v4197_v26 = vmul.f32 %v4024_v60, %v4024_v60  ;;  %v4803_v51 = vpack.c.bf16 %v4024_v60, %v4024_v60 }
 0x1fc   : > { %4427 = vst.msk [vmem:[%s6214_s7 + $0x20] sm:$0xf] %vm4418_vm13, %v4802_v52  ;;  %v4236_v53 = vadd.f32 %v4235_v24, %v4234_v8  ;;  %v4135_v30 = vadd.f32 %v4134_v54, %v4133_v23  ;;  %v3830_v47 = vpop.permute.xlu0 %3829  ;;  %4430 = vst.msk [vmem:[%s6214_s7 + $0x2c] sm:$0xf] %vm4418_vm13, %v4805_v29  ;;  %v4138_v38 = vsel %vm4116_vm14, %v4862_v33, 0.0  ;;  %v4241_v50 = vsel %vm4116_vm14, %v4199_v46, 0.0 }
 0x1fd   : > { %v4237_v42 = vsel %vm4116_vm14, %v4197_v26, 0.0  ;;  %3864 = vst.msk [vmem:[#allocation3 + $0x70] sm:$0xff] %vm3849_vm10, %v3830_v47 }
 0x1fe   : > { %v2966_v14 = vpop.permute.xlu1 %2965  ;;  %v4137_v35 = vadd.f32 %v4136_v1, %v4135_v30  ;;  %v4238_v34 = vadd.f32 %v4237_v42, %v4236_v53  ;;  %4428 = vst.msk [vmem:[%s6214_s7 + $0x24] sm:$0xf] %vm4418_vm13, %v4803_v51 }
 0x1ff   : > { %2999 = vst.msk [vmem:[#allocation3 + $0x78] sm:$0xff] %vm6423_vm1, %v2966_v14 }
 0x200   : > { %v4240_v16 = vadd.f32 %v4239_v37, %v4238_v34  ;;  %v4139_v39 = vadd.f32 %v4138_v38, %v4137_v35 }
 0x202   : > { %v3511_v3 = vpop.permute.xlu1 %3510  ;;  %v4242_v56 = vadd.f32 %v4241_v50, %v4240_v16 }
 0x203   : > { %3544 = vst.msk [vmem:[#allocation3 + $0x78] sm:$0xff] %vm3528_vm9, %v3511_v3 }
 0x204   : > { %v3880_v13 = vld [vmem:[#allocation3 + $0x70] sm:$0xff] }
 0x205   : > { %4879 = vmatprep.mubr.msk.bf16.mxu1 %vm3902_vm15, %v3880_v13 }
 0x206   : > { %v3832_v43 = vpop.permute.xlu1 %3831 }
 0x207   : > { %3865 = vst.msk [vmem:[#allocation3 + $0x78] sm:$0xff] %vm3849_vm10, %v3832_v43 }
 0x20e   : > { %v3881_v5 = vld [vmem:[#allocation3 + $0x78] sm:$0xff] }
 0x20f   : > { %4880 = vmatmul.mubr.msk.bf16.gmra.mrb[12].mxu1 %vm3902_vm15, %v3881_v5 }
 0x227   : > { %v4865_v58 = vpop.f32.mrb[12].mxu0 }
 0x228   : > { %v4808_v57 = vpack.c.bf16 %v4865_v58, %v4865_v58  ;;  %v4037_v22 = vpop.f32.mrb[13].mxu0  ;;  %v4202_v61 = vmul.f32 %v4865_v58, %v4865_v58  ;;  %v4144_v44 = vsel %vm4116_vm14, %v4865_v58, 0.0 }
 0x229   : > { %v4140_v31 = vsel %vm4116_vm14, %v4037_v22, 0.0  ;;  %v4200_v59 = vmul.f32 %v4037_v22, %v4037_v22  ;;  %v4806_v2 = vpack.c.bf16 %v4037_v22, %v4037_v22  ;;  %v4866_v28 = vpop.f32.mrb[14].mxu0 }
 0x22a   : > { %4433 = vst.msk [vmem:[%s6214_s7 + $0x38] sm:$0xf] %vm4418_vm13, %v4808_v57  ;;  %v4141_v62 = vadd.f32 %v4140_v31, %v4139_v39  ;;  %v4040_v55 = vpop.f32.mrb[15].mxu0  ;;  %v4809_v32 = vpack.c.bf16 %v4866_v28, %v4866_v28  ;;  %v4203_v4 = vmul.f32 %v4866_v28, %v4866_v28  ;;  %v4247_v10 = vsel %vm4116_vm14, %v4202_v61, 0.0 }
 0x22b   : > { %v4243_v63 = vsel %vm4116_vm14, %v4200_v59, 0.0  ;;  %4431 = vst.msk [vmem:[%s6214_s7 + $0x30] sm:$0xf] %vm4418_vm13, %v4806_v2  ;;  %v4142_v48 = vsel %vm4116_vm14, %v4040_v55, 0.0  ;;  %v4201_v25 = vmul.f32 %v4040_v55, %v4040_v55  ;;  %v4807_v20 = vpack.c.bf16 %v4040_v55, %v4040_v55 }
 0x22c   : > { %v4244_v0 = vadd.f32 %v4243_v63, %v4242_v56  ;;  %v4143_v6 = vadd.f32 %v4142_v48, %v4141_v62  ;;  %4434 = vst.msk [vmem:[%s6214_s7 + $0x3c] sm:$0xf] %vm4418_vm13, %v4809_v32  ;;  %v4146_v27 = vsel %vm4116_vm14, %v4866_v28, 0.0  ;;  %v4249_v15 = vsel %vm4116_vm14, %v4203_v4, 0.0 }
 0x22d   : > { %v4245_v45 = vsel %vm4116_vm14, %v4201_v25, 0.0  ;;  %4432 = vst.msk [vmem:[%s6214_s7 + $0x34] sm:$0xf] %vm4418_vm13, %v4807_v20 }
 0x22e   : > { %v4145_v40 = vadd.f32 %v4144_v44, %v4143_v6  ;;  %v4246_v8 = vadd.f32 %v4245_v45, %v4244_v0 }
 0x230   : > { %v4248_v36 = vadd.f32 %v4247_v10, %v4246_v8  ;;  %v4147_v12 = vadd.f32 %v4146_v27, %v4145_v40 }
 0x232   : > { %v4250_v11 = vadd.f32 %v4249_v15, %v4248_v36 }
 0x252   : > { %v4869_v18 = vpop.f32.mrb[0].mxu1 }
 0x253   : > { %v4812_v49 = vpack.c.bf16 %v4869_v18, %v4869_v18  ;;  %v4053_v41 = vpop.f32.mrb[1].mxu1  ;;  %v4206_v33 = vmul.f32 %v4869_v18, %v4869_v18  ;;  %v4152_v30 = vsel %vm4116_vm14, %v4869_v18, 0.0 }
 0x254   : > { %v4148_v21 = vsel %vm4116_vm14, %v4053_v41, 0.0  ;;  %v4204_v9 = vmul.f32 %v4053_v41, %v4053_v41  ;;  %v4810_v17 = vpack.c.bf16 %v4053_v41, %v4053_v41  ;;  %v4870_v52 = vpop.f32.mrb[2].mxu1 }
 0x255   : > { %4437 = vst.msk [vmem:[%s6214_s7 + $0x48] sm:$0xf] %vm4418_vm13, %v4812_v49  ;;  %v4149_v19 = vadd.f32 %v4148_v21, %v4147_v12  ;;  %v4056_v7 = vpop.f32.mrb[3].mxu1  ;;  %v4813_v60 = vpack.c.bf16 %v4870_v52, %v4870_v52  ;;  %v4207_v51 = vmul.f32 %v4870_v52, %v4870_v52  ;;  %v4255_v42 = vsel %vm4116_vm14, %v4206_v33, 0.0 }
 0x256   : > { %v4251_v23 = vsel %vm4116_vm14, %v4204_v9, 0.0  ;;  %4435 = vst.msk [vmem:[%s6214_s7 + $0x40] sm:$0xf] %vm4418_vm13, %v4810_v17  ;;  %v4150_v24 = vsel %vm4116_vm14, %v4056_v7, 0.0  ;;  %v4205_v29 = vmul.f32 %v4056_v7, %v4056_v7  ;;  %v4811_v53 = vpack.c.bf16 %v4056_v7, %v4056_v7 }
 0x257   : > { %v4252_v54 = vadd.f32 %v4251_v23, %v4250_v11  ;;  %v4151_v26 = vadd.f32 %v4150_v24, %v4149_v19  ;;  %4438 = vst.msk [vmem:[%s6214_s7 + $0x4c] sm:$0xf] %vm4418_vm13, %v4813_v60  ;;  %v4154_v14 = vsel %vm4116_vm14, %v4870_v52, 0.0  ;;  %v4257_v37 = vsel %vm4116_vm14, %v4207_v51, 0.0 }
 0x258   : > { %v4253_v47 = vsel %vm4116_vm14, %v4205_v29, 0.0  ;;  %4436 = vst.msk [vmem:[%s6214_s7 + $0x44] sm:$0xf] %vm4418_vm13, %v4811_v53 }
 0x259   : > { %v4153_v1 = vadd.f32 %v4152_v30, %v4151_v26  ;;  %v4254_v46 = vadd.f32 %v4253_v47, %v4252_v54 }
 0x25b   : > { %v4256_v35 = vadd.f32 %v4255_v42, %v4254_v46  ;;  %v4155_v34 = vadd.f32 %v4154_v14, %v4153_v1 }
 0x25d   : > { %v4258_v38 = vadd.f32 %v4257_v37, %v4256_v35 }
 0x283   : > { %v4873_v16 = vpop.f32.mrb[4].mxu1 }
 0x284   : > { %v4816_v39 = vpack.c.bf16 %v4873_v16, %v4873_v16  ;;  %v4069_v50 = vpop.f32.mrb[5].mxu1  ;;  %v4210_v5 = vmul.f32 %v4873_v16, %v4873_v16  ;;  %v4160_v55 = vsel %vm4116_vm14, %v4873_v16, 0.0 }
 0x285   : > { %v4156_v3 = vsel %vm4116_vm14, %v4069_v50, 0.0  ;;  %v4208_v56 = vmul.f32 %v4069_v50, %v4069_v50  ;;  %v4814_v13 = vpack.c.bf16 %v4069_v50, %v4069_v50  ;;  %v4874_v43 = vpop.f32.mrb[6].mxu1 }
 0x286   : > { %4441 = vst.msk [vmem:[%s6214_s7 + $0x58] sm:$0xf] %vm4418_vm13, %v4816_v39  ;;  %v4157_v58 = vadd.f32 %v4156_v3, %v4155_v34  ;;  %v4072_v57 = vpop.f32.mrb[7].mxu1  ;;  %v4817_v31 = vpack.c.bf16 %v4874_v43, %v4874_v43  ;;  %v4211_v63 = vmul.f32 %v4874_v43, %v4874_v43  ;;  %v4263_v0 = vsel %vm4116_vm14, %v4210_v5, 0.0 }
 0x287   : > { %v4259_v22 = vsel %vm4116_vm14, %v4208_v56, 0.0  ;;  %4439 = vst.msk [vmem:[%s6214_s7 + $0x50] sm:$0xf] %vm4418_vm13, %v4814_v13  ;;  %v4158_v59 = vsel %vm4116_vm14, %v4072_v57, 0.0  ;;  %v4209_v2 = vmul.f32 %v4072_v57, %v4072_v57  ;;  %v4815_v62 = vpack.c.bf16 %v4072_v57, %v4072_v57 }
 0x288   : > { %v4260_v28 = vadd.f32 %v4259_v22, %v4258_v38  ;;  %v4159_v61 = vadd.f32 %v4158_v59, %v4157_v58  ;;  %4442 = vst.msk [vmem:[%s6214_s7 + $0x5c] sm:$0xf] %vm4418_vm13, %v4817_v31  ;;  %v4162_v6 = vsel %vm4116_vm14, %v4874_v43, 0.0  ;;  %v4265_v4 = vsel %vm4116_vm14, %v4211_v63, 0.0 }
 0x289   : > { %v4261_v32 = vsel %vm4116_vm14, %v4209_v2, 0.0  ;;  %4440 = vst.msk [vmem:[%s6214_s7 + $0x54] sm:$0xf] %vm4418_vm13, %v4815_v62 }
 0x28a   : > { %v4161_v48 = vadd.f32 %v4160_v55, %v4159_v61  ;;  %v4262_v25 = vadd.f32 %v4261_v32, %v4260_v28 }
 0x28c   : > { %v4264_v20 = vadd.f32 %v4263_v0, %v4262_v25  ;;  %v4163_v44 = vadd.f32 %v4162_v6, %v4161_v48 }
 0x28e   : > { %v4266_v45 = vadd.f32 %v4265_v4, %v4264_v20 }
 0x2b5   : > { %v4877_v40 = vpop.f32.mrb[8].mxu1 }
 0x2b6   : > { %v4820_v8 = vpack.c.bf16 %v4877_v40, %v4877_v40  ;;  %v4085_v10 = vpop.f32.mrb[9].mxu1  ;;  %v4214_v11 = vmul.f32 %v4877_v40, %v4877_v40  ;;  %v4168_v7 = vsel %vm4116_vm14, %v4877_v40, 0.0 }
 0x2b7   : > { %v4164_v27 = vsel %vm4116_vm14, %v4085_v10, 0.0  ;;  %v4212_v36 = vmul.f32 %v4085_v10, %v4085_v10  ;;  %v4818_v12 = vpack.c.bf16 %v4085_v10, %v4085_v10  ;;  %v4878_v15 = vpop.f32.mrb[10].mxu1 }
 0x2b8   : > { %4445 = vst.msk [vmem:[%s6214_s7 + $0x68] sm:$0xf] %vm4418_vm13, %v4820_v8  ;;  %v4165_v18 = vadd.f32 %v4164_v27, %v4163_v44  ;;  %v4088_v49 = vpop.f32.mrb[11].mxu1  ;;  %v4821_v21 = vpack.c.bf16 %v4878_v15, %v4878_v15  ;;  %v4215_v23 = vmul.f32 %v4878_v15, %v4878_v15  ;;  %v4271_v54 = vsel %vm4116_vm14, %v4214_v11, 0.0 }
 0x2b9   : > { %v4267_v41 = vsel %vm4116_vm14, %v4212_v36, 0.0  ;;  %4443 = vst.msk [vmem:[%s6214_s7 + $0x60] sm:$0xf] %vm4418_vm13, %v4818_v12  ;;  %v4166_v9 = vsel %vm4116_vm14, %v4088_v49, 0.0  ;;  %v4213_v17 = vmul.f32 %v4088_v49, %v4088_v49  ;;  %v4819_v19 = vpack.c.bf16 %v4088_v49, %v4088_v49 }
 0x2ba   : > { %v4268_v52 = vadd.f32 %v4267_v41, %v4266_v45  ;;  %v4167_v33 = vadd.f32 %v4166_v9, %v4165_v18  ;;  %4446 = vst.msk [vmem:[%s6214_s7 + $0x6c] sm:$0xf] %vm4418_vm13, %v4821_v21  ;;  %v4170_v26 = vsel %vm4116_vm14, %v4878_v15, 0.0  ;;  %v4273_v51 = vsel %vm4116_vm14, %v4215_v23, 0.0 }
 0x2bb   : > { %v4269_v60 = vsel %vm4116_vm14, %v4213_v17, 0.0  ;;  %4444 = vst.msk [vmem:[%s6214_s7 + $0x64] sm:$0xf] %vm4418_vm13, %v4819_v19 }
 0x2bc   : > { %v4169_v24 = vadd.f32 %v4168_v7, %v4167_v33  ;;  %v4270_v29 = vadd.f32 %v4269_v60, %v4268_v52 }
 0x2be   : > { %v4272_v53 = vadd.f32 %v4271_v54, %v4270_v29  ;;  %v4171_v30 = vadd.f32 %v4170_v26, %v4169_v24 }
 0x2c0   : > { %v4274_v47 = vadd.f32 %v4273_v51, %v4272_v53 }
 0x2e2   : > { %v4881_v1 = vpop.f32.mrb[12].mxu1 }
 0x2e3   : > { %v4824_v46 = vpack.c.bf16 %v4881_v1, %v4881_v1  ;;  %v4101_v42 = vpop.f32.mrb[13].mxu1  ;;  %v4218_v38 = vmul.f32 %v4881_v1, %v4881_v1  ;;  %v4176_v57 = vsel %vm4116_vm14, %v4881_v1, 0.0 }
 0x2e4   : > { %v4172_v14 = vsel %vm4116_vm14, %v4101_v42, 0.0  ;;  %v4216_v35 = vmul.f32 %v4101_v42, %v4101_v42  ;;  %v4822_v34 = vpack.c.bf16 %v4101_v42, %v4101_v42  ;;  %v4882_v37 = vpop.f32.mrb[14].mxu1 }
 0x2e5   : > { %4449 = vst.msk [vmem:[%s6214_s7 + $0x78] sm:$0xf] %vm4418_vm13, %v4824_v46  ;;  %v4173_v16 = vadd.f32 %v4172_v14, %v4171_v30  ;;  %v4104_v39 = vpop.f32.mrb[15].mxu1  ;;  %v4825_v3 = vpack.c.bf16 %v4882_v37, %v4882_v37  ;;  %v4219_v22 = vmul.f32 %v4882_v37, %v4882_v37  ;;  %v4279_v28 = vsel %vm4116_vm14, %v4218_v38, 0.0 }
 0x2e6   : > { %v4275_v50 = vsel %vm4116_vm14, %v4216_v35, 0.0  ;;  %4447 = vst.msk [vmem:[%s6214_s7 + $0x70] sm:$0xf] %vm4418_vm13, %v4822_v34  ;;  %v4174_v56 = vsel %vm4116_vm14, %v4104_v39, 0.0  ;;  %v4217_v13 = vmul.f32 %v4104_v39, %v4104_v39  ;;  %v4823_v58 = vpack.c.bf16 %v4104_v39, %v4104_v39 }
 0x2e7   : > { %v4276_v43 = vadd.f32 %v4275_v50, %v4274_v47  ;;  %v4175_v5 = vadd.f32 %v4174_v56, %v4173_v16  ;;  %4450 = vst.msk [vmem:[%s6214_s7 + $0x7c] sm:$0xf] %vm4418_vm13, %v4825_v3  ;;  %v4178_v61 = vsel %vm4116_vm14, %v4882_v37, 0.0  ;;  %v4281_v63 = vsel %vm4116_vm14, %v4219_v22, 0.0 }
 0x2e8   : > { %v4277_v31 = vsel %vm4116_vm14, %v4217_v13, 0.0  ;;  %4448 = vst.msk [vmem:[%s6214_s7 + $0x74] sm:$0xf] %vm4418_vm13, %v4823_v58 }
 0x2e9   : > { %v4177_v59 = vadd.f32 %v4176_v57, %v4175_v5  ;;  %v4278_v2 = vadd.f32 %v4277_v31, %v4276_v43 }
 0x2eb   : > { %v4179_v62 = vadd.f32 %v4178_v61, %v4177_v59  ;;  %v4280_v55 = vadd.f32 %v4279_v28, %v4278_v2 }
 0x2ed   : > { %v4180_v32 = vrot.slane %v4179_v62, 4  ;;  %v4282_v48 = vadd.f32 %v4281_v63, %v4280_v55 }
 0x2ef   : > { %v4181_v25 = vadd.f32 %v4180_v32, %v4179_v62  ;;  %v4283_v0 = vrot.slane %v4282_v48, 4 }
 0x2f1   : > { %v4182_v6 = vrot.slane %v4181_v25, 2  ;;  %v4284_v20 = vadd.f32 %v4283_v0, %v4282_v48 }
 0x2f3   : > { %v4183_v44 = vadd.f32 %v4182_v6, %v4181_v25  ;;  %v4285_v4 = vrot.slane %v4284_v20, 2 }
 0x2f5   : > { %v4184_v45 = vrot.slane %v4183_v44, 1  ;;  %v4286_v40 = vadd.f32 %v4285_v4, %v4284_v20 }
 0x2f7   : > { %v4185_v8 = vadd.f32 %v4184_v45, %v4183_v44  ;;  %v4287_v10 = vrot.slane %v4286_v40, 1 }
 0x2f9   : > { %4187 = vst.msk [vmem:[%s181_s11] sm:$0x1] %vm4186_vm6, %v4185_v8  ;;  %v4288_v27 = vadd.f32 %v4287_v10, %v4286_v40 }
 0x2fb   : > { %4289 = vst.msk [vmem:[%s181_s11 + $0x1] sm:$0x1] %vm4186_vm6, %v4288_v27 }
 0x2fc PF: > { %s14_s12 = sadd.s32 1, %s4965_s12  }
 0x2fd   : > { %p11_p4 = scmp.ge.s32.totalorder %s14_s12, 4  }
 0x2ff   :  { %13 = sbr.rel (!%p11_p4) target bundleno = 1 (0x1), region = 73 }

</bundles_post_ra>
